<compile_context>
chip_gen: v6e
topology: v6e:2x2x1
jax: 0.10.0
libtpu: 0.0.40
codegen_flags: <defaults>
</compile_context>

<pallas_src>
import jax
import jax.numpy as jnp
from jax.experimental import pallas as pl
from jax.experimental.pallas import tpu as pltpu

EPS = 1e-5


def _default_vmem_limit():
    """75% of physical VMEM, capped at 96 MiB (v5e/v6e ~96 MiB, v7x ~48 MiB)."""
    try:
        cap = getattr(pltpu.get_tpu_info(), "vmem_capacity_bytes", 0) or 0
        if cap <= 0:
            raise ValueError("unknown VMEM capacity")
        return int(min((cap * 3) // 4, 96 * 1024 * 1024))
    except Exception:
        return 48 * 1024 * 1024


_VMEM_LIMIT = _default_vmem_limit()


def _compiler_params():
    return pltpu.CompilerParams(dimension_semantics=("parallel",),
                                vmem_limit_bytes=_VMEM_LIMIT)


def _pad_lanes(c, mult=128):
    """Round a channel count up to a multiple of 128 (lane-dense stores)."""
    return ((c + mult - 1) // mult) * mult


def _row_tile(m, target=512):
    """Largest multiple-of-8 divisor of m that is <= target.

    m = N*H*W is a multiple of 8 for all realistic shapes, in which case the
    search always succeeds (8 divides m).  Otherwise we fall back to a single
    block.  TODO(synk): ragged last-block masking for m % 8 != 0.
    """
    if m % 8 != 0:
        return m
    t = min(target, m)
    t -= t % 8
    for tm in range(t, 7, -8):
        if m % tm == 0:
            return tm
    return 8


def _write_partial_stats(st_ref, y):
    """Per-channel partial (sum, sum-of-squares) for the two-pass BatchNorm.

    Channels are 128-padded, so both stores are lane-dense (single-sublane).
    """
    c = y.shape[-1]
    st_ref[0:1, 0:1, :] = jnp.sum(y, axis=0, keepdims=True).reshape(1, 1, c)
    st_ref[0:1, 1:2, :] = jnp.sum(y * y, axis=0, keepdims=True).reshape(1, 1, c)


def _conv1_kernel(x_ref, w_ref, y_ref, st_ref):
    # conv1: 1x1 (Cin -> P) as a bf16 matmul over channels, f32 accumulation.
    xb = x_ref[...].astype(jnp.bfloat16)
    y = jnp.dot(xb, w_ref[...], preferred_element_type=jnp.float32)
    y_ref[...] = y.astype(y_ref.dtype)            # bf16 store (halved HBM bytes)
    _write_partial_stats(st_ref, y)               # stats from the f32 accumulator


def _bn_relu_conv3x3_kernel(y1_ref, sc_ref, sh_ref, w_ref, y2_ref, st_ref, pad_ref):
    # bn1 (scale/shift, f32) + ReLU, then 3x3 stride-1 pad-1 conv: the nine
    # taps are folded into accumulating matmuls read directly from the bf16
    # padded scratch (no im2col staging buffer).
    _, h, w, p = y1_ref.shape
    a = jnp.maximum(
        y1_ref[0].astype(jnp.float32).reshape(h * w, p) * sc_ref[...] + sh_ref[...],
        0.0)
    ab = a.reshape(h, w, p).astype(jnp.bfloat16)

    # Zero only the 1-pixel halo, unconditionally every step: megacore-safe
    # (a pl.when(program_id==0) init never runs on the second v7x core) and
    # negligible next to the matmuls.
    zrow = jnp.zeros((1, w + 2, p), jnp.bfloat16)
    zcol = jnp.zeros((h, 1, p), jnp.bfloat16)
    pad_ref[0:1, :, :] = zrow
    pad_ref[h + 1:h + 2, :, :] = zrow
    pad_ref[1:h + 1, 0:1, :] = zcol
    pad_ref[1:h + 1, w + 1:w + 2, :] = zcol
    pad_ref[1:h + 1, 1:w + 1, :] = ab

    padded = pad_ref[...]                          # (H+2, W+2, P) bf16
    acc = jnp.zeros((h * w, p), jnp.float32)
    for tap in range(9):                           # unrolled; each shifted
        ky, kx = tap // 3, tap % 3                 # operand is read exactly once
        patch = padded[ky:ky + h, kx:kx + w, :].reshape(h * w, p)
        acc = acc + jnp.dot(patch, w_ref[tap], preferred_element_type=jnp.float32)

    y2_ref[...] = acc.reshape(1, h, w, p).astype(y2_ref.dtype)   # bf16 store
    _write_partial_stats(st_ref, acc)


def _bn_relu_conv1x1_kernel(y2_ref, sc_ref, sh_ref, w_ref, y3_ref, st_ref):
    # bn2 (scale/shift) + ReLU, then conv3: 1x1 (P -> 4P) bf16 matmul.
    a = jnp.maximum(
        y2_ref[...].astype(jnp.float32) * sc_ref[...] + sh_ref[...], 0.0)
    y = jnp.dot(a.astype(jnp.bfloat16), w_ref[...],
                preferred_element_type=jnp.float32)
    y3_ref[...] = y.astype(y3_ref.dtype)           # bf16 store
    _write_partial_stats(st_ref, y)


def _bn_add_relu_kernel(y3_ref, x_ref, sc_ref, sh_ref, o_ref):
    # bn3 (scale/shift) + residual add + final ReLU (f32 output).
    o_ref[...] = jnp.maximum(
        y3_ref[...].astype(jnp.float32) * sc_ref[...] + sh_ref[...] + x_ref[...],
        0.0)


def _finalize_bn(partial_stats, count, gamma, beta):
    """Turn per-block (sum, sumsq) partials into a per-channel scale/shift."""
    tot = jnp.sum(partial_stats, axis=0)           # (2, C)
    mean = tot[0] / count
    var = jnp.maximum(tot[1] / count - mean * mean, 0.0)   # biased variance
    scale = gamma * jax.lax.rsqrt(var + EPS)
    shift = beta - mean * scale
    return scale.reshape(1, -1), shift.reshape(1, -1)


@jax.jit
def bottleneck_block(x, w1, w2, w3, g1, b1, g2, b2, g3, b3):
    """NHWC forward of OriginalBottleneckBlock (stride=1, downsample=None)."""
    n, h, w, cin = x.shape
    p = w1.shape[1]
    cout = w3.shape[1]
    assert cout == cin, "downsample is None => output channels must equal input"

    f32, bf16 = jnp.float32, jnp.bfloat16
    cin_p, p_p, cout_p = _pad_lanes(cin), _pad_lanes(p), _pad_lanes(cout)

    m = n * h * w
    tm = _row_tile(m)
    g = m // tm

    # Lane padding (zeros) so every kernel store is lane-dense; exactly
    # neutral for real-channel BN statistics and stripped at the end.
    xp = jnp.pad(x.astype(f32), ((0, 0), (0, 0), (0, 0), (0, cin_p - cin)))
    w1p = jnp.pad(w1, ((0, cin_p - cin), (0, p_p - p))).astype(bf16)
    w2p = jnp.pad(w2, ((0, 0), (0, p_p - p), (0, p_p - p))).astype(bf16)
    w3p = jnp.pad(w3, ((0, p_p - p), (0, cout_p - cout))).astype(bf16)

    def _pad_param(v, c_to, fill):
        v = v.reshape(-1).astype(f32)
        return jnp.pad(v, (0, c_to - v.shape[0]), constant_values=fill)

    g1p, b1p = _pad_param(g1, p_p, 1.0), _pad_param(b1, p_p, 0.0)
    g2p, b2p = _pad_param(g2, p_p, 1.0), _pad_param(b2, p_p, 0.0)
    g3p, b3p = _pad_param(g3, cout_p, 1.0), _pad_param(b3, cout_p, 0.0)

    x2d = xp.reshape(m, cin_p)

    # ---- stage 1: conv1 (1x1) + bn1 partial stats ------------------------
    y1, st1 = pl.pallas_call(
        _conv1_kernel,
        grid=(g,),
        in_specs=[pl.BlockSpec((tm, cin_p), lambda i: (i, 0)),
                  pl.BlockSpec((cin_p, p_p), lambda i: (0, 0))],
        out_specs=[pl.BlockSpec((tm, p_p), lambda i: (i, 0)),
                   pl.BlockSpec((1, 2, p_p), lambda i: (i, 0, 0))],
        out_shape=[jax.ShapeDtypeStruct((m, p_p), bf16),
                   jax.ShapeDtypeStruct((g, 2, p_p), f32)],
        compiler_params=_compiler_params(),
    )(x2d, w1p)
    sc1, sh1 = _finalize_bn(st1, m, g1p, b1p)

    # ---- stage 2: bn1+relu, conv2 (3x3, 9 accumulating taps) + bn2 stats --
    y2, st2 = pl.pallas_call(
        _bn_relu_conv3x3_kernel,
        grid=(n,),
        in_specs=[pl.BlockSpec((1, h, w, p_p), lambda i: (i, 0, 0, 0)),
                  pl.BlockSpec((1, p_p), lambda i: (0, 0)),
                  pl.BlockSpec((1, p_p), lambda i: (0, 0)),
                  pl.BlockSpec((9, p_p, p_p), lambda i: (0, 0, 0))],
        out_specs=[pl.BlockSpec((1, h, w, p_p), lambda i: (i, 0, 0, 0)),
                   pl.BlockSpec((1, 2, p_p), lambda i: (i, 0, 0))],
        out_shape=[jax.ShapeDtypeStruct((n, h, w, p_p), bf16),
                   jax.ShapeDtypeStruct((n, 2, p_p), f32)],
        scratch_shapes=[pltpu.VMEM((h + 2, w + 2, p_p), bf16)],
        compiler_params=_compiler_params(),
    )(y1.reshape(n, h, w, p_p), sc1, sh1, w2p)
    sc2, sh2 = _finalize_bn(st2, m, g2p, b2p)

    # ---- stage 3: bn2+relu, conv3 (1x1) + bn3 partial stats --------------
    y3, st3 = pl.pallas_call(
        _bn_relu_conv1x1_kernel,
        grid=(g,),
        in_specs=[pl.BlockSpec((tm, p_p), lambda i: (i, 0)),
                  pl.BlockSpec((1, p_p), lambda i: (0, 0)),
                  pl.BlockSpec((1, p_p), lambda i: (0, 0)),
                  pl.BlockSpec((p_p, cout_p), lambda i: (0, 0))],
        out_specs=[pl.BlockSpec((tm, cout_p), lambda i: (i, 0)),
                   pl.BlockSpec((1, 2, cout_p), lambda i: (i, 0, 0))],
        out_shape=[jax.ShapeDtypeStruct((m, cout_p), bf16),
                   jax.ShapeDtypeStruct((g, 2, cout_p), f32)],
        compiler_params=_compiler_params(),
    )(y2.reshape(m, p_p), sc2, sh2, w3p)
    sc3, sh3 = _finalize_bn(st3, m, g3p, b3p)

    # ---- stage 4: bn3, residual add, final relu --------------------------
    out2d = pl.pallas_call(
        _bn_add_relu_kernel,
        grid=(g,),
        in_specs=[pl.BlockSpec((tm, cout_p), lambda i: (i, 0)),
                  pl.BlockSpec((tm, cout_p), lambda i: (i, 0)),
                  pl.BlockSpec((1, cout_p), lambda i: (0, 0)),
                  pl.BlockSpec((1, cout_p), lambda i: (0, 0))],
        out_specs=pl.BlockSpec((tm, cout_p), lambda i: (i, 0)),
        out_shape=jax.ShapeDtypeStruct((m, cout_p), f32),
        compiler_params=_compiler_params(),
    )(y3, x2d, sc3, sh3)

    return out2d[:, :cout].reshape(n, h, w, cout)


def reference(x, w1, w2, w3, g1, b1, g2, b2, g3, b3):
    """Pure-JAX NHWC reference mirroring the kernel's numerics
    (bf16 matmul operands, f32 accumulation, bf16-stored intermediates,
    BN stats from the f32 accumulator)."""
    bf, f32 = jnp.bfloat16, jnp.float32

    def bn_scale_shift(y, g, b):
        mean = y.mean(axis=(0, 1, 2))
        var = (y * y).mean(axis=(0, 1, 2)) - mean * mean
        scale = g * jax.lax.rsqrt(var + EPS)
        shift = b - mean * scale
        return scale, shift

    p = w1.shape[1]
    y1 = jnp.einsum('nhwc,cp->nhwp', x.astype(bf), w1.astype(bf),
                    preferred_element_type=f32)
    sc1, sh1 = bn_scale_shift(y1, g1, b1)
    a1 = jax.nn.relu(y1.astype(bf).astype(f32) * sc1 + sh1)

    k = w2.reshape(3, 3, p, p)                     # HWIO
    y2 = jax.lax.conv_general_dilated(
        a1.astype(bf), k.astype(bf), window_strides=(1, 1),
        padding=((1, 1), (1, 1)),
        dimension_numbers=('NHWC', 'HWIO', 'NHWC'),
        preferred_element_type=f32)
    sc2, sh2 = bn_scale_shift(y2, g2, b2)
    a2 = jax.nn.relu(y2.astype(bf).astype(f32) * sc2 + sh2)

    y3 = jnp.einsum('nhwp,pc->nhwc', a2.astype(bf), w3.astype(bf),
                    preferred_element_type=f32)
    sc3, sh3 = bn_scale_shift(y3, g3, b3)
    return jax.nn.relu(y3.astype(bf).astype(f32) * sc3 + sh3 + x)


if __name__ == "__main__":
    # Small shapes consistent with the module: inplanes = planes * expansion.
    N, H, W = 2, 16, 16
    planes = 4
    inplanes = planes * 4                          # 16 -> residual add is valid

    key = jax.random.PRNGKey(0)
    kx, k1, k2, k3 = jax.random.split(key, 4)

    x = jax.random.normal(kx, (N, H, W, inplanes), jnp.float32)

    # Deterministic "kaiming-ish" init for the conv weights (no bias).
    w1 = jax.random.normal(k1, (inplanes, planes), jnp.float32) / jnp.sqrt(inplanes)
    w2 = jax.random.normal(k2, (9, planes, planes), jnp.float32) / jnp.sqrt(9.0 * planes)
    w3 = jax.random.normal(k3, (planes, planes * 4), jnp.float32) / jnp.sqrt(planes)

    # BatchNorm affine params at PyTorch defaults (gamma=1, beta=0).
    g1 = jnp.ones((planes,), jnp.float32)
    b1 = jnp.zeros((planes,), jnp.float32)
    g2 = jnp.ones((planes,), jnp.float32)
    b2 = jnp.zeros((planes,), jnp.float32)
    g3 = jnp.ones((planes * 4,), jnp.float32)
    b3 = jnp.zeros((planes * 4,), jnp.float32)

    out = bottleneck_block(x, w1, w2, w3, g1, b1, g2, b2, g3, b3)
    out = jax.block_until_ready(out)

    ref = reference(x, w1, w2, w3, g1, b1, g2, b2, g3, b3)
    assert out.shape == (N, H, W, planes * 4)
    max_err = float(jnp.max(jnp.abs(out - ref)))
    assert max_err < 2e-2, f"max abs error {max_err}"

    print("KERNEL_OK")
</pallas_src>

<mosaic_0001>
module attributes {stable_mosaic.version = 11 : i64} {
  func.func @_conv1_kernel(%arg0: i32, %arg1: memref<512x128xf32, #tpu.memory_space<vmem>>, %arg2: memref<128x128xbf16, #tpu.memory_space<vmem>>, %arg3: memref<512x128xbf16, #tpu.memory_space<vmem>>, %arg4: memref<1x2x128xf32, #tpu.memory_space<vmem>>) attributes {dimension_semantics = [#tpu.dimension_semantics<parallel>], iteration_bounds = array<i64: 1>, scalar_prefetch = 0 : i64, scratch_operands = 0 : i64, tpu.core_type = #tpu.core_type<tc>, window_params = [{transform_indices = @transform_0, window_bounds = array<i64: 512, 128>}, {pipeline_mode = #tpu.pipeline_mode<synchronous>, transform_indices = @transform_1, window_bounds = array<i64: 128, 128>}, {transform_indices = @transform_2, window_bounds = array<i64: 512, 128>}, {transform_indices = @transform_3, window_bounds = array<i64: 1, 2, 128>}]} {
    %c0 = arith.constant 0 : index
    %c0_0 = arith.constant 0 : index
    %0 = vector.load %arg1[%c0, %c0_0] : memref<512x128xf32, #tpu.memory_space<vmem>>, vector<512x128xf32>
    %1 = arith.truncf %0 : vector<512x128xf32> to vector<512x128xbf16>
    %c0_1 = arith.constant 0 : index
    %c0_2 = arith.constant 0 : index
    %2 = vector.load %arg2[%c0_1, %c0_2] : memref<128x128xbf16, #tpu.memory_space<vmem>>, vector<128x128xbf16>
    %cst = arith.constant dense<0.000000e+00> : vector<512x128xf32>
    %3 = tpu.matmul %1, %2, %cst {dimension_numbers = #tpu.dot_dimension_numbers<[1], [0], [0], [1], [0, 0, 1, 1], [], []>} : vector<512x128xbf16>, vector<128x128xbf16>, vector<512x128xf32> -> vector<512x128xf32>
    %4 = arith.truncf %3 : vector<512x128xf32> to vector<512x128xbf16>
    %c0_3 = arith.constant 0 : index
    %c0_4 = arith.constant 0 : index
    %5 = vector.load %arg3[%c0_3, %c0_4] : memref<512x128xbf16, #tpu.memory_space<vmem>>, vector<512x128xbf16>
    tpu.vector_store %arg3[%c0_3, %c0_4], %4 {strides = array<i32>} : memref<512x128xbf16, #tpu.memory_space<vmem>>, vector<512x128xbf16>,
    %cst_5 = arith.constant dense<0.000000e+00> : vector<128xf32>
    %6 = vector.multi_reduction <add>, %3, %cst_5 [0] : vector<512x128xf32> to vector<128xf32>
    %7 = vector.shape_cast %6 : vector<128xf32> to vector<1x128xf32>
    %8 = vector.shape_cast %7 : vector<1x128xf32> to vector<1x1x128xf32>
    %c0_6 = arith.constant 0 : index
    %c0_7 = arith.constant 0 : index
    %c0_8 = arith.constant 0 : index
    %9 = vector.load %arg4[%c0_6, %c0_7, %c0_8] : memref<1x2x128xf32, #tpu.memory_space<vmem>>, vector<1x1x128xf32>
    tpu.vector_store %arg4[%c0_6, %c0_7, %c0_8], %8 {strides = array<i32>} : memref<1x2x128xf32, #tpu.memory_space<vmem>>, vector<1x1x128xf32>,
    %10 = arith.mulf %3, %3 : vector<512x128xf32>
    %cst_9 = arith.constant dense<0.000000e+00> : vector<128xf32>
    %11 = vector.multi_reduction <add>, %10, %cst_9 [0] : vector<512x128xf32> to vector<128xf32>
    %12 = vector.shape_cast %11 : vector<128xf32> to vector<1x128xf32>
    %13 = vector.shape_cast %12 : vector<1x128xf32> to vector<1x1x128xf32>
    %c0_10 = arith.constant 0 : index
    %c1 = arith.constant 1 : index
    %c0_11 = arith.constant 0 : index
    %14 = vector.load %arg4[%c0_10, %c1, %c0_11] : memref<1x2x128xf32, #tpu.memory_space<vmem>>, vector<1x1x128xf32>
    tpu.vector_store %arg4[%c0_10, %c1, %c0_11], %13 {strides = array<i32>} : memref<1x2x128xf32, #tpu.memory_space<vmem>>, vector<1x1x128xf32>,
    return
  }
  func.func @transform_0(%arg0: i32) -> (i32, i32) {
    %c0_i32 = arith.constant 0 : i32
    %c0_i32_0 = arith.constant 0 : i32
    return %arg0, %c0_i32 : i32, i32
  }
  func.func @transform_1(%arg0: i32) -> (i32, i32) {
    %c0_i32 = arith.constant 0 : i32
    %c0_i32_0 = arith.constant 0 : i32
    %c0_i32_1 = arith.constant 0 : i32
    return %c0_i32, %c0_i32_0 : i32, i32
  }
  func.func @transform_2(%arg0: i32) -> (i32, i32) {
    %c0_i32 = arith.constant 0 : i32
    %c0_i32_0 = arith.constant 0 : i32
    return %arg0, %c0_i32 : i32, i32
  }
  func.func @transform_3(%arg0: i32) -> (i32, i32, i32) {
    %c0_i32 = arith.constant 0 : i32
    %c0_i32_0 = arith.constant 0 : i32
    %c0_i32_1 = arith.constant 0 : i32
    return %arg0, %c0_i32, %c0_i32_0 : i32, i32, i32
  }
}

module attributes {stable_mosaic.version = 11 : i64} {
  func.func @_bn_relu_conv3x3_kernel(%arg0: i32, %arg1: memref<1x16x16x128xbf16, #tpu.memory_space<vmem>>, %arg2: memref<1x128xf32, #tpu.memory_space<vmem>>, %arg3: memref<1x128xf32, #tpu.memory_space<vmem>>, %arg4: memref<9x128x128xbf16, #tpu.memory_space<vmem>>, %arg5: memref<1x16x16x128xbf16, #tpu.memory_space<vmem>>, %arg6: memref<1x2x128xf32, #tpu.memory_space<vmem>>, %arg7: memref<18x18x128xbf16, #tpu.memory_space<vmem>>) attributes {dimension_semantics = [#tpu.dimension_semantics<parallel>], iteration_bounds = array<i64: 2>, scalar_prefetch = 0 : i64, scratch_operands = 1 : i64, tpu.core_type = #tpu.core_type<tc>, window_params = [{transform_indices = @transform_0, window_bounds = array<i64: 1, 16, 16, 128>}, {pipeline_mode = #tpu.pipeline_mode<synchronous>, transform_indices = @transform_1, window_bounds = array<i64: 1, 128>}, {pipeline_mode = #tpu.pipeline_mode<synchronous>, transform_indices = @transform_2, window_bounds = array<i64: 1, 128>}, {pipeline_mode = #tpu.pipeline_mode<synchronous>, transform_indices = @transform_3, window_bounds = array<i64: 9, 128, 128>}, {transform_indices = @transform_4, window_bounds = array<i64: 1, 16, 16, 128>}, {transform_indices = @transform_5, window_bounds = array<i64: 1, 2, 128>}]} {
    %c0 = arith.constant 0 : index
    %c0_0 = arith.constant 0 : index
    %c0_1 = arith.constant 0 : index
    %c0_2 = arith.constant 0 : index
    %0 = vector.load %arg1[%c0, %c0_0, %c0_1, %c0_2] : memref<1x16x16x128xbf16, #tpu.memory_space<vmem>>, vector<1x16x16x128xbf16>
    %1 = vector.shape_cast %0 : vector<1x16x16x128xbf16> to vector<16x16x128xbf16>
    %2 = arith.extf %1 : vector<16x16x128xbf16> to vector<16x16x128xf32>
    %3 = vector.shape_cast %2 : vector<16x16x128xf32> to vector<256x128xf32>
    %c0_3 = arith.constant 0 : index
    %c0_4 = arith.constant 0 : index
    %4 = vector.load %arg2[%c0_3, %c0_4] : memref<1x128xf32, #tpu.memory_space<vmem>>, vector<1x128xf32>
    %5 = vector.broadcast %4 : vector<1x128xf32> to vector<256x128xf32>
    %6 = arith.mulf %3, %5 : vector<256x128xf32>
    %c0_5 = arith.constant 0 : index
    %c0_6 = arith.constant 0 : index
    %7 = vector.load %arg3[%c0_5, %c0_6] : memref<1x128xf32, #tpu.memory_space<vmem>>, vector<1x128xf32>
    %8 = vector.broadcast %7 : vector<1x128xf32> to vector<256x128xf32>
    %9 = arith.addf %6, %8 : vector<256x128xf32>
    %cst = arith.constant 0.000000e+00 : f32
    %10 = vector.broadcast %cst : f32 to vector<256x128xf32>
    %11 = arith.maximumf %9, %10 : vector<256x128xf32>
    %12 = vector.shape_cast %11 : vector<256x128xf32> to vector<16x16x128xf32>
    %13 = arith.truncf %12 : vector<16x16x128xf32> to vector<16x16x128xbf16>
    %cst_7 = arith.constant 0.000000e+00 : bf16
    %14 = vector.broadcast %cst_7 : bf16 to vector<1x18x128xbf16>
    %cst_8 = arith.constant 0.000000e+00 : bf16
    %15 = vector.broadcast %cst_8 : bf16 to vector<16x1x128xbf16>
    %c0_9 = arith.constant 0 : index
    %c0_10 = arith.constant 0 : index
    %c0_11 = arith.constant 0 : index
    %16 = vector.load %arg7[%c0_9, %c0_10, %c0_11] : memref<18x18x128xbf16, #tpu.memory_space<vmem>>, vector<1x18x128xbf16>
    tpu.vector_store %arg7[%c0_9, %c0_10, %c0_11], %14 {strides = array<i32>} : memref<18x18x128xbf16, #tpu.memory_space<vmem>>, vector<1x18x128xbf16>,
    %c17 = arith.constant 17 : index
    %c0_12 = arith.constant 0 : index
    %c0_13 = arith.constant 0 : index
    %17 = vector.load %arg7[%c17, %c0_12, %c0_13] : memref<18x18x128xbf16, #tpu.memory_space<vmem>>, vector<1x18x128xbf16>
    tpu.vector_store %arg7[%c17, %c0_12, %c0_13], %14 {strides = array<i32>} : memref<18x18x128xbf16, #tpu.memory_space<vmem>>, vector<1x18x128xbf16>,
    %c1 = arith.constant 1 : index
    %c0_14 = arith.constant 0 : index
    %c0_15 = arith.constant 0 : index
    %18 = vector.load %arg7[%c1, %c0_14, %c0_15] : memref<18x18x128xbf16, #tpu.memory_space<vmem>>, vector<16x1x128xbf16>
    tpu.vector_store %arg7[%c1, %c0_14, %c0_15], %15 {strides = array<i32>} : memref<18x18x128xbf16, #tpu.memory_space<vmem>>, vector<16x1x128xbf16>,
    %c1_16 = arith.constant 1 : index
    %c17_17 = arith.constant 17 : index
    %c0_18 = arith.constant 0 : index
    %19 = vector.load %arg7[%c1_16, %c17_17, %c0_18] : memref<18x18x128xbf16, #tpu.memory_space<vmem>>, vector<16x1x128xbf16>
    tpu.vector_store %arg7[%c1_16, %c17_17, %c0_18], %15 {strides = array<i32>} : memref<18x18x128xbf16, #tpu.memory_space<vmem>>, vector<16x1x128xbf16>,
    %c1_19 = arith.constant 1 : index
    %c1_20 = arith.constant 1 : index
    %c0_21 = arith.constant 0 : index
    %20 = vector.load %arg7[%c1_19, %c1_20, %c0_21] : memref<18x18x128xbf16, #tpu.memory_space<vmem>>, vector<16x16x128xbf16>
    tpu.vector_store %arg7[%c1_19, %c1_20, %c0_21], %13 {strides = array<i32>} : memref<18x18x128xbf16, #tpu.memory_space<vmem>>, vector<16x16x128xbf16>,
    %c0_22 = arith.constant 0 : index
    %c0_23 = arith.constant 0 : index
    %c0_24 = arith.constant 0 : index
    %21 = vector.load %arg7[%c0_22, %c0_23, %c0_24] : memref<18x18x128xbf16, #tpu.memory_space<vmem>>, vector<18x18x128xbf16>
    %cst_25 = arith.constant 0.000000e+00 : f32
    %22 = vector.broadcast %cst_25 : f32 to vector<256x128xf32>
    %23 = vector.extract_strided_slice %21 {offsets = [0, 0, 0], sizes = [16, 16, 128], strides = [1, 1, 1]} : vector<18x18x128xbf16> to vector<16x16x128xbf16>
    %24 = vector.shape_cast %23 : vector<16x16x128xbf16> to vector<256x128xbf16>
    %c0_26 = arith.constant 0 : index
    %c0_27 = arith.constant 0 : index
    %c0_28 = arith.constant 0 : index
    %25 = vector.load %arg4[%c0_26, %c0_27, %c0_28] : memref<9x128x128xbf16, #tpu.memory_space<vmem>>, vector<1x128x128xbf16>
    %26 = vector.shape_cast %25 : vector<1x128x128xbf16> to vector<128x128xbf16>
    %cst_29 = arith.constant dense<0.000000e+00> : vector<256x128xf32>
    %27 = tpu.matmul %24, %26, %cst_29 {dimension_numbers = #tpu.dot_dimension_numbers<[1], [0], [0], [1], [0, 0, 1, 1], [], []>} : vector<256x128xbf16>, vector<128x128xbf16>, vector<256x128xf32> -> vector<256x128xf32>
    %28 = arith.addf %22, %27 : vector<256x128xf32>
    %29 = vector.extract_strided_slice %21 {offsets = [0, 1, 0], sizes = [16, 16, 128], strides = [1, 1, 1]} : vector<18x18x128xbf16> to vector<16x16x128xbf16>
    %30 = vector.shape_cast %29 : vector<16x16x128xbf16> to vector<256x128xbf16>
    %c1_30 = arith.constant 1 : index
    %c0_31 = arith.constant 0 : index
    %c0_32 = arith.constant 0 : index
    %31 = vector.load %arg4[%c1_30, %c0_31, %c0_32] : memref<9x128x128xbf16, #tpu.memory_space<vmem>>, vector<1x128x128xbf16>
    %32 = vector.shape_cast %31 : vector<1x128x128xbf16> to vector<128x128xbf16>
    %cst_33 = arith.constant dense<0.000000e+00> : vector<256x128xf32>
    %33 = tpu.matmul %30, %32, %cst_33 {dimension_numbers = #tpu.dot_dimension_numbers<[1], [0], [0], [1], [0, 0, 1, 1], [], []>} : vector<256x128xbf16>, vector<128x128xbf16>, vector<256x128xf32> -> vector<256x128xf32>
    %34 = arith.addf %28, %33 : vector<256x128xf32>
    %35 = vector.extract_strided_slice %21 {offsets = [0, 2, 0], sizes = [16, 16, 128], strides = [1, 1, 1]} : vector<18x18x128xbf16> to vector<16x16x128xbf16>
    %36 = vector.shape_cast %35 : vector<16x16x128xbf16> to vector<256x128xbf16>
    %c2 = arith.constant 2 : index
    %c0_34 = arith.constant 0 : index
    %c0_35 = arith.constant 0 : index
    %37 = vector.load %arg4[%c2, %c0_34, %c0_35] : memref<9x128x128xbf16, #tpu.memory_space<vmem>>, vector<1x128x128xbf16>
    %38 = vector.shape_cast %37 : vector<1x128x128xbf16> to vector<128x128xbf16>
    %cst_36 = arith.constant dense<0.000000e+00> : vector<256x128xf32>
    %39 = tpu.matmul %36, %38, %cst_36 {dimension_numbers = #tpu.dot_dimension_numbers<[1], [0], [0], [1], [0, 0, 1, 1], [], []>} : vector<256x128xbf16>, vector<128x128xbf16>, vector<256x128xf32> -> vector<256x128xf32>
    %40 = arith.addf %34, %39 : vector<256x128xf32>
    %41 = vector.extract_strided_slice %21 {offsets = [1, 0, 0], sizes = [16, 16, 128], strides = [1, 1, 1]} : vector<18x18x128xbf16> to vector<16x16x128xbf16>
    %42 = vector.shape_cast %41 : vector<16x16x128xbf16> to vector<256x128xbf16>
    %c3 = arith.constant 3 : index
    %c0_37 = arith.constant 0 : index
    %c0_38 = arith.constant 0 : index
    %43 = vector.load %arg4[%c3, %c0_37, %c0_38] : memref<9x128x128xbf16, #tpu.memory_space<vmem>>, vector<1x128x128xbf16>
    %44 = vector.shape_cast %43 : vector<1x128x128xbf16> to vector<128x128xbf16>
    %cst_39 = arith.constant dense<0.000000e+00> : vector<256x128xf32>
    %45 = tpu.matmul %42, %44, %cst_39 {dimension_numbers = #tpu.dot_dimension_numbers<[1], [0], [0], [1], [0, 0, 1, 1], [], []>} : vector<256x128xbf16>, vector<128x128xbf16>, vector<256x128xf32> -> vector<256x128xf32>
    %46 = arith.addf %40, %45 : vector<256x128xf32>
    %47 = vector.extract_strided_slice %21 {offsets = [1, 1, 0], sizes = [16, 16, 128], strides = [1, 1, 1]} : vector<18x18x128xbf16> to vector<16x16x128xbf16>
    %48 = vector.shape_cast %47 : vector<16x16x128xbf16> to vector<256x128xbf16>
    %c4 = arith.constant 4 : index
    %c0_40 = arith.constant 0 : index
    %c0_41 = arith.constant 0 : index
    %49 = vector.load %arg4[%c4, %c0_40, %c0_41] : memref<9x128x128xbf16, #tpu.memory_space<vmem>>, vector<1x128x128xbf16>
    %50 = vector.shape_cast %49 : vector<1x128x128xbf16> to vector<128x128xbf16>
    %cst_42 = arith.constant dense<0.000000e+00> : vector<256x128xf32>
    %51 = tpu.matmul %48, %50, %cst_42 {dimension_numbers = #tpu.dot_dimension_numbers<[1], [0], [0], [1], [0, 0, 1, 1], [], []>} : vector<256x128xbf16>, vector<128x128xbf16>, vector<256x128xf32> -> vector<256x128xf32>
    %52 = arith.addf %46, %51 : vector<256x128xf32>
    %53 = vector.extract_strided_slice %21 {offsets = [1, 2, 0], sizes = [16, 16, 128], strides = [1, 1, 1]} : vector<18x18x128xbf16> to vector<16x16x128xbf16>
    %54 = vector.shape_cast %53 : vector<16x16x128xbf16> to vector<256x128xbf16>
    %c5 = arith.constant 5 : index
    %c0_43 = arith.constant 0 : index
    %c0_44 = arith.constant 0 : index
    %55 = vector.load %arg4[%c5, %c0_43, %c0_44] : memref<9x128x128xbf16, #tpu.memory_space<vmem>>, vector<1x128x128xbf16>
    %56 = vector.shape_cast %55 : vector<1x128x128xbf16> to vector<128x128xbf16>
    %cst_45 = arith.constant dense<0.000000e+00> : vector<256x128xf32>
    %57 = tpu.matmul %54, %56, %cst_45 {dimension_numbers = #tpu.dot_dimension_numbers<[1], [0], [0], [1], [0, 0, 1, 1], [], []>} : vector<256x128xbf16>, vector<128x128xbf16>, vector<256x128xf32> -> vector<256x128xf32>
    %58 = arith.addf %52, %57 : vector<256x128xf32>
    %59 = vector.extract_strided_slice %21 {offsets = [2, 0, 0], sizes = [16, 16, 128], strides = [1, 1, 1]} : vector<18x18x128xbf16> to vector<16x16x128xbf16>
    %60 = vector.shape_cast %59 : vector<16x16x128xbf16> to vector<256x128xbf16>
    %c6 = arith.constant 6 : index
    %c0_46 = arith.constant 0 : index
    %c0_47 = arith.constant 0 : index
    %61 = vector.load %arg4[%c6, %c0_46, %c0_47] : memref<9x128x128xbf16, #tpu.memory_space<vmem>>, vector<1x128x128xbf16>
    %62 = vector.shape_cast %61 : vector<1x128x128xbf16> to vector<128x128xbf16>
    %cst_48 = arith.constant dense<0.000000e+00> : vector<256x128xf32>
    %63 = tpu.matmul %60, %62, %cst_48 {dimension_numbers = #tpu.dot_dimension_numbers<[1], [0], [0], [1], [0, 0, 1, 1], [], []>} : vector<256x128xbf16>, vector<128x128xbf16>, vector<256x128xf32> -> vector<256x128xf32>
    %64 = arith.addf %58, %63 : vector<256x128xf32>
    %65 = vector.extract_strided_slice %21 {offsets = [2, 1, 0], sizes = [16, 16, 128], strides = [1, 1, 1]} : vector<18x18x128xbf16> to vector<16x16x128xbf16>
    %66 = vector.shape_cast %65 : vector<16x16x128xbf16> to vector<256x128xbf16>
    %c7 = arith.constant 7 : index
    %c0_49 = arith.constant 0 : index
    %c0_50 = arith.constant 0 : index
    %67 = vector.load %arg4[%c7, %c0_49, %c0_50] : memref<9x128x128xbf16, #tpu.memory_space<vmem>>, vector<1x128x128xbf16>
    %68 = vector.shape_cast %67 : vector<1x128x128xbf16> to vector<128x128xbf16>
    %cst_51 = arith.constant dense<0.000000e+00> : vector<256x128xf32>
    %69 = tpu.matmul %66, %68, %cst_51 {dimension_numbers = #tpu.dot_dimension_numbers<[1], [0], [0], [1], [0, 0, 1, 1], [], []>} : vector<256x128xbf16>, vector<128x128xbf16>, vector<256x128xf32> -> vector<256x128xf32>
    %70 = arith.addf %64, %69 : vector<256x128xf32>
    %71 = vector.extract_strided_slice %21 {offsets = [2, 2, 0], sizes = [16, 16, 128], strides = [1, 1, 1]} : vector<18x18x128xbf16> to vector<16x16x128xbf16>
    %72 = vector.shape_cast %71 : vector<16x16x128xbf16> to vector<256x128xbf16>
    %c8 = arith.constant 8 : index
    %c0_52 = arith.constant 0 : index
    %c0_53 = arith.constant 0 : index
    %73 = vector.load %arg4[%c8, %c0_52, %c0_53] : memref<9x128x128xbf16, #tpu.memory_space<vmem>>, vector<1x128x128xbf16>
    %74 = vector.shape_cast %73 : vector<1x128x128xbf16> to vector<128x128xbf16>
    %cst_54 = arith.constant dense<0.000000e+00> : vector<256x128xf32>
    %75 = tpu.matmul %72, %74, %cst_54 {dimension_numbers = #tpu.dot_dimension_numbers<[1], [0], [0], [1], [0, 0, 1, 1], [], []>} : vector<256x128xbf16>, vector<128x128xbf16>, vector<256x128xf32> -> vector<256x128xf32>
    %76 = arith.addf %70, %75 : vector<256x128xf32>
    %77 = vector.shape_cast %76 : vector<256x128xf32> to vector<1x16x16x128xf32>
    %78 = arith.truncf %77 : vector<1x16x16x128xf32> to vector<1x16x16x128xbf16>
    %c0_55 = arith.constant 0 : index
    %c0_56 = arith.constant 0 : index
    %c0_57 = arith.constant 0 : index
    %c0_58 = arith.constant 0 : index
    %79 = vector.load %arg5[%c0_55, %c0_56, %c0_57, %c0_58] : memref<1x16x16x128xbf16, #tpu.memory_space<vmem>>, vector<1x16x16x128xbf16>
    tpu.vector_store %arg5[%c0_55, %c0_56, %c0_57, %c0_58], %78 {strides = array<i32>} : memref<1x16x16x128xbf16, #tpu.memory_space<vmem>>, vector<1x16x16x128xbf16>,
    %cst_59 = arith.constant dense<0.000000e+00> : vector<128xf32>
    %80 = vector.multi_reduction <add>, %76, %cst_59 [0] : vector<256x128xf32> to vector<128xf32>
    %81 = vector.shape_cast %80 : vector<128xf32> to vector<1x128xf32>
    %82 = vector.shape_cast %81 : vector<1x128xf32> to vector<1x1x128xf32>
    %c0_60 = arith.constant 0 : index
    %c0_61 = arith.constant 0 : index
    %c0_62 = arith.constant 0 : index
    %83 = vector.load %arg6[%c0_60, %c0_61, %c0_62] : memref<1x2x128xf32, #tpu.memory_space<vmem>>, vector<1x1x128xf32>
    tpu.vector_store %arg6[%c0_60, %c0_61, %c0_62], %82 {strides = array<i32>} : memref<1x2x128xf32, #tpu.memory_space<vmem>>, vector<1x1x128xf32>,
    %84 = arith.mulf %76, %76 : vector<256x128xf32>
    %cst_63 = arith.constant dense<0.000000e+00> : vector<128xf32>
    %85 = vector.multi_reduction <add>, %84, %cst_63 [0] : vector<256x128xf32> to vector<128xf32>
    %86 = vector.shape_cast %85 : vector<128xf32> to vector<1x128xf32>
    %87 = vector.shape_cast %86 : vector<1x128xf32> to vector<1x1x128xf32>
    %c0_64 = arith.constant 0 : index
    %c1_65 = arith.constant 1 : index
    %c0_66 = arith.constant 0 : index
    %88 = vector.load %arg6[%c0_64, %c1_65, %c0_66] : memref<1x2x128xf32, #tpu.memory_space<vmem>>, vector<1x1x128xf32>
    tpu.vector_store %arg6[%c0_64, %c1_65, %c0_66], %87 {strides = array<i32>} : memref<1x2x128xf32, #tpu.memory_space<vmem>>, vector<1x1x128xf32>,
    return
  }
  func.func @transform_0(%arg0: i32) -> (i32, i32, i32, i32) {
    %c0_i32 = arith.constant 0 : i32
    %c0_i32_0 = arith.constant 0 : i32
    %c0_i32_1 = arith.constant 0 : i32
    %c0_i32_2 = arith.constant 0 : i32
    return %arg0, %c0_i32, %c0_i32_0, %c0_i32_1 : i32, i32, i32, i32
  }
  func.func @transform_1(%arg0: i32) -> (i32, i32) {
    %c0_i32 = arith.constant 0 : i32
    %c0_i32_0 = arith.constant 0 : i32
    %c0_i32_1 = arith.constant 0 : i32
    return %c0_i32, %c0_i32_0 : i32, i32
  }
  func.func @transform_2(%arg0: i32) -> (i32, i32) {
    %c0_i32 = arith.constant 0 : i32
    %c0_i32_0 = arith.constant 0 : i32
    %c0_i32_1 = arith.constant 0 : i32
    return %c0_i32, %c0_i32_0 : i32, i32
  }
  func.func @transform_3(%arg0: i32) -> (i32, i32, i32) {
    %c0_i32 = arith.constant 0 : i32
    %c0_i32_0 = arith.constant 0 : i32
    %c0_i32_1 = arith.constant 0 : i32
    %c0_i32_2 = arith.constant 0 : i32
    return %c0_i32, %c0_i32_0, %c0_i32_1 : i32, i32, i32
  }
  func.func @transform_4(%arg0: i32) -> (i32, i32, i32, i32) {
    %c0_i32 = arith.constant 0 : i32
    %c0_i32_0 = arith.constant 0 : i32
    %c0_i32_1 = arith.constant 0 : i32
    %c0_i32_2 = arith.constant 0 : i32
    return %arg0, %c0_i32, %c0_i32_0, %c0_i32_1 : i32, i32, i32, i32
  }
  func.func @transform_5(%arg0: i32) -> (i32, i32, i32) {
    %c0_i32 = arith.constant 0 : i32
    %c0_i32_0 = arith.constant 0 : i32
    %c0_i32_1 = arith.constant 0 : i32
    return %arg0, %c0_i32, %c0_i32_0 : i32, i32, i32
  }
}

module attributes {stable_mosaic.version = 11 : i64} {
  func.func @_bn_relu_conv1x1_kernel(%arg0: i32, %arg1: memref<512x128xbf16, #tpu.memory_space<vmem>>, %arg2: memref<1x128xf32, #tpu.memory_space<vmem>>, %arg3: memref<1x128xf32, #tpu.memory_space<vmem>>, %arg4: memref<128x128xbf16, #tpu.memory_space<vmem>>, %arg5: memref<512x128xbf16, #tpu.memory_space<vmem>>, %arg6: memref<1x2x128xf32, #tpu.memory_space<vmem>>) attributes {dimension_semantics = [#tpu.dimension_semantics<parallel>], iteration_bounds = array<i64: 1>, scalar_prefetch = 0 : i64, scratch_operands = 0 : i64, tpu.core_type = #tpu.core_type<tc>, window_params = [{transform_indices = @transform_0, window_bounds = array<i64: 512, 128>}, {pipeline_mode = #tpu.pipeline_mode<synchronous>, transform_indices = @transform_1, window_bounds = array<i64: 1, 128>}, {pipeline_mode = #tpu.pipeline_mode<synchronous>, transform_indices = @transform_2, window_bounds = array<i64: 1, 128>}, {pipeline_mode = #tpu.pipeline_mode<synchronous>, transform_indices = @transform_3, window_bounds = array<i64: 128, 128>}, {transform_indices = @transform_4, window_bounds = array<i64: 512, 128>}, {transform_indices = @transform_5, window_bounds = array<i64: 1, 2, 128>}]} {
    %c0 = arith.constant 0 : index
    %c0_0 = arith.constant 0 : index
    %0 = vector.load %arg1[%c0, %c0_0] : memref<512x128xbf16, #tpu.memory_space<vmem>>, vector<512x128xbf16>
    %1 = arith.extf %0 : vector<512x128xbf16> to vector<512x128xf32>
    %c0_1 = arith.constant 0 : index
    %c0_2 = arith.constant 0 : index
    %2 = vector.load %arg2[%c0_1, %c0_2] : memref<1x128xf32, #tpu.memory_space<vmem>>, vector<1x128xf32>
    %3 = vector.broadcast %2 : vector<1x128xf32> to vector<512x128xf32>
    %4 = arith.mulf %1, %3 : vector<512x128xf32>
    %c0_3 = arith.constant 0 : index
    %c0_4 = arith.constant 0 : index
    %5 = vector.load %arg3[%c0_3, %c0_4] : memref<1x128xf32, #tpu.memory_space<vmem>>, vector<1x128xf32>
    %6 = vector.broadcast %5 : vector<1x128xf32> to vector<512x128xf32>
    %7 = arith.addf %4, %6 : vector<512x128xf32>
    %cst = arith.constant 0.000000e+00 : f32
    %8 = vector.broadcast %cst : f32 to vector<512x128xf32>
    %9 = arith.maximumf %7, %8 : vector<512x128xf32>
    %10 = arith.truncf %9 : vector<512x128xf32> to vector<512x128xbf16>
    %c0_5 = arith.constant 0 : index
    %c0_6 = arith.constant 0 : index
    %11 = vector.load %arg4[%c0_5, %c0_6] : memref<128x128xbf16, #tpu.memory_space<vmem>>, vector<128x128xbf16>
    %cst_7 = arith.constant dense<0.000000e+00> : vector<512x128xf32>
    %12 = tpu.matmul %10, %11, %cst_7 {dimension_numbers = #tpu.dot_dimension_numbers<[1], [0], [0], [1], [0, 0, 1, 1], [], []>} : vector<512x128xbf16>, vector<128x128xbf16>, vector<512x128xf32> -> vector<512x128xf32>
    %13 = arith.truncf %12 : vector<512x128xf32> to vector<512x128xbf16>
    %c0_8 = arith.constant 0 : index
    %c0_9 = arith.constant 0 : index
    %14 = vector.load %arg5[%c0_8, %c0_9] : memref<512x128xbf16, #tpu.memory_space<vmem>>, vector<512x128xbf16>
    tpu.vector_store %arg5[%c0_8, %c0_9], %13 {strides = array<i32>} : memref<512x128xbf16, #tpu.memory_space<vmem>>, vector<512x128xbf16>,
    %cst_10 = arith.constant dense<0.000000e+00> : vector<128xf32>
    %15 = vector.multi_reduction <add>, %12, %cst_10 [0] : vector<512x128xf32> to vector<128xf32>
    %16 = vector.shape_cast %15 : vector<128xf32> to vector<1x128xf32>
    %17 = vector.shape_cast %16 : vector<1x128xf32> to vector<1x1x128xf32>
    %c0_11 = arith.constant 0 : index
    %c0_12 = arith.constant 0 : index
    %c0_13 = arith.constant 0 : index
    %18 = vector.load %arg6[%c0_11, %c0_12, %c0_13] : memref<1x2x128xf32, #tpu.memory_space<vmem>>, vector<1x1x128xf32>
    tpu.vector_store %arg6[%c0_11, %c0_12, %c0_13], %17 {strides = array<i32>} : memref<1x2x128xf32, #tpu.memory_space<vmem>>, vector<1x1x128xf32>,
    %19 = arith.mulf %12, %12 : vector<512x128xf32>
    %cst_14 = arith.constant dense<0.000000e+00> : vector<128xf32>
    %20 = vector.multi_reduction <add>, %19, %cst_14 [0] : vector<512x128xf32> to vector<128xf32>
    %21 = vector.shape_cast %20 : vector<128xf32> to vector<1x128xf32>
    %22 = vector.shape_cast %21 : vector<1x128xf32> to vector<1x1x128xf32>
    %c0_15 = arith.constant 0 : index
    %c1 = arith.constant 1 : index
    %c0_16 = arith.constant 0 : index
    %23 = vector.load %arg6[%c0_15, %c1, %c0_16] : memref<1x2x128xf32, #tpu.memory_space<vmem>>, vector<1x1x128xf32>
    tpu.vector_store %arg6[%c0_15, %c1, %c0_16], %22 {strides = array<i32>} : memref<1x2x128xf32, #tpu.memory_space<vmem>>, vector<1x1x128xf32>,
    return
  }
  func.func @transform_0(%arg0: i32) -> (i32, i32) {
    %c0_i32 = arith.constant 0 : i32
    %c0_i32_0 = arith.constant 0 : i32
    return %arg0, %c0_i32 : i32, i32
  }
  func.func @transform_1(%arg0: i32) -> (i32, i32) {
    %c0_i32 = arith.constant 0 : i32
    %c0_i32_0 = arith.constant 0 : i32
    %c0_i32_1 = arith.constant 0 : i32
    return %c0_i32, %c0_i32_0 : i32, i32
  }
  func.func @transform_2(%arg0: i32) -> (i32, i32) {
    %c0_i32 = arith.constant 0 : i32
    %c0_i32_0 = arith.constant 0 : i32
    %c0_i32_1 = arith.constant 0 : i32
    return %c0_i32, %c0_i32_0 : i32, i32
  }
  func.func @transform_3(%arg0: i32) -> (i32, i32) {
    %c0_i32 = arith.constant 0 : i32
    %c0_i32_0 = arith.constant 0 : i32
    %c0_i32_1 = arith.constant 0 : i32
    return %c0_i32, %c0_i32_0 : i32, i32
  }
  func.func @transform_4(%arg0: i32) -> (i32, i32) {
    %c0_i32 = arith.constant 0 : i32
    %c0_i32_0 = arith.constant 0 : i32
    return %arg0, %c0_i32 : i32, i32
  }
  func.func @transform_5(%arg0: i32) -> (i32, i32, i32) {
    %c0_i32 = arith.constant 0 : i32
    %c0_i32_0 = arith.constant 0 : i32
    %c0_i32_1 = arith.constant 0 : i32
    return %arg0, %c0_i32, %c0_i32_0 : i32, i32, i32
  }
}

module attributes {stable_mosaic.version = 11 : i64} {
  func.func @_bn_add_relu_kernel(%arg0: i32, %arg1: memref<512x128xbf16, #tpu.memory_space<vmem>>, %arg2: memref<512x128xf32, #tpu.memory_space<vmem>>, %arg3: memref<1x128xf32, #tpu.memory_space<vmem>>, %arg4: memref<1x128xf32, #tpu.memory_space<vmem>>, %arg5: memref<512x128xf32, #tpu.memory_space<vmem>>) attributes {dimension_semantics = [#tpu.dimension_semantics<parallel>], iteration_bounds = array<i64: 1>, scalar_prefetch = 0 : i64, scratch_operands = 0 : i64, tpu.core_type = #tpu.core_type<tc>, window_params = [{transform_indices = @transform_0, window_bounds = array<i64: 512, 128>}, {transform_indices = @transform_1, window_bounds = array<i64: 512, 128>}, {pipeline_mode = #tpu.pipeline_mode<synchronous>, transform_indices = @transform_2, window_bounds = array<i64: 1, 128>}, {pipeline_mode = #tpu.pipeline_mode<synchronous>, transform_indices = @transform_3, window_bounds = array<i64: 1, 128>}, {transform_indices = @transform_4, window_bounds = array<i64: 512, 128>}]} {
    %c0 = arith.constant 0 : index
    %c0_0 = arith.constant 0 : index
    %0 = vector.load %arg1[%c0, %c0_0] : memref<512x128xbf16, #tpu.memory_space<vmem>>, vector<512x128xbf16>
    %1 = arith.extf %0 : vector<512x128xbf16> to vector<512x128xf32>
    %c0_1 = arith.constant 0 : index
    %c0_2 = arith.constant 0 : index
    %2 = vector.load %arg3[%c0_1, %c0_2] : memref<1x128xf32, #tpu.memory_space<vmem>>, vector<1x128xf32>
    %3 = vector.broadcast %2 : vector<1x128xf32> to vector<512x128xf32>
    %4 = arith.mulf %1, %3 : vector<512x128xf32>
    %c0_3 = arith.constant 0 : index
    %c0_4 = arith.constant 0 : index
    %5 = vector.load %arg4[%c0_3, %c0_4] : memref<1x128xf32, #tpu.memory_space<vmem>>, vector<1x128xf32>
    %6 = vector.broadcast %5 : vector<1x128xf32> to vector<512x128xf32>
    %7 = arith.addf %4, %6 : vector<512x128xf32>
    %c0_5 = arith.constant 0 : index
    %c0_6 = arith.constant 0 : index
    %8 = vector.load %arg2[%c0_5, %c0_6] : memref<512x128xf32, #tpu.memory_space<vmem>>, vector<512x128xf32>
    %9 = arith.addf %7, %8 : vector<512x128xf32>
    %cst = arith.constant 0.000000e+00 : f32
    %10 = vector.broadcast %cst : f32 to vector<512x128xf32>
    %11 = arith.maximumf %9, %10 : vector<512x128xf32>
    %c0_7 = arith.constant 0 : index
    %c0_8 = arith.constant 0 : index
    %12 = vector.load %arg5[%c0_7, %c0_8] : memref<512x128xf32, #tpu.memory_space<vmem>>, vector<512x128xf32>
    tpu.vector_store %arg5[%c0_7, %c0_8], %11 {strides = array<i32>} : memref<512x128xf32, #tpu.memory_space<vmem>>, vector<512x128xf32>,
    return
  }
  func.func @transform_0(%arg0: i32) -> (i32, i32) {
    %c0_i32 = arith.constant 0 : i32
    %c0_i32_0 = arith.constant 0 : i32
    return %arg0, %c0_i32 : i32, i32
  }
  func.func @transform_1(%arg0: i32) -> (i32, i32) {
    %c0_i32 = arith.constant 0 : i32
    %c0_i32_0 = arith.constant 0 : i32
    return %arg0, %c0_i32 : i32, i32
  }
  func.func @transform_2(%arg0: i32) -> (i32, i32) {
    %c0_i32 = arith.constant 0 : i32
    %c0_i32_0 = arith.constant 0 : i32
    %c0_i32_1 = arith.constant 0 : i32
    return %c0_i32, %c0_i32_0 : i32, i32
  }
  func.func @transform_3(%arg0: i32) -> (i32, i32) {
    %c0_i32 = arith.constant 0 : i32
    %c0_i32_0 = arith.constant 0 : i32
    %c0_i32_1 = arith.constant 0 : i32
    return %c0_i32, %c0_i32_0 : i32, i32
  }
  func.func @transform_4(%arg0: i32) -> (i32, i32) {
    %c0_i32 = arith.constant 0 : i32
    %c0_i32_0 = arith.constant 0 : i32
    return %arg0, %c0_i32 : i32, i32
  }
}

</mosaic_0001>

<bundles_post_ra>
// kernel: bottleneck_block.7
= control target key start
LH: loop header
LB: loop body
LE: loop exit
PB: predicated region body
PF: predicated region fallthrough
CT: control target
= control target key end

     0   :  { %s1203_s0 = inlined_call_operand.vmem [shape: bf16[512,128], index: 0, kind: input, shape index: {}]   ;;  %s1204_s1 = inlined_call_operand.vmem [shape: f32[512,128], index: 1, kind: input, shape index: {}]   ;;  %s1205_s2 = inlined_call_operand.vmem [shape: f32[1,128], index: 2, kind: input, shape index: {}]   ;;  %s1206_s3 = inlined_call_operand.vmem [shape: f32[1,128], index: 3, kind: input, shape index: {}]   ;;  %s1207_s4 = inlined_call_operand.hbm [shape: f32[512,128], index: 4, kind: output, shape index: {}]  }
   0x1   :  { %v563_v0 = vld [vmem:[%s1203_s0] sm:$0xff]   ;;  %v690_v4 = vld [vmem:[%s1203_s0 + $0x8] sm:$0xff]   ;;  %v691_v8 = vld [vmem:[%s1203_s0 + $0x10] sm:$0xff]  }
   0x2   :  { %v780_v1 = vld [vmem:[%s1205_s2] ss:$0 sm:$0xff]  ;;  %v564_v2 = vunpack.c.l.bf16 %v563_v0  ;;  %v565_v3 = vunpack.c.h.bf16 %v563_v0  ;;  %v568_v6 = vunpack.c.l.bf16 %v690_v4  ;;  %v569_v7 = vunpack.c.h.bf16 %v690_v4  ;;  %v692_v13 = vld [vmem:[%s1203_s0 + $0x18] sm:$0xff]   ;;  %v289_v15 = vld [vmem:[%s1204_s1 + $0x8] sm:$0xff] }
   0x3   :  { %v788_v5 = vld [vmem:[%s1206_s3] ss:$0 sm:$0xff]  ;;  %v572_v11 = vunpack.c.l.bf16 %v691_v8  ;;  %v573_v12 = vunpack.c.h.bf16 %v691_v8  ;;  %v576_v18 = vunpack.c.l.bf16 %v692_v13  ;;  %v577_v19 = vunpack.c.h.bf16 %v692_v13  ;;  %v290_v22 = vld [vmem:[%s1204_s1 + $0x10] sm:$0xff]  ;;  %v291_v23 = vld [vmem:[%s1204_s1 + $0x18] sm:$0xff] }
   0x4   :  { %v153_v9 = vmul.f32 %v564_v2, %v780_v1  ;;  %v154_v10 = vmul.f32 %v565_v3, %v780_v1  ;;  %v288_v14 = vld [vmem:[%s1204_s1] sm:$0xff]  ;;  %v155_v16 = vmul.f32 %v568_v6, %v780_v1  ;;  %v156_v17 = vmul.f32 %v569_v7, %v780_v1  ;;  %v293_v29 = vld [vmem:[%s1204_s1 + $0x28] sm:$0xff]  ;;  %v294_v36 = vld [vmem:[%s1204_s1 + $0x30] sm:$0xff] }
   0x5   :  { %v157_v24 = vmul.f32 %v572_v11, %v780_v1  ;;  %v158_v25 = vmul.f32 %v573_v12, %v780_v1  ;;  %v292_v28 = vld [vmem:[%s1204_s1 + $0x20] sm:$0xff]  ;;  %v159_v30 = vmul.f32 %v576_v18, %v780_v1  ;;  %v160_v31 = vmul.f32 %v577_v19, %v780_v1  ;;  %v295_v37 = vld [vmem:[%s1204_s1 + $0x38] sm:$0xff]  ;;  %v694_v47 = vld [vmem:[%s1203_s0 + $0x28] sm:$0xff]  }
   0x6   :  { %v224_v20 = vadd.f32 %v788_v5, %v153_v9  ;;  %v225_v21 = vadd.f32 %v788_v5, %v154_v10  ;;  %v226_v26 = vadd.f32 %v788_v5, %v155_v16  ;;  %v227_v27 = vadd.f32 %v788_v5, %v156_v17  ;;  %v693_v42 = vld [vmem:[%s1203_s0 + $0x20] sm:$0xff]   ;;  %v695_v52 = vld [vmem:[%s1203_s0 + $0x30] sm:$0xff]   ;;  %v696_v57 = vld [vmem:[%s1203_s0 + $0x38] sm:$0xff]  }
   0x7   :  { %v228_v34 = vadd.f32 %v788_v5, %v157_v24  ;;  %v229_v35 = vadd.f32 %v788_v5, %v158_v25  ;;  %v230_v40 = vadd.f32 %v788_v5, %v159_v30  ;;  %v231_v41 = vadd.f32 %v788_v5, %v160_v31  ;;  %v296_v3 = vld [vmem:[%s1204_s1 + $0x40] sm:$0xff]  ;;  %v297_v4 = vld [vmem:[%s1204_s1 + $0x48] sm:$0xff]  ;;  %v298_v12 = vld [vmem:[%s1204_s1 + $0x50] sm:$0xff] }
   0x8   :  { %v352_v32 = vadd.f32 %v288_v14, %v224_v20  ;;  %v353_v33 = vadd.f32 %v289_v15, %v225_v21  ;;  %v354_v38 = vadd.f32 %v290_v22, %v226_v26  ;;  %v355_v39 = vadd.f32 %v291_v23, %v227_v27  ;;  %v299_v13 = vld [vmem:[%s1204_s1 + $0x58] sm:$0xff]  ;;  %v300_v18 = vld [vmem:[%s1204_s1 + $0x60] sm:$0xff]  ;;  %v301_v19 = vld [vmem:[%s1204_s1 + $0x68] sm:$0xff] }
   0x9   :  { %v356_v45 = vadd.f32 %v292_v28, %v228_v34  ;;  %v357_v46 = vadd.f32 %v293_v29, %v229_v35  ;;  %v358_v50 = vadd.f32 %v294_v36, %v230_v40  ;;  %v359_v51 = vadd.f32 %v295_v37, %v231_v41  ;;  %v302_v26 = vld [vmem:[%s1204_s1 + $0x70] sm:$0xff]  ;;  %v303_v27 = vld [vmem:[%s1204_s1 + $0x78] sm:$0xff]  ;;  %v698_v37 = vld [vmem:[%s1203_s0 + $0x48] sm:$0xff]  }
   0xa   :  { %v416_v43 = vmax.f32 %v352_v32, 0.0  ;;  %v417_v44 = vmax.f32 %v353_v33, 0.0  ;;  %v418_v48 = vmax.f32 %v354_v38, 0.0  ;;  %v419_v49 = vmax.f32 %v355_v39, 0.0  ;;  %v697_v32 = vld [vmem:[%s1203_s0 + $0x40] sm:$0xff]  }
   0xb   :  { %v420_v53 = vmax.f32 %v356_v45, 0.0  ;;  %v421_v54 = vmax.f32 %v357_v46, 0.0  ;;  %v580_v55 = vunpack.c.l.bf16 %v693_v42  ;;  %v581_v56 = vunpack.c.h.bf16 %v693_v42  ;;  %v699_v42 = vld [vmem:[%s1203_s0 + $0x50] sm:$0xff]  }
   0xc   :  { %480 = vst [vmem:[#allocation2] sm:$0xff] %v416_v43  ;;  %481 = vst [vmem:[#allocation2 + $0x8] sm:$0xff] %v417_v44  ;;  %v422_v58 = vmax.f32 %v358_v50, 0.0  ;;  %v423_v59 = vmax.f32 %v359_v51, 0.0  ;;  %v584_v60 = vunpack.c.l.bf16 %v694_v47  ;;  %v585_v61 = vunpack.c.h.bf16 %v694_v47  ;;  %v700_v47 = vld [vmem:[%s1203_s0 + $0x58] sm:$0xff]  }
   0xd   :  { %482 = vst [vmem:[#allocation2 + $0x10] sm:$0xff] %v418_v48  ;;  %483 = vst [vmem:[#allocation2 + $0x18] sm:$0xff] %v419_v49  ;;  %v161_v62 = vmul.f32 %v580_v55, %v780_v1  ;;  %v162_v63 = vmul.f32 %v581_v56, %v780_v1  ;;  %v588_v0 = vunpack.c.l.bf16 %v695_v52  ;;  %v589_v2 = vunpack.c.h.bf16 %v695_v52  ;;  %v304_v56 = vld [vmem:[%s1204_s1 + $0x80] sm:$0xff] }
   0xe   :  { %484 = vst [vmem:[#allocation2 + $0x20] sm:$0xff] %v420_v53  ;;  %485 = vst [vmem:[#allocation2 + $0x28] sm:$0xff] %v421_v54  ;;  %v163_v6 = vmul.f32 %v584_v60, %v780_v1  ;;  %v164_v7 = vmul.f32 %v585_v61, %v780_v1  ;;  %v592_v8 = vunpack.c.l.bf16 %v696_v57  ;;  %v593_v9 = vunpack.c.h.bf16 %v696_v57  ;;  %v305_v57 = vld [vmem:[%s1204_s1 + $0x88] sm:$0xff] }
   0xf   :  { %486 = vst [vmem:[#allocation2 + $0x30] sm:$0xff] %v422_v58  ;;  %487 = vst [vmem:[#allocation2 + $0x38] sm:$0xff] %v423_v59  ;;  %v232_v10 = vadd.f32 %v788_v5, %v161_v62  ;;  %v233_v11 = vadd.f32 %v788_v5, %v162_v63  ;;  %v165_v14 = vmul.f32 %v588_v0, %v780_v1  ;;  %v596_v45 = vunpack.c.l.bf16 %v697_v32  ;;  %v306_v0 = vld [vmem:[%s1204_s1 + $0x90] sm:$0xff] }
  0x10   :  { %v166_v15 = vmul.f32 %v589_v2, %v780_v1  ;;  %v234_v16 = vadd.f32 %v788_v5, %v163_v6  ;;  %v235_v17 = vadd.f32 %v788_v5, %v164_v7  ;;  %v167_v20 = vmul.f32 %v592_v8, %v780_v1  ;;  %v307_v2 = vld [vmem:[%s1204_s1 + $0x98] sm:$0xff]  ;;  %v308_v8 = vld [vmem:[%s1204_s1 + $0xa0] sm:$0xff] }
  0x11   :  { %v168_v21 = vmul.f32 %v593_v9, %v780_v1  ;;  %v360_v22 = vadd.f32 %v296_v3, %v232_v10  ;;  %v361_v23 = vadd.f32 %v297_v4, %v233_v11  ;;  %v236_v24 = vadd.f32 %v788_v5, %v165_v14  ;;  %v309_v9 = vld [vmem:[%s1204_s1 + $0xa8] sm:$0xff] }
  0x12   :  { %v237_v25 = vadd.f32 %v788_v5, %v166_v15  ;;  %v362_v28 = vadd.f32 %v298_v12, %v234_v16  ;;  %v363_v29 = vadd.f32 %v299_v13, %v235_v17  ;;  %v238_v30 = vadd.f32 %v788_v5, %v167_v20  ;;  %v310_v16 = vld [vmem:[%s1204_s1 + $0xb0] sm:$0xff]  ;;  %v311_v17 = vld [vmem:[%s1204_s1 + $0xb8] sm:$0xff] }
  0x13   :  { %v239_v31 = vadd.f32 %v788_v5, %v168_v21  ;;  %v424_v33 = vmax.f32 %v360_v22, 0.0  ;;  %v425_v34 = vmax.f32 %v361_v23, 0.0  ;;  %v364_v35 = vadd.f32 %v300_v18, %v236_v24  ;;  %v701_v22 = vld [vmem:[%s1203_s0 + $0x60] sm:$0xff]  }
  0x14   :  { %v365_v36 = vadd.f32 %v301_v19, %v237_v25  ;;  %v426_v38 = vmax.f32 %v362_v28, 0.0  ;;  %v427_v39 = vmax.f32 %v363_v29, 0.0  ;;  %v366_v40 = vadd.f32 %v302_v26, %v238_v30 }
  0x15   :  { %v367_v41 = vadd.f32 %v303_v27, %v239_v31  ;;  %488 = vst [vmem:[#allocation2 + $0x40] sm:$0xff] %v424_v33  ;;  %489 = vst [vmem:[#allocation2 + $0x48] sm:$0xff] %v425_v34  ;;  %v428_v43 = vmax.f32 %v364_v35, 0.0  ;;  %v597_v46 = vunpack.c.h.bf16 %v697_v32  ;;  %v600_v50 = vunpack.c.l.bf16 %v698_v37  ;;  %v702_v27 = vld [vmem:[%s1203_s0 + $0x68] sm:$0xff]   ;;  %v703_v32 = vld [vmem:[%s1203_s0 + $0x70] sm:$0xff]  }
  0x16   :  { %v429_v44 = vmax.f32 %v365_v36, 0.0  ;;  %490 = vst [vmem:[#allocation2 + $0x50] sm:$0xff] %v426_v38  ;;  %491 = vst [vmem:[#allocation2 + $0x58] sm:$0xff] %v427_v39  ;;  %v430_v48 = vmax.f32 %v366_v40, 0.0  ;;  %v601_v51 = vunpack.c.h.bf16 %v698_v37  ;;  %v169_v52 = vmul.f32 %v596_v45, %v780_v1  ;;  %v704_v37 = vld [vmem:[%s1203_s0 + $0x78] sm:$0xff]  }
  0x17   :  { %v431_v49 = vmax.f32 %v367_v41, 0.0  ;;  %492 = vst [vmem:[#allocation2 + $0x60] sm:$0xff] %v428_v43  ;;  %v170_v53 = vmul.f32 %v597_v46, %v780_v1  ;;  %v604_v54 = vunpack.c.l.bf16 %v699_v42  ;;  %v605_v55 = vunpack.c.h.bf16 %v699_v42 }
  0x18   :  { %493 = vst [vmem:[#allocation2 + $0x68] sm:$0xff] %v429_v44  ;;  %494 = vst [vmem:[#allocation2 + $0x70] sm:$0xff] %v430_v48  ;;  %v171_v58 = vmul.f32 %v600_v50, %v780_v1  ;;  %v172_v59 = vmul.f32 %v601_v51, %v780_v1  ;;  %v608_v60 = vunpack.c.l.bf16 %v700_v47  ;;  %v609_v61 = vunpack.c.h.bf16 %v700_v47 }
  0x19   :  { %495 = vst [vmem:[#allocation2 + $0x78] sm:$0xff] %v431_v49  ;;  %v240_v62 = vadd.f32 %v788_v5, %v169_v52  ;;  %v241_v63 = vadd.f32 %v788_v5, %v170_v53  ;;  %v173_v3 = vmul.f32 %v604_v54, %v780_v1  ;;  %v174_v4 = vmul.f32 %v605_v55, %v780_v1 }
  0x1a   :  { %v242_v6 = vadd.f32 %v788_v5, %v171_v58  ;;  %v243_v7 = vadd.f32 %v788_v5, %v172_v59  ;;  %v175_v10 = vmul.f32 %v608_v60, %v780_v1  ;;  %v176_v11 = vmul.f32 %v609_v61, %v780_v1 }
  0x1b   :  { %v368_v12 = vadd.f32 %v304_v56, %v240_v62  ;;  %v369_v13 = vadd.f32 %v305_v57, %v241_v63  ;;  %v244_v14 = vadd.f32 %v788_v5, %v173_v3  ;;  %v245_v15 = vadd.f32 %v788_v5, %v174_v4 }
  0x1c   :  { %v370_v18 = vadd.f32 %v306_v0, %v242_v6  ;;  %v371_v19 = vadd.f32 %v307_v2, %v243_v7  ;;  %v246_v20 = vadd.f32 %v788_v5, %v175_v10  ;;  %v247_v21 = vadd.f32 %v788_v5, %v176_v11 }
  0x1d   :  { %v432_v23 = vmax.f32 %v368_v12, 0.0  ;;  %v433_v24 = vmax.f32 %v369_v13, 0.0  ;;  %v372_v25 = vadd.f32 %v308_v8, %v244_v14  ;;  %v373_v26 = vadd.f32 %v309_v9, %v245_v15 }
  0x1e   :  { %v434_v28 = vmax.f32 %v370_v18, 0.0  ;;  %v435_v29 = vmax.f32 %v371_v19, 0.0  ;;  %v374_v30 = vadd.f32 %v310_v16, %v246_v20  ;;  %v375_v31 = vadd.f32 %v311_v17, %v247_v21 }
  0x1f   :  { %496 = vst [vmem:[#allocation2 + $0x80] sm:$0xff] %v432_v23  ;;  %497 = vst [vmem:[#allocation2 + $0x88] sm:$0xff] %v433_v24  ;;  %v436_v33 = vmax.f32 %v372_v25, 0.0  ;;  %v437_v34 = vmax.f32 %v373_v26, 0.0  ;;  %v612_v35 = vunpack.c.l.bf16 %v701_v22  ;;  %v613_v36 = vunpack.c.h.bf16 %v701_v22 }
  0x20   :  { %498 = vst [vmem:[#allocation2 + $0x90] sm:$0xff] %v434_v28  ;;  %499 = vst [vmem:[#allocation2 + $0x98] sm:$0xff] %v435_v29  ;;  %v438_v38 = vmax.f32 %v374_v30, 0.0  ;;  %v439_v39 = vmax.f32 %v375_v31, 0.0  ;;  %v616_v40 = vunpack.c.l.bf16 %v702_v27  ;;  %v617_v41 = vunpack.c.h.bf16 %v702_v27 }
  0x21   :  { %9 = vsyncpa [#allocation3], 0  ;;  %500 = vst [vmem:[#allocation2 + $0xa0] sm:$0xff] %v436_v33  ;;  %v177_v42 = vmul.f32 %v612_v35, %v780_v1  ;;  %v178_v43 = vmul.f32 %v613_v36, %v780_v1  ;;  %v620_v44 = vunpack.c.l.bf16 %v703_v32  ;;  %v621_v45 = vunpack.c.h.bf16 %v703_v32  ;;  %v312_v46 = vld [vmem:[%s1204_s1 + $0xc0] sm:$0xff]  ;;  %v313_v47 = vld [vmem:[%s1204_s1 + $0xc8] sm:$0xff]  ;;  %s746_s14 = smov [#allocation2]  }
  0x22   :  { %501 = vst [vmem:[#allocation2 + $0xa8] sm:$0xff] %v437_v34  ;;  %502 = vst [vmem:[#allocation2 + $0xb0] sm:$0xff] %v438_v38  ;;  %v179_v48 = vmul.f32 %v616_v40, %v780_v1  ;;  %v180_v49 = vmul.f32 %v617_v41, %v780_v1  ;;  %v624_v50 = vunpack.c.l.bf16 %v704_v37  ;;  %v625_v51 = vunpack.c.h.bf16 %v704_v37  ;;  %v314_v54 = vld [vmem:[%s1204_s1 + $0xd0] sm:$0xff]  ;;  %v315_v55 = vld [vmem:[%s1204_s1 + $0xd8] sm:$0xff]  ;;  %s549_s15 = sshll.u32 %s746_s14, 4  ;;  %s550_s15 = int_to_ptr.vmem [resolvable:$true] %s549_s15 }
  0x23   :  { %503 = vst [vmem:[#allocation2 + $0xb8] sm:$0xff] %v439_v39  ;;  %v248_v52 = vadd.f32 %v788_v5, %v177_v42  ;;  %v249_v53 = vadd.f32 %v788_v5, %v178_v43  ;;  %v181_v56 = vmul.f32 %v620_v44, %v780_v1  ;;  %v182_v57 = vmul.f32 %v621_v45, %v780_v1  ;;  %v316_v60 = vld [vmem:[%s1204_s1 + $0xe0] sm:$0xff]  ;;  %v317_v61 = vld [vmem:[%s1204_s1 + $0xe8] sm:$0xff]  ;;  %v318_v6 = vld [vmem:[%s1204_s1 + $0xf0] sm:$0xff]  ;;  %p729_p1 = scmp.lt.s32.totalorder %s550_s15, %s550_s15 }
  0x24   :  { %v250_v58 = vadd.f32 %v788_v5, %v179_v48  ;;  %v251_v59 = vadd.f32 %v788_v5, %v180_v49  ;;  %v183_v62 = vmul.f32 %v624_v50, %v780_v1  ;;  %v184_v63 = vmul.f32 %v625_v51, %v780_v1  ;;  %v319_v7 = vld [vmem:[%s1204_s1 + $0xf8] sm:$0xff]  ;;  %v705_v12 = vld [vmem:[%s1203_s0 + $0x80] sm:$0xff]   ;;  %v706_v17 = vld [vmem:[%s1203_s0 + $0x88] sm:$0xff]  }
  0x25   :  { %v376_v0 = vadd.f32 %v312_v46, %v248_v52  ;;  %v377_v2 = vadd.f32 %v313_v47, %v249_v53  ;;  %v252_v3 = vadd.f32 %v788_v5, %v181_v56  ;;  %v253_v4 = vadd.f32 %v788_v5, %v182_v57  ;;  %v707_v22 = vld [vmem:[%s1203_s0 + $0x90] sm:$0xff]   ;;  %v708_v27 = vld [vmem:[%s1203_s0 + $0x98] sm:$0xff]   ;;  %v320_v36 = vld [vmem:[%s1204_s1 + $0x100] sm:$0xff] }
  0x26   :  { %v378_v8 = vadd.f32 %v314_v54, %v250_v58  ;;  %v379_v9 = vadd.f32 %v315_v55, %v251_v59  ;;  %v254_v10 = vadd.f32 %v788_v5, %v183_v62  ;;  %v255_v11 = vadd.f32 %v788_v5, %v184_v63  ;;  %v321_v37 = vld [vmem:[%s1204_s1 + $0x108] sm:$0xff]  ;;  %v322_v44 = vld [vmem:[%s1204_s1 + $0x110] sm:$0xff]  ;;  %v323_v45 = vld [vmem:[%s1204_s1 + $0x118] sm:$0xff] }
  0x27   :  { %v440_v13 = vmax.f32 %v376_v0, 0.0  ;;  %v441_v14 = vmax.f32 %v377_v2, 0.0  ;;  %v380_v15 = vadd.f32 %v316_v60, %v252_v3  ;;  %v381_v16 = vadd.f32 %v317_v61, %v253_v4  ;;  %v324_v50 = vld [vmem:[%s1204_s1 + $0x120] sm:$0xff]  ;;  %v325_v51 = vld [vmem:[%s1204_s1 + $0x128] sm:$0xff]  ;;  %v326_v58 = vld [vmem:[%s1204_s1 + $0x130] sm:$0xff] }
  0x28   :  { %v442_v18 = vmax.f32 %v378_v8, 0.0  ;;  %v443_v19 = vmax.f32 %v379_v9, 0.0  ;;  %v382_v20 = vadd.f32 %v318_v6, %v254_v10  ;;  %v383_v21 = vadd.f32 %v319_v7, %v255_v11  ;;  %v327_v59 = vld [vmem:[%s1204_s1 + $0x138] sm:$0xff]  ;;  %v709_v0 = vld [vmem:[%s1203_s0 + $0xa0] sm:$0xff]   ;;  %v710_v7 = vld [vmem:[%s1203_s0 + $0xa8] sm:$0xff]  }
  0x29   :  { %504 = vst [vmem:[#allocation2 + $0xc0] sm:$0xff] %v440_v13  ;;  %505 = vst [vmem:[#allocation2 + $0xc8] sm:$0xff] %v441_v14  ;;  %v444_v23 = vmax.f32 %v380_v15, 0.0  ;;  %v445_v24 = vmax.f32 %v381_v16, 0.0  ;;  %v628_v25 = vunpack.c.l.bf16 %v705_v12  ;;  %v629_v26 = vunpack.c.h.bf16 %v705_v12  ;;  %v711_v12 = vld [vmem:[%s1203_s0 + $0xb0] sm:$0xff]  }
  0x2a   :  { %506 = vst [vmem:[#allocation2 + $0xd0] sm:$0xff] %v442_v18  ;;  %507 = vst [vmem:[#allocation2 + $0xd8] sm:$0xff] %v443_v19  ;;  %v446_v28 = vmax.f32 %v382_v20, 0.0  ;;  %v447_v29 = vmax.f32 %v383_v21, 0.0  ;;  %v632_v30 = vunpack.c.l.bf16 %v706_v17  ;;  %v633_v31 = vunpack.c.h.bf16 %v706_v17  ;;  %v712_v17 = vld [vmem:[%s1203_s0 + $0xb8] sm:$0xff]  }
  0x2b   :  { %508 = vst [vmem:[#allocation2 + $0xe0] sm:$0xff] %v444_v23  ;;  %509 = vst [vmem:[#allocation2 + $0xe8] sm:$0xff] %v445_v24  ;;  %v185_v32 = vmul.f32 %v628_v25, %v780_v1  ;;  %v186_v33 = vmul.f32 %v629_v26, %v780_v1  ;;  %v636_v34 = vunpack.c.l.bf16 %v707_v22  ;;  %v637_v35 = vunpack.c.h.bf16 %v707_v22  ;;  %v328_v26 = vld [vmem:[%s1204_s1 + $0x140] sm:$0xff] }
  0x2c   :  { %510 = vst [vmem:[#allocation2 + $0xf0] sm:$0xff] %v446_v28  ;;  %511 = vst [vmem:[#allocation2 + $0xf8] sm:$0xff] %v447_v29  ;;  %v187_v38 = vmul.f32 %v632_v30, %v780_v1  ;;  %v188_v39 = vmul.f32 %v633_v31, %v780_v1  ;;  %v640_v40 = vunpack.c.l.bf16 %v708_v27  ;;  %v641_v41 = vunpack.c.h.bf16 %v708_v27  ;;  %v329_v27 = vld [vmem:[%s1204_s1 + $0x148] sm:$0xff] }
  0x2d   :  { %v256_v42 = vadd.f32 %v788_v5, %v185_v32  ;;  %v257_v43 = vadd.f32 %v788_v5, %v186_v33  ;;  %v189_v46 = vmul.f32 %v636_v34, %v780_v1  ;;  %v190_v47 = vmul.f32 %v637_v35, %v780_v1  ;;  %v330_v34 = vld [vmem:[%s1204_s1 + $0x150] sm:$0xff]  ;;  %v331_v35 = vld [vmem:[%s1204_s1 + $0x158] sm:$0xff] }
  0x2e   :  { %v258_v48 = vadd.f32 %v788_v5, %v187_v38  ;;  %v259_v49 = vadd.f32 %v788_v5, %v188_v39  ;;  %v191_v52 = vmul.f32 %v640_v40, %v780_v1  ;;  %v192_v53 = vmul.f32 %v641_v41, %v780_v1  ;;  %v332_v40 = vld [vmem:[%s1204_s1 + $0x160] sm:$0xff]  ;;  %v333_v41 = vld [vmem:[%s1204_s1 + $0x168] sm:$0xff] }
  0x2f   :  { %v384_v54 = vadd.f32 %v320_v36, %v256_v42  ;;  %v385_v55 = vadd.f32 %v321_v37, %v257_v43  ;;  %v260_v56 = vadd.f32 %v788_v5, %v189_v46  ;;  %v261_v57 = vadd.f32 %v788_v5, %v190_v47 }
  0x30   :  { %v386_v60 = vadd.f32 %v322_v44, %v258_v48  ;;  %v387_v61 = vadd.f32 %v323_v45, %v259_v49  ;;  %v262_v62 = vadd.f32 %v788_v5, %v191_v52  ;;  %v263_v63 = vadd.f32 %v788_v5, %v192_v53  ;;  %v334_v48 = vld [vmem:[%s1204_s1 + $0x170] sm:$0xff]  ;;  %v335_v49 = vld [vmem:[%s1204_s1 + $0x178] sm:$0xff] }
  0x31   :  { %v448_v2 = vmax.f32 %v384_v54, 0.0  ;;  %v449_v3 = vmax.f32 %v385_v55, 0.0  ;;  %v388_v4 = vadd.f32 %v324_v50, %v260_v56  ;;  %v389_v6 = vadd.f32 %v325_v51, %v261_v57  ;;  %v713_v54 = vld [vmem:[%s1203_s0 + $0xc0] sm:$0xff]  }
  0x32   :  { %v450_v8 = vmax.f32 %v386_v60, 0.0  ;;  %v451_v9 = vmax.f32 %v387_v61, 0.0  ;;  %v390_v10 = vadd.f32 %v326_v58, %v262_v62  ;;  %v391_v11 = vadd.f32 %v327_v59, %v263_v63  ;;  %v714_v59 = vld [vmem:[%s1203_s0 + $0xc8] sm:$0xff]  }
  0x33   :  { %512 = vst [vmem:[#allocation2 + $0x100] sm:$0xff] %v448_v2  ;;  %513 = vst [vmem:[#allocation2 + $0x108] sm:$0xff] %v449_v3  ;;  %v452_v13 = vmax.f32 %v388_v4, 0.0  ;;  %v453_v14 = vmax.f32 %v389_v6, 0.0  ;;  %v644_v15 = vunpack.c.l.bf16 %v709_v0  ;;  %v645_v16 = vunpack.c.h.bf16 %v709_v0  ;;  %v715_v0 = vld [vmem:[%s1203_s0 + $0xd0] sm:$0xff]  }
  0x34   :  { %514 = vst [vmem:[#allocation2 + $0x110] sm:$0xff] %v450_v8  ;;  %515 = vst [vmem:[#allocation2 + $0x118] sm:$0xff] %v451_v9  ;;  %v454_v18 = vmax.f32 %v390_v10, 0.0  ;;  %v455_v19 = vmax.f32 %v391_v11, 0.0  ;;  %v648_v20 = vunpack.c.l.bf16 %v710_v7  ;;  %v649_v21 = vunpack.c.h.bf16 %v710_v7  ;;  %v716_v7 = vld [vmem:[%s1203_s0 + $0xd8] sm:$0xff]  }
  0x35   :  { %516 = vst [vmem:[#allocation2 + $0x120] sm:$0xff] %v452_v13  ;;  %517 = vst [vmem:[#allocation2 + $0x128] sm:$0xff] %v453_v14  ;;  %v193_v22 = vmul.f32 %v644_v15, %v780_v1  ;;  %v194_v23 = vmul.f32 %v645_v16, %v780_v1  ;;  %v652_v24 = vunpack.c.l.bf16 %v711_v12  ;;  %v653_v25 = vunpack.c.h.bf16 %v711_v12  ;;  %v336_v16 = vld [vmem:[%s1204_s1 + $0x180] sm:$0xff] }
  0x36   :  { %518 = vst [vmem:[#allocation2 + $0x130] sm:$0xff] %v454_v18  ;;  %519 = vst [vmem:[#allocation2 + $0x138] sm:$0xff] %v455_v19  ;;  %v195_v28 = vmul.f32 %v648_v20, %v780_v1  ;;  %v196_v29 = vmul.f32 %v649_v21, %v780_v1  ;;  %v656_v30 = vunpack.c.l.bf16 %v712_v17  ;;  %v657_v31 = vunpack.c.h.bf16 %v712_v17  ;;  %v337_v17 = vld [vmem:[%s1204_s1 + $0x188] sm:$0xff] }
  0x37   :  { %v264_v32 = vadd.f32 %v788_v5, %v193_v22  ;;  %v265_v33 = vadd.f32 %v788_v5, %v194_v23  ;;  %v197_v36 = vmul.f32 %v652_v24, %v780_v1  ;;  %v198_v37 = vmul.f32 %v653_v25, %v780_v1  ;;  %v338_v24 = vld [vmem:[%s1204_s1 + $0x190] sm:$0xff]  ;;  %v339_v25 = vld [vmem:[%s1204_s1 + $0x198] sm:$0xff] }
  0x38   :  { %v266_v38 = vadd.f32 %v788_v5, %v195_v28  ;;  %v267_v39 = vadd.f32 %v788_v5, %v196_v29  ;;  %v199_v42 = vmul.f32 %v656_v30, %v780_v1  ;;  %v200_v43 = vmul.f32 %v657_v31, %v780_v1  ;;  %v340_v30 = vld [vmem:[%s1204_s1 + $0x1a0] sm:$0xff]  ;;  %v341_v31 = vld [vmem:[%s1204_s1 + $0x1a8] sm:$0xff] }
  0x39   :  { %v392_v44 = vadd.f32 %v328_v26, %v264_v32  ;;  %v393_v45 = vadd.f32 %v329_v27, %v265_v33  ;;  %v268_v46 = vadd.f32 %v788_v5, %v197_v36  ;;  %v269_v47 = vadd.f32 %v788_v5, %v198_v37 }
  0x3a   :  { %v394_v50 = vadd.f32 %v330_v34, %v266_v38  ;;  %v395_v51 = vadd.f32 %v331_v35, %v267_v39  ;;  %v270_v52 = vadd.f32 %v788_v5, %v199_v42  ;;  %v271_v53 = vadd.f32 %v788_v5, %v200_v43  ;;  %v342_v38 = vld [vmem:[%s1204_s1 + $0x1b0] sm:$0xff]  ;;  %v343_v39 = vld [vmem:[%s1204_s1 + $0x1b8] sm:$0xff] }
  0x3b   :  { %v456_v55 = vmax.f32 %v392_v44, 0.0  ;;  %v457_v56 = vmax.f32 %v393_v45, 0.0  ;;  %v396_v57 = vadd.f32 %v332_v40, %v268_v46  ;;  %v397_v58 = vadd.f32 %v333_v41, %v269_v47  ;;  %v717_v44 = vld [vmem:[%s1203_s0 + $0xe0] sm:$0xff]  }
  0x3c   :  { %v458_v60 = vmax.f32 %v394_v50, 0.0  ;;  %v459_v61 = vmax.f32 %v395_v51, 0.0  ;;  %v398_v62 = vadd.f32 %v334_v48, %v270_v52  ;;  %v399_v63 = vadd.f32 %v335_v49, %v271_v53  ;;  %v718_v49 = vld [vmem:[%s1203_s0 + $0xe8] sm:$0xff]  }
  0x3d   :  { %520 = vst [vmem:[#allocation2 + $0x140] sm:$0xff] %v456_v55  ;;  %521 = vst [vmem:[#allocation2 + $0x148] sm:$0xff] %v457_v56  ;;  %v460_v2 = vmax.f32 %v396_v57, 0.0  ;;  %v461_v3 = vmax.f32 %v397_v58, 0.0  ;;  %v660_v4 = vunpack.c.l.bf16 %v713_v54  ;;  %v661_v6 = vunpack.c.h.bf16 %v713_v54  ;;  %v719_v54 = vld [vmem:[%s1203_s0 + $0xf0] sm:$0xff]  }
  0x3e   :  { %522 = vst [vmem:[#allocation2 + $0x150] sm:$0xff] %v458_v60  ;;  %523 = vst [vmem:[#allocation2 + $0x158] sm:$0xff] %v459_v61  ;;  %v462_v8 = vmax.f32 %v398_v62, 0.0  ;;  %v463_v9 = vmax.f32 %v399_v63, 0.0  ;;  %v664_v10 = vunpack.c.l.bf16 %v714_v59  ;;  %v665_v11 = vunpack.c.h.bf16 %v714_v59  ;;  %v720_v59 = vld [vmem:[%s1203_s0 + $0xf8] sm:$0xff]  }
  0x3f   :  { %524 = vst [vmem:[#allocation2 + $0x160] sm:$0xff] %v460_v2  ;;  %525 = vst [vmem:[#allocation2 + $0x168] sm:$0xff] %v461_v3  ;;  %v201_v12 = vmul.f32 %v660_v4, %v780_v1  ;;  %v202_v13 = vmul.f32 %v661_v6, %v780_v1  ;;  %v668_v14 = vunpack.c.l.bf16 %v715_v0  ;;  %v669_v15 = vunpack.c.h.bf16 %v715_v0  ;;  %v344_v6 = vld [vmem:[%s1204_s1 + $0x1c0] sm:$0xff] }
  0x40   :  { %526 = vst [vmem:[#allocation2 + $0x170] sm:$0xff] %v462_v8  ;;  %527 = vst [vmem:[#allocation2 + $0x178] sm:$0xff] %v463_v9  ;;  %v203_v18 = vmul.f32 %v664_v10, %v780_v1  ;;  %v204_v19 = vmul.f32 %v665_v11, %v780_v1  ;;  %v672_v20 = vunpack.c.l.bf16 %v716_v7  ;;  %v673_v21 = vunpack.c.h.bf16 %v716_v7  ;;  %v345_v7 = vld [vmem:[%s1204_s1 + $0x1c8] sm:$0xff] }
  0x41   :  { %v272_v22 = vadd.f32 %v788_v5, %v201_v12  ;;  %v273_v23 = vadd.f32 %v788_v5, %v202_v13  ;;  %v205_v26 = vmul.f32 %v668_v14, %v780_v1  ;;  %v206_v27 = vmul.f32 %v669_v15, %v780_v1  ;;  %v346_v14 = vld [vmem:[%s1204_s1 + $0x1d0] sm:$0xff]  ;;  %v347_v15 = vld [vmem:[%s1204_s1 + $0x1d8] sm:$0xff] }
  0x42   :  { %v274_v28 = vadd.f32 %v788_v5, %v203_v18  ;;  %v275_v29 = vadd.f32 %v788_v5, %v204_v19  ;;  %v207_v32 = vmul.f32 %v672_v20, %v780_v1  ;;  %v208_v33 = vmul.f32 %v673_v21, %v780_v1  ;;  %v348_v20 = vld [vmem:[%s1204_s1 + $0x1e0] sm:$0xff]  ;;  %v349_v21 = vld [vmem:[%s1204_s1 + $0x1e8] sm:$0xff] }
  0x43   :  { %v400_v34 = vadd.f32 %v336_v16, %v272_v22  ;;  %v401_v35 = vadd.f32 %v337_v17, %v273_v23  ;;  %v276_v36 = vadd.f32 %v788_v5, %v205_v26  ;;  %v277_v37 = vadd.f32 %v788_v5, %v206_v27 }
  0x44   :  { %v402_v40 = vadd.f32 %v338_v24, %v274_v28  ;;  %v403_v41 = vadd.f32 %v339_v25, %v275_v29  ;;  %v278_v42 = vadd.f32 %v788_v5, %v207_v32  ;;  %v279_v43 = vadd.f32 %v788_v5, %v208_v33  ;;  %v350_v28 = vld [vmem:[%s1204_s1 + $0x1f0] sm:$0xff]  ;;  %v351_v29 = vld [vmem:[%s1204_s1 + $0x1f8] sm:$0xff]  ;;  %s724_s1 = scalar_lea.vmem %s550_s15, 8192 }
  0x45   :  { %v464_v45 = vmax.f32 %v400_v34, 0.0  ;;  %v465_v46 = vmax.f32 %v401_v35, 0.0  ;;  %v404_v47 = vadd.f32 %v340_v30, %v276_v36  ;;  %v405_v48 = vadd.f32 %v341_v31, %v277_v37  ;;  %p725_p0 = scmp.ne.s32.totalorder %s550_s15, %s724_s1  ;;  %p730_p2 = scmp.lt.s32.totalorder %s724_s1, %s724_s1 }
  0x46   :  { %v466_v50 = vmax.f32 %v402_v40, 0.0  ;;  %v467_v51 = vmax.f32 %v403_v41, 0.0  ;;  %v406_v52 = vadd.f32 %v342_v38, %v278_v42  ;;  %v407_v53 = vadd.f32 %v343_v39, %v279_v43 }
  0x47   :  { %528 = vst [vmem:[#allocation2 + $0x180] sm:$0xff] %v464_v45  ;;  %529 = vst [vmem:[#allocation2 + $0x188] sm:$0xff] %v465_v46  ;;  %v468_v55 = vmax.f32 %v404_v47, 0.0  ;;  %v469_v56 = vmax.f32 %v405_v48, 0.0  ;;  %v676_v57 = vunpack.c.l.bf16 %v717_v44  ;;  %v677_v58 = vunpack.c.h.bf16 %v717_v44  ;;  %p731_p3 = por %p730_p2, %p729_p1 }
  0x48   :  { %530 = vst [vmem:[#allocation2 + $0x190] sm:$0xff] %v466_v50  ;;  %531 = vst [vmem:[#allocation2 + $0x198] sm:$0xff] %v467_v51  ;;  %v470_v60 = vmax.f32 %v406_v52, 0.0  ;;  %v471_v61 = vmax.f32 %v407_v53, 0.0  ;;  %v680_v62 = vunpack.c.l.bf16 %v718_v49  ;;  %v681_v63 = vunpack.c.h.bf16 %v718_v49 }
  0x49   :  { %532 = vst [vmem:[#allocation2 + $0x1a0] sm:$0xff] %v468_v55  ;;  %533 = vst [vmem:[#allocation2 + $0x1a8] sm:$0xff] %v469_v56  ;;  %v209_v0 = vmul.f32 %v676_v57, %v780_v1  ;;  %v210_v2 = vmul.f32 %v677_v58, %v780_v1  ;;  %v684_v3 = vunpack.c.l.bf16 %v719_v54  ;;  %v685_v4 = vunpack.c.h.bf16 %v719_v54  ;;  %p732_p4 = pnand %p731_p3, %p725_p0 }
  0x4a   :  { %534 = vst [vmem:[#allocation2 + $0x1b0] sm:$0xff] %v470_v60  ;;  %535 = vst [vmem:[#allocation2 + $0x1b8] sm:$0xff] %v471_v61  ;;  %v211_v8 = vmul.f32 %v680_v62, %v780_v1  ;;  %v212_v9 = vmul.f32 %v681_v63, %v780_v1  ;;  %v688_v10 = vunpack.c.l.bf16 %v720_v59  ;;  %v689_v11 = vunpack.c.h.bf16 %v720_v59 }
  0x4b   :  { %v280_v12 = vadd.f32 %v788_v5, %v209_v0  ;;  %v281_v13 = vadd.f32 %v788_v5, %v210_v2  ;;  %v213_v16 = vmul.f32 %v684_v3, %v780_v1  ;;  %v214_v17 = vmul.f32 %v685_v4, %v780_v1 }
  0x4c   :  { %v282_v18 = vadd.f32 %v788_v5, %v211_v8  ;;  %v283_v19 = vadd.f32 %v788_v5, %v212_v9  ;;  %v215_v22 = vmul.f32 %v688_v10, %v780_v1  ;;  %v216_v23 = vmul.f32 %v689_v11, %v780_v1 }
  0x4d   :  { %v408_v24 = vadd.f32 %v344_v6, %v280_v12  ;;  %v409_v25 = vadd.f32 %v345_v7, %v281_v13  ;;  %v284_v26 = vadd.f32 %v788_v5, %v213_v16  ;;  %v285_v27 = vadd.f32 %v788_v5, %v214_v17 }
  0x4e   :  { %v410_v30 = vadd.f32 %v346_v14, %v282_v18  ;;  %v411_v31 = vadd.f32 %v347_v15, %v283_v19  ;;  %v286_v32 = vadd.f32 %v788_v5, %v215_v22  ;;  %v287_v1 = vadd.f32 %v788_v5, %v216_v23 }
  0x4f   :  { %v472_v33 = vmax.f32 %v408_v24, 0.0  ;;  %v473_v34 = vmax.f32 %v409_v25, 0.0  ;;  %v412_v35 = vadd.f32 %v348_v20, %v284_v26  ;;  %v413_v36 = vadd.f32 %v349_v21, %v285_v27 }
  0x50   :  { %v474_v37 = vmax.f32 %v410_v30, 0.0  ;;  %v475_v38 = vmax.f32 %v411_v31, 0.0  ;;  %v414_v39 = vadd.f32 %v350_v28, %v286_v32  ;;  %v415_v40 = vadd.f32 %v351_v29, %v287_v1 }
  0x51   :  { %536 = vst [vmem:[#allocation2 + $0x1c0] sm:$0xff] %v472_v33  ;;  %537 = vst [vmem:[#allocation2 + $0x1c8] sm:$0xff] %v473_v34  ;;  %v476_v41 = vmax.f32 %v412_v35, 0.0  ;;  %v477_v42 = vmax.f32 %v413_v36, 0.0 }
  0x52   :  { %538 = vst [vmem:[#allocation2 + $0x1d0] sm:$0xff] %v474_v37  ;;  %539 = vst [vmem:[#allocation2 + $0x1d8] sm:$0xff] %v475_v38  ;;  %v478_v43 = vmax.f32 %v414_v39, 0.0  ;;  %v479_v44 = vmax.f32 %v415_v40, 0.0 }
  0x53   :  { %540 = vst [vmem:[#allocation2 + $0x1e0] sm:$0xff] %v476_v41  ;;  %541 = vst [vmem:[#allocation2 + $0x1e8] sm:$0xff] %v477_v42 }
  0x54   :  { %542 = vst [vmem:[#allocation2 + $0x1f0] sm:$0xff] %v478_v43  ;;  %543 = vst [vmem:[#allocation2 + $0x1f8] sm:$0xff] %v479_v44 }
  0x55   :  { %735 = shalt.err (!%p732_p4)
}
  0x56   :  { %s747_s16 = smov 128   ;;  %s748_s17 = smov 8  }
  0x57   :  { %555 = dma.vmem_to_hbm [thread:$0]  %s550_s15, 8192, %s1207_s4, [#allocation3], %s747_s16, %s747_s16, %s748_s17  }
  0x58   :  { %744 = dma.done.wait [#allocation3], 8192  }
  0x59   :  { %745 = vsyncadd [#allocation3], 4294959104 }
  0x5a   :  { %559 = vsyncpa [#allocation3], 1 }

// kernel: bottleneck_block.4
= control target key start
LH: loop header
LB: loop body
LE: loop exit
PB: predicated region body
PF: predicated region fallthrough
CT: control target
= control target key end

     0   :  { %s1996_s1 = inlined_call_operand.vmem [shape: bf16[128,128], index: 1, kind: input, shape index: {}]   ;;  %s1997_s0 = inlined_call_operand.vmem [shape: f32[512,128], index: 0, kind: input, shape index: {}]   ;;  %s1998_s2 = inlined_call_operand.vmem [shape: bf16[512,128], index: 2, kind: output, shape index: {0}]   ;;  %s1999_s3 = inlined_call_operand.vmem [shape: f32[1,2,128], index: 3, kind: output, shape index: {1}]  }
   0x1   :  { %v1458_v0 = vld [vmem:[%s1996_s1 + $0x38] sm:$0xff]   ;;  %v1459_v1 = vld [vmem:[%s1996_s1 + $0x30] sm:$0xff]   ;;  %v1460_v2 = vld [vmem:[%s1996_s1 + $0x28] sm:$0xff]  }
   0x2   :  { %1362 = vmatprep.subr.bf16.mxu0 %v1458_v0  ;;  %1442 = vmatprep.subr.bf16.mxu1 %v1458_v0  ;;  %v1461_v3 = vld [vmem:[%s1996_s1 + $0x20] sm:$0xff]   ;;  %v15_v5 = vld [vmem:[%s1997_s0 + $0x8] sm:$0xff]  ;;  %v1462_v7 = vld [vmem:[%s1996_s1 + $0x18] sm:$0xff]  }
   0x3   :  { %1363 = vmatpush3.bf16.msra.mxu0 %v1458_v0  ;;  %1450 = vmatpush3.bf16.msra.mxu1 %v1458_v0  ;;  %v14_v4 = vld [vmem:[%s1997_s0] sm:$0xff]  ;;  %v1463_v8 = vld [vmem:[%s1996_s1 + $0x10] sm:$0xff]   ;;  %v47_v10 = vld [vmem:[%s1997_s0 + $0x108] sm:$0xff] }
   0x4   :  { %1364 = vmatprep.subr.bf16.mxu0 %v1459_v1  ;;  %1443 = vmatprep.subr.bf16.mxu1 %v1459_v1  ;;  %v78_v6 = vpack.c.bf16 %v15_v5, %v14_v4  ;;  %v46_v9 = vld [vmem:[%s1997_s0 + $0x100] sm:$0xff]  ;;  %v1464_v11 = vld [vmem:[%s1996_s1 + $0x8] sm:$0xff]   ;;  %v16_v14 = vld [vmem:[%s1997_s0 + $0x10] sm:$0xff] }
   0x5   :  { %v94_v12 = vpack.c.bf16 %v47_v10, %v46_v9  ;;  %v1465_v13 = vld [vmem:[%s1996_s1] sm:$0xff]   ;;  %v17_v15 = vld [vmem:[%s1997_s0 + $0x18] sm:$0xff]  ;;  %v19_v17 = vld [vmem:[%s1997_s0 + $0x28] sm:$0xff] }
   0x6   :  { %1378 = vmatprep.mubr.bf16.mxu0 %v78_v6  ;;  %v18_v16 = vld [vmem:[%s1997_s0 + $0x20] sm:$0xff]  ;;  %v48_v18 = vld [vmem:[%s1997_s0 + $0x110] sm:$0xff]  ;;  %v49_v19 = vld [vmem:[%s1997_s0 + $0x118] sm:$0xff]  ;;  %v79_v22 = vpack.c.bf16 %v17_v15, %v16_v14 }
   0x7   :  { %1365 = vmatpush3.bf16.msra.mxu0 %v1459_v1  ;;  %1451 = vmatpush3.bf16.msra.mxu1 %v1459_v1  ;;  %v50_v20 = vld [vmem:[%s1997_s0 + $0x120] sm:$0xff]  ;;  %v51_v21 = vld [vmem:[%s1997_s0 + $0x128] sm:$0xff]  ;;  %v80_v23 = vpack.c.bf16 %v19_v17, %v18_v16  ;;  %v95_v24 = vpack.c.bf16 %v49_v19, %v48_v18  ;;  %v20_v26 = vld [vmem:[%s1997_s0 + $0x30] sm:$0xff] }
   0x8   :  { %1366 = vmatprep.subr.bf16.mxu0 %v1460_v2  ;;  %1444 = vmatprep.subr.bf16.mxu1 %v1460_v2  ;;  %v96_v25 = vpack.c.bf16 %v51_v21, %v50_v20  ;;  %v21_v27 = vld [vmem:[%s1997_s0 + $0x38] sm:$0xff]  ;;  %v22_v28 = vld [vmem:[%s1997_s0 + $0x40] sm:$0xff]  ;;  %v23_v29 = vld [vmem:[%s1997_s0 + $0x48] sm:$0xff] }
   0x9   :  { %1410 = vmatprep.mubr.bf16.mxu1 %v94_v12  ;;  %v52_v30 = vld [vmem:[%s1997_s0 + $0x130] sm:$0xff]  ;;  %v53_v31 = vld [vmem:[%s1997_s0 + $0x138] sm:$0xff]  ;;  %v54_v32 = vld [vmem:[%s1997_s0 + $0x140] sm:$0xff]  ;;  %v81_v34 = vpack.c.bf16 %v21_v27, %v20_v26  ;;  %v82_v35 = vpack.c.bf16 %v23_v29, %v22_v28 }
   0xa   :  { %v55_v33 = vld [vmem:[%s1997_s0 + $0x148] sm:$0xff]  ;;  %v97_v36 = vpack.c.bf16 %v53_v31, %v52_v30  ;;  %v24_v38 = vld [vmem:[%s1997_s0 + $0x50] sm:$0xff]  ;;  %v25_v39 = vld [vmem:[%s1997_s0 + $0x58] sm:$0xff] }
   0xb   :  { %1367 = vmatpush3.bf16.msra.mxu0 %v1460_v2  ;;  %1452 = vmatpush3.bf16.msra.mxu1 %v1460_v2  ;;  %v98_v37 = vpack.c.bf16 %v55_v33, %v54_v32  ;;  %v26_v40 = vld [vmem:[%s1997_s0 + $0x60] sm:$0xff]  ;;  %v27_v41 = vld [vmem:[%s1997_s0 + $0x68] sm:$0xff]  ;;  %v56_v42 = vld [vmem:[%s1997_s0 + $0x150] sm:$0xff]  ;;  %v83_v46 = vpack.c.bf16 %v25_v39, %v24_v38 }
   0xc   :  { %1368 = vmatprep.subr.bf16.mxu0 %v1461_v3  ;;  %1445 = vmatprep.subr.bf16.mxu1 %v1461_v3  ;;  %v57_v43 = vld [vmem:[%s1997_s0 + $0x158] sm:$0xff]  ;;  %v58_v44 = vld [vmem:[%s1997_s0 + $0x160] sm:$0xff]  ;;  %v59_v45 = vld [vmem:[%s1997_s0 + $0x168] sm:$0xff]  ;;  %v84_v47 = vpack.c.bf16 %v27_v41, %v26_v40 }
   0xd   :  { %v99_v48 = vpack.c.bf16 %v57_v43, %v56_v42  ;;  %v100_v49 = vpack.c.bf16 %v59_v45, %v58_v44  ;;  %v28_v50 = vld [vmem:[%s1997_s0 + $0x70] sm:$0xff]  ;;  %v29_v51 = vld [vmem:[%s1997_s0 + $0x78] sm:$0xff]  ;;  %v30_v52 = vld [vmem:[%s1997_s0 + $0x80] sm:$0xff] }
   0xe   :  { %v31_v53 = vld [vmem:[%s1997_s0 + $0x88] sm:$0xff]  ;;  %v60_v54 = vld [vmem:[%s1997_s0 + $0x170] sm:$0xff]  ;;  %v61_v55 = vld [vmem:[%s1997_s0 + $0x178] sm:$0xff]  ;;  %v85_v58 = vpack.c.bf16 %v29_v51, %v28_v50 }
   0xf   :  { %1369 = vmatpush3.bf16.msra.mxu0 %v1461_v3  ;;  %1453 = vmatpush3.bf16.msra.mxu1 %v1461_v3  ;;  %v62_v56 = vld [vmem:[%s1997_s0 + $0x180] sm:$0xff]  ;;  %v63_v57 = vld [vmem:[%s1997_s0 + $0x188] sm:$0xff]  ;;  %v86_v59 = vpack.c.bf16 %v31_v53, %v30_v52  ;;  %v101_v60 = vpack.c.bf16 %v61_v55, %v60_v54  ;;  %v32_v62 = vld [vmem:[%s1997_s0 + $0x90] sm:$0xff] }
  0x10   :  { %1370 = vmatprep.subr.bf16.mxu0 %v1462_v7  ;;  %1446 = vmatprep.subr.bf16.mxu1 %v1462_v7  ;;  %v102_v61 = vpack.c.bf16 %v63_v57, %v62_v56  ;;  %v33_v63 = vld [vmem:[%s1997_s0 + $0x98] sm:$0xff]  ;;  %v34_v0 = vld [vmem:[%s1997_s0 + $0xa0] sm:$0xff]  ;;  %v35_v1 = vld [vmem:[%s1997_s0 + $0xa8] sm:$0xff] }
  0x11   :  { %v64_v2 = vld [vmem:[%s1997_s0 + $0x190] sm:$0xff]  ;;  %v65_v3 = vld [vmem:[%s1997_s0 + $0x198] sm:$0xff]  ;;  %v66_v4 = vld [vmem:[%s1997_s0 + $0x1a0] sm:$0xff]  ;;  %v87_v6 = vpack.c.bf16 %v33_v63, %v32_v62 }
  0x12   :  { %v67_v5 = vld [vmem:[%s1997_s0 + $0x1a8] sm:$0xff]  ;;  %v36_v10 = vld [vmem:[%s1997_s0 + $0xb0] sm:$0xff]  ;;  %v38_v12 = vld [vmem:[%s1997_s0 + $0xc0] sm:$0xff] }
  0x13   :  { %1371 = vmatpush3.bf16.msra.mxu0 %v1462_v7  ;;  %1454 = vmatpush3.bf16.msra.mxu1 %v1462_v7  ;;  %v88_v7 = vpack.c.bf16 %v35_v1, %v34_v0  ;;  %v104_v9 = vpack.c.bf16 %v67_v5, %v66_v4  ;;  %v68_v14 = vld [vmem:[%s1997_s0 + $0x1b0] sm:$0xff]  ;;  %v69_v15 = vld [vmem:[%s1997_s0 + $0x1b8] sm:$0xff]  ;;  %v70_v16 = vld [vmem:[%s1997_s0 + $0x1c0] sm:$0xff] }
  0x14   :  { %1372 = vmatprep.subr.bf16.mxu0 %v1463_v8  ;;  %1447 = vmatprep.subr.bf16.mxu1 %v1463_v8  ;;  %v71_v17 = vld [vmem:[%s1997_s0 + $0x1c8] sm:$0xff]  ;;  %v105_v20 = vpack.c.bf16 %v69_v15, %v68_v14  ;;  %v72_v26 = vld [vmem:[%s1997_s0 + $0x1d0] sm:$0xff]  ;;  %v73_v27 = vld [vmem:[%s1997_s0 + $0x1d8] sm:$0xff] }
  0x15   :  { %v106_v21 = vpack.c.bf16 %v71_v17, %v70_v16  ;;  %v74_v28 = vld [vmem:[%s1997_s0 + $0x1e0] sm:$0xff]  ;;  %v75_v29 = vld [vmem:[%s1997_s0 + $0x1e8] sm:$0xff]  ;;  %v107_v32 = vpack.c.bf16 %v73_v27, %v72_v26 }
  0x16   :  { %v108_v33 = vpack.c.bf16 %v75_v29, %v74_v28 }
  0x17   :  { %1373 = vmatpush3.bf16.msra.mxu0 %v1463_v8  ;;  %1455 = vmatpush3.bf16.msra.mxu1 %v1463_v8  ;;  %v103_v8 = vpack.c.bf16 %v65_v3, %v64_v2 }
  0x18   :  { %1374 = vmatprep.subr.bf16.mxu0 %v1464_v11  ;;  %1448 = vmatprep.subr.bf16.mxu1 %v1464_v11 }
  0x1b   :  { %1375 = vmatpush3.bf16.msra.mxu0 %v1464_v11  ;;  %1456 = vmatpush3.bf16.msra.mxu1 %v1464_v11  ;;  %v37_v11 = vld [vmem:[%s1997_s0 + $0xb8] sm:$0xff] }
  0x1c   :  { %1376 = vmatprep.subr.bf16.mxu0 %v1465_v13  ;;  %1449 = vmatprep.subr.bf16.mxu1 %v1465_v13  ;;  %v89_v18 = vpack.c.bf16 %v37_v11, %v36_v10 }
  0x1f   :  { %1377 = vmatpush3.bf16.msra.mxu0 %v1465_v13  ;;  %1457 = vmatpush3.bf16.msra.mxu1 %v1465_v13  ;;  %v39_v13 = vld [vmem:[%s1997_s0 + $0xc8] sm:$0xff] }
  0x20   :  { %v90_v19 = vpack.c.bf16 %v39_v13, %v38_v12 }
  0x22   :  { %1379 = vmatmul.mubr.bf16.vlgmr.msra.gmra.mxu0 %v79_v22  ;;  %1411 = vmatmul.mubr.bf16.vlgmr.msra.gmra.mxu1 %v95_v24  ;;  %v40_v22 = vld [vmem:[%s1997_s0 + $0xd0] sm:$0xff]  ;;  %v42_v24 = vld [vmem:[%s1997_s0 + $0xe0] sm:$0xff] }
  0x23   :  { %1382 = vmatprep.mubr.bf16.mxu0 %v80_v23  ;;  %1414 = vmatprep.mubr.bf16.mxu1 %v96_v25  ;;  %v41_v23 = vld [vmem:[%s1997_s0 + $0xd8] sm:$0xff]  ;;  %v43_v25 = vld [vmem:[%s1997_s0 + $0xe8] sm:$0xff] }
  0x24   :  { %v91_v30 = vpack.c.bf16 %v41_v23, %v40_v22  ;;  %v92_v31 = vpack.c.bf16 %v43_v25, %v42_v24 }
  0x2a   :  { %1383 = vmatmul.mubr.bf16.gmra.mxu0 %v81_v34  ;;  %1415 = vmatmul.mubr.bf16.gmra.mxu1 %v97_v36  ;;  %v44_v34 = vld [vmem:[%s1997_s0 + $0xf0] sm:$0xff] }
  0x2b   :  { %1386 = vmatprep.mubr.bf16.mxu0 %v82_v35  ;;  %1418 = vmatprep.mubr.bf16.mxu1 %v98_v37  ;;  %v45_v35 = vld [vmem:[%s1997_s0 + $0xf8] sm:$0xff]  ;;  %v76_v36 = vld [vmem:[%s1997_s0 + $0x1f0] sm:$0xff] }
  0x2c   :  { %v77_v37 = vld [vmem:[%s1997_s0 + $0x1f8] sm:$0xff]  ;;  %v93_v38 = vpack.c.bf16 %v45_v35, %v44_v34 }
  0x2d   :  { %v109_v39 = vpack.c.bf16 %v77_v37, %v76_v36 }
  0x32   :  { %1387 = vmatmul.mubr.bf16.gmra.mxu0 %v83_v46  ;;  %1419 = vmatmul.mubr.bf16.gmra.mxu1 %v99_v48 }
  0x33   :  { %1390 = vmatprep.mubr.bf16.mxu0 %v84_v47  ;;  %1422 = vmatprep.mubr.bf16.mxu1 %v100_v49 }
  0x3a   :  { %1391 = vmatmul.mubr.bf16.gmra.mxu0 %v85_v58  ;;  %1423 = vmatmul.mubr.bf16.gmra.mxu1 %v101_v60 }
  0x3b   :  { %1394 = vmatprep.mubr.bf16.mxu0 %v86_v59  ;;  %1426 = vmatprep.mubr.bf16.mxu1 %v102_v61 }
  0x42   :  { %1395 = vmatmul.mubr.bf16.gmra.mxu0 %v87_v6  ;;  %1427 = vmatmul.mubr.bf16.gmra.mxu1 %v103_v8 }
  0x43   :  { %1398 = vmatprep.mubr.bf16.mxu0 %v88_v7  ;;  %1430 = vmatprep.mubr.bf16.mxu1 %v104_v9 }
  0x4a   :  { %1399 = vmatmul.mubr.bf16.gmra.mxu0 %v89_v18  ;;  %1431 = vmatmul.mubr.bf16.gmra.mxu1 %v105_v20 }
  0x4b   :  { %1402 = vmatprep.mubr.bf16.mxu0 %v90_v19  ;;  %1434 = vmatprep.mubr.bf16.mxu1 %v106_v21 }
  0x52   :  { %1403 = vmatmul.mubr.bf16.gmra.mxu0 %v91_v30  ;;  %1435 = vmatmul.mubr.bf16.gmra.mxu1 %v107_v32 }
  0x53   :  { %1406 = vmatprep.mubr.bf16.mxu0 %v92_v31  ;;  %1438 = vmatprep.mubr.bf16.mxu1 %v108_v33 }
  0x5a   :  { %1407 = vmatmul.mubr.bf16.gmra.mxu0 %v93_v38  ;;  %1439 = vmatmul.mubr.bf16.gmra.mxu1 %v109_v39 }
  0xe2   :  { %v1380_v40 = vpop.f32.mrf.mxu0  ;;  %v1702_v41 = vpop.f32.mrf.mxu1 }
  0xe3   :  { %v855_v56 = vmul.f32 %v1380_v40, %v1380_v40 }
  0xe4   :  { %v208_v42 = vpop.f32.mrf.mxu0  ;;  %v1704_v43 = vpop.f32.mrf.mxu1 }
  0xe5   :  { %v853_v49 = vmul.f32 %v208_v42, %v208_v42 }
  0xe6   :  { %v1381_v44 = vpop.f32.mrf.mxu0  ;;  %v1706_v46 = vpop.f32.mrf.mxu1 }
  0xe7   :  { %v1139_v45 = vpack.c.bf16 %v1381_v44, %v1380_v40  ;;  %v1219_v48 = vpack.c.bf16 %v1706_v46, %v1702_v41  ;;  %v856_v61 = vmul.f32 %v1381_v44, %v1381_v44 }
  0xe8   :  { %v211_v47 = vpop.f32.mrf.mxu0  ;;  %v1713_v53 = vpop.f32.mrf.mxu1 }
  0xe9   :  { %1291 = vst [vmem:[%s1998_s2 + $0x8] sm:$0xff] %v1139_v45   ;;  %v1134_v50 = vpack.c.bf16 %v211_v47, %v208_v42  ;;  %v783_v51 = vadd.f32 %v211_v47, %v208_v42  ;;  %v854_v52 = vmul.f32 %v211_v47, %v211_v47  ;;  %1307 = vst [vmem:[%s1998_s2 + $0x88] sm:$0xff] %v1219_v48  }
  0xea   :  { %v1384_v54 = vpop.f32.mrf.mxu0  ;;  %v1214_v55 = vpack.c.bf16 %v1713_v53, %v1704_v43  ;;  %v1723_v59 = vpop.f32.mrf.mxu1 }
  0xeb   :  { %1135 = vst [vmem:[%s1998_s2] sm:$0xff] %v1134_v50   ;;  %v784_v57 = vadd.f32 %v1380_v40, %v783_v51  ;;  %v917_v58 = vadd.f32 %v854_v52, %v853_v49  ;;  %v859_v16 = vmul.f32 %v1384_v54, %v1384_v54 }
  0xec   :  { %v224_v60 = vpop.f32.mrf.mxu0  ;;  %1306 = vst [vmem:[%s1998_s2 + $0x80] sm:$0xff] %v1214_v55   ;;  %v1728_v0 = vpop.f32.mrf.mxu1 }
  0xed   :  { %v918_v62 = vadd.f32 %v917_v58, %v855_v56  ;;  %v785_v63 = vadd.f32 %v1381_v44, %v784_v57  ;;  %v857_v3 = vmul.f32 %v224_v60, %v224_v60 }
  0xee   :  { %v1385_v1 = vpop.f32.mrf.mxu0  ;;  %v1730_v6 = vpop.f32.mrf.mxu1 }
  0xef   :  { %v786_v2 = vadd.f32 %v785_v63, %v224_v60  ;;  %v919_v4 = vadd.f32 %v918_v62, %v856_v61  ;;  %v1149_v5 = vpack.c.bf16 %v1385_v1, %v1384_v54  ;;  %v1229_v8 = vpack.c.bf16 %v1730_v6, %v1723_v59 }
  0xf0   :  { %v227_v7 = vpop.f32.mrf.mxu0  ;;  %v1737_v13 = vpop.f32.mrf.mxu1  ;;  %v860_v21 = vmul.f32 %v1385_v1, %v1385_v1 }
  0xf1   :  { %v920_v9 = vadd.f32 %v919_v4, %v857_v3  ;;  %1293 = vst [vmem:[%s1998_s2 + $0x18] sm:$0xff] %v1149_v5   ;;  %v1144_v10 = vpack.c.bf16 %v227_v7, %v224_v60  ;;  %v787_v11 = vadd.f32 %v786_v2, %v227_v7  ;;  %v858_v12 = vmul.f32 %v227_v7, %v227_v7 }
  0xf2   :  { %v1388_v14 = vpop.f32.mrf.mxu0  ;;  %1309 = vst [vmem:[%s1998_s2 + $0x98] sm:$0xff] %v1229_v8   ;;  %v1224_v15 = vpack.c.bf16 %v1737_v13, %v1728_v0  ;;  %v1747_v19 = vpop.f32.mrf.mxu1 }
  0xf3   :  { %1292 = vst [vmem:[%s1998_s2 + $0x10] sm:$0xff] %v1144_v10   ;;  %v788_v17 = vadd.f32 %v1384_v54, %v787_v11  ;;  %v921_v18 = vadd.f32 %v920_v9, %v858_v12  ;;  %v863_v40 = vmul.f32 %v1388_v14, %v1388_v14 }
  0xf4   :  { %v240_v20 = vpop.f32.mrf.mxu0  ;;  %1308 = vst [vmem:[%s1998_s2 + $0x90] sm:$0xff] %v1224_v15   ;;  %v1752_v24 = vpop.f32.mrf.mxu1 }
  0xf5   :  { %v922_v22 = vadd.f32 %v921_v18, %v859_v16  ;;  %v789_v23 = vadd.f32 %v1385_v1, %v788_v17  ;;  %v861_v27 = vmul.f32 %v240_v20, %v240_v20 }
  0xf6   :  { %v1389_v25 = vpop.f32.mrf.mxu0  ;;  %v1754_v30 = vpop.f32.mrf.mxu1 }
  0xf7   :  { %v790_v26 = vadd.f32 %v789_v23, %v240_v20  ;;  %v923_v28 = vadd.f32 %v922_v22, %v860_v21  ;;  %v1159_v29 = vpack.c.bf16 %v1389_v25, %v1388_v14  ;;  %v1239_v32 = vpack.c.bf16 %v1754_v30, %v1747_v19 }
  0xf8   :  { %v243_v31 = vpop.f32.mrf.mxu0  ;;  %v1761_v37 = vpop.f32.mrf.mxu1  ;;  %v864_v48 = vmul.f32 %v1389_v25, %v1389_v25 }
  0xf9   :  { %v924_v33 = vadd.f32 %v923_v28, %v861_v27  ;;  %1295 = vst [vmem:[%s1998_s2 + $0x28] sm:$0xff] %v1159_v29   ;;  %v1154_v34 = vpack.c.bf16 %v243_v31, %v240_v20  ;;  %v791_v35 = vadd.f32 %v790_v26, %v243_v31  ;;  %v862_v36 = vmul.f32 %v243_v31, %v243_v31 }
  0xfa   :  { %v1392_v38 = vpop.f32.mrf.mxu0  ;;  %1311 = vst [vmem:[%s1998_s2 + $0xa8] sm:$0xff] %v1239_v32   ;;  %v1234_v39 = vpack.c.bf16 %v1761_v37, %v1752_v24  ;;  %v1771_v45 = vpop.f32.mrf.mxu1 }
  0xfb   :  { %1294 = vst [vmem:[%s1998_s2 + $0x20] sm:$0xff] %v1154_v34   ;;  %v792_v42 = vadd.f32 %v1388_v14, %v791_v35  ;;  %v925_v44 = vadd.f32 %v924_v33, %v862_v36  ;;  %v867_v7 = vmul.f32 %v1392_v38, %v1392_v38 }
  0xfc   :  { %v256_v47 = vpop.f32.mrf.mxu0  ;;  %1310 = vst [vmem:[%s1998_s2 + $0xa0] sm:$0xff] %v1234_v39   ;;  %v1776_v51 = vpop.f32.mrf.mxu1 }
  0xfd   :  { %v926_v49 = vadd.f32 %v925_v44, %v863_v40  ;;  %v793_v50 = vadd.f32 %v1389_v25, %v792_v42  ;;  %v865_v55 = vmul.f32 %v256_v47, %v256_v47 }
  0xfe   :  { %v1393_v52 = vpop.f32.mrf.mxu0  ;;  %v1778_v58 = vpop.f32.mrf.mxu1 }
  0xff   :  { %v794_v54 = vadd.f32 %v793_v50, %v256_v47  ;;  %v927_v56 = vadd.f32 %v926_v49, %v864_v48  ;;  %v1169_v57 = vpack.c.bf16 %v1393_v52, %v1392_v38  ;;  %v1249_v61 = vpack.c.bf16 %v1778_v58, %v1771_v45 }
 0x100   :  { %v259_v60 = vpop.f32.mrf.mxu0  ;;  %v1785_v3 = vpop.f32.mrf.mxu1  ;;  %v868_v12 = vmul.f32 %v1393_v52, %v1393_v52 }
 0x101   :  { %v928_v62 = vadd.f32 %v927_v56, %v865_v55  ;;  %1297 = vst [vmem:[%s1998_s2 + $0x38] sm:$0xff] %v1169_v57   ;;  %v1164_v63 = vpack.c.bf16 %v259_v60, %v256_v47  ;;  %v795_v1 = vadd.f32 %v794_v54, %v259_v60  ;;  %v866_v2 = vmul.f32 %v259_v60, %v259_v60 }
 0x102   :  { %v1396_v4 = vpop.f32.mrf.mxu0  ;;  %1313 = vst [vmem:[%s1998_s2 + $0xb8] sm:$0xff] %v1249_v61   ;;  %v1244_v5 = vpack.c.bf16 %v1785_v3, %v1776_v51  ;;  %v1795_v10 = vpop.f32.mrf.mxu1 }
 0x103   :  { %1296 = vst [vmem:[%s1998_s2 + $0x30] sm:$0xff] %v1164_v63   ;;  %v796_v8 = vadd.f32 %v1392_v38, %v795_v1  ;;  %v929_v9 = vadd.f32 %v928_v62, %v866_v2  ;;  %v871_v35 = vmul.f32 %v1396_v4, %v1396_v4 }
 0x104   :  { %v272_v11 = vpop.f32.mrf.mxu0  ;;  %1312 = vst [vmem:[%s1998_s2 + $0xb0] sm:$0xff] %v1244_v5   ;;  %v1800_v16 = vpop.f32.mrf.mxu1 }
 0x105   :  { %v930_v14 = vadd.f32 %v929_v9, %v867_v7  ;;  %v797_v15 = vadd.f32 %v1393_v52, %v796_v8  ;;  %v869_v20 = vmul.f32 %v272_v11, %v272_v11 }
 0x106   :  { %v1397_v17 = vpop.f32.mrf.mxu0  ;;  %v1802_v23 = vpop.f32.mrf.mxu1 }
 0x107   :  { %v798_v18 = vadd.f32 %v797_v15, %v272_v11  ;;  %v931_v21 = vadd.f32 %v930_v14, %v868_v12  ;;  %v1179_v22 = vpack.c.bf16 %v1397_v17, %v1396_v4  ;;  %v1259_v26 = vpack.c.bf16 %v1802_v23, %v1795_v10 }
 0x108   :  { %v275_v25 = vpop.f32.mrf.mxu0  ;;  %v1809_v32 = vpop.f32.mrf.mxu1  ;;  %v872_v42 = vmul.f32 %v1397_v17, %v1397_v17 }
 0x109   :  { %v932_v27 = vadd.f32 %v931_v21, %v869_v20  ;;  %1299 = vst [vmem:[%s1998_s2 + $0x48] sm:$0xff] %v1179_v22   ;;  %v1174_v28 = vpack.c.bf16 %v275_v25, %v272_v11  ;;  %v799_v29 = vadd.f32 %v798_v18, %v275_v25  ;;  %v870_v31 = vmul.f32 %v275_v25, %v275_v25 }
 0x10a   :  { %v1400_v33 = vpop.f32.mrf.mxu0  ;;  %1315 = vst [vmem:[%s1998_s2 + $0xc8] sm:$0xff] %v1259_v26   ;;  %v1254_v34 = vpack.c.bf16 %v1809_v32, %v1800_v16  ;;  %v1819_v39 = vpop.f32.mrf.mxu1 }
 0x10b   :  { %1298 = vst [vmem:[%s1998_s2 + $0x40] sm:$0xff] %v1174_v28   ;;  %v800_v36 = vadd.f32 %v1396_v4, %v799_v29  ;;  %v933_v38 = vadd.f32 %v932_v27, %v870_v31  ;;  %v875_v7 = vmul.f32 %v1400_v33, %v1400_v33 }
 0x10c   :  { %v288_v40 = vpop.f32.mrf.mxu0  ;;  %1314 = vst [vmem:[%s1998_s2 + $0xc0] sm:$0xff] %v1254_v34   ;;  %v1824_v48 = vpop.f32.mrf.mxu1 }
 0x10d   :  { %v934_v44 = vadd.f32 %v933_v38, %v871_v35  ;;  %v801_v47 = vadd.f32 %v1397_v17, %v800_v36  ;;  %v873_v52 = vmul.f32 %v288_v40, %v288_v40 }
 0x10e   :  { %v1401_v49 = vpop.f32.mrf.mxu0  ;;  %v1826_v56 = vpop.f32.mrf.mxu1 }
 0x10f   :  { %v802_v50 = vadd.f32 %v801_v47, %v288_v40  ;;  %v935_v54 = vadd.f32 %v934_v44, %v872_v42  ;;  %v1189_v55 = vpack.c.bf16 %v1401_v49, %v1400_v33  ;;  %v1269_v60 = vpack.c.bf16 %v1826_v56, %v1819_v39 }
 0x110   :  { %v291_v57 = vpop.f32.mrf.mxu0  ;;  %v1833_v2 = vpop.f32.mrf.mxu1  ;;  %v876_v14 = vmul.f32 %v1401_v49, %v1401_v49 }
 0x111   :  { %v936_v61 = vadd.f32 %v935_v54, %v873_v52  ;;  %1301 = vst [vmem:[%s1998_s2 + $0x58] sm:$0xff] %v1189_v55   ;;  %v1184_v62 = vpack.c.bf16 %v291_v57, %v288_v40  ;;  %v803_v63 = vadd.f32 %v802_v50, %v291_v57  ;;  %v874_v1 = vmul.f32 %v291_v57, %v291_v57 }
 0x112   :  { %v1404_v4 = vpop.f32.mrf.mxu0  ;;  %1317 = vst [vmem:[%s1998_s2 + $0xd8] sm:$0xff] %v1269_v60   ;;  %v1264_v5 = vpack.c.bf16 %v1833_v2, %v1824_v48  ;;  %v1843_v11 = vpop.f32.mrf.mxu1 }
 0x113   :  { %1300 = vst [vmem:[%s1998_s2 + $0x50] sm:$0xff] %v1184_v62   ;;  %v804_v8 = vadd.f32 %v1400_v33, %v803_v63  ;;  %v937_v9 = vadd.f32 %v936_v61, %v874_v1  ;;  %v879_v42 = vmul.f32 %v1404_v4, %v1404_v4 }
 0x114   :  { %v304_v12 = vpop.f32.mrf.mxu0  ;;  %1316 = vst [vmem:[%s1998_s2 + $0xd0] sm:$0xff] %v1264_v5   ;;  %v1848_v18 = vpop.f32.mrf.mxu1 }
 0x115   :  { %v938_v15 = vadd.f32 %v937_v9, %v875_v7  ;;  %v805_v17 = vadd.f32 %v1401_v49, %v804_v8  ;;  %v877_v22 = vmul.f32 %v304_v12, %v304_v12 }
 0x116   :  { %v1405_v20 = vpop.f32.mrf.mxu0  ;;  %v1850_v27 = vpop.f32.mrf.mxu1 }
 0x117   :  { %v806_v21 = vadd.f32 %v805_v17, %v304_v12  ;;  %v939_v25 = vadd.f32 %v938_v15, %v876_v14  ;;  %v1199_v26 = vpack.c.bf16 %v1405_v20, %v1404_v4  ;;  %v1279_v29 = vpack.c.bf16 %v1850_v27, %v1843_v11 }
 0x118   :  { %v307_v28 = vpop.f32.mrf.mxu0  ;;  %v1857_v36 = vpop.f32.mrf.mxu1  ;;  %v880_v52 = vmul.f32 %v1405_v20, %v1405_v20 }
 0x119   :  { %v940_v31 = vadd.f32 %v939_v25, %v877_v22  ;;  %1303 = vst [vmem:[%s1998_s2 + $0x68] sm:$0xff] %v1199_v26   ;;  %v1194_v33 = vpack.c.bf16 %v307_v28, %v304_v12  ;;  %v807_v34 = vadd.f32 %v806_v21, %v307_v28  ;;  %v878_v35 = vmul.f32 %v307_v28, %v307_v28 }
 0x11a   :  { %v1408_v38 = vpop.f32.mrf.mxu0  ;;  %1319 = vst [vmem:[%s1998_s2 + $0xe8] sm:$0xff] %v1279_v29   ;;  %v1274_v40 = vpack.c.bf16 %v1857_v36, %v1848_v18  ;;  %v1867_v49 = vpop.f32.mrf.mxu1  ;;  %v885_v29 = vmul.f32 %v1704_v43, %v1704_v43 }
 0x11b   :  { %1302 = vst [vmem:[%s1998_s2 + $0x60] sm:$0xff] %v1194_v33   ;;  %v808_v44 = vadd.f32 %v1404_v4, %v807_v34  ;;  %v941_v47 = vadd.f32 %v940_v31, %v878_v35  ;;  %v886_v35 = vmul.f32 %v1713_v53, %v1713_v53 }
 0x11c   :  { %v320_v50 = vpop.f32.mrf.mxu0  ;;  %1318 = vst [vmem:[%s1998_s2 + $0xe0] sm:$0xff] %v1274_v40   ;;  %v1872_v57 = vpop.f32.mrf.mxu1  ;;  %v887_v40 = vmul.f32 %v1702_v41, %v1702_v41 }
 0x11d   :  { %v942_v54 = vadd.f32 %v941_v47, %v879_v42  ;;  %v809_v55 = vadd.f32 %v1405_v20, %v808_v44  ;;  %v881_v62 = vmul.f32 %v320_v50, %v320_v50  ;;  %v883_v20 = vmul.f32 %v1408_v38, %v1408_v38 }
 0x11e   :  { %v1409_v60 = vpop.f32.mrf.mxu0  ;;  %v1874_v5 = vpop.f32.mrf.mxu1  ;;  %v888_v47 = vmul.f32 %v1706_v46, %v1706_v46 }
 0x11f   :  { %v810_v61 = vadd.f32 %v809_v55, %v320_v50  ;;  %v943_v63 = vadd.f32 %v942_v54, %v880_v52  ;;  %v1209_v1 = vpack.c.bf16 %v1409_v60, %v1408_v38  ;;  %v1289_v7 = vpack.c.bf16 %v1874_v5, %v1867_v49 }
 0x120   :  { %v323_v4 = vpop.f32.mrf.mxu0  ;;  %v1881_v15 = vpop.f32.mrf.mxu1  ;;  %v884_v25 = vmul.f32 %v1409_v60, %v1409_v60  ;;  %v889_v54 = vmul.f32 %v1728_v0, %v1728_v0 }
 0x121   :  { %v944_v8 = vadd.f32 %v943_v63, %v881_v62  ;;  %1305 = vst [vmem:[%s1998_s2 + $0x78] sm:$0xff] %v1209_v1   ;;  %v1204_v9 = vpack.c.bf16 %v323_v4, %v320_v50  ;;  %v811_v12 = vadd.f32 %v810_v61, %v323_v4  ;;  %v882_v14 = vmul.f32 %v323_v4, %v323_v4 }
 0x122   :  { %1321 = vst [vmem:[%s1998_s2 + $0xf8] sm:$0xff] %v1289_v7   ;;  %v1284_v17 = vpack.c.bf16 %v1881_v15, %v1872_v57  ;;  %v890_v61 = vmul.f32 %v1737_v13, %v1737_v13  ;;  %v893_v7 = vmul.f32 %v1752_v24, %v1752_v24 }
 0x123   :  { %1304 = vst [vmem:[%s1998_s2 + $0x70] sm:$0xff] %v1204_v9   ;;  %v812_v21 = vadd.f32 %v1408_v38, %v811_v12  ;;  %v945_v22 = vadd.f32 %v944_v8, %v882_v14  ;;  %v894_v12 = vmul.f32 %v1761_v37, %v1761_v37 }
 0x124   :  { %1320 = vst [vmem:[%s1998_s2 + $0xf0] sm:$0xff] %v1284_v17  }
 0x125   :  { %v813_v26 = vadd.f32 %v1409_v60, %v812_v21  ;;  %v946_v28 = vadd.f32 %v945_v22, %v883_v20  ;;  %v897_v22 = vmul.f32 %v1776_v51, %v1776_v51 }
 0x127   :  { %v947_v31 = vadd.f32 %v946_v28, %v884_v25  ;;  %v814_v33 = vadd.f32 %v813_v26, %v1704_v43  ;;  %v898_v28 = vmul.f32 %v1785_v3, %v1785_v3 }
 0x129   :  { %v815_v34 = vadd.f32 %v814_v33, %v1713_v53  ;;  %v948_v38 = vadd.f32 %v947_v31, %v885_v29 }
 0x12b   :  { %v816_v42 = vadd.f32 %v1702_v41, %v815_v34  ;;  %v949_v44 = vadd.f32 %v948_v38, %v886_v35  ;;  %v891_v41 = vmul.f32 %v1723_v59, %v1723_v59  ;;  %v901_v35 = vmul.f32 %v1800_v16, %v1800_v16 }
 0x12d   :  { %v950_v50 = vadd.f32 %v949_v44, %v887_v40  ;;  %v817_v52 = vadd.f32 %v1706_v46, %v816_v42  ;;  %v892_v46 = vmul.f32 %v1730_v6, %v1730_v6  ;;  %v902_v42 = vmul.f32 %v1809_v32, %v1809_v32 }
 0x12f   :  { %v818_v43 = vadd.f32 %v817_v52, %v1728_v0  ;;  %v951_v55 = vadd.f32 %v950_v50, %v888_v47 }
 0x131   :  { %v952_v53 = vadd.f32 %v951_v55, %v889_v54  ;;  %v819_v60 = vadd.f32 %v818_v43, %v1737_v13  ;;  %v905_v43 = vmul.f32 %v1824_v48, %v1824_v48 }
 0x133   :  { %v820_v62 = vadd.f32 %v1723_v59, %v819_v60  ;;  %v953_v63 = vadd.f32 %v952_v53, %v890_v61  ;;  %v895_v59 = vmul.f32 %v1747_v19, %v1747_v19  ;;  %v906_v53 = vmul.f32 %v1833_v2, %v1833_v2 }
 0x135   :  { %v954_v1 = vadd.f32 %v953_v63, %v891_v41  ;;  %v821_v4 = vadd.f32 %v1730_v6, %v820_v62  ;;  %v896_v6 = vmul.f32 %v1754_v30, %v1754_v30  ;;  %v909_v63 = vmul.f32 %v1848_v18, %v1848_v18 }
 0x137   :  { %v822_v0 = vadd.f32 %v821_v4, %v1752_v24  ;;  %v955_v8 = vadd.f32 %v954_v1, %v892_v46  ;;  %v910_v4 = vmul.f32 %v1857_v36, %v1857_v36 }
 0x139   :  { %v956_v9 = vadd.f32 %v955_v8, %v893_v7  ;;  %v823_v13 = vadd.f32 %v822_v0, %v1761_v37 }
 0x13b   :  { %v824_v14 = vadd.f32 %v1747_v19, %v823_v13  ;;  %v957_v17 = vadd.f32 %v956_v9, %v894_v12  ;;  %v899_v19 = vmul.f32 %v1771_v45, %v1771_v45  ;;  %v913_v13 = vmul.f32 %v1872_v57, %v1872_v57 }
 0x13d   :  { %v958_v20 = vadd.f32 %v957_v17, %v895_v59  ;;  %v825_v21 = vadd.f32 %v1754_v30, %v824_v14  ;;  %v900_v30 = vmul.f32 %v1778_v58, %v1778_v58  ;;  %v914_v14 = vmul.f32 %v1881_v15, %v1881_v15 }
 0x13f   :  { %v826_v24 = vadd.f32 %v825_v21, %v1776_v51  ;;  %v959_v25 = vadd.f32 %v958_v20, %v896_v6 }
 0x141   :  { %v960_v26 = vadd.f32 %v959_v25, %v897_v22  ;;  %v827_v37 = vadd.f32 %v826_v24, %v1785_v3 }
 0x143   :  { %v828_v29 = vadd.f32 %v1771_v45, %v827_v37  ;;  %v961_v31 = vadd.f32 %v960_v26, %v898_v28  ;;  %v903_v45 = vmul.f32 %v1795_v10, %v1795_v10 }
 0x145   :  { %v962_v33 = vadd.f32 %v961_v31, %v899_v19  ;;  %v829_v34 = vadd.f32 %v1778_v58, %v828_v29  ;;  %v904_v58 = vmul.f32 %v1802_v23, %v1802_v23 }
 0x147   :  { %v830_v51 = vadd.f32 %v829_v34, %v1800_v16  ;;  %v963_v38 = vadd.f32 %v962_v33, %v900_v30 }
 0x149   :  { %v964_v40 = vadd.f32 %v963_v38, %v901_v35  ;;  %v831_v3 = vadd.f32 %v830_v51, %v1809_v32 }
 0x14b   :  { %v832_v44 = vadd.f32 %v1795_v10, %v831_v3  ;;  %v965_v47 = vadd.f32 %v964_v40, %v902_v42  ;;  %v907_v10 = vmul.f32 %v1819_v39, %v1819_v39 }
 0x14d   :  { %v966_v50 = vadd.f32 %v965_v47, %v903_v45  ;;  %v833_v52 = vadd.f32 %v1802_v23, %v832_v44  ;;  %v908_v23 = vmul.f32 %v1826_v56, %v1826_v56 }
 0x14f   :  { %v834_v16 = vadd.f32 %v833_v52, %v1824_v48  ;;  %v967_v54 = vadd.f32 %v966_v50, %v904_v58 }
 0x151   :  { %v968_v55 = vadd.f32 %v967_v54, %v905_v43  ;;  %v835_v32 = vadd.f32 %v834_v16, %v1833_v2 }
 0x153   :  { %v836_v60 = vadd.f32 %v1819_v39, %v835_v32  ;;  %v969_v61 = vadd.f32 %v968_v55, %v906_v53  ;;  %v911_v39 = vmul.f32 %v1843_v11, %v1843_v11 }
 0x155   :  { %v970_v41 = vadd.f32 %v969_v61, %v907_v10  ;;  %v837_v62 = vadd.f32 %v1826_v56, %v836_v60  ;;  %v912_v56 = vmul.f32 %v1850_v27, %v1850_v27 }
 0x157   :  { %v838_v48 = vadd.f32 %v837_v62, %v1848_v18  ;;  %v971_v46 = vadd.f32 %v970_v41, %v908_v23 }
 0x159   :  { %v972_v1 = vadd.f32 %v971_v46, %v909_v63  ;;  %v839_v2 = vadd.f32 %v838_v48, %v1857_v36 }
 0x15b   :  { %v840_v0 = vadd.f32 %v1843_v11, %v839_v2  ;;  %v973_v7 = vadd.f32 %v972_v1, %v910_v4  ;;  %v915_v11 = vmul.f32 %v1867_v49, %v1867_v49 }
 0x15d   :  { %v974_v8 = vadd.f32 %v973_v7, %v911_v39  ;;  %v841_v9 = vadd.f32 %v1850_v27, %v840_v0  ;;  %v916_v27 = vmul.f32 %v1874_v5, %v1874_v5 }
 0x15f   :  { %v842_v18 = vadd.f32 %v841_v9, %v1872_v57  ;;  %v975_v12 = vadd.f32 %v974_v8, %v912_v56 }
 0x161   :  { %v976_v59 = vadd.f32 %v975_v12, %v913_v13  ;;  %v843_v36 = vadd.f32 %v842_v18, %v1881_v15 }
 0x163   :  { %v844_v17 = vadd.f32 %v1867_v49, %v843_v36  ;;  %v977_v6 = vadd.f32 %v976_v59, %v914_v14 }
 0x165   :  { %v845_v20 = vadd.f32 %v1874_v5, %v844_v17  ;;  %v978_v21 = vadd.f32 %v977_v6, %v915_v11 }
 0x167   :  { %v846_v57 = vrot.slane %v845_v20, 4  ;;  %v979_v24 = vadd.f32 %v978_v21, %v916_v27 }
 0x169   :  { %v847_v22 = vadd.f32 %v846_v57, %v845_v20  ;;  %v980_v25 = vrot.slane %v979_v24, 4 }
 0x16b   :  { %v848_v26 = vrot.slane %v847_v22, 2  ;;  %v981_v37 = vadd.f32 %v980_v25, %v979_v24 }
 0x16d   :  { %v849_v28 = vadd.f32 %v848_v26, %v847_v22  ;;  %v982_v15 = vrot.slane %v981_v37, 2 }
 0x16f   :  { %v850_v19 = vrot.slane %v849_v28, 1  ;;  %v983_v29 = vadd.f32 %v982_v15, %v981_v37 }
 0x171   :  { %v851_v31 = vadd.f32 %v850_v19, %v849_v28  ;;  %v984_v30 = vrot.slane %v983_v29, 1 }
 0x173   :  { %852 = vst [vmem:[%s1999_s3] sm:$0x1] %v851_v31  ;;  %v985_v49 = vadd.f32 %v984_v30, %v983_v29 }
 0x175   :  { %986 = vst [vmem:[%s1999_s3 + $0x1] sm:$0x1] %v985_v49 }

// kernel: bottleneck_block.6
= control target key start
LH: loop header
LB: loop body
LE: loop exit
PB: predicated region body
PF: predicated region fallthrough
CT: control target
= control target key end

     0   :  { %s2519_s3 = inlined_call_operand.vmem [shape: bf16[128,128], index: 3, kind: input, shape index: {}]   ;;  %s2520_s0 = inlined_call_operand.vmem [shape: bf16[512,128], index: 0, kind: input, shape index: {}]   ;;  %s2521_s1 = inlined_call_operand.vmem [shape: f32[1,128], index: 1, kind: input, shape index: {}]   ;;  %s2522_s2 = inlined_call_operand.vmem [shape: f32[1,128], index: 2, kind: input, shape index: {}]   ;;  %s2523_s4 = inlined_call_operand.vmem [shape: bf16[512,128], index: 4, kind: output, shape index: {0}]   ;;  %s2524_s5 = inlined_call_operand.vmem [shape: f32[1,2,128], index: 5, kind: output, shape index: {1}]  }
   0x1   :  { %v1895_v0 = vld [vmem:[%s2519_s3 + $0x38] sm:$0xff]   ;;  %v1896_v1 = vld [vmem:[%s2519_s3 + $0x30] sm:$0xff]   ;;  %v1897_v2 = vld [vmem:[%s2519_s3 + $0x28] sm:$0xff]  }
   0x2   :  { %1799 = vmatprep.subr.bf16.mxu0 %v1895_v0  ;;  %1879 = vmatprep.subr.bf16.mxu1 %v1895_v0  ;;  %v1898_v3 = vld [vmem:[%s2519_s3 + $0x20] sm:$0xff]   ;;  %v1697_v8 = vld [vmem:[%s2520_s0 + $0x8] sm:$0xff]   ;;  %v1698_v9 = vld [vmem:[%s2520_s0 + $0x10] sm:$0xff]  }
   0x3   :  { %1800 = vmatpush3.bf16.msra.mxu0 %v1895_v0  ;;  %1887 = vmatpush3.bf16.msra.mxu1 %v1895_v0  ;;  %v1410_v4 = vld [vmem:[%s2520_s0] sm:$0xff]   ;;  %v1899_v13 = vld [vmem:[%s2519_s3 + $0x18] sm:$0xff]   ;;  %v1415_v14 = vunpack.c.l.bf16 %v1697_v8  ;;  %v1416_v15 = vunpack.c.h.bf16 %v1697_v8  ;;  %v1419_v16 = vunpack.c.l.bf16 %v1698_v9  ;;  %v1420_v19 = vunpack.c.h.bf16 %v1698_v9  ;;  %v1900_v22 = vld [vmem:[%s2519_s3 + $0x10] sm:$0xff]  }
   0x4   :  { %1801 = vmatprep.subr.bf16.mxu0 %v1896_v1  ;;  %1880 = vmatprep.subr.bf16.mxu1 %v1896_v1  ;;  %v1951_v5 = vld [vmem:[%s2521_s1] ss:$0 sm:$0xff]  ;;  %v1411_v6 = vunpack.c.l.bf16 %v1410_v4  ;;  %v1412_v7 = vunpack.c.h.bf16 %v1410_v4  ;;  %v1699_v26 = vld [vmem:[%s2520_s0 + $0x18] sm:$0xff]   ;;  %v1901_v31 = vld [vmem:[%s2519_s3 + $0x8] sm:$0xff]  }
   0x5   :  { %v1962_v10 = vld [vmem:[%s2522_s2] ss:$0 sm:$0xff]  ;;  %v157_v23 = vmul.f32 %v1415_v14, %v1951_v5  ;;  %v158_v24 = vmul.f32 %v1416_v15, %v1951_v5  ;;  %v159_v25 = vmul.f32 %v1419_v16, %v1951_v5  ;;  %v160_v28 = vmul.f32 %v1420_v19, %v1951_v5  ;;  %v1701_v38 = vld [vmem:[%s2520_s0 + $0x28] sm:$0xff]   ;;  %v1702_v41 = vld [vmem:[%s2520_s0 + $0x30] sm:$0xff]  }
   0x6   :  { %v155_v11 = vmul.f32 %v1411_v6, %v1951_v5  ;;  %v156_v12 = vmul.f32 %v1412_v7, %v1951_v5  ;;  %v1700_v29 = vld [vmem:[%s2520_s0 + $0x20] sm:$0xff]   ;;  %v1423_v30 = vunpack.c.l.bf16 %v1699_v26  ;;  %v1424_v35 = vunpack.c.h.bf16 %v1699_v26  ;;  %v1703_v42 = vld [vmem:[%s2520_s0 + $0x38] sm:$0xff]   ;;  %v1705_v63 = vld [vmem:[%s2520_s0 + $0x48] sm:$0xff]  }
   0x7   :  { %1802 = vmatpush3.bf16.msra.mxu0 %v1896_v1  ;;  %1888 = vmatpush3.bf16.msra.mxu1 %v1896_v1  ;;  %v228_v32 = vadd.f32 %v1962_v10, %v157_v23  ;;  %v229_v33 = vadd.f32 %v1962_v10, %v158_v24  ;;  %v230_v34 = vadd.f32 %v1962_v10, %v159_v25  ;;  %v1427_v37 = vunpack.c.l.bf16 %v1700_v29  ;;  %v1902_v43 = vld [vmem:[%s2519_s3] sm:$0xff]   ;;  %v1706_v4 = vld [vmem:[%s2520_s0 + $0x50] sm:$0xff]   ;;  %v1707_v23 = vld [vmem:[%s2520_s0 + $0x58] sm:$0xff]  }
   0x8   :  { %1803 = vmatprep.subr.bf16.mxu0 %v1897_v2  ;;  %1881 = vmatprep.subr.bf16.mxu1 %v1897_v2  ;;  %v226_v17 = vadd.f32 %v1962_v10, %v155_v11  ;;  %v227_v18 = vadd.f32 %v1962_v10, %v156_v12  ;;  %v231_v36 = vadd.f32 %v1962_v10, %v160_v28  ;;  %v1428_v40 = vunpack.c.h.bf16 %v1700_v29  ;;  %v1704_v48 = vld [vmem:[%s2520_s0 + $0x40] sm:$0xff]  }
   0x9   :  { %v161_v39 = vmul.f32 %v1423_v30, %v1951_v5  ;;  %v292_v44 = vmax.f32 %v228_v32, 0.0  ;;  %v293_v45 = vmax.f32 %v229_v33, 0.0  ;;  %v294_v46 = vmax.f32 %v230_v34, 0.0 }
   0xa   :  { %v290_v20 = vmax.f32 %v226_v17, 0.0  ;;  %v291_v21 = vmax.f32 %v227_v18, 0.0  ;;  %v162_v47 = vmul.f32 %v1424_v35, %v1951_v5  ;;  %v295_v49 = vmax.f32 %v231_v36, 0.0 }
   0xb   :  { %1804 = vmatpush3.bf16.msra.mxu0 %v1897_v2  ;;  %1889 = vmatpush3.bf16.msra.mxu1 %v1897_v2  ;;  %v163_v50 = vmul.f32 %v1427_v37, %v1951_v5  ;;  %v1431_v51 = vunpack.c.l.bf16 %v1701_v38  ;;  %v1432_v52 = vunpack.c.h.bf16 %v1701_v38  ;;  %v1435_v53 = vunpack.c.l.bf16 %v1702_v41 }
   0xc   :  { %1805 = vmatprep.subr.bf16.mxu0 %v1898_v3  ;;  %1882 = vmatprep.subr.bf16.mxu1 %v1898_v3  ;;  %v354_v27 = vpack.c.bf16 %v291_v21, %v290_v20  ;;  %v1436_v54 = vunpack.c.h.bf16 %v1702_v41  ;;  %v1439_v55 = vunpack.c.l.bf16 %v1703_v42  ;;  %v1440_v56 = vunpack.c.h.bf16 %v1703_v42 }
   0xd   :  { %v164_v57 = vmul.f32 %v1428_v40, %v1951_v5  ;;  %v1443_v58 = vunpack.c.l.bf16 %v1704_v48  ;;  %v1444_v59 = vunpack.c.h.bf16 %v1704_v48  ;;  %v355_v60 = vpack.c.bf16 %v293_v45, %v292_v44  ;;  %v1712_v44 = vld [vmem:[%s2520_s0 + $0x80] sm:$0xff]  }
   0xe   :  { %1815 = vmatprep.mubr.bf16.mxu0 %v354_v27  ;;  %v232_v61 = vadd.f32 %v1962_v10, %v161_v39  ;;  %v233_v62 = vadd.f32 %v1962_v10, %v162_v47  ;;  %v356_v0 = vpack.c.bf16 %v295_v49, %v294_v46  ;;  %v234_v1 = vadd.f32 %v1962_v10, %v163_v50 }
   0xf   :  { %1806 = vmatpush3.bf16.msra.mxu0 %v1898_v3  ;;  %1890 = vmatpush3.bf16.msra.mxu1 %v1898_v3  ;;  %v165_v2 = vmul.f32 %v1431_v51, %v1951_v5  ;;  %v166_v3 = vmul.f32 %v1432_v52, %v1951_v5  ;;  %v167_v6 = vmul.f32 %v1435_v53, %v1951_v5  ;;  %v1447_v14 = vunpack.c.l.bf16 %v1705_v63  ;;  %v2055_v52 = vld [vmem:[%s2520_s0 + $0x60] sm:$0xff]  }
  0x10   :  { %1807 = vmatprep.subr.bf16.mxu0 %v1899_v13  ;;  %1883 = vmatprep.subr.bf16.mxu1 %v1899_v13  ;;  %v168_v7 = vmul.f32 %v1436_v54, %v1951_v5  ;;  %v169_v8 = vmul.f32 %v1439_v55, %v1951_v5  ;;  %v170_v9 = vmul.f32 %v1440_v56, %v1951_v5  ;;  %v296_v15 = vmax.f32 %v232_v61, 0.0 }
  0x11   :  { %v235_v11 = vadd.f32 %v1962_v10, %v164_v57  ;;  %v171_v12 = vmul.f32 %v1443_v58, %v1951_v5  ;;  %v297_v16 = vmax.f32 %v233_v62, 0.0  ;;  %v1448_v17 = vunpack.c.h.bf16 %v1705_v63 }
  0x12   :  { %v1451_v18 = vunpack.c.l.bf16 %v1706_v4  ;;  %v298_v19 = vmax.f32 %v234_v1, 0.0  ;;  %v236_v20 = vadd.f32 %v1962_v10, %v165_v2  ;;  %v237_v21 = vadd.f32 %v1962_v10, %v166_v3 }
  0x13   :  { %1808 = vmatpush3.bf16.msra.mxu0 %v1899_v13  ;;  %1891 = vmatpush3.bf16.msra.mxu1 %v1899_v13  ;;  %v172_v13 = vmul.f32 %v1444_v59, %v1951_v5  ;;  %v238_v24 = vadd.f32 %v1962_v10, %v167_v6  ;;  %v239_v25 = vadd.f32 %v1962_v10, %v168_v7  ;;  %v299_v28 = vmax.f32 %v235_v11, 0.0  ;;  %v1713_v59 = vld [vmem:[%s2520_s0 + $0x88] sm:$0xff]   ;;  %v1715_v11 = vld [vmem:[%s2520_s0 + $0x98] sm:$0xff]  }
  0x14   :  { %1809 = vmatprep.subr.bf16.mxu0 %v1900_v22  ;;  %1884 = vmatprep.subr.bf16.mxu1 %v1900_v22  ;;  %v240_v26 = vadd.f32 %v1962_v10, %v169_v8  ;;  %v241_v27 = vadd.f32 %v1962_v10, %v170_v9  ;;  %v242_v29 = vadd.f32 %v1962_v10, %v171_v12  ;;  %v1455_v35 = vunpack.c.l.bf16 %v1707_v23 }
  0x15   :  { %v243_v30 = vadd.f32 %v1962_v10, %v172_v13  ;;  %v357_v32 = vpack.c.bf16 %v297_v16, %v296_v15  ;;  %v174_v33 = vmul.f32 %v1448_v17, %v1951_v5  ;;  %v175_v34 = vmul.f32 %v1451_v18, %v1951_v5 }
  0x16   :  { %v300_v36 = vmax.f32 %v236_v20, 0.0  ;;  %v301_v37 = vmax.f32 %v237_v21, 0.0  ;;  %v1456_v39 = vunpack.c.h.bf16 %v1707_v23  ;;  %v302_v40 = vmax.f32 %v238_v24, 0.0  ;;  %v1716_v24 = vld [vmem:[%s2520_s0 + $0xa0] sm:$0xff]  }
  0x17   :  { %1810 = vmatpush3.bf16.msra.mxu0 %v1900_v22  ;;  %1892 = vmatpush3.bf16.msra.mxu1 %v1900_v22  ;;  %v1452_v22 = vunpack.c.h.bf16 %v1706_v4  ;;  %v303_v41 = vmax.f32 %v239_v25, 0.0  ;;  %v304_v42 = vmax.f32 %v240_v26, 0.0  ;;  %v358_v45 = vpack.c.bf16 %v299_v28, %v298_v19 }
  0x18   :  { %1811 = vmatprep.subr.bf16.mxu0 %v1901_v31  ;;  %1885 = vmatprep.subr.bf16.mxu1 %v1901_v31  ;;  %v306_v46 = vmax.f32 %v242_v29, 0.0  ;;  %v307_v47 = vmax.f32 %v243_v30, 0.0  ;;  %v245_v49 = vadd.f32 %v1962_v10, %v174_v33  ;;  %v2049_v50 = vadd.f32 %v1962_v10, %v175_v34  ;;  %v1717_v33 = vld [vmem:[%s2520_s0 + $0xa8] sm:$0xff]  }
  0x19   :  { %v176_v38 = vmul.f32 %v1452_v22, %v1951_v5  ;;  %v177_v51 = vmul.f32 %v1455_v35, %v1951_v5  ;;  %v178_v54 = vmul.f32 %v1456_v39, %v1951_v5  ;;  %v1475_v55 = vunpack.c.l.bf16 %v1712_v44 }
  0x1a   :  { %v359_v56 = vpack.c.bf16 %v301_v37, %v300_v36  ;;  %v360_v57 = vpack.c.bf16 %v303_v41, %v302_v40  ;;  %v1459_v62 = vunpack.c.l.bf16 %v2055_v52  ;;  %v1476_v63 = vunpack.c.h.bf16 %v1712_v44 }
  0x1b   :  { %1812 = vmatpush3.bf16.msra.mxu0 %v1901_v31  ;;  %1893 = vmatpush3.bf16.msra.mxu1 %v1901_v31  ;;  %v173_v31 = vmul.f32 %v1447_v14, %v1951_v5  ;;  %v2058_v53 = vadd.f32 %v1962_v10, %v176_v38  ;;  %v309_v1 = vmax.f32 %v245_v49, 0.0  ;;  %v310_v2 = vmax.f32 %v2049_v50, 0.0 }
  0x1c   :  { %1813 = vmatprep.subr.bf16.mxu0 %v1902_v43  ;;  %1886 = vmatprep.subr.bf16.mxu1 %v1902_v43  ;;  %v2074_v3 = vadd.f32 %v1962_v10, %v177_v51  ;;  %v187_v4 = vmul.f32 %v1475_v55, %v1951_v5  ;;  %v2079_v7 = vadd.f32 %v1962_v10, %v178_v54  ;;  %v1479_v9 = vunpack.c.l.bf16 %v1713_v59 }
  0x1d   :  { %v244_v48 = vadd.f32 %v1962_v10, %v173_v31  ;;  %v311_v6 = vmax.f32 %v2058_v53, 0.0  ;;  %v188_v8 = vmul.f32 %v1476_v63, %v1951_v5  ;;  %v1460_v12 = vunpack.c.h.bf16 %v2055_v52 }
  0x1e   :  { %v258_v13 = vadd.f32 %v1962_v10, %v187_v4  ;;  %v1480_v14 = vunpack.c.h.bf16 %v1713_v59  ;;  %v2088_v16 = vmul.f32 %v1459_v62, %v1951_v5  ;;  %v189_v18 = vmul.f32 %v1479_v9, %v1951_v5 }
  0x1f   :  { %1814 = vmatpush3.bf16.msra.mxu0 %v1902_v43  ;;  %1894 = vmatpush3.bf16.msra.mxu1 %v1902_v43  ;;  %v305_v43 = vmax.f32 %v241_v27, 0.0  ;;  %v308_v61 = vmax.f32 %v244_v48, 0.0  ;;  %v259_v17 = vadd.f32 %v1962_v10, %v188_v8  ;;  %v1487_v23 = vunpack.c.l.bf16 %v1715_v11 }
  0x20   :  { %v322_v20 = vmax.f32 %v258_v13, 0.0  ;;  %v190_v21 = vmul.f32 %v1480_v14, %v1951_v5  ;;  %v260_v27 = vadd.f32 %v1962_v10, %v189_v18  ;;  %v1488_v31 = vunpack.c.h.bf16 %v1715_v11  ;;  %v1720_v18 = vld [vmem:[%s2520_s0 + $0xc0] sm:$0xff]  }
  0x21   :  { %v2061_v58 = vpack.c.bf16 %v305_v43, %v304_v42  ;;  %v2097_v25 = vpack.c.bf16 %v309_v1, %v308_v61  ;;  %v323_v26 = vmax.f32 %v259_v17, 0.0  ;;  %v1491_v37 = vunpack.c.l.bf16 %v1716_v24  ;;  %v1719_v1 = vld [vmem:[%s2520_s0 + $0xb8] sm:$0xff]  }
  0x22   :  { %1816 = vmatmul.mubr.bf16.vlgmr.msra.gmra.mxu0 %v355_v60  ;;  %v2066_v60 = vpack.c.bf16 %v307_v47, %v306_v46  ;;  %v261_v29 = vadd.f32 %v1962_v10, %v190_v21  ;;  %v324_v35 = vmax.f32 %v260_v27, 0.0  ;;  %v194_v40 = vmul.f32 %v1488_v31, %v1951_v5  ;;  %v1718_v46 = vld [vmem:[%s2520_s0 + $0xb0] sm:$0xff]   ;;  %v1709_v47 = vld [vmem:[%s2520_s0 + $0x68] sm:$0xff]  }
  0x23   :  { %1819 = vmatprep.mubr.bf16.mxu0 %v356_v0  ;;  %v1714_v0 = vld [vmem:[%s2520_s0 + $0x90] sm:$0xff]   ;;  %v370_v34 = vpack.c.bf16 %v323_v26, %v322_v20  ;;  %v1492_v43 = vunpack.c.h.bf16 %v1716_v24  ;;  %v195_v44 = vmul.f32 %v1491_v37, %v1951_v5  ;;  %v1496_v54 = vunpack.c.h.bf16 %v1717_v33 }
  0x24   :  { %v1483_v15 = vunpack.c.l.bf16 %v1714_v0  ;;  %v1484_v19 = vunpack.c.h.bf16 %v1714_v0  ;;  %v325_v38 = vmax.f32 %v261_v29, 0.0  ;;  %v265_v49 = vadd.f32 %v1962_v10, %v194_v40  ;;  %v1722_v40 = vld [vmem:[%s2520_s0 + $0xd0] sm:$0xff]  }
  0x25   :  { %1847 = vmatprep.mubr.bf16.mxu1 %v370_v34  ;;  %v198_v62 = vmul.f32 %v1496_v54, %v1951_v5  ;;  %v1499_v63 = vunpack.c.l.bf16 %v1718_v46  ;;  %v1500_v0 = vunpack.c.h.bf16 %v1718_v46  ;;  %v312_v4 = vmax.f32 %v2074_v3, 0.0 }
  0x26   :  { %v191_v22 = vmul.f32 %v1483_v15, %v1951_v5  ;;  %v192_v28 = vmul.f32 %v1484_v19, %v1951_v5  ;;  %v371_v48 = vpack.c.bf16 %v325_v38, %v324_v35  ;;  %v329_v61 = vmax.f32 %v265_v49, 0.0 }
  0x27   :  { %v1463_v8 = vunpack.c.l.bf16 %v1709_v47  ;;  %v313_v13 = vmax.f32 %v2079_v7, 0.0  ;;  %v1464_v14 = vunpack.c.h.bf16 %v1709_v47  ;;  %v199_v15 = vmul.f32 %v1499_v63, %v1951_v5 }
  0x28   :  { %v262_v30 = vadd.f32 %v1962_v10, %v191_v22  ;;  %v263_v36 = vadd.f32 %v1962_v10, %v192_v28  ;;  %1848 = vmatmul.mubr.bf16.vlgmr.msra.gmra.mxu1 %v371_v48  ;;  %v200_v17 = vmul.f32 %v1500_v0, %v1951_v5  ;;  %v180_v3 = vmul.f32 %v1460_v12, %v1951_v5 }
  0x29   :  { %v1503_v19 = vunpack.c.l.bf16 %v1719_v1  ;;  %v1504_v20 = vunpack.c.h.bf16 %v1719_v1  ;;  %v270_v24 = vadd.f32 %v1962_v10, %v199_v15  ;;  %v1507_v27 = vunpack.c.l.bf16 %v1720_v18  ;;  %v1723_v15 = vld [vmem:[%s2520_s0 + $0xd8] sm:$0xff]  }
  0x2a   :  { %1820 = vmatmul.mubr.bf16.gmra.mxu0 %v357_v32  ;;  %v193_v32 = vmul.f32 %v1487_v23, %v1951_v5  ;;  %v326_v39 = vmax.f32 %v262_v30, 0.0  ;;  %v327_v42 = vmax.f32 %v263_v36, 0.0  ;;  %v269_v23 = vadd.f32 %v1962_v10, %v198_v62 }
  0x2b   :  { %1823 = vmatprep.mubr.bf16.mxu0 %v358_v45  ;;  %v1495_v45 = vunpack.c.l.bf16 %v1717_v33  ;;  %v1508_v52 = vunpack.c.h.bf16 %v1720_v18  ;;  %v364_v12 = vpack.c.bf16 %v311_v6, %v310_v2  ;;  %v250_v28 = vadd.f32 %v1962_v10, %v2088_v16  ;;  %v1711_v33 = vld [vmem:[%s2520_s0 + $0x78] sm:$0xff]   ;;  %v1721_v16 = vld [vmem:[%s2520_s0 + $0xc8] sm:$0xff]  }
  0x2c   :  { %v264_v41 = vadd.f32 %v1962_v10, %v193_v32  ;;  %v372_v55 = vpack.c.bf16 %v327_v42, %v326_v39  ;;  %v251_v31 = vadd.f32 %v1962_v10, %v180_v3  ;;  %v181_v32 = vmul.f32 %v1463_v8, %v1951_v5 }
  0x2d   :  { %v197_v59 = vmul.f32 %v1495_v45, %v1951_v5  ;;  %v201_v34 = vmul.f32 %v1503_v19, %v1951_v5  ;;  %v202_v50 = vmul.f32 %v1504_v20, %v1951_v5  ;;  %v365_v35 = vpack.c.bf16 %v313_v13, %v312_v4 }
  0x2e   :  { %v328_v51 = vmax.f32 %v264_v41, 0.0  ;;  %1851 = vmatprep.mubr.bf16.mxu1 %v372_v55  ;;  %v182_v53 = vmul.f32 %v1464_v14, %v1951_v5  ;;  %v333_v6 = vmax.f32 %v269_v23, 0.0  ;;  %v334_v36 = vmax.f32 %v270_v24, 0.0 }
  0x2f   :  { %v268_v22 = vadd.f32 %v1962_v10, %v197_v59  ;;  %v203_v38 = vmul.f32 %v1507_v27, %v1951_v5  ;;  %v204_v39 = vmul.f32 %v1508_v52, %v1951_v5  ;;  %v314_v41 = vmax.f32 %v250_v28, 0.0 }
  0x30   :  { %v373_v21 = vpack.c.bf16 %v329_v61, %v328_v51  ;;  %v315_v45 = vmax.f32 %v251_v31, 0.0  ;;  %v272_v46 = vadd.f32 %v1962_v10, %v201_v34  ;;  %v273_v47 = vadd.f32 %v1962_v10, %v202_v50 }
  0x31   :  { %v332_v2 = vmax.f32 %v268_v22, 0.0  ;;  %v1511_v48 = vunpack.c.l.bf16 %v1721_v16  ;;  %v1512_v51 = vunpack.c.h.bf16 %v1721_v16  ;;  %v1515_v54 = vunpack.c.l.bf16 %v1722_v40 }
  0x32   :  { %1824 = vmatmul.mubr.bf16.gmra.mxu0 %v359_v56  ;;  %v196_v56 = vmul.f32 %v1492_v43, %v1951_v5  ;;  %1852 = vmatmul.mubr.bf16.gmra.mxu1 %v373_v21  ;;  %v1516_v55 = vunpack.c.h.bf16 %v1722_v40  ;;  %v275_v59 = vadd.f32 %v1962_v10, %v204_v39  ;;  %v253_v61 = vadd.f32 %v1962_v10, %v182_v53  ;;  %v1724_v21 = vld [vmem:[%s2520_s0 + $0xe0] sm:$0xff]  }
  0x33   :  { %1827 = vmatprep.mubr.bf16.mxu0 %v360_v57  ;;  %v266_v57 = vadd.f32 %v1962_v10, %v195_v44  ;;  %v1471_v44 = vunpack.c.l.bf16 %v1711_v33  ;;  %v375_v49 = vpack.c.bf16 %v333_v6, %v332_v2  ;;  %v1472_v0 = vunpack.c.h.bf16 %v1711_v33 }
  0x34   :  { %v267_v9 = vadd.f32 %v1962_v10, %v196_v56  ;;  %v252_v56 = vadd.f32 %v1962_v10, %v181_v32  ;;  %v366_v1 = vpack.c.bf16 %v315_v45, %v314_v41  ;;  %v336_v4 = vmax.f32 %v272_v46, 0.0  ;;  %v1726_v41 = vld [vmem:[%s2520_s0 + $0xf0] sm:$0xff]  }
  0x35   :  { %v330_v11 = vmax.f32 %v266_v57, 0.0  ;;  %v274_v57 = vadd.f32 %v1962_v10, %v203_v38  ;;  %v337_v8 = vmax.f32 %v273_v47, 0.0  ;;  %v207_v13 = vmul.f32 %v1515_v54, %v1951_v5 }
  0x36   :  { %v331_v7 = vmax.f32 %v267_v9, 0.0  ;;  %v205_v9 = vmul.f32 %v1511_v48, %v1951_v5  ;;  %v208_v14 = vmul.f32 %v1516_v55, %v1951_v5  ;;  %v339_v3 = vmax.f32 %v275_v59, 0.0 }
  0x37   :  { %v338_v18 = vmax.f32 %v274_v57, 0.0  ;;  %v186_v20 = vmul.f32 %v1472_v0, %v1951_v5  ;;  %v377_v23 = vpack.c.bf16 %v337_v8, %v336_v4  ;;  %v278_v27 = vadd.f32 %v1962_v10, %v207_v13 }
  0x38   :  { %v374_v26 = vpack.c.bf16 %v331_v7, %v330_v11  ;;  %v206_v11 = vmul.f32 %v1512_v51, %v1951_v5  ;;  %v317_v7 = vmax.f32 %v253_v61, 0.0  ;;  %v276_v24 = vadd.f32 %v1962_v10, %v205_v9 }
  0x39   :  { %v279_v52 = vadd.f32 %v1962_v10, %v208_v14  ;;  %v378_v28 = vpack.c.bf16 %v339_v3, %v338_v18  ;;  %v257_v33 = vadd.f32 %v1962_v10, %v186_v20  ;;  %v342_v2 = vmax.f32 %v278_v27, 0.0 }
  0x3a   :  { %1828 = vmatmul.mubr.bf16.gmra.mxu0 %v2061_v58  ;;  %v1710_v58 = vld [vmem:[%s2520_s0 + $0x70] sm:$0xff]   ;;  %1855 = vmatprep.mubr.bf16.mxu1 %v374_v26  ;;  %v1519_v26 = vunpack.c.l.bf16 %v1723_v15  ;;  %v340_v50 = vmax.f32 %v276_v24, 0.0  ;;  %v1531_v51 = vunpack.c.l.bf16 %v1726_v41  ;;  %v1532_v54 = vunpack.c.h.bf16 %v1726_v41 }
  0x3b   :  { %1831 = vmatprep.mubr.bf16.mxu0 %v2066_v60  ;;  %v271_v60 = vadd.f32 %v1962_v10, %v200_v17  ;;  %v1467_v29 = vunpack.c.l.bf16 %v1710_v58  ;;  %v1468_v30 = vunpack.c.h.bf16 %v1710_v58  ;;  %1856 = vmatmul.mubr.bf16.gmra.mxu1 %v375_v49  ;;  %v185_v17 = vmul.f32 %v1471_v44, %v1951_v5 }
  0x3c   :  { %v316_v58 = vmax.f32 %v252_v56, 0.0  ;;  %v343_v6 = vmax.f32 %v279_v52, 0.0  ;;  %v321_v40 = vmax.f32 %v257_v33, 0.0  ;;  %v216_v0 = vmul.f32 %v1532_v54, %v1951_v5 }
  0x3d   :  { %v335_v37 = vmax.f32 %v271_v60, 0.0  ;;  %v183_v42 = vmul.f32 %v1467_v29, %v1951_v5  ;;  %v184_v43 = vmul.f32 %v1468_v30, %v1951_v5  ;;  %v277_v60 = vadd.f32 %v1962_v10, %v206_v11 }
  0x3e   :  { %v1523_v29 = vunpack.c.l.bf16 %v1724_v21  ;;  %v1524_v30 = vunpack.c.h.bf16 %v1724_v21  ;;  %v367_v31 = vpack.c.bf16 %v317_v7, %v316_v58  ;;  %v256_v32 = vadd.f32 %v1962_v10, %v185_v17 }
  0x3f   :  { %v254_v62 = vadd.f32 %v1962_v10, %v183_v42  ;;  %v255_v63 = vadd.f32 %v1962_v10, %v184_v43  ;;  %v341_v53 = vmax.f32 %v277_v60, 0.0  ;;  %v380_v45 = vpack.c.bf16 %v343_v6, %v342_v2 }
  0x40   :  { %v212_v38 = vmul.f32 %v1524_v30, %v1951_v5  ;;  %v320_v39 = vmax.f32 %v256_v32, 0.0  ;;  %v287_v17 = vadd.f32 %v1962_v10, %v216_v0 }
  0x41   :  { %v318_v19 = vmax.f32 %v254_v62, 0.0  ;;  %v319_v22 = vmax.f32 %v255_v63, 0.0  ;;  %v379_v44 = vpack.c.bf16 %v341_v53, %v340_v50  ;;  %v215_v63 = vmul.f32 %v1531_v51, %v1951_v5 }
  0x42   :  { %1832 = vmatmul.mubr.bf16.gmra.mxu0 %v2097_v25  ;;  %v376_v25 = vpack.c.bf16 %v335_v37, %v334_v36  ;;  %v1725_v36 = vld [vmem:[%s2520_s0 + $0xe8] sm:$0xff]   ;;  %v211_v37 = vmul.f32 %v1523_v29, %v1951_v5  ;;  %v283_v49 = vadd.f32 %v1962_v10, %v212_v38  ;;  %v369_v55 = vpack.c.bf16 %v321_v40, %v320_v39 }
  0x43   :  { %1835 = vmatprep.mubr.bf16.mxu0 %v364_v12  ;;  %v1520_v12 = vunpack.c.h.bf16 %v1723_v15  ;;  %v368_v34 = vpack.c.bf16 %v319_v22, %v318_v19  ;;  %v1527_v43 = vunpack.c.l.bf16 %v1725_v36  ;;  %v1528_v47 = vunpack.c.h.bf16 %v1725_v36 }
  0x44   :  { %1859 = vmatprep.mubr.bf16.mxu1 %v376_v25  ;;  %v282_v48 = vadd.f32 %v1962_v10, %v211_v37  ;;  %v347_v62 = vmax.f32 %v283_v49, 0.0  ;;  %v286_v15 = vadd.f32 %v1962_v10, %v215_v63  ;;  %v351_v20 = vmax.f32 %v287_v17, 0.0 }
  0x45   :  { %1860 = vmatmul.mubr.bf16.gmra.mxu1 %v377_v23  ;;  %v210_v16 = vmul.f32 %v1520_v12, %v1951_v5  ;;  %v213_v56 = vmul.f32 %v1527_v43, %v1951_v5  ;;  %v214_v59 = vmul.f32 %v1528_v47, %v1951_v5 }
  0x46   :  { %1863 = vmatprep.mubr.bf16.mxu1 %v378_v28  ;;  %v346_v61 = vmax.f32 %v282_v48, 0.0  ;;  %v350_v19 = vmax.f32 %v286_v15, 0.0 }
  0x47   :  { %v281_v46 = vadd.f32 %v1962_v10, %v210_v16  ;;  %v284_v4 = vadd.f32 %v1962_v10, %v213_v56  ;;  %v285_v9 = vadd.f32 %v1962_v10, %v214_v59 }
  0x48   :  { %v382_v14 = vpack.c.bf16 %v347_v62, %v346_v61  ;;  %v384_v24 = vpack.c.bf16 %v351_v20, %v350_v19 }
  0x49   :  { %v345_v57 = vmax.f32 %v281_v46, 0.0  ;;  %v348_v18 = vmax.f32 %v284_v4, 0.0  ;;  %v349_v3 = vmax.f32 %v285_v9, 0.0 }
  0x4a   :  { %1836 = vmatmul.mubr.bf16.gmra.mxu0 %v365_v35  ;;  %v209_v35 = vmul.f32 %v1519_v26, %v1951_v5 }
  0x4b   :  { %1839 = vmatprep.mubr.bf16.mxu0 %v366_v1  ;;  %v1727_v1 = vld [vmem:[%s2520_s0 + $0xf8] sm:$0xff]   ;;  %v383_v21 = vpack.c.bf16 %v349_v3, %v348_v18 }
  0x4c   :  { %v280_v42 = vadd.f32 %v1962_v10, %v209_v35  ;;  %v1535_v11 = vunpack.c.l.bf16 %v1727_v1  ;;  %v1536_v13 = vunpack.c.h.bf16 %v1727_v1 }
  0x4d   :  { %1864 = vmatmul.mubr.bf16.gmra.mxu1 %v379_v44 }
  0x4e   :  { %v344_v25 = vmax.f32 %v280_v42, 0.0  ;;  %1867 = vmatprep.mubr.bf16.mxu1 %v380_v45  ;;  %v217_v58 = vmul.f32 %v1535_v11, %v1951_v5  ;;  %v218_v7 = vmul.f32 %v1536_v13, %v1951_v5 }
  0x50   :  { %v381_v8 = vpack.c.bf16 %v345_v57, %v344_v25  ;;  %v288_v22 = vadd.f32 %v1962_v10, %v217_v58  ;;  %v289_v23 = vadd.f32 %v1962_v10, %v218_v7 }
  0x52   :  { %1840 = vmatmul.mubr.bf16.gmra.mxu0 %v367_v31  ;;  %v352_v26 = vmax.f32 %v288_v22, 0.0  ;;  %v353_v60 = vmax.f32 %v289_v23, 0.0 }
  0x53   :  { %1843 = vmatprep.mubr.bf16.mxu0 %v368_v34 }
  0x54   :  { %v385_v27 = vpack.c.bf16 %v353_v60, %v352_v26 }
  0x55   :  { %1868 = vmatmul.mubr.bf16.gmra.mxu1 %v381_v8 }
  0x56   :  { %1871 = vmatprep.mubr.bf16.mxu1 %v382_v14 }
  0x5a   :  { %1844 = vmatmul.mubr.bf16.gmra.mxu0 %v369_v55 }
  0x5d   :  { %1872 = vmatmul.mubr.bf16.gmra.mxu1 %v383_v21 }
  0x5e   :  { %1875 = vmatprep.mubr.bf16.mxu1 %v384_v24 }
  0x65   :  { %1876 = vmatmul.mubr.bf16.gmra.mxu1 %v385_v27 }
  0xe2   :  { %v1817_v52 = vpop.f32.mrf.mxu0 }
  0xe3   :  { %v1131_v34 = vmul.f32 %v1817_v52, %v1817_v52 }
  0xe4   :  { %v484_v12 = vpop.f32.mrf.mxu0 }
  0xe5   :  { %v1129_v30 = vmul.f32 %v484_v12, %v484_v12 }
  0xe6   :  { %v1818_v28 = vpop.f32.mrf.mxu0 }
  0xe7   :  { %v1545_v29 = vpack.c.bf16 %v1818_v28, %v1817_v52  ;;  %v1132_v2 = vmul.f32 %v1818_v28, %v1818_v28 }
  0xe8   :  { %v487_v5 = vpop.f32.mrf.mxu0  ;;  %v2237_v0 = vpop.f32.mrf.mxu1 }
  0xe9   :  { %1728 = vst [vmem:[%s2523_s4 + $0x8] sm:$0xff] %v1545_v29   ;;  %v1540_v31 = vpack.c.bf16 %v487_v5, %v484_v12  ;;  %v1059_v32 = vadd.f32 %v487_v5, %v484_v12  ;;  %v1130_v10 = vmul.f32 %v487_v5, %v487_v5 }
  0xea   :  { %v1821_v33 = vpop.f32.mrf.mxu0  ;;  %v2242_v13 = vpop.f32.mrf.mxu1 }
  0xeb   :  { %1541 = vst [vmem:[%s2523_s4] sm:$0xff] %v1540_v31   ;;  %v1060_v50 = vadd.f32 %v1817_v52, %v1059_v32  ;;  %v1193_v35 = vadd.f32 %v1130_v10, %v1129_v30  ;;  %v1135_v47 = vmul.f32 %v1821_v33, %v1821_v33 }
  0xec   :  { %v500_v53 = vpop.f32.mrf.mxu0  ;;  %v2247_v3 = vpop.f32.mrf.mxu1 }
  0xed   :  { %v1194_v6 = vadd.f32 %v1193_v35, %v1131_v34  ;;  %v1061_v16 = vadd.f32 %v1818_v28, %v1060_v50  ;;  %v1133_v38 = vmul.f32 %v500_v53, %v500_v53  ;;  %v1625_v20 = vpack.c.bf16 %v2247_v3, %v2237_v0 }
  0xee   :  { %v1822_v36 = vpop.f32.mrf.mxu0  ;;  %v2251_v22 = vpop.f32.mrf.mxu1 }
  0xef   :  { %v1062_v37 = vadd.f32 %v1061_v16, %v500_v53  ;;  %v1195_v39 = vadd.f32 %v1194_v6, %v1132_v2  ;;  %v1555_v40 = vpack.c.bf16 %v1822_v36, %v1821_v33  ;;  %v1136_v54 = vmul.f32 %v1822_v36, %v1822_v36  ;;  %1744 = vst [vmem:[%s2523_s4 + $0x88] sm:$0xff] %v1625_v20  }
  0xf0   :  { %v503_v41 = vpop.f32.mrf.mxu0  ;;  %v1620_v52 = vpack.c.bf16 %v2251_v22, %v2242_v13 }
  0xf1   :  { %v1196_v42 = vadd.f32 %v1195_v39, %v1133_v38  ;;  %1730 = vst [vmem:[%s2523_s4 + $0x18] sm:$0xff] %v1555_v40   ;;  %v1550_v43 = vpack.c.bf16 %v503_v41, %v500_v53  ;;  %v1063_v44 = vadd.f32 %v1062_v37, %v503_v41  ;;  %v1134_v45 = vmul.f32 %v503_v41, %v503_v41 }
  0xf2   :  { %v1825_v46 = vpop.f32.mrf.mxu0  ;;  %v2258_v12 = vpop.f32.mrf.mxu1  ;;  %1743 = vst [vmem:[%s2523_s4 + $0x80] sm:$0xff] %v1620_v52  }
  0xf3   :  { %1729 = vst [vmem:[%s2523_s4 + $0x10] sm:$0xff] %v1550_v43   ;;  %v1064_v48 = vadd.f32 %v1821_v33, %v1063_v44  ;;  %v1197_v49 = vadd.f32 %v1196_v42, %v1134_v45  ;;  %v1139_v14 = vmul.f32 %v1825_v46, %v1825_v46 }
  0xf4   :  { %v516_v51 = vpop.f32.mrf.mxu0  ;;  %v2266_v32 = vpop.f32.mrf.mxu1 }
  0xf5   :  { %v1198_v55 = vadd.f32 %v1197_v49, %v1135_v47  ;;  %v1065_v56 = vadd.f32 %v1822_v36, %v1064_v48  ;;  %v1137_v59 = vmul.f32 %v516_v51, %v516_v51 }
  0xf6   :  { %v1826_v25 = vpop.f32.mrf.mxu0  ;;  %v2271_v35 = vpop.f32.mrf.mxu1 }
  0xf7   :  { %v1066_v57 = vadd.f32 %v1065_v56, %v516_v51  ;;  %v1199_v61 = vadd.f32 %v1198_v55, %v1136_v54  ;;  %v1565_v62 = vpack.c.bf16 %v1826_v25, %v1825_v46  ;;  %v1140_v58 = vmul.f32 %v1826_v25, %v1826_v25 }
  0xf8   :  { %v519_v63 = vpop.f32.mrf.mxu0  ;;  %v1635_v16 = vpack.c.bf16 %v2271_v35, %v2258_v12  ;;  %v2275_v37 = vpop.f32.mrf.mxu1 }
  0xf9   :  { %v1200_v1 = vadd.f32 %v1199_v61, %v1137_v59  ;;  %1732 = vst [vmem:[%s2523_s4 + $0x28] sm:$0xff] %v1565_v62   ;;  %v1560_v4 = vpack.c.bf16 %v519_v63, %v516_v51  ;;  %v1067_v8 = vadd.f32 %v1066_v57, %v519_v63  ;;  %v1138_v9 = vmul.f32 %v519_v63, %v519_v63 }
  0xfa   :  { %v1829_v11 = vpop.f32.mrf.mxu0  ;;  %1746 = vst [vmem:[%s2523_s4 + $0x98] sm:$0xff] %v1635_v16   ;;  %v1630_v43 = vpack.c.bf16 %v2275_v37, %v2266_v32 }
  0xfb   :  { %1731 = vst [vmem:[%s2523_s4 + $0x20] sm:$0xff] %v1560_v4   ;;  %v1068_v15 = vadd.f32 %v1825_v46, %v1067_v8  ;;  %v1201_v17 = vadd.f32 %v1200_v1, %v1138_v9  ;;  %v1143_v10 = vmul.f32 %v1829_v11, %v1829_v11  ;;  %v2282_v44 = vpop.f32.mrf.mxu1 }
  0xfc   :  { %v532_v18 = vpop.f32.mrf.mxu0  ;;  %1745 = vst [vmem:[%s2523_s4 + $0x90] sm:$0xff] %v1630_v43  }
  0xfd   :  { %v1202_v7 = vadd.f32 %v1201_v17, %v1139_v14  ;;  %v1069_v19 = vadd.f32 %v1826_v25, %v1068_v15  ;;  %v1141_v24 = vmul.f32 %v532_v18, %v532_v18  ;;  %v2290_v51 = vpop.f32.mrf.mxu1 }
  0xfe   :  { %v1830_v21 = vpop.f32.mrf.mxu0 }
  0xff   :  { %v1070_v23 = vadd.f32 %v1069_v19, %v532_v18  ;;  %v1203_v26 = vadd.f32 %v1202_v7, %v1140_v58  ;;  %v1575_v60 = vpack.c.bf16 %v1830_v21, %v1829_v11  ;;  %v1144_v53 = vmul.f32 %v1830_v21, %v1830_v21  ;;  %v2295_v57 = vpop.f32.mrf.mxu1 }
 0x100   :  { %v535_v27 = vpop.f32.mrf.mxu0  ;;  %v1645_v63 = vpack.c.bf16 %v2295_v57, %v2282_v44 }
 0x101   :  { %v1204_v28 = vadd.f32 %v1203_v26, %v1141_v24  ;;  %1734 = vst [vmem:[%s2523_s4 + $0x38] sm:$0xff] %v1575_v60   ;;  %v1570_v29 = vpack.c.bf16 %v535_v27, %v532_v18  ;;  %v1071_v5 = vadd.f32 %v1070_v23, %v535_v27  ;;  %v1142_v30 = vmul.f32 %v535_v27, %v535_v27  ;;  %v2299_v4 = vpop.f32.mrf.mxu1 }
 0x102   :  { %v1833_v31 = vpop.f32.mrf.mxu0  ;;  %1748 = vst [vmem:[%s2523_s4 + $0xa8] sm:$0xff] %v1645_v63   ;;  %v1640_v17 = vpack.c.bf16 %v2299_v4, %v2290_v51 }
 0x103   :  { %1733 = vst [vmem:[%s2523_s4 + $0x30] sm:$0xff] %v1570_v29   ;;  %v1072_v33 = vadd.f32 %v1829_v11, %v1071_v5  ;;  %v1205_v34 = vadd.f32 %v1204_v28, %v1142_v30  ;;  %v1147_v54 = vmul.f32 %v1833_v31, %v1833_v31 }
 0x104   :  { %v548_v50 = vpop.f32.mrf.mxu0  ;;  %1747 = vst [vmem:[%s2523_s4 + $0xa0] sm:$0xff] %v1640_v17  }
 0x105   :  { %v1206_v2 = vadd.f32 %v1205_v34, %v1143_v10  ;;  %v1073_v6 = vadd.f32 %v1830_v21, %v1072_v33  ;;  %v1145_v39 = vmul.f32 %v548_v50, %v548_v50  ;;  %v2306_v18 = vpop.f32.mrf.mxu1 }
 0x106   :  { %v1834_v36 = vpop.f32.mrf.mxu0 }
 0x107   :  { %v1074_v38 = vadd.f32 %v1073_v6, %v548_v50  ;;  %v1207_v40 = vadd.f32 %v1206_v2, %v1144_v53  ;;  %v1585_v41 = vpack.c.bf16 %v1834_v36, %v1833_v31  ;;  %v1148_v59 = vmul.f32 %v1834_v36, %v1834_v36  ;;  %v2314_v23 = vpop.f32.mrf.mxu1 }
 0x108   :  { %v551_v42 = vpop.f32.mrf.mxu0 }
 0x109   :  { %v1208_v45 = vadd.f32 %v1207_v40, %v1145_v39  ;;  %1736 = vst [vmem:[%s2523_s4 + $0x48] sm:$0xff] %v1585_v41   ;;  %v1580_v46 = vpack.c.bf16 %v551_v42, %v548_v50  ;;  %v1075_v47 = vadd.f32 %v1074_v38, %v551_v42  ;;  %v1146_v48 = vmul.f32 %v551_v42, %v551_v42  ;;  %v2319_v52 = vpop.f32.mrf.mxu1 }
 0x10a   :  { %v1837_v49 = vpop.f32.mrf.mxu0  ;;  %v1655_v30 = vpack.c.bf16 %v2319_v52, %v2306_v18 }
 0x10b   :  { %1735 = vst [vmem:[%s2523_s4 + $0x40] sm:$0xff] %v1580_v46   ;;  %v1076_v55 = vadd.f32 %v1833_v31, %v1075_v47  ;;  %v1209_v56 = vadd.f32 %v1208_v45, %v1146_v48  ;;  %v1151_v24 = vmul.f32 %v1837_v49, %v1837_v49  ;;  %v2323_v10 = vpop.f32.mrf.mxu1 }
 0x10c   :  { %v564_v25 = vpop.f32.mrf.mxu0  ;;  %1750 = vst [vmem:[%s2523_s4 + $0xb8] sm:$0xff] %v1655_v30   ;;  %v1650_v6 = vpack.c.bf16 %v2323_v10, %v2314_v23 }
 0x10d   :  { %v1210_v61 = vadd.f32 %v1209_v56, %v1147_v54  ;;  %v1077_v62 = vadd.f32 %v1834_v36, %v1076_v55  ;;  %v1149_v9 = vmul.f32 %v564_v25, %v564_v25  ;;  %v2330_v16 = vpop.f32.mrf.mxu1 }
 0x10e   :  { %v1838_v1 = vpop.f32.mrf.mxu0  ;;  %1749 = vst [vmem:[%s2523_s4 + $0xb0] sm:$0xff] %v1650_v6   ;;  %v1163_v6 = vmul.f32 %v2237_v0, %v2237_v0 }
 0x10f   :  { %v1078_v8 = vadd.f32 %v1077_v62, %v564_v25  ;;  %v1211_v11 = vadd.f32 %v1210_v61, %v1148_v59  ;;  %v1595_v14 = vpack.c.bf16 %v1838_v1, %v1837_v49  ;;  %v1152_v28 = vmul.f32 %v1838_v1, %v1838_v1  ;;  %v2338_v42 = vpop.f32.mrf.mxu1 }
 0x110   :  { %v567_v15 = vpop.f32.mrf.mxu0 }
 0x111   :  { %v1212_v58 = vadd.f32 %v1211_v11, %v1149_v9  ;;  %1738 = vst [vmem:[%s2523_s4 + $0x58] sm:$0xff] %v1595_v14   ;;  %v1590_v7 = vpack.c.bf16 %v567_v15, %v564_v25  ;;  %v1079_v19 = vadd.f32 %v1078_v8, %v567_v15  ;;  %v1150_v20 = vmul.f32 %v567_v15, %v567_v15  ;;  %v2343_v48 = vpop.f32.mrf.mxu1 }
 0x112   :  { %v1841_v21 = vpop.f32.mrf.mxu0  ;;  %v1665_v56 = vpack.c.bf16 %v2343_v48, %v2330_v16 }
 0x113   :  { %1737 = vst [vmem:[%s2523_s4 + $0x50] sm:$0xff] %v1590_v7   ;;  %v1080_v26 = vadd.f32 %v1837_v49, %v1079_v19  ;;  %v1213_v60 = vadd.f32 %v1212_v58, %v1150_v20  ;;  %v1155_v43 = vmul.f32 %v1841_v21, %v1841_v21  ;;  %v2347_v59 = vpop.f32.mrf.mxu1 }
 0x114   :  { %v580_v27 = vpop.f32.mrf.mxu0  ;;  %1752 = vst [vmem:[%s2523_s4 + $0xc8] sm:$0xff] %v1665_v56   ;;  %v1660_v9 = vpack.c.bf16 %v2347_v59, %v2338_v42  ;;  %v1166_v56 = vmul.f32 %v2275_v37, %v2275_v37 }
 0x115   :  { %v1214_v29 = vadd.f32 %v1213_v60, %v1151_v24  ;;  %v1081_v5 = vadd.f32 %v1838_v1, %v1080_v26  ;;  %v1153_v34 = vmul.f32 %v580_v27, %v580_v27  ;;  %v2354_v11 = vpop.f32.mrf.mxu1 }
 0x116   :  { %v1842_v31 = vpop.f32.mrf.mxu0  ;;  %1751 = vst [vmem:[%s2523_s4 + $0xc0] sm:$0xff] %v1660_v9  }
 0x117   :  { %v1082_v33 = vadd.f32 %v1081_v5, %v580_v27  ;;  %v1215_v50 = vadd.f32 %v1214_v29, %v1152_v28  ;;  %v1605_v53 = vpack.c.bf16 %v1842_v31, %v1841_v21  ;;  %v1156_v49 = vmul.f32 %v1842_v31, %v1842_v31  ;;  %v2362_v7 = vpop.f32.mrf.mxu1 }
 0x118   :  { %v583_v2 = vpop.f32.mrf.mxu0  ;;  %v1161_v5 = vmul.f32 %v2242_v13, %v2242_v13 }
 0x119   :  { %v1216_v36 = vadd.f32 %v1215_v50, %v1153_v34  ;;  %1740 = vst [vmem:[%s2523_s4 + $0x68] sm:$0xff] %v1605_v53   ;;  %v1600_v38 = vpack.c.bf16 %v583_v2, %v580_v27  ;;  %v1083_v39 = vadd.f32 %v1082_v33, %v583_v2  ;;  %v1154_v40 = vmul.f32 %v583_v2, %v583_v2  ;;  %v2367_v24 = vpop.f32.mrf.mxu1 }
 0x11a   :  { %v1845_v41 = vpop.f32.mrf.mxu0  ;;  %v1675_v28 = vpack.c.bf16 %v2367_v24, %v2354_v11  ;;  %v1162_v53 = vmul.f32 %v2251_v22, %v2251_v22 }
 0x11b   :  { %1739 = vst [vmem:[%s2523_s4 + $0x60] sm:$0xff] %v1600_v38   ;;  %v1084_v45 = vadd.f32 %v1841_v21, %v1083_v39  ;;  %v1217_v46 = vadd.f32 %v1216_v36, %v1154_v40  ;;  %v1159_v19 = vmul.f32 %v1845_v41, %v1845_v41  ;;  %v2371_v29 = vpop.f32.mrf.mxu1  ;;  %v1164_v40 = vmul.f32 %v2247_v3, %v2247_v3 }
 0x11c   :  { %v596_v47 = vpop.f32.mrf.mxu0  ;;  %1754 = vst [vmem:[%s2523_s4 + $0xd8] sm:$0xff] %v1675_v28   ;;  %v1670_v33 = vpack.c.bf16 %v2371_v29, %v2362_v7 }
 0x11d   :  { %v1218_v54 = vadd.f32 %v1217_v46, %v1155_v43  ;;  %v1085_v55 = vadd.f32 %v1842_v31, %v1084_v45  ;;  %v1157_v62 = vmul.f32 %v596_v47, %v596_v47  ;;  %v2381_v34 = vpop.f32.mrf.mxu1 }
 0x11e   :  { %v1846_v25 = vpop.f32.mrf.mxu0  ;;  %1753 = vst [vmem:[%s2523_s4 + $0xd0] sm:$0xff] %v1670_v33  }
 0x11f   :  { %v1086_v61 = vadd.f32 %v1085_v55, %v596_v47  ;;  %v1219_v63 = vadd.f32 %v1218_v54, %v1156_v49  ;;  %v1615_v1 = vpack.c.bf16 %v1846_v25, %v1845_v41  ;;  %v1160_v26 = vmul.f32 %v1846_v25, %v1846_v25 }
 0x120   :  { %v599_v8 = vpop.f32.mrf.mxu0 }
 0x121   :  { %v1220_v14 = vadd.f32 %v1219_v63, %v1157_v62  ;;  %1742 = vst [vmem:[%s2523_s4 + $0x78] sm:$0xff] %v1615_v1   ;;  %v1610_v15 = vpack.c.bf16 %v599_v8, %v596_v47  ;;  %v1087_v17 = vadd.f32 %v1086_v61, %v599_v8  ;;  %v1158_v58 = vmul.f32 %v599_v8, %v599_v8 }
 0x122   :  { %v1165_v47 = vmul.f32 %v2266_v32, %v2266_v32  ;;  %v1168_v1 = vmul.f32 %v2271_v35, %v2271_v35 }
 0x123   :  { %1741 = vst [vmem:[%s2523_s4 + $0x70] sm:$0xff] %v1610_v15   ;;  %v1088_v20 = vadd.f32 %v1845_v41, %v1087_v17  ;;  %v1221_v21 = vadd.f32 %v1220_v14, %v1158_v58  ;;  %v1169_v17 = vmul.f32 %v2290_v51, %v2290_v51 }
 0x125   :  { %v1089_v60 = vadd.f32 %v1846_v25, %v1088_v20  ;;  %v1222_v27 = vadd.f32 %v1221_v21, %v1159_v19  ;;  %v1167_v25 = vmul.f32 %v2258_v12, %v2258_v12  ;;  %v1170_v20 = vmul.f32 %v2299_v4, %v2299_v4 }
 0x127   :  { %v1223_v30 = vadd.f32 %v1222_v27, %v1160_v26  ;;  %v1090_v31 = vadd.f32 %v1089_v60, %v2242_v13  ;;  %v2389_v13 = vpop.f32.mrf.mxu1  ;;  %v1172_v60 = vmul.f32 %v2295_v57, %v2295_v57 }
 0x129   :  { %v1091_v50 = vadd.f32 %v1090_v31, %v2251_v22  ;;  %v1224_v2 = vadd.f32 %v1223_v30, %v1161_v5  ;;  %v2394_v39 = vpop.f32.mrf.mxu1 }
 0x12a   :  { %v1685_v43 = vpack.c.bf16 %v2394_v39, %v2381_v34 }
 0x12b   :  { %v1092_v36 = vadd.f32 %v2237_v0, %v1091_v50  ;;  %v1225_v38 = vadd.f32 %v1224_v2, %v1162_v53  ;;  %v2401_v45 = vpop.f32.mrf.mxu1  ;;  %v1174_v50 = vmul.f32 %v2323_v10, %v2323_v10 }
 0x12c   :  { %1756 = vst [vmem:[%s2523_s4 + $0xe8] sm:$0xff] %v1685_v43   ;;  %v1680_v49 = vpack.c.bf16 %v2401_v45, %v2389_v13 }
 0x12d   :  { %v1226_v41 = vadd.f32 %v1225_v38, %v1163_v6  ;;  %v1093_v22 = vadd.f32 %v2247_v3, %v1092_v36  ;;  %v2411_v54 = vpop.f32.mrf.mxu1  ;;  %v1177_v38 = vmul.f32 %v2338_v42, %v2338_v42 }
 0x12e   :  { %1755 = vst [vmem:[%s2523_s4 + $0xe0] sm:$0xff] %v1680_v49   ;;  %v1181_v49 = vmul.f32 %v2362_v7, %v2362_v7 }
 0x12f   :  { %v1094_v46 = vadd.f32 %v1093_v22, %v2266_v32  ;;  %v1227_v0 = vadd.f32 %v1226_v41, %v1164_v40  ;;  %v2419_v32 = vpop.f32.mrf.mxu1  ;;  %v1178_v22 = vmul.f32 %v2347_v59, %v2347_v59 }
 0x131   :  { %v1228_v3 = vadd.f32 %v1227_v0, %v1165_v47  ;;  %v1095_v55 = vadd.f32 %v1094_v46, %v2275_v37  ;;  %v2424_v63 = vpop.f32.mrf.mxu1 }
 0x132   :  { %v1695_v9 = vpack.c.bf16 %v2424_v63, %v2411_v54 }
 0x133   :  { %v1096_v61 = vadd.f32 %v2258_v12, %v1095_v55  ;;  %v1229_v62 = vadd.f32 %v1228_v3, %v1166_v56  ;;  %v2431_v14 = vpop.f32.mrf.mxu1  ;;  %v1182_v56 = vmul.f32 %v2371_v29, %v2371_v29 }
 0x134   :  { %1758 = vst [vmem:[%s2523_s4 + $0xf8] sm:$0xff] %v1695_v9   ;;  %v1690_v58 = vpack.c.bf16 %v2431_v14, %v2419_v32 }
 0x135   :  { %v1230_v8 = vadd.f32 %v1229_v62, %v1167_v25  ;;  %v1097_v37 = vadd.f32 %v2271_v35, %v1096_v61 }
 0x136   :  { %1757 = vst [vmem:[%s2523_s4 + $0xf0] sm:$0xff] %v1690_v58  }
 0x137   :  { %v1098_v15 = vadd.f32 %v1097_v37, %v2290_v51  ;;  %v1231_v12 = vadd.f32 %v1230_v8, %v1168_v1  ;;  %v1171_v51 = vmul.f32 %v2282_v44, %v2282_v44  ;;  %v1185_v8 = vmul.f32 %v2389_v13, %v2389_v13 }
 0x139   :  { %v1232_v19 = vadd.f32 %v1231_v12, %v1169_v17  ;;  %v1099_v35 = vadd.f32 %v1098_v15, %v2299_v4  ;;  %v1173_v4 = vmul.f32 %v2314_v23, %v2314_v23  ;;  %v1186_v15 = vmul.f32 %v2401_v45, %v2401_v45 }
 0x13b   :  { %v1100_v21 = vadd.f32 %v2282_v44, %v1099_v35  ;;  %v1233_v26 = vadd.f32 %v1232_v19, %v1170_v20  ;;  %v1175_v44 = vmul.f32 %v2306_v18, %v2306_v18  ;;  %v1189_v35 = vmul.f32 %v2419_v32, %v2419_v32 }
 0x13d   :  { %v1234_v27 = vadd.f32 %v1233_v26, %v1171_v51  ;;  %v1101_v28 = vadd.f32 %v2295_v57, %v1100_v21  ;;  %v1176_v57 = vmul.f32 %v2319_v52, %v2319_v52  ;;  %v1190_v21 = vmul.f32 %v2431_v14, %v2431_v14 }
 0x13f   :  { %v1102_v5 = vadd.f32 %v1101_v28, %v2314_v23  ;;  %v1235_v30 = vadd.f32 %v1234_v27, %v1172_v60 }
 0x141   :  { %v1236_v31 = vadd.f32 %v1235_v30, %v1173_v4  ;;  %v1103_v33 = vadd.f32 %v1102_v5, %v2323_v10 }
 0x143   :  { %v1104_v53 = vadd.f32 %v2306_v18, %v1103_v33  ;;  %v1237_v2 = vadd.f32 %v1236_v31, %v1174_v50  ;;  %v1179_v18 = vmul.f32 %v2330_v16, %v2330_v16 }
 0x145   :  { %v1238_v6 = vadd.f32 %v1237_v2, %v1175_v44  ;;  %v1105_v36 = vadd.f32 %v2319_v52, %v1104_v53  ;;  %v1180_v52 = vmul.f32 %v2343_v48, %v2343_v48 }
 0x147   :  { %v1106_v23 = vadd.f32 %v1105_v36, %v2338_v42  ;;  %v1239_v40 = vadd.f32 %v1238_v6, %v1176_v57 }
 0x149   :  { %v1240_v41 = vadd.f32 %v1239_v40, %v1177_v38  ;;  %v1107_v10 = vadd.f32 %v1106_v23, %v2347_v59 }
 0x14b   :  { %v1108_v43 = vadd.f32 %v2330_v16, %v1107_v10  ;;  %v1241_v46 = vadd.f32 %v1240_v41, %v1178_v22  ;;  %v1183_v16 = vmul.f32 %v2354_v11, %v2354_v11 }
 0x14d   :  { %v1242_v47 = vadd.f32 %v1241_v46, %v1179_v18  ;;  %v1109_v0 = vadd.f32 %v2343_v48, %v1108_v43  ;;  %v1184_v48 = vmul.f32 %v2367_v24, %v2367_v24 }
 0x14f   :  { %v1110_v42 = vadd.f32 %v1109_v0, %v2362_v7  ;;  %v1243_v3 = vadd.f32 %v1242_v47, %v1180_v52 }
 0x151   :  { %v1244_v55 = vadd.f32 %v1243_v3, %v1181_v49  ;;  %v1111_v59 = vadd.f32 %v1110_v42, %v2371_v29 }
 0x153   :  { %v1112_v25 = vadd.f32 %v2354_v11, %v1111_v59  ;;  %v1245_v61 = vadd.f32 %v1244_v55, %v1182_v56  ;;  %v1187_v11 = vmul.f32 %v2381_v34, %v2381_v34 }
 0x155   :  { %v1246_v62 = vadd.f32 %v1245_v61, %v1183_v16  ;;  %v1113_v1 = vadd.f32 %v2367_v24, %v1112_v25  ;;  %v1188_v24 = vmul.f32 %v2394_v39, %v2394_v39 }
 0x157   :  { %v1114_v7 = vadd.f32 %v1113_v1, %v2389_v13  ;;  %v1247_v37 = vadd.f32 %v1246_v62, %v1184_v48 }
 0x159   :  { %v1248_v9 = vadd.f32 %v1247_v37, %v1185_v8  ;;  %v1115_v29 = vadd.f32 %v1114_v7, %v2401_v45 }
 0x15b   :  { %v1116_v17 = vadd.f32 %v2381_v34, %v1115_v29  ;;  %v1249_v12 = vadd.f32 %v1248_v9, %v1186_v15  ;;  %v1191_v34 = vmul.f32 %v2411_v54, %v2411_v54 }
 0x15d   :  { %v1250_v58 = vadd.f32 %v1249_v12, %v1187_v11  ;;  %v1117_v19 = vadd.f32 %v2394_v39, %v1116_v17  ;;  %v1192_v39 = vmul.f32 %v2424_v63, %v2424_v63 }
 0x15f   :  { %v1118_v13 = vadd.f32 %v1117_v19, %v2419_v32  ;;  %v1251_v20 = vadd.f32 %v1250_v58, %v1188_v24 }
 0x161   :  { %v1252_v51 = vadd.f32 %v1251_v20, %v1189_v35  ;;  %v1119_v45 = vadd.f32 %v1118_v13, %v2431_v14 }
 0x163   :  { %v1120_v26 = vadd.f32 %v2411_v54, %v1119_v45  ;;  %v1253_v60 = vadd.f32 %v1252_v51, %v1190_v21 }
 0x165   :  { %v1121_v27 = vadd.f32 %v2424_v63, %v1120_v26  ;;  %v1254_v28 = vadd.f32 %v1253_v60, %v1191_v34 }
 0x167   :  { %v1122_v32 = vrot.slane %v1121_v27, 4  ;;  %v1255_v5 = vadd.f32 %v1254_v28, %v1192_v39 }
 0x169   :  { %v1123_v4 = vadd.f32 %v1122_v32, %v1121_v27  ;;  %v1256_v30 = vrot.slane %v1255_v5, 4 }
 0x16b   :  { %v1124_v31 = vrot.slane %v1123_v4, 2  ;;  %v1257_v33 = vadd.f32 %v1256_v30, %v1255_v5 }
 0x16d   :  { %v1125_v50 = vadd.f32 %v1124_v31, %v1123_v4  ;;  %v1258_v14 = vrot.slane %v1257_v33, 2 }
 0x16f   :  { %v1126_v44 = vrot.slane %v1125_v50, 1  ;;  %v1259_v53 = vadd.f32 %v1258_v14, %v1257_v33 }
 0x171   :  { %v1127_v2 = vadd.f32 %v1126_v44, %v1125_v50  ;;  %v1260_v57 = vrot.slane %v1259_v53, 1 }
 0x173   :  { %1128 = vst [vmem:[%s2524_s5] sm:$0x1] %v1127_v2  ;;  %v1261_v54 = vadd.f32 %v1260_v57, %v1259_v53 }
 0x175   :  { %1262 = vst [vmem:[%s2524_s5 + $0x1] sm:$0x1] %v1261_v54 }

// kernel: bottleneck_block.5
= control target key start
LH: loop header
LB: loop body
LE: loop exit
PB: predicated region body
PF: predicated region fallthrough
CT: control target
= control target key end

     0   :  { %s5978_s18 = smov 0   ;;  %s7743_s0 = inlined_call_operand.vmem [shape: bf16[2,16,16,128], index: 0, kind: input, shape index: {}]   ;;  %s7744_s1 = inlined_call_operand.vmem [shape: f32[1,128], index: 1, kind: input, shape index: {}]   ;;  %s7745_s2 = inlined_call_operand.vmem [shape: f32[1,128], index: 2, kind: input, shape index: {}]   ;;  %s7746_s3 = inlined_call_operand.vmem [shape: bf16[9,128,128], index: 3, kind: input, shape index: {}]   ;;  %s7747_s4 = inlined_call_operand.vmem [shape: bf16[2,16,16,128], index: 4, kind: output, shape index: {0}]   ;;  %s7748_s5 = inlined_call_operand.vmem [shape: f32[2,2,128], index: 5, kind: output, shape index: {1}]  }
   0x1 LB: > { %s4551_s19 = sadd.s32 4294967295, %s5945_s18   ;;  %p4555_p0 = scmp.ge.s32.totalorder %s5945_s18, 1  ;;  %s5945_s18 = sphi %s5978_s18, %s16_s18  }
   0x2   : > { %p190_p1 = scmp.lt.s32.totalorder %s5945_s18, 3 }
   0x4   : > { %p191_p2 = pnand %p4555_p0, %p190_p1 }
   0x6   : > { %194 = sbr.rel (%p191_p2) target bundleno = 679 (0x2a7), region = 36 }
   0xb   : > { %v5814_v0 = vld [vmem:[%s7746_s3 + $0x78] sm:$0xff]   ;;  %v5815_v1 = vld [vmem:[%s7746_s3 + $0x70] sm:$0xff]   ;;  %v5947_v2 = vmov 0   ;;  %p222_p3 = scmp.lt.s32.totalorder %s4551_s19, 1  ;;  %v5816_v3 = vld [vmem:[%s7746_s3 + $0x68] sm:$0xff]   ;;  %vm435_vm0 = vcmask 1040384  }
   0xc   : > { %427 = vst [vmem:[#allocation2] sm:$0xf] %v5947_v2  ;;  %428 = vst [vmem:[#allocation2 + $0x4] sm:$0xf] %v5947_v2  ;;  %5357 = vmatprep.subr.bf16.mxu0 %v5814_v0  ;;  %5789 = vmatprep.subr.bf16.mxu1 %v5814_v0  ;;  %v5817_v4 = vld [vmem:[%s7746_s3 + $0x60] sm:$0xff]   ;;  %v5818_v22 = vld [vmem:[%s7746_s3 + $0x58] sm:$0xff]  }
   0xd   : > { %429 = vst [vmem:[#allocation2 + $0x8] sm:$0x1] %v5947_v2  ;;  %431 = vst [vmem:[#allocation2 + $0xcc] sm:$0xf] %v5947_v2  ;;  %5358 = vmatpush3.bf16.msra.mxu0 %v5814_v0  ;;  %5797 = vmatpush3.bf16.msra.mxu1 %v5814_v0  ;;  %s7941_s19 = smov (!%p222_p3, %s4551_s19), 1  ;;  %vm938_vm7 = vcmask 1043456  }
   0xe   : > { %432 = vst [vmem:[#allocation2 + $0xd0] sm:$0xf] %v5947_v2  ;;  %433 = vst [vmem:[#allocation2 + $0xd4] sm:$0x1] %v5947_v2  ;;  %5359 = vmatprep.subr.bf16.mxu0 %v5815_v1  ;;  %5790 = vmatprep.subr.bf16.mxu1 %v5815_v1  ;;  %s4901_s26 = sshll.u32 %s7941_s19, 7  ;;  %v5819_v33 = vld [vmem:[%s7746_s3 + $0x50] sm:$0xff]  }
   0xf   : > { %s6006_s6 = scalar_lea.vmem %s7743_s0, %s4901_s26  ;;  %vm1122_vm1 = vsmask.f32 3328  ;;  %vm1123_vm2 = vsmask.f32 7440  ;;  %v6017_v20 = vld [vmem:[%s7744_s1] ss:$0 sm:$0xff]  ;;  %s7610_s10 = scalar_lea.vmem %s7747_s4, %s4901_s26 }
  0x10   : > { %v4968_v14 = vld [vmem:[%s6006_s6] sm:$0xff]   ;;  %v5117_v15 = vld [vmem:[%s6006_s6 + $0x38] sm:$0xff]   ;;  %vm6029_vm3 = vmor %vm1122_vm1, %vm1123_vm2  ;;  %vm436_vm4 = vsmask.f32 256  ;;  %vm486_vm6 = vsmask.f32 7938 }
  0x11   : > { %5360 = vmatpush3.bf16.msra.mxu0 %v5815_v1  ;;  %5798 = vmatpush3.bf16.msra.mxu1 %v5815_v1  ;;  %v4969_v18 = vunpack.c.l.bf16 %v4968_v14  ;;  %v4970_v19 = vunpack.c.h.bf16 %v4968_v14  ;;  %v6022_v21 = vld [vmem:[%s7745_s2] ss:$0 sm:$0xff]  ;;  %vm6037_vm5 = vmand %vm435_vm0, %vm436_vm4  ;;  %v438_v31 = vld [vmem:[#allocation2 + $0xc] sm:$0x1]  ;;  %vm616_vm9 = vsmask.f32 4368  ;;  %v4997_v37 = vunpack.c.l.bf16 %v5117_v15 }
  0x12   : > { %5361 = vmatprep.subr.bf16.mxu0 %v5816_v3  ;;  %5791 = vmatprep.subr.bf16.mxu1 %v5816_v3  ;;  %v488_v32 = vld [vmem:[#allocation2 + $0x14] sm:$0x1]  ;;  %v439_v35 = vsel %vm6037_vm5, 0, %v438_v31  ;;  %vm6048_vm8 = vmand %vm435_vm0, %vm486_vm6  ;;  %v459_v38 = vld [vmem:[#allocation2 + $0x60] sm:$0x1]  ;;  %v4998_v45 = vunpack.c.h.bf16 %v5117_v15  ;;  %vm2120_vm12 = vcmask 1042432  }
  0x13   : > { %v1052_v5 = vld [vmem:[#allocation2] sm:$0xf]  ;;  %v1053_v6 = vld [vmem:[#allocation2 + $0x4] sm:$0xf]  ;;  %v308_v28 = vmul.f32 %v4969_v18, %v6017_v20  ;;  %v309_v29 = vmul.f32 %v4970_v19, %v6017_v20  ;;  %440 = vst [vmem:[#allocation2 + $0xc] sm:$0x1] %v439_v35  ;;  %v322_v46 = vmul.f32 %v4997_v37, %v6017_v20  ;;  %vm6085_vm10 = vmor %vm436_vm4, %vm616_vm9 }
  0x14   : > { %v6008_v7 = vld [vmem:[#allocation2 + $0x8] sm:$0x1]  ;;  %v1126_v8 = vshrl.u32 %v1052_v5, 16  ;;  %v1129_v9 = vshll.u32 %v1052_v5, 16  ;;  %v1135_v10 = vshll.u32 %v1053_v6, 16  ;;  %v1139_v11 = vshrl.u32 %v1053_v6, 16  ;;  %vm6094_vm11 = vmand %vm938_vm7, %vm486_vm6 }
  0x15   : > { %v1145_v12 = vshll.u32 %v6008_v7, 16  ;;  %5362 = vmatpush3.bf16.msra.mxu0 %v5816_v3  ;;  %5799 = vmatpush3.bf16.msra.mxu1 %v5816_v3  ;;  %v347_v40 = vadd.f32 %v6022_v21, %v308_v28  ;;  %v348_v41 = vadd.f32 %v6022_v21, %v309_v29  ;;  %v489_v42 = vsel %vm6048_vm8, 0, %v488_v32  ;;  %v509_v43 = vld [vmem:[#allocation2 + $0x68] sm:$0x1]  ;;  %v5118_v52 = vld [vmem:[%s6006_s6 + $0x40] sm:$0xff]   ;;  %v5898_v23 = vld [vmem:[%s7746_s3 + $0x210] sm:$0xff]  }
  0x16   : > { %v1128_v16 = vrot.slane %v1126_v8, 4  ;;  %v1131_v17 = vrot.slane %v1129_v9, 5  ;;  %5363 = vmatprep.subr.bf16.mxu0 %v5817_v4  ;;  %5792 = vmatprep.subr.bf16.mxu1 %v5817_v4  ;;  %v1137_v24 = vrot.slane %v1135_v10, 5  ;;  %v1141_v25 = vrot.slane %v1139_v11, 4  ;;  %490 = vst [vmem:[#allocation2 + $0x14] sm:$0x1] %v489_v42 }
  0x17   : > { %v1147_v26 = vrot.slane %v1145_v12, 5  ;;  %v460_v47 = vsel %vm6037_vm5, 0, %v459_v38  ;;  %v379_v49 = vmax.f32 %v347_v40, 0.0  ;;  %v380_v50 = vmax.f32 %v348_v41, 0.0  ;;  %v462_v57 = vld [vmem:[#allocation2 + $0x6c] sm:$0x1] }
  0x18   : > { %v1132_v27 = vor.u32 %v1131_v17, %v1128_v16  ;;  %v1142_v34 = vor.u32 %v1141_v25, %v1137_v24  ;;  %461 = vst [vmem:[#allocation2 + $0x60] sm:$0x1] %v460_v47  ;;  %v510_v51 = vsel %vm6048_vm8, 0, %v509_v43  ;;  %v323_v54 = vmul.f32 %v4998_v45, %v6017_v20  ;;  %v512_v62 = vld [vmem:[#allocation2 + $0x74] sm:$0x1]  ;;  %v5820_v63 = vld [vmem:[%s7746_s3 + $0x48] sm:$0xff]  }
  0x19   : > { %5364 = vmatpush3.bf16.msra.mxu0 %v5817_v4  ;;  %5800 = vmatpush3.bf16.msra.mxu1 %v5817_v4  ;;  %v361_v55 = vadd.f32 %v6022_v21, %v322_v46  ;;  %511 = vst [vmem:[#allocation2 + $0x68] sm:$0x1] %v510_v51  ;;  %v5001_v56 = vunpack.c.l.bf16 %v5118_v52  ;;  %v4903_v59 = vpack.c.bf16 %v379_v49, %v379_v49  ;;  %v5002_v61 = vunpack.c.h.bf16 %v5118_v52  ;;  %v6076_v4 = vld [vmem:[%s6006_s6 + $0x8] sm:$0xff]   ;;  %v5821_v15 = vld [vmem:[%s7746_s3 + $0x40] sm:$0xff]   ;;  %v6102_v40 = vld [vmem:[%s7746_s3 + $0x38] sm:$0xff]   ;;  %s4560_s26 = sshll.u32 %s7941_s19, 1 }
  0x1a   : > { %v1133_v39 = vrot.slane %v1132_v27, 4  ;;  %5365 = vmatprep.subr.bf16.mxu0 %v5818_v22  ;;  %5793 = vmatprep.subr.bf16.mxu1 %v5818_v22  ;;  %v1143_v44 = vrot.slane %v1142_v34, 4  ;;  %v4904_v60 = vpack.c.bf16 %v380_v50, %v380_v50  ;;  %v362_v0 = vadd.f32 %v6022_v21, %v323_v54  ;;  %v940_v25 = vld [vmem:[#allocation2 + $0xc] sm:$0xf]  ;;  %v441_v42 = vld [vmem:[#allocation2 + $0x18] sm:$0x1]  ;;  %s235_s13 = scalar_lea.vmem %s7748_s5, %s4560_s26 }
  0x1b   : > { %v393_v1 = vmax.f32 %v361_v55, 0.0  ;;  %v324_v2 = vmul.f32 %v5001_v56, %v6017_v20  ;;  %v463_v3 = vsel %vm6037_vm5, 0, %v462_v57  ;;  %v619_v5 = vshrl.u32 %v4903_v59, 16  ;;  %v6113_v47 = vld [vmem:[%s7746_s3 + $0xb8] sm:$0xff]  }
  0x1c   : > { %v1138_v48 = vsel %vm6029_vm3, %v1133_v39, %v1137_v24  ;;  %v1148_v53 = vsel %vm6029_vm3, %v1143_v44, %v1147_v26  ;;  %v622_v6 = vshll.u32 %v4903_v59, 16  ;;  %v627_v8 = vshrl.u32 %v4904_v60, 16  ;;  %464 = vst [vmem:[#allocation2 + $0x6c] sm:$0x1] %v463_v3  ;;  %v5870_v16 = vld [vmem:[%s7746_s3 + $0x178] sm:$0xff]  }
  0x1d   : > { %5366 = vmatpush3.bf16.msra.mxu0 %v5818_v22  ;;  %5801 = vmatpush3.bf16.msra.mxu1 %v5818_v22  ;;  %v4611_v58 = vcombine.low %v1138_v48, %v1148_v53  ;;  %v630_v9 = vshll.u32 %v4904_v60, 16  ;;  %v394_v10 = vmax.f32 %v362_v0, 0.0  ;;  %v4917_v11 = vpack.c.bf16 %v393_v1, %v393_v1  ;;  %v944_v26 = vld [vmem:[#allocation2 + $0x14] sm:$0x1] }
  0x1e   : > { %5367 = vmatprep.subr.bf16.mxu0 %v5819_v33  ;;  %5794 = vmatprep.subr.bf16.mxu1 %v5819_v33  ;;  %v325_v12 = vmul.f32 %v5002_v61, %v6017_v20  ;;  %v363_v14 = vadd.f32 %v6022_v21, %v324_v2  ;;  %v621_v17 = vrot.slane %v619_v5, 7  ;;  %v629_v18 = vrot.slane %v627_v8, 7 }
  0x1f   : > { %5373 = vmatprep.mubr.bf16.mxu0 %v4611_v58  ;;  %v513_v19 = vsel %vm6048_vm8, 0, %v512_v62  ;;  %v4973_v22 = vunpack.c.l.bf16 %v6076_v4  ;;  %v4918_v27 = vpack.c.bf16 %v394_v10, %v394_v10  ;;  %v738_v28 = vshrl.u32 %v4917_v11, 16  ;;  %v989_v46 = vld [vmem:[#allocation2 + $0x60] sm:$0xf] }
  0x20   : > { %v741_v29 = vshll.u32 %v4917_v11, 16  ;;  %v364_v31 = vadd.f32 %v6022_v21, %v325_v12  ;;  %514 = vst [vmem:[#allocation2 + $0x74] sm:$0x1] %v513_v19  ;;  %v624_v32 = vor.u32 %v622_v6, %v621_v17  ;;  %v632_v34 = vor.u32 %v630_v9, %v629_v18  ;;  %v993_v52 = vld [vmem:[#allocation2 + $0x68] sm:$0x1] }
  0x21   : > { %5368 = vmatpush3.bf16.msra.mxu0 %v5819_v33  ;;  %5802 = vmatpush3.bf16.msra.mxu1 %v5819_v33  ;;  %v625_v33 = vrot.slane %v621_v17, 4  ;;  %v634_v35 = vrot.slane %v629_v18, 4  ;;  %v740_v37 = vrot.slane %v738_v28, 7  ;;  %v746_v38 = vshrl.u32 %v4918_v27, 16  ;;  %v491_v62 = vld [vmem:[#allocation2 + $0x20] sm:$0x1] }
  0x22   : > { %5369 = vmatprep.subr.bf16.mxu0 %v5820_v63  ;;  %5795 = vmatprep.subr.bf16.mxu1 %v5820_v63  ;;  %v749_v39 = vshll.u32 %v4918_v27, 16  ;;  %v395_v41 = vmax.f32 %v363_v14, 0.0  ;;  %v941_v44 = vsel %vm6094_vm11, %v624_v32, %v940_v25  ;;  %v396_v48 = vmax.f32 %v364_v31, 0.0  ;;  %v6133_v9 = vld [vmem:[%s6006_s6 + $0x48] sm:$0xff]  }
  0x23   : > { %v633_v43 = vsel %vm6085_vm10, %v625_v33, %v632_v34  ;;  %v945_v45 = vsel %vm6037_vm5, %v634_v35, %v944_v26  ;;  %942 = vst [vmem:[#allocation2 + $0xc] sm:$0xf] %v941_v44  ;;  %v743_v49 = vor.u32 %v741_v29, %v740_v37  ;;  %v744_v50 = vrot.slane %v740_v37, 4  ;;  %v996_v35 = vld [vmem:[#allocation2 + $0x6c] sm:$0xf] }
  0x24   : > { %943 = vst [vmem:[#allocation2 + $0x10] sm:$0xf] %v633_v43  ;;  %946 = vst [vmem:[#allocation2 + $0x14] sm:$0x1] %v945_v45  ;;  %v748_v51 = vrot.slane %v746_v38, 7  ;;  %v4919_v53 = vpack.c.bf16 %v395_v41, %v395_v41  ;;  %v4920_v54 = vpack.c.bf16 %v396_v48, %v396_v48  ;;  %v4974_v55 = vunpack.c.h.bf16 %v6076_v4 }
  0x25   : > { %5370 = vmatpush3.bf16.msra.mxu0 %v5820_v63  ;;  %5803 = vmatpush3.bf16.msra.mxu1 %v5820_v63  ;;  %v310_v56 = vmul.f32 %v4973_v22, %v6017_v20  ;;  %v442_v57 = vsel %vm6037_vm5, 0, %v441_v42  ;;  %v990_v60 = vsel %vm6094_vm11, %v743_v49, %v989_v46  ;;  %v6122_v63 = vld [vmem:[%s6006_s6 + $0x10] sm:$0xff]   ;;  %v492_v11 = vsel %vm6048_vm8, 0, %v491_v62 }
  0x26   : > { %5371 = vmatprep.subr.bf16.mxu0 %v5821_v15  ;;  %5796 = vmatprep.subr.bf16.mxu1 %v5821_v15  ;;  %v751_v58 = vor.u32 %v749_v39, %v748_v51  ;;  %v753_v59 = vrot.slane %v748_v51, 4  ;;  %v755_v61 = vshrl.u32 %v4919_v53, 16  ;;  %443 = vst [vmem:[#allocation2 + $0x18] sm:$0x1] %v442_v57  ;;  %991 = vst [vmem:[#allocation2 + $0x60] sm:$0xf] %v990_v60  ;;  %v4977_v12 = vunpack.c.l.bf16 %v6122_v63 }
  0x27   : > { %v758_v0 = vshll.u32 %v4919_v53, 16  ;;  %v763_v1 = vshrl.u32 %v4920_v54, 16  ;;  %v766_v2 = vshll.u32 %v4920_v54, 16  ;;  %v311_v3 = vmul.f32 %v4974_v55, %v6017_v20  ;;  %493 = vst [vmem:[#allocation2 + $0x20] sm:$0x1] %v492_v11 }
  0x28   : > { %v752_v4 = vsel %vm6085_vm10, %v744_v50, %v751_v58  ;;  %v994_v5 = vsel %vm6037_vm5, %v753_v59, %v993_v52  ;;  %v757_v6 = vrot.slane %v755_v61, 7  ;;  %v349_v8 = vadd.f32 %v6022_v21, %v310_v56  ;;  %v1000_v41 = vld [vmem:[#allocation2 + $0x74] sm:$0x1] }
  0x29   : > { %5372 = vmatpush3.bf16.msra.mxu0 %v5821_v15  ;;  %5804 = vmatpush3.bf16.msra.mxu1 %v5821_v15  ;;  %992 = vst [vmem:[#allocation2 + $0x64] sm:$0xf] %v752_v4  ;;  %995 = vst [vmem:[#allocation2 + $0x68] sm:$0x1] %v994_v5  ;;  %v765_v10 = vrot.slane %v763_v1, 7  ;;  %v350_v17 = vadd.f32 %v6022_v21, %v311_v3  ;;  %v4978_v27 = vunpack.c.h.bf16 %v6122_v63  ;;  %v5005_v29 = vunpack.c.l.bf16 %v6133_v9  ;;  %v5827_v63 = vld [vmem:[%s7746_s3 + $0xa8] sm:$0xff]  }
  0x2a   : > { %5405 = vmatprep.subr.bf16.mxu1 %v6102_v40  ;;  %5453 = vmatprep.subr.bf16.mxu0 %v6113_v47  ;;  %v760_v14 = vor.u32 %v758_v0, %v757_v6  ;;  %v761_v15 = vrot.slane %v757_v6, 4  ;;  %v381_v18 = vmax.f32 %v349_v8, 0.0  ;;  %v1055_v19 = vld [vmem:[#allocation2 + $0xc] sm:$0xf]  ;;  %v6141_v28 = vmul.f32 %v4977_v12, %v6017_v20  ;;  %v5825_v8 = vld [vmem:[%s7746_s3 + $0xb0] sm:$0xff]  }
  0x2b   : > { %v1056_v22 = vld [vmem:[#allocation2 + $0x10] sm:$0xf]  ;;  %v1057_v25 = vld [vmem:[#allocation2 + $0x14] sm:$0x1]  ;;  %v768_v26 = vor.u32 %v766_v2, %v765_v10  ;;  %v1150_v31 = vshrl.u32 %v1055_v19, 16  ;;  %v1153_v32 = vshll.u32 %v1055_v19, 16  ;;  %v5006_v42 = vunpack.c.h.bf16 %v6133_v9 }
  0x2c   : > { %v1159_v33 = vshll.u32 %v1056_v22, 16  ;;  %v1163_v34 = vshrl.u32 %v1056_v22, 16  ;;  %v1169_v37 = vshll.u32 %v1057_v25, 16  ;;  %v770_v39 = vrot.slane %v765_v10, 4 }
  0x2d   : > { %v769_v38 = vsel %vm6085_vm10, %v761_v15, %v768_v26  ;;  %v1152_v43 = vrot.slane %v1150_v31, 4  ;;  %v1155_v44 = vrot.slane %v1153_v32, 5  ;;  %v1076_v48 = vld [vmem:[#allocation2 + $0x60] sm:$0xf]  ;;  %v997_v52 = vsel %vm6094_vm11, %v760_v14, %v996_v35 }
  0x2e   : > { %v1161_v45 = vrot.slane %v1159_v33, 5  ;;  %v1165_v46 = vrot.slane %v1163_v34, 4  ;;  %999 = vst [vmem:[#allocation2 + $0x70] sm:$0xf] %v769_v38  ;;  %v1171_v49 = vrot.slane %v1169_v37, 5  ;;  %v1318_v50 = vshrl.u32 %v1076_v48, 16 }
  0x2f   : > { %v1321_v51 = vshll.u32 %v1076_v48, 16  ;;  %v1156_v53 = vor.u32 %v1155_v44, %v1152_v43  ;;  %998 = vst [vmem:[#allocation2 + $0x6c] sm:$0xf] %v997_v52  ;;  %v1001_v57 = vsel %vm6037_vm5, %v770_v39, %v1000_v41  ;;  %v382_v58 = vmax.f32 %v350_v17, 0.0  ;;  %v947_v39 = vld [vmem:[#allocation2 + $0x18] sm:$0xf] }
  0x30   : > { %v1166_v54 = vor.u32 %v1165_v46, %v1161_v45  ;;  %v1077_v55 = vld [vmem:[#allocation2 + $0x64] sm:$0xf]  ;;  %v1078_v56 = vld [vmem:[#allocation2 + $0x68] sm:$0x1]  ;;  %v1320_v59 = vrot.slane %v1318_v50, 4  ;;  %v4905_v3 = vpack.c.bf16 %v381_v18, %v381_v18  ;;  %v313_v41 = vmul.f32 %v4978_v27, %v6017_v20 }
  0x31   : > { %v1323_v60 = vrot.slane %v1321_v51, 5  ;;  %v1327_v61 = vshll.u32 %v1077_v55, 16  ;;  %v1331_v62 = vshrl.u32 %v1077_v55, 16  ;;  %1002 = vst [vmem:[#allocation2 + $0x74] sm:$0x1] %v1001_v57  ;;  %v1157_v0 = vrot.slane %v1156_v53, 4 }
  0x32   : > { %v1167_v1 = vrot.slane %v1166_v54, 4  ;;  %v1337_v2 = vshll.u32 %v1078_v56, 16  ;;  %v4906_v10 = vpack.c.bf16 %v382_v58, %v382_v58  ;;  %v636_v15 = vshrl.u32 %v4905_v3, 16  ;;  %v444_v43 = vld [vmem:[#allocation2 + $0x24] sm:$0x1] }
  0x33   : > { %v1324_v4 = vor.u32 %v1323_v60, %v1320_v59  ;;  %v1329_v5 = vrot.slane %v1327_v61, 5  ;;  %v1333_v6 = vrot.slane %v1331_v62, 4  ;;  %v1162_v11 = vsel %vm6029_vm3, %v1157_v0, %v1161_v45  ;;  %v494_v54 = vld [vmem:[#allocation2 + $0x2c] sm:$0x1]  ;;  %v951_v0 = vld [vmem:[#allocation2 + $0x20] sm:$0x1] }
  0x34   : > { %v1172_v12 = vsel %vm6029_vm3, %v1167_v1, %v1171_v49  ;;  %v1339_v14 = vrot.slane %v1337_v2, 5  ;;  %v639_v25 = vshll.u32 %v4905_v3, 16  ;;  %v638_v32 = vrot.slane %v636_v15, 7  ;;  %v5824_v15 = vld [vmem:[%s7746_s3 + $0x30] sm:$0xff]  }
  0x35   : > { %v6158_v17 = vcombine.low %v1162_v11, %v1172_v12  ;;  %v1325_v19 = vrot.slane %v1324_v4, 4  ;;  %v1334_v18 = vor.u32 %v1333_v6, %v1329_v5  ;;  %v1080_v22 = vld [vmem:[#allocation2 + $0x70] sm:$0xf]  ;;  %v644_v33 = vshrl.u32 %v4906_v10, 16  ;;  %v465_v6 = vld [vmem:[#allocation2 + $0x78] sm:$0x1] }
  0x36   : > { %v1351_v26 = vshll.u32 %v1080_v22, 16  ;;  %v1355_v31 = vshrl.u32 %v1080_v22, 16  ;;  %v1079_v37 = vld [vmem:[#allocation2 + $0x6c] sm:$0xf]  ;;  %v647_v38 = vshll.u32 %v4906_v10, 16  ;;  %v641_v52 = vor.u32 %v639_v25, %v638_v32 }
  0x37   : > { %5374 = vmatmul.mubr.bf16.vlgmr.msra.gmra.mxu0 %v6158_v17  ;;  %v1330_v34 = vsel %vm6029_vm3, %v1325_v19, %v1329_v5  ;;  %v1335_v35 = vrot.slane %v1334_v18, 4  ;;  %v1342_v45 = vshrl.u32 %v1079_v37, 16  ;;  %v1345_v46 = vshll.u32 %v1079_v37, 16 }
  0x38   : > { %v1081_v44 = vld [vmem:[#allocation2 + $0x74] sm:$0x1]  ;;  %v1353_v48 = vrot.slane %v1351_v26, 5  ;;  %v1357_v49 = vrot.slane %v1355_v31, 4  ;;  %5454 = vmatpush3.bf16.msra.mxu0 %v6113_v47  ;;  %v642_v53 = vrot.slane %v638_v32, 4  ;;  %v646_v59 = vrot.slane %v644_v33, 7 }
  0x39   : > { %v1340_v50 = vsel %vm6029_vm3, %v1335_v35, %v1339_v14  ;;  %v1361_v51 = vshll.u32 %v1081_v44, 16  ;;  %5455 = vmatprep.subr.bf16.mxu0 %v5825_v8  ;;  %v1344_v55 = vrot.slane %v1342_v45, 4  ;;  %v1347_v56 = vrot.slane %v1345_v46, 5  ;;  %v515_v26 = vld [vmem:[#allocation2 + $0x80] sm:$0x1]  ;;  %v5120_v31 = vld [vmem:[%s6006_s6 + $0x50] sm:$0xff]  }
  0x3a   : > { %v6172_v27 = vcombine.low %v1330_v34, %v1340_v50  ;;  %v1358_v57 = vor.u32 %v1357_v49, %v1353_v48  ;;  %v948_v47 = vsel %vm6094_vm11, %v641_v52, %v947_v39  ;;  %v351_v60 = vadd.f32 %v6022_v21, %v6141_v28  ;;  %v5831_v35 = vld [vmem:[%s7746_s3 + $0x98] sm:$0xff]  }
  0x3b   : > { %v1363_v58 = vrot.slane %v1361_v51, 5  ;;  %v1348_v61 = vor.u32 %v1347_v56, %v1344_v55  ;;  %949 = vst [vmem:[#allocation2 + $0x18] sm:$0xf] %v948_v47  ;;  %v352_v1 = vadd.f32 %v6022_v21, %v313_v41  ;;  %v445_v2 = vsel %vm6037_vm5, 0, %v444_v43 }
  0x3c   : > { %7796 = vst [vmem:[#allocation3_spill] sm:$0xff] %v6172_v27  ;;  %5389 = vmatprep.mubr.bf16.mxu1 %v6172_v27  ;;  %v1359_v62 = vrot.slane %v1358_v57, 4  ;;  %5456 = vmatpush3.bf16.msra.mxu0 %v5825_v8  ;;  %v649_v3 = vor.u32 %v647_v38, %v646_v59  ;;  %v651_v4 = vrot.slane %v646_v59, 4  ;;  %v383_v5 = vmax.f32 %v351_v60, 0.0  ;;  %446 = vst [vmem:[#allocation2 + $0x24] sm:$0x1] %v445_v2 }
  0x3d   : > { %v495_v28 = vsel %vm6048_vm8, 0, %v494_v54  ;;  %5457 = vmatprep.subr.bf16.mxu0 %v5827_v63  ;;  %v5829_v8 = vld [vmem:[%s7746_s3 + $0xa0] sm:$0xff]   ;;  %v1349_v10 = vrot.slane %v1348_v61, 4  ;;  %v384_v12 = vmax.f32 %v352_v1, 0.0  ;;  %v326_v14 = vmul.f32 %v5005_v29, %v6017_v20  ;;  %v5826_v59 = vld [vmem:[%s7746_s3 + $0x28] sm:$0xff]  }
  0x3e   : > { %v1364_v11 = vsel %vm6029_vm3, %v1359_v62, %v1363_v58  ;;  %496 = vst [vmem:[#allocation2 + $0x2c] sm:$0x1] %v495_v28  ;;  %v650_v19 = vsel %vm6085_vm10, %v642_v53, %v649_v3  ;;  %v952_v18 = vsel %vm6037_vm5, %v651_v4, %v951_v0  ;;  %v4907_v22 = vpack.c.bf16 %v383_v5, %v383_v5 }
  0x3f   : > { %v327_v25 = vmul.f32 %v5006_v42, %v6017_v20  ;;  %v1354_v29 = vsel %vm6029_vm3, %v1349_v10, %v1353_v48  ;;  %950 = vst [vmem:[#allocation2 + $0x1c] sm:$0xf] %v650_v19  ;;  %953 = vst [vmem:[#allocation2 + $0x20] sm:$0x1] %v952_v18  ;;  %v4908_v32 = vpack.c.bf16 %v384_v12, %v384_v12  ;;  %v466_v34 = vsel %vm6037_vm5, 0, %v465_v6  ;;  %v6231_v6 = vld [vmem:[%s7746_s3 + $0x20] sm:$0xff]  }
  0x40   : > { %v365_v33 = vadd.f32 %v6022_v21, %v326_v14  ;;  %5458 = vmatpush3.bf16.msra.mxu0 %v5827_v63  ;;  %v6211_v9 = vcombine.low %v1354_v29, %v1364_v11  ;;  %v653_v42 = vshrl.u32 %v4907_v22, 16  ;;  %v656_v37 = vshll.u32 %v4907_v22, 16  ;;  %467 = vst [vmem:[#allocation2 + $0x78] sm:$0x1] %v466_v34  ;;  %v468_v19 = vld [vmem:[#allocation2 + $0x84] sm:$0x1] }
  0x41   : > { %v366_v38 = vadd.f32 %v6022_v21, %v327_v25  ;;  %5459 = vmatprep.subr.bf16.mxu0 %v5829_v8  ;;  %v661_v39 = vshrl.u32 %v4908_v32, 16  ;;  %v664_v41 = vshll.u32 %v4908_v32, 16  ;;  %v516_v44 = vsel %vm6048_vm8, 0, %v515_v26  ;;  %v6236_v18 = vld [vmem:[%s7746_s3 + $0x88] sm:$0xff]  }
  0x42   : > { %7797 = vst [vmem:[#allocation4_spill] sm:$0xff] %v6211_v9  ;;  %v397_v43 = vmax.f32 %v365_v33, 0.0  ;;  %5390 = vmatmul.mubr.bf16.vlgmr.msra.gmra.mxu1 %v6211_v9  ;;  %v1058_v45 = vld [vmem:[#allocation2 + $0x18] sm:$0xf]  ;;  %v655_v46 = vrot.slane %v653_v42, 7  ;;  %v5009_v49 = vunpack.c.l.bf16 %v5120_v31  ;;  %v5010_v50 = vunpack.c.h.bf16 %v5120_v31 }
  0x43   : > { %v398_v48 = vmax.f32 %v366_v38, 0.0  ;;  %517 = vst [vmem:[#allocation2 + $0x80] sm:$0x1] %v516_v44  ;;  %5406 = vmatpush3.bf16.msra.mxu1 %v6102_v40  ;;  %v1174_v51 = vshrl.u32 %v1058_v45, 16  ;;  %v1177_v52 = vshll.u32 %v1058_v45, 16  ;;  %v663_v53 = vrot.slane %v661_v39, 7 }
  0x44   : > { %v954_v54 = vld [vmem:[#allocation2 + $0x24] sm:$0xf]  ;;  %v4921_v63 = vpack.c.bf16 %v397_v43, %v397_v43  ;;  %5460 = vmatpush3.bf16.msra.mxu0 %v5829_v8  ;;  %5407 = vmatprep.subr.bf16.mxu1 %v5824_v15  ;;  %v658_v55 = vor.u32 %v656_v37, %v655_v46  ;;  %v659_v56 = vrot.slane %v655_v46, 4  ;;  %v328_v47 = vmul.f32 %v5009_v49, %v6017_v20  ;;  %v5833_v40 = vld [vmem:[%s7746_s3 + $0x90] sm:$0xff]   ;;  %v518_v31 = vld [vmem:[#allocation2 + $0x8c] sm:$0x1] }
  0x45   : > { %v958_v57 = vld [vmem:[#allocation2 + $0x2c] sm:$0x1]  ;;  %v4922_v58 = vpack.c.bf16 %v398_v48, %v398_v48  ;;  %5461 = vmatprep.subr.bf16.mxu0 %v5831_v35  ;;  %v1176_v60 = vrot.slane %v1174_v51, 4  ;;  %v1179_v61 = vrot.slane %v1177_v52, 5  ;;  %v666_v62 = vor.u32 %v664_v41, %v663_v53  ;;  %v5113_v41 = vld [vmem:[%s6006_s6 + $0x18] sm:$0xff]  }
  0x46   : > { %v668_v0 = vrot.slane %v663_v53, 4  ;;  %v1059_v1 = vld [vmem:[#allocation2 + $0x1c] sm:$0xf]  ;;  %v1060_v2 = vld [vmem:[#allocation2 + $0x20] sm:$0x1]  ;;  %v955_v3 = vsel %vm6094_vm11, %v658_v55, %v954_v54  ;;  %v772_v4 = vshrl.u32 %v4921_v63, 16  ;;  %v329_v28 = vmul.f32 %v5010_v50, %v6017_v20 }
  0x47   : > { %v775_v5 = vshll.u32 %v4921_v63, 16  ;;  %5408 = vmatpush3.bf16.msra.mxu1 %v5824_v15  ;;  %v1180_v8 = vor.u32 %v1179_v61, %v1176_v60  ;;  %v1183_v10 = vshll.u32 %v1059_v1, 16  ;;  %v1187_v11 = vshrl.u32 %v1059_v1, 16  ;;  %956 = vst [vmem:[#allocation2 + $0x24] sm:$0xf] %v955_v3  ;;  %v5830_v52 = vld [vmem:[%s7746_s3 + $0x18] sm:$0xff]  }
  0x48   : > { %v1193_v12 = vshll.u32 %v1060_v2, 16  ;;  %v1003_v14 = vld [vmem:[#allocation2 + $0x78] sm:$0xf]  ;;  %5462 = vmatpush3.bf16.msra.mxu0 %v5831_v35  ;;  %v667_v22 = vsel %vm6085_vm10, %v659_v56, %v666_v62  ;;  %v959_v25 = vsel %vm6037_vm5, %v668_v0, %v958_v57  ;;  %v774_v15 = vrot.slane %v772_v4, 7  ;;  %5409 = vmatprep.subr.bf16.mxu1 %v5826_v59  ;;  %v5837_v53 = vld [vmem:[%s7746_s3 + $0x80] sm:$0xff]   ;;  %v5832_v60 = vld [vmem:[%s7746_s3 + $0x10] sm:$0xff]  }
  0x49   : > { %v780_v26 = vshrl.u32 %v4922_v58, 16  ;;  %5463 = vmatprep.subr.bf16.mxu0 %v5833_v40  ;;  %v1181_v29 = vrot.slane %v1180_v8, 4  ;;  %v1185_v32 = vrot.slane %v1183_v10, 5  ;;  %v1189_v33 = vrot.slane %v1187_v11, 4  ;;  %957 = vst [vmem:[#allocation2 + $0x28] sm:$0xf] %v667_v22 }
  0x4a   : > { %v1195_v34 = vrot.slane %v1193_v12, 5  ;;  %960 = vst [vmem:[#allocation2 + $0x2c] sm:$0x1] %v959_v25  ;;  %v1007_v35 = vld [vmem:[#allocation2 + $0x80] sm:$0x1]  ;;  %v777_v42 = vor.u32 %v775_v5, %v774_v15  ;;  %v778_v37 = vrot.slane %v774_v15, 4  ;;  %v367_v45 = vadd.f32 %v6022_v21, %v328_v47 }
  0x4b   : > { %v782_v38 = vrot.slane %v780_v26, 7  ;;  %v783_v39 = vshll.u32 %v4922_v58, 16  ;;  %v1186_v43 = vsel %vm6029_vm3, %v1181_v29, %v1185_v32  ;;  %v1190_v44 = vor.u32 %v1189_v33, %v1185_v32  ;;  %5410 = vmatpush3.bf16.msra.mxu1 %v5826_v59  ;;  %v5841_v10 = vld [vmem:[%s7746_s3 + $0x138] sm:$0xff]  }
  0x4c   : > { %v368_v46 = vadd.f32 %v6022_v21, %v329_v28  ;;  %v1004_v50 = vsel %vm6094_vm11, %v777_v42, %v1003_v14  ;;  %v469_v51 = vsel %vm6037_vm5, 0, %v468_v19  ;;  %5411 = vmatprep.subr.bf16.mxu1 %v6231_v6  ;;  %5464 = vmatpush3.bf16.msra.mxu0 %v5833_v40  ;;  %v399_v63 = vmax.f32 %v367_v45, 0.0 }
  0x4d   : > { %v785_v48 = vor.u32 %v783_v39, %v782_v38  ;;  %v787_v49 = vrot.slane %v782_v38, 4  ;;  %v1191_v54 = vrot.slane %v1190_v44, 4  ;;  %1005 = vst [vmem:[#allocation2 + $0x78] sm:$0xf] %v1004_v50  ;;  %470 = vst [vmem:[#allocation2 + $0x84] sm:$0x1] %v469_v51  ;;  %5465 = vmatprep.subr.bf16.mxu0 %v6236_v18  ;;  %v4981_v47 = vunpack.c.l.bf16 %v5113_v41 }
  0x4e   : > { %v400_v55 = vmax.f32 %v368_v46, 0.0  ;;  %v519_v56 = vsel %vm6048_vm8, 0, %v518_v31  ;;  %v1061_v57 = vld [vmem:[#allocation2 + $0x24] sm:$0xf]  ;;  %v4982_v40 = vunpack.c.h.bf16 %v5113_v41  ;;  %v4923_v1 = vpack.c.bf16 %v399_v63, %v399_v63 }
  0x4f   : > { %v786_v58 = vsel %vm6085_vm10, %v778_v37, %v785_v48  ;;  %v1008_v59 = vsel %vm6037_vm5, %v787_v49, %v1007_v35  ;;  %520 = vst [vmem:[#allocation2 + $0x8c] sm:$0x1] %v519_v56  ;;  %v1196_v61 = vsel %vm6029_vm3, %v1191_v54, %v1195_v34  ;;  %v1198_v62 = vshrl.u32 %v1061_v57, 16  ;;  %5412 = vmatpush3.bf16.msra.mxu1 %v6231_v6  ;;  %v497_v56 = vld [vmem:[#allocation2 + $0x38] sm:$0x1] }
  0x50   : > { %v1201_v0 = vshll.u32 %v1061_v57, 16  ;;  %1006 = vst [vmem:[#allocation2 + $0x7c] sm:$0xf] %v786_v58  ;;  %1009 = vst [vmem:[#allocation2 + $0x80] sm:$0x1] %v1008_v59  ;;  %v6271_v2 = vcombine.low %v1186_v43, %v1196_v61  ;;  %v4924_v5 = vpack.c.bf16 %v400_v55, %v400_v55  ;;  %v314_v28 = vmul.f32 %v4981_v47, %v6017_v20  ;;  %v5114_v57 = vld [vmem:[%s6006_s6 + $0x20] sm:$0xff]  }
  0x51   : > { %v1062_v3 = vld [vmem:[#allocation2 + $0x28] sm:$0xf]  ;;  %v1063_v4 = vld [vmem:[#allocation2 + $0x2c] sm:$0x1]  ;;  %v6275_v8 = vmul.f32 %v4982_v40, %v6017_v20  ;;  %5413 = vmatprep.subr.bf16.mxu1 %v5830_v52  ;;  %v1200_v11 = vrot.slane %v1198_v62, 4  ;;  %5466 = vmatpush3.bf16.msra.mxu0 %v6236_v18  ;;  %v789_v22 = vshrl.u32 %v4923_v1, 16 }
  0x52   : > { %v1203_v12 = vrot.slane %v1201_v0, 5  ;;  %v1207_v14 = vshll.u32 %v1062_v3, 16  ;;  %v1211_v19 = vshrl.u32 %v1062_v3, 16  ;;  %5377 = vmatprep.mubr.bf16.mxu0 %v6271_v2  ;;  %v1217_v6 = vshll.u32 %v1063_v4, 16  ;;  %5467 = vmatprep.subr.bf16.mxu0 %v5837_v53  ;;  %v5834_v18 = vld [vmem:[%s7746_s3 + $0x8] sm:$0xff]   ;;  %v5836_v61 = vld [vmem:[%s7746_s3] sm:$0xff]  }
  0x53   : > { %v792_v25 = vshll.u32 %v4923_v1, 16  ;;  %v797_v15 = vshrl.u32 %v4924_v5, 16  ;;  %v800_v29 = vshll.u32 %v4924_v5, 16  ;;  %5414 = vmatpush3.bf16.msra.mxu1 %v5830_v52  ;;  %v791_v34 = vrot.slane %v789_v22, 7  ;;  %v450_v40 = vld [vmem:[#allocation2 + $0x3c] sm:$0x1] }
  0x54   : > { %v1204_v20 = vor.u32 %v1203_v12, %v1200_v11  ;;  %v1209_v26 = vrot.slane %v1207_v14, 5  ;;  %v1213_v31 = vrot.slane %v1211_v19, 4  ;;  %v1219_v32 = vrot.slane %v1217_v6, 5  ;;  %v1082_v33 = vld [vmem:[#allocation2 + $0x78] sm:$0xf]  ;;  %5415 = vmatprep.subr.bf16.mxu1 %v5832_v60 }
  0x55   : > { %v799_v35 = vrot.slane %v797_v15, 7  ;;  %v6283_v42 = vadd.f32 %v6022_v21, %v314_v28  ;;  %v1366_v39 = vshrl.u32 %v1082_v33, 16  ;;  %v1369_v41 = vshll.u32 %v1082_v33, 16  ;;  %v1010_v43 = vld [vmem:[#allocation2 + $0x84] sm:$0xf]  ;;  %5468 = vmatpush3.bf16.msra.mxu0 %v5837_v53  ;;  %v5121_v22 = vld [vmem:[%s6006_s6 + $0x58] sm:$0xff]  }
  0x56   : > { %v1205_v37 = vrot.slane %v1204_v20, 4  ;;  %v1214_v38 = vor.u32 %v1213_v31, %v1209_v26  ;;  %v794_v46 = vor.u32 %v792_v25, %v791_v34  ;;  %v795_v48 = vrot.slane %v791_v34, 4  ;;  %v447_v21 = vld [vmem:[#allocation2 + $0x30] sm:$0x1]  ;;  %5549 = vmatprep.subr.bf16.mxu0 %v5841_v10  ;;  %v1014_v55 = vld [vmem:[#allocation2 + $0x8c] sm:$0x1] }
  0x57   : > { %v1083_v44 = vld [vmem:[#allocation2 + $0x7c] sm:$0xf]  ;;  %v1084_v45 = vld [vmem:[#allocation2 + $0x80] sm:$0x1]  ;;  %v802_v49 = vor.u32 %v800_v29, %v799_v35  ;;  %v804_v50 = vrot.slane %v799_v35, 4  ;;  %v1368_v54 = vrot.slane %v1366_v39, 4  ;;  %5416 = vmatpush3.bf16.msra.mxu1 %v5832_v60  ;;  %v4985_v20 = vunpack.c.l.bf16 %v5114_v57 }
  0x58   : > { %v1210_v51 = vsel %vm6029_vm3, %v1205_v37, %v1209_v26  ;;  %v1215_v52 = vrot.slane %v1214_v38, 4  ;;  %v1371_v63 = vrot.slane %v1369_v41, 5  ;;  %v1375_v58 = vshll.u32 %v1083_v44, 16  ;;  %5417 = vmatprep.subr.bf16.mxu1 %v5834_v18  ;;  %v500_v3 = vld [vmem:[#allocation2 + $0x44] sm:$0x1] }
  0x59   : > { %v1379_v53 = vshrl.u32 %v1083_v44, 16  ;;  %v1385_v59 = vshll.u32 %v1084_v45, 16  ;;  %v803_v47 = vsel %vm6085_vm10, %v795_v48, %v802_v49  ;;  %v1011_v60 = vsel %vm6094_vm11, %v794_v46, %v1010_v43  ;;  %v6307_v12 = vld [vmem:[%s7745_s2] ss:$0 sm:$0xff] }
  0x5a   : > { %v1220_v62 = vsel %vm6029_vm3, %v1215_v52, %v1219_v32  ;;  %v1372_v0 = vor.u32 %v1371_v63, %v1368_v54  ;;  %1013 = vst [vmem:[#allocation2 + $0x88] sm:$0xf] %v803_v47  ;;  %v1015_v1 = vsel %vm6037_vm5, %v804_v50, %v1014_v55  ;;  %v1377_v5 = vrot.slane %v1375_v58, 5  ;;  %1012 = vst [vmem:[#allocation2 + $0x84] sm:$0xf] %v1011_v60 }
  0x5b   : > { %v6302_v4 = vcombine.low %v1210_v51, %v1220_v62  ;;  %v1381_v28 = vrot.slane %v1379_v53, 4  ;;  %v1387_v10 = vrot.slane %v1385_v59, 5  ;;  %1016 = vst [vmem:[#allocation2 + $0x8c] sm:$0x1] %v1015_v1  ;;  %v354_v14 = vadd.f32 %v6307_v12, %v6275_v8  ;;  %5418 = vmatpush3.bf16.msra.mxu1 %v5834_v18  ;;  %v5839_v8 = vld [vmem:[%s7746_s3 + $0xf8] sm:$0xff]  }
  0x5c   : > { %v1373_v11 = vrot.slane %v1372_v0, 4  ;;  %v385_v19 = vmax.f32 %v6283_v42, 0.0  ;;  %v448_v6 = vsel %vm6037_vm5, 0, %v447_v21  ;;  %v498_v15 = vsel %vm6048_vm8, 0, %v497_v56  ;;  %5419 = vmatprep.subr.bf16.mxu1 %v5836_v61  ;;  %v6328_v35 = vld [vmem:[%s7744_s1] ss:$0 sm:$0xff] }
  0x5d   : > { %5378 = vmatmul.mubr.bf16.gmra.mxu0 %v6302_v4  ;;  %v1382_v25 = vor.u32 %v1381_v28, %v1377_v5  ;;  %449 = vst [vmem:[#allocation2 + $0x30] sm:$0x1] %v448_v6  ;;  %v4986_v26 = vunpack.c.h.bf16 %v5114_v57  ;;  %v386_v29 = vmax.f32 %v354_v14, 0.0  ;;  %499 = vst [vmem:[#allocation2 + $0x38] sm:$0x1] %v498_v15  ;;  %v451_v33 = vsel %vm6037_vm5, 0, %v450_v40 }
  0x5e   : > { %v1378_v31 = vsel %vm6029_vm3, %v1373_v11, %v1377_v5  ;;  %v4909_v32 = vpack.c.bf16 %v385_v19, %v385_v19  ;;  %v316_v42 = vmul.f32 %v6328_v35, %v4985_v20  ;;  %452 = vst [vmem:[#allocation2 + $0x3c] sm:$0x1] %v451_v33  ;;  %v501_v37 = vsel %vm6048_vm8, 0, %v500_v3 }
  0x5f   : > { %v1383_v34 = vrot.slane %v1382_v25, 4  ;;  %v317_v18 = vmul.f32 %v6328_v35, %v4986_v26  ;;  %v4910_v38 = vpack.c.bf16 %v386_v29, %v386_v29  ;;  %502 = vst [vmem:[#allocation2 + $0x44] sm:$0x1] %v501_v37  ;;  %v5013_v43 = vunpack.c.l.bf16 %v5121_v22  ;;  %5420 = vmatpush3.bf16.msra.mxu1 %v5836_v61 }
  0x60   : > { %v670_v39 = vshrl.u32 %v4909_v32, 16  ;;  %v673_v41 = vshll.u32 %v4909_v32, 16  ;;  %v355_v46 = vadd.f32 %v6307_v12, %v316_v42  ;;  %v5014_v49 = vunpack.c.h.bf16 %v5121_v22  ;;  %5501 = vmatprep.subr.bf16.mxu1 %v5839_v8  ;;  %v471_v8 = vld [vmem:[#allocation2 + $0x90] sm:$0x1] }
  0x61   : > { %v1388_v44 = vsel %vm6029_vm3, %v1383_v34, %v1387_v10  ;;  %v1086_v45 = vld [vmem:[#allocation2 + $0x88] sm:$0xf]  ;;  %v356_v48 = vadd.f32 %v6307_v12, %v317_v18  ;;  %v1085_v21 = vld [vmem:[#allocation2 + $0x84] sm:$0xf]  ;;  %v330_v63 = vmul.f32 %v6328_v35, %v5013_v43  ;;  %v678_v47 = vshrl.u32 %v4910_v38, 16 }
  0x62   : > { %v6338_v50 = vcombine.low %v1378_v31, %v1388_v44  ;;  %v1087_v51 = vld [vmem:[#allocation2 + $0x8c] sm:$0x1]  ;;  %v1399_v52 = vshll.u32 %v1086_v45, 16  ;;  %v1403_v54 = vshrl.u32 %v1086_v45, 16  ;;  %v1390_v55 = vshrl.u32 %v1085_v21, 16 }
  0x63   : > { %v1393_v56 = vshll.u32 %v1085_v21, 16  ;;  %v1409_v57 = vshll.u32 %v1087_v51, 16  ;;  %v672_v58 = vrot.slane %v670_v39, 7  ;;  %v681_v40 = vshll.u32 %v4910_v38, 16  ;;  %v521_v31 = vld [vmem:[#allocation2 + $0x98] sm:$0x1] }
  0x64   : > { %7798 = vst [vmem:[#allocation5_spill] sm:$0xff] %v6338_v50  ;;  %5393 = vmatprep.mubr.bf16.mxu1 %v6338_v50  ;;  %v1401_v53 = vrot.slane %v1399_v52, 5  ;;  %v1405_v59 = vrot.slane %v1403_v54, 4  ;;  %v961_v61 = vld [vmem:[#allocation2 + $0x30] sm:$0xf]  ;;  %v1392_v62 = vrot.slane %v1390_v55, 4  ;;  %v331_v22 = vmul.f32 %v6328_v35, %v5014_v49 }
  0x65   : > { %v1395_v0 = vrot.slane %v1393_v56, 5  ;;  %v1411_v60 = vrot.slane %v1409_v57, 5  ;;  %v675_v1 = vor.u32 %v673_v41, %v672_v58  ;;  %v676_v5 = vrot.slane %v672_v58, 4  ;;  %v965_v19 = vld [vmem:[#allocation2 + $0x38] sm:$0x1]  ;;  %v5122_v39 = vld [vmem:[%s6006_s6 + $0x60] sm:$0xff]  }
  0x66   : > { %v1406_v3 = vor.u32 %v1405_v59, %v1401_v53  ;;  %v680_v28 = vrot.slane %v678_v47, 7  ;;  %v387_v10 = vmax.f32 %v355_v46, 0.0  ;;  %v388_v6 = vmax.f32 %v356_v48, 0.0  ;;  %v968_v46 = vld [vmem:[#allocation2 + $0x3c] sm:$0xf] }
  0x67   : > { %v1396_v11 = vor.u32 %v1395_v0, %v1392_v62  ;;  %v962_v14 = vsel %vm6094_vm11, %v675_v1, %v961_v61  ;;  %v369_v33 = vadd.f32 %v6307_v12, %v330_v63  ;;  %v370_v34 = vadd.f32 %v6307_v12, %v331_v22  ;;  %v972_v21 = vld [vmem:[#allocation2 + $0x44] sm:$0x1] }
  0x68   : > { %v1407_v25 = vrot.slane %v1406_v3, 4  ;;  %v683_v15 = vor.u32 %v681_v40, %v680_v28  ;;  %v685_v20 = vrot.slane %v680_v28, 4  ;;  %963 = vst [vmem:[#allocation2 + $0x30] sm:$0xf] %v962_v14  ;;  %v4911_v26 = vpack.c.bf16 %v387_v10, %v387_v10 }
  0x69   : > { %v1397_v29 = vrot.slane %v1396_v11, 4  ;;  %v4912_v32 = vpack.c.bf16 %v388_v6, %v388_v6  ;;  %v401_v51 = vmax.f32 %v369_v33, 0.0  ;;  %v402_v52 = vmax.f32 %v370_v34, 0.0 }
  0x6a   : > { %v1412_v42 = vsel %vm6029_vm3, %v1407_v25, %v1411_v60  ;;  %v684_v18 = vsel %vm6085_vm10, %v676_v5, %v683_v15  ;;  %v966_v37 = vsel %vm6037_vm5, %v685_v20, %v965_v19  ;;  %v687_v38 = vshrl.u32 %v4911_v26, 16 }
  0x6b   : > { %v1402_v41 = vsel %vm6029_vm3, %v1397_v29, %v1401_v53  ;;  %964 = vst [vmem:[#allocation2 + $0x34] sm:$0xf] %v684_v18  ;;  %967 = vst [vmem:[#allocation2 + $0x38] sm:$0x1] %v966_v37  ;;  %v690_v43 = vshll.u32 %v4911_v26, 16  ;;  %v695_v44 = vshrl.u32 %v4912_v32, 16  ;;  %v5017_v56 = vunpack.c.l.bf16 %v5122_v39 }
  0x6c   : > { %v698_v45 = vshll.u32 %v4912_v32, 16  ;;  %v6356_v48 = vcombine.low %v1402_v41, %v1412_v42  ;;  %v689_v49 = vrot.slane %v687_v38, 7  ;;  %v472_v63 = vsel %vm6037_vm5, 0, %v471_v8  ;;  %v474_v18 = vld [vmem:[#allocation2 + $0x9c] sm:$0x1] }
  0x6d   : > { %v697_v54 = vrot.slane %v695_v44, 7  ;;  %v522_v55 = vsel %vm6048_vm8, 0, %v521_v31  ;;  %473 = vst [vmem:[#allocation2 + $0x90] sm:$0x1] %v472_v63  ;;  %v4925_v53 = vpack.c.bf16 %v401_v51, %v401_v51  ;;  %v4926_v59 = vpack.c.bf16 %v402_v52, %v402_v52  ;;  %v524_v51 = vld [vmem:[#allocation2 + $0xa4] sm:$0x1] }
  0x6e   : > { %7799 = vst [vmem:[#allocation6_spill] sm:$0xff] %v6356_v48  ;;  %5394 = vmatmul.mubr.bf16.gmra.mxu1 %v6356_v48  ;;  %v692_v57 = vor.u32 %v690_v43, %v689_v49  ;;  %v693_v58 = vrot.slane %v689_v49, 4  ;;  %523 = vst [vmem:[#allocation2 + $0x98] sm:$0x1] %v522_v55  ;;  %v5018_v62 = vunpack.c.h.bf16 %v5122_v39  ;;  %v332_v0 = vmul.f32 %v6328_v35, %v5017_v56 }
  0x6f   : > { %v6363_v47 = vld [vmem:[#allocation2 + $0x30] sm:$0xf]  ;;  %v700_v40 = vor.u32 %v698_v45, %v697_v54  ;;  %v702_v61 = vrot.slane %v697_v54, 4  ;;  %v806_v5 = vshrl.u32 %v4925_v53, 16  ;;  %v809_v11 = vshll.u32 %v4925_v53, 16 }
  0x70   : > { %v1222_v60 = vshrl.u32 %v6363_v47, 16  ;;  %v1225_v1 = vshll.u32 %v6363_v47, 16  ;;  %v969_v3 = vsel %vm6094_vm11, %v692_v57, %v968_v46  ;;  %v814_v14 = vshrl.u32 %v4926_v59, 16 }
  0x71   : > { %v701_v28 = vsel %vm6085_vm10, %v693_v58, %v700_v40  ;;  %970 = vst [vmem:[#allocation2 + $0x3c] sm:$0xf] %v969_v3  ;;  %v973_v10 = vsel %vm6037_vm5, %v702_v61, %v972_v21  ;;  %v333_v15 = vmul.f32 %v6328_v35, %v5018_v62  ;;  %v371_v20 = vadd.f32 %v6307_v12, %v332_v0 }
  0x72   : > { %v6374_v19 = vld [vmem:[#allocation2 + $0x34] sm:$0xf]  ;;  %v6376_v6 = vld [vmem:[#allocation2 + $0x38] sm:$0x1]  ;;  %v1224_v22 = vrot.slane %v1222_v60, 4  ;;  %v1227_v25 = vrot.slane %v1225_v1, 5 }
  0x73   : > { %971 = vst [vmem:[#allocation2 + $0x40] sm:$0xf] %v701_v28  ;;  %974 = vst [vmem:[#allocation2 + $0x44] sm:$0x1] %v973_v10  ;;  %v1231_v26 = vshll.u32 %v6374_v19, 16  ;;  %v1235_v8 = vshrl.u32 %v6374_v19, 16  ;;  %v372_v42 = vadd.f32 %v6307_v12, %v333_v15 }
  0x74   : > { %v1241_v31 = vshll.u32 %v6376_v6, 16  ;;  %v808_v29 = vrot.slane %v806_v5, 7  ;;  %v1228_v32 = vor.u32 %v1227_v25, %v1224_v22  ;;  %v816_v33 = vrot.slane %v814_v14, 7  ;;  %v1017_v43 = vld [vmem:[#allocation2 + $0x90] sm:$0xf]  ;;  %v5115_v15 = vld [vmem:[%s6006_s6 + $0x28] sm:$0xff]  }
  0x75   : > { %v817_v34 = vshll.u32 %v4926_v59, 16  ;;  %v1233_v37 = vrot.slane %v1231_v26, 5  ;;  %v1237_v38 = vrot.slane %v1235_v8, 4  ;;  %v1021_v21 = vld [vmem:[#allocation2 + $0x98] sm:$0x1]  ;;  %v403_v63 = vmax.f32 %v371_v20, 0.0 }
  0x76   : > { %v1243_v39 = vrot.slane %v1241_v31, 5  ;;  %v811_v41 = vor.u32 %v809_v11, %v808_v29  ;;  %v1229_v44 = vrot.slane %v1228_v32, 4  ;;  %v812_v45 = vrot.slane %v808_v29, 4 }
  0x77   : > { %v819_v46 = vor.u32 %v817_v34, %v816_v33  ;;  %v821_v49 = vrot.slane %v816_v33, 4  ;;  %v1238_v52 = vor.u32 %v1237_v38, %v1233_v37  ;;  %v404_v55 = vmax.f32 %v372_v42, 0.0  ;;  %v6413_v42 = vld [vmem:[%s6006_s6 + $0x30] sm:$0xff]  }
  0x78   : > { %v1018_v54 = vsel %vm6094_vm11, %v811_v41, %v1017_v43  ;;  %v1234_v56 = vsel %vm6029_vm3, %v1229_v44, %v1233_v37  ;;  %v6388_v57 = vld [vmem:[#allocation2 + $0x3c] sm:$0xf]  ;;  %v475_v59 = vsel %vm6037_vm5, 0, %v474_v18  ;;  %v4927_v60 = vpack.c.bf16 %v403_v63, %v403_v63 }
  0x79   : > { %v820_v58 = vsel %vm6085_vm10, %v812_v45, %v819_v46  ;;  %1019 = vst [vmem:[#allocation2 + $0x90] sm:$0xf] %v1018_v54  ;;  %v1022_v53 = vsel %vm6037_vm5, %v821_v49, %v1021_v21  ;;  %v1239_v40 = vrot.slane %v1238_v52, 4  ;;  %v1246_v0 = vshrl.u32 %v6388_v57, 16  ;;  %476 = vst [vmem:[#allocation2 + $0x9c] sm:$0x1] %v475_v59 }
  0x7a   : > { %v6396_v61 = vld [vmem:[#allocation2 + $0x40] sm:$0xf]  ;;  %v6398_v62 = vld [vmem:[#allocation2 + $0x44] sm:$0x1]  ;;  %1020 = vst [vmem:[#allocation2 + $0x94] sm:$0xf] %v820_v58  ;;  %v4928_v1 = vpack.c.bf16 %v404_v55, %v404_v55  ;;  %v4990_v46 = vunpack.c.h.bf16 %v5115_v15  ;;  %v4993_v63 = vunpack.c.l.bf16 %v6413_v42 }
  0x7b   : > { %1023 = vst [vmem:[#allocation2 + $0x98] sm:$0x1] %v1022_v53  ;;  %v1249_v3 = vshll.u32 %v6388_v57, 16  ;;  %v1255_v5 = vshll.u32 %v6396_v61, 16  ;;  %v1259_v28 = vshrl.u32 %v6396_v61, 16  ;;  %v1265_v10 = vshll.u32 %v6398_v62, 16 }
  0x7c   : > { %v1244_v11 = vsel %vm6029_vm3, %v1239_v40, %v1243_v39  ;;  %v1248_v14 = vrot.slane %v1246_v0, 4  ;;  %v525_v22 = vsel %vm6048_vm8, 0, %v524_v51  ;;  %v823_v25 = vshrl.u32 %v4927_v60, 16  ;;  %v453_v40 = vld [vmem:[#allocation2 + $0x48] sm:$0x1] }
  0x7d   : > { %v6410_v20 = vcombine.low %v1234_v56, %v1244_v11  ;;  %v1251_v26 = vrot.slane %v1249_v3, 5  ;;  %v1257_v8 = vrot.slane %v1255_v5, 5  ;;  %v1261_v31 = vrot.slane %v1259_v28, 4  ;;  %526 = vst [vmem:[#allocation2 + $0xa4] sm:$0x1] %v525_v22 }
  0x7e   : > { %v1267_v29 = vrot.slane %v1265_v10, 5  ;;  %v825_v32 = vrot.slane %v823_v25, 7  ;;  %v826_v33 = vshll.u32 %v4927_v60, 16  ;;  %v831_v34 = vshrl.u32 %v4928_v1, 16  ;;  %v503_v0 = vld [vmem:[#allocation2 + $0x50] sm:$0x1] }
  0x7f   : > { %5381 = vmatprep.mubr.bf16.mxu0 %v6410_v20  ;;  %v1252_v18 = vor.u32 %v1251_v26, %v1248_v14  ;;  %v1262_v37 = vor.u32 %v1261_v31, %v1257_v8  ;;  %v834_v38 = vshll.u32 %v4928_v1, 16  ;;  %v4989_v39 = vunpack.c.l.bf16 %v5115_v15  ;;  %v456_v25 = vld [vmem:[#allocation2 + $0x54] sm:$0x1]  ;;  %v506_v15 = vld [vmem:[#allocation2 + $0x5c] sm:$0x1] }
  0x80   : > { %v6416_v41 = vld [vmem:[#allocation2 + $0x90] sm:$0xf]  ;;  %v828_v43 = vor.u32 %v826_v33, %v825_v32  ;;  %v829_v44 = vrot.slane %v825_v32, 4  ;;  %v833_v45 = vrot.slane %v831_v34, 7  ;;  %v1024_v59 = vld [vmem:[#allocation2 + $0x9c] sm:$0xf]  ;;  %v319_v34 = vmul.f32 %v6328_v35, %v4990_v46 }
  0x81   : > { %v1253_v49 = vrot.slane %v1252_v18, 4  ;;  %v1263_v21 = vrot.slane %v1262_v37, 4  ;;  %v6418_v51 = vld [vmem:[#allocation2 + $0x94] sm:$0xf]  ;;  %v318_v54 = vmul.f32 %v6328_v35, %v4989_v39  ;;  %v1414_v55 = vshrl.u32 %v6416_v41, 16  ;;  %v5123_v37 = vld [vmem:[%s6006_s6 + $0x68] sm:$0xff]  }
  0x82   : > { %v6420_v52 = vld [vmem:[#allocation2 + $0x98] sm:$0x1]  ;;  %v1417_v56 = vshll.u32 %v6416_v41, 16  ;;  %v1423_v58 = vshll.u32 %v6418_v51, 16  ;;  %v1427_v53 = vshrl.u32 %v6418_v51, 16  ;;  %v836_v5 = vor.u32 %v834_v38, %v833_v45 }
  0x83   : > { %v1258_v60 = vsel %vm6029_vm3, %v1253_v49, %v1257_v8  ;;  %v1268_v1 = vsel %vm6029_vm3, %v1263_v21, %v1267_v29  ;;  %v1433_v3 = vshll.u32 %v6420_v52, 16  ;;  %v1416_v10 = vrot.slane %v1414_v55, 4  ;;  %v5935_v36 = vld [vmem:[#allocation2 + $0x3c] sm:$0xf] }
  0x84   : > { %v6433_v28 = vcombine.low %v1258_v60, %v1268_v1  ;;  %v1419_v11 = vrot.slane %v1417_v56, 5  ;;  %v1425_v14 = vrot.slane %v1423_v58, 5  ;;  %v1028_v22 = vld [vmem:[#allocation2 + $0xa4] sm:$0x1]  ;;  %v1429_v26 = vrot.slane %v1427_v53, 4 }
  0x85   : > { %v1435_v31 = vrot.slane %v1433_v3, 5  ;;  %v837_v8 = vsel %vm6085_vm10, %v829_v44, %v836_v5  ;;  %v838_v32 = vrot.slane %v833_v45, 4  ;;  %v1025_v33 = vsel %vm6094_vm11, %v828_v43, %v1024_v59 }
  0x86   : > { %7800 = vst [vmem:[#allocation7_spill] sm:$0xff] %v6433_v28  ;;  %5382 = vmatmul.mubr.bf16.gmra.mxu0 %v6433_v28  ;;  %v1420_v29 = vor.u32 %v1419_v11, %v1416_v10  ;;  %1027 = vst [vmem:[#allocation2 + $0xa0] sm:$0xf] %v837_v8  ;;  %v357_v18 = vadd.f32 %v6307_v12, %v318_v54  ;;  %v1430_v38 = vor.u32 %v1429_v26, %v1425_v14  ;;  %vm2121_vm13 = vcmask 1046532  }
  0x87   : > { %1026 = vst [vmem:[#allocation2 + $0x9c] sm:$0xf] %v1025_v33  ;;  %v1029_v39 = vsel %vm6037_vm5, %v838_v32, %v1028_v22  ;;  %v454_v44 = vsel %vm6037_vm5, 0, %v453_v40  ;;  %v504_v45 = vsel %vm6048_vm8, 0, %v503_v0  ;;  %v358_v43 = vadd.f32 %v6307_v12, %v319_v34  ;;  %vm6572_vm14 = vmor %vm2120_vm12, %vm2121_vm13 }
  0x88   : > { %v1421_v49 = vrot.slane %v1420_v29, 4  ;;  %1030 = vst [vmem:[#allocation2 + $0xa4] sm:$0x1] %v1029_v39  ;;  %v389_v21 = vmax.f32 %v357_v18, 0.0  ;;  %455 = vst [vmem:[#allocation2 + $0x48] sm:$0x1] %v454_v44  ;;  %v4994_v46 = vunpack.c.h.bf16 %v6413_v42  ;;  %v320_v55 = vmul.f32 %v6328_v35, %v4993_v63 }
  0x89   : > { %505 = vst [vmem:[#allocation2 + $0x50] sm:$0x1] %v504_v45  ;;  %v1431_v54 = vrot.slane %v1430_v38, 4  ;;  %v457_v56 = vsel %vm6037_vm5, 0, %v456_v25  ;;  %v507_v58 = vsel %vm6048_vm8, 0, %v506_v15  ;;  %v390_v59 = vmax.f32 %v358_v43, 0.0 }
  0x8a   : > { %v1426_v53 = vsel %vm6029_vm3, %v1421_v49, %v1425_v14  ;;  %v4913_v40 = vpack.c.bf16 %v389_v21, %v389_v21  ;;  %v321_v0 = vmul.f32 %v6328_v35, %v4994_v46  ;;  %458 = vst [vmem:[#allocation2 + $0x54] sm:$0x1] %v457_v56  ;;  %508 = vst [vmem:[#allocation2 + $0x5c] sm:$0x1] %v507_v58  ;;  %v5021_v60 = vunpack.c.l.bf16 %v5123_v37 }
  0x8b   : > { %v1436_v42 = vsel %vm6029_vm3, %v1431_v54, %v1435_v31  ;;  %v359_v63 = vadd.f32 %v6307_v12, %v320_v55  ;;  %v5022_v1 = vunpack.c.h.bf16 %v5123_v37  ;;  %v4914_v5 = vpack.c.bf16 %v390_v59, %v390_v59 }
  0x8c   : > { %v6462_v3 = vcombine.low %v1426_v53, %v1436_v42  ;;  %v704_v10 = vshrl.u32 %v4913_v40, 16  ;;  %v707_v11 = vshll.u32 %v4913_v40, 16  ;;  %v360_v14 = vadd.f32 %v6307_v12, %v321_v0  ;;  %v477_v42 = vld [vmem:[#allocation2 + $0xa8] sm:$0x1] }
  0x8d   : > { %v6464_v22 = vld [vmem:[#allocation2 + $0xa0] sm:$0xf]  ;;  %v391_v25 = vmax.f32 %v359_v63, 0.0  ;;  %v334_v15 = vmul.f32 %v6328_v35, %v5021_v60  ;;  %v335_v26 = vmul.f32 %v6328_v35, %v5022_v1  ;;  %v712_v33 = vshrl.u32 %v4914_v5, 16 }
  0x8e   : > { %7801 = vst [vmem:[#allocation8_spill] sm:$0xff] %v6462_v3  ;;  %5397 = vmatprep.mubr.bf16.mxu1 %v6462_v3  ;;  %v6470_v31 = vld [vmem:[#allocation2 + $0x9c] sm:$0xf]  ;;  %v1447_v8 = vshll.u32 %v6464_v22, 16  ;;  %v1451_v32 = vshrl.u32 %v6464_v22, 16  ;;  %v706_v29 = vrot.slane %v704_v10, 7 }
  0x8f   : > { %v6474_v34 = vld [vmem:[#allocation2 + $0xa4] sm:$0x1]  ;;  %v1438_v18 = vshrl.u32 %v6470_v31, 16  ;;  %v1441_v37 = vshll.u32 %v6470_v31, 16  ;;  %v715_v38 = vshll.u32 %v4914_v5, 16  ;;  %v392_v39 = vmax.f32 %v360_v14, 0.0 }
  0x90   : > { %v1449_v44 = vrot.slane %v1447_v8, 5  ;;  %v1453_v45 = vrot.slane %v1451_v32, 4  ;;  %v1457_v49 = vshll.u32 %v6474_v34, 16  ;;  %v709_v43 = vor.u32 %v707_v11, %v706_v29  ;;  %v975_v21 = vld [vmem:[#allocation2 + $0x48] sm:$0xf] }
  0x91   : > { %v1440_v46 = vrot.slane %v1438_v18, 4  ;;  %v1443_v54 = vrot.slane %v1441_v37, 5  ;;  %v710_v55 = vrot.slane %v706_v29, 4  ;;  %v714_v56 = vrot.slane %v712_v33, 7  ;;  %v979_v40 = vld [vmem:[#allocation2 + $0x50] sm:$0x1] }
  0x92   : > { %v1454_v58 = vor.u32 %v1453_v45, %v1449_v44  ;;  %v1459_v53 = vrot.slane %v1457_v49, 5  ;;  %v976_v59 = vsel %vm6094_vm11, %v709_v43, %v975_v21  ;;  %v4915_v0 = vpack.c.bf16 %v391_v25, %v391_v25  ;;  %v527_v32 = vld [vmem:[#allocation2 + $0xb0] sm:$0x1]  ;;  %v982_v37 = vld [vmem:[#allocation2 + $0x54] sm:$0xf] }
  0x93   : > { %v1444_v63 = vor.u32 %v1443_v54, %v1440_v46  ;;  %v717_v60 = vor.u32 %v715_v38, %v714_v56  ;;  %v719_v1 = vrot.slane %v714_v56, 4  ;;  %977 = vst [vmem:[#allocation2 + $0x48] sm:$0xf] %v976_v59  ;;  %v4916_v5 = vpack.c.bf16 %v392_v39, %v392_v39  ;;  %v986_v49 = vld [vmem:[#allocation2 + $0x5c] sm:$0x1] }
  0x94   : > { %v1455_v10 = vrot.slane %v1454_v58, 4  ;;  %v721_v11 = vshrl.u32 %v4915_v0, 16  ;;  %v724_v14 = vshll.u32 %v4915_v0, 16  ;;  %v373_v8 = vadd.f32 %v6307_v12, %v334_v15 }
  0x95   : > { %v1445_v29 = vrot.slane %v1444_v63, 4  ;;  %v718_v33 = vsel %vm6085_vm10, %v710_v55, %v717_v60  ;;  %v980_v25 = vsel %vm6037_vm5, %v719_v1, %v979_v40  ;;  %v729_v18 = vshrl.u32 %v4916_v5, 16  ;;  %v5124_v55 = vld [vmem:[%s6006_s6 + $0x70] sm:$0xff]  }
  0x96   : > { %v1460_v38 = vsel %vm6029_vm3, %v1455_v10, %v1459_v53  ;;  %978 = vst [vmem:[#allocation2 + $0x4c] sm:$0xf] %v718_v33  ;;  %981 = vst [vmem:[#allocation2 + $0x50] sm:$0x1] %v980_v25  ;;  %v723_v39 = vrot.slane %v721_v11, 7  ;;  %v732_v45 = vshll.u32 %v4916_v5, 16  ;;  %v374_v15 = vadd.f32 %v6307_v12, %v335_v26 }
  0x97   : > { %v1450_v43 = vsel %vm6029_vm3, %v1445_v29, %v1449_v44  ;;  %v731_v21 = vrot.slane %v729_v18, 7  ;;  %v405_v46 = vmax.f32 %v373_v8, 0.0  ;;  %v478_v54 = vsel %vm6037_vm5, 0, %v477_v42 }
  0x98   : > { %v6494_v56 = vcombine.low %v1450_v43, %v1460_v38  ;;  %v726_v58 = vor.u32 %v724_v14, %v723_v39  ;;  %v727_v53 = vrot.slane %v723_v39, 4  ;;  %v406_v59 = vmax.f32 %v374_v15, 0.0  ;;  %479 = vst [vmem:[#allocation2 + $0xa8] sm:$0x1] %v478_v54 }
  0x99   : > { %v734_v40 = vor.u32 %v732_v45, %v731_v21  ;;  %v736_v0 = vrot.slane %v731_v21, 4  ;;  %v528_v26 = vsel %vm6048_vm8, 0, %v527_v32  ;;  %v4929_v63 = vpack.c.bf16 %v405_v46, %v405_v46 }
  0x9a   : > { %7802 = vst [vmem:[#allocation9_spill] sm:$0xff] %v6494_v56  ;;  %5398 = vmatmul.mubr.bf16.gmra.mxu1 %v6494_v56  ;;  %v6499_v44 = vld [vmem:[#allocation2 + $0x48] sm:$0xf]  ;;  %v983_v42 = vsel %vm6094_vm11, %v726_v58, %v982_v37  ;;  %529 = vst [vmem:[#allocation2 + $0xb0] sm:$0x1] %v528_v26  ;;  %v4930_v60 = vpack.c.bf16 %v406_v59, %v406_v59  ;;  %v5025_v1 = vunpack.c.l.bf16 %v5124_v55  ;;  %v5026_v5 = vunpack.c.h.bf16 %v5124_v55 }
  0x9b   : > { %v1270_v10 = vshrl.u32 %v6499_v44, 16  ;;  %v1273_v11 = vshll.u32 %v6499_v44, 16  ;;  %v735_v14 = vsel %vm6085_vm10, %v727_v53, %v734_v40  ;;  %984 = vst [vmem:[#allocation2 + $0x54] sm:$0xf] %v983_v42  ;;  %v987_v8 = vsel %vm6037_vm5, %v736_v0, %v986_v49  ;;  %v480_v42 = vld [vmem:[#allocation2 + $0xb4] sm:$0x1] }
  0x9c   : > { %985 = vst [vmem:[#allocation2 + $0x58] sm:$0xf] %v735_v14  ;;  %988 = vst [vmem:[#allocation2 + $0x5c] sm:$0x1] %v987_v8  ;;  %v840_v32 = vshrl.u32 %v4929_v63, 16  ;;  %v843_v29 = vshll.u32 %v4929_v63, 16  ;;  %v336_v45 = vmul.f32 %v6328_v35, %v5025_v1  ;;  %v337_v15 = vmul.f32 %v6328_v35, %v5026_v5 }
  0x9d   : > { %v848_v33 = vshrl.u32 %v4930_v60, 16  ;;  %v851_v25 = vshll.u32 %v4930_v60, 16  ;;  %v6509_v18 = vld [vmem:[#allocation2 + $0x4c] sm:$0xf]  ;;  %v6511_v37 = vld [vmem:[#allocation2 + $0x50] sm:$0x1] }
  0x9e   : > { %v1272_v38 = vrot.slane %v1270_v10, 4  ;;  %v1275_v39 = vrot.slane %v1273_v11, 5  ;;  %v1279_v43 = vshll.u32 %v6509_v18, 16  ;;  %v1283_v49 = vshrl.u32 %v6509_v18, 16 }
  0x9f   : > { %v1289_v21 = vshll.u32 %v6511_v37, 16  ;;  %v842_v46 = vrot.slane %v840_v32, 7  ;;  %v850_v55 = vrot.slane %v848_v33, 7  ;;  %v1031_v58 = vld [vmem:[#allocation2 + $0xa8] sm:$0xf]  ;;  %v375_v53 = vadd.f32 %v6307_v12, %v336_v45 }
  0xa0   : > { %v1276_v54 = vor.u32 %v1275_v39, %v1272_v38  ;;  %v376_v59 = vadd.f32 %v6307_v12, %v337_v15  ;;  %v1281_v40 = vrot.slane %v1279_v43, 5  ;;  %v1285_v0 = vrot.slane %v1283_v49, 4  ;;  %v530_v38 = vld [vmem:[#allocation2 + $0xbc] sm:$0x1] }
  0xa1   : > { %v1291_v26 = vrot.slane %v1289_v21, 5  ;;  %v845_v63 = vor.u32 %v843_v29, %v842_v46  ;;  %v846_v60 = vrot.slane %v842_v46, 4  ;;  %v853_v1 = vor.u32 %v851_v25, %v850_v55  ;;  %v1035_v10 = vld [vmem:[#allocation2 + $0xb0] sm:$0x1] }
  0xa2   : > { %v1277_v35 = vrot.slane %v1276_v54, 4  ;;  %v855_v5 = vrot.slane %v850_v55, 4  ;;  %v1286_v11 = vor.u32 %v1285_v0, %v1281_v40  ;;  %v6520_v14 = vld [vmem:[#allocation2 + $0x54] sm:$0xf]  ;;  %v407_v32 = vmax.f32 %v375_v53, 0.0 }
  0xa3   : > { %v1032_v8 = vsel %vm6094_vm11, %v845_v63, %v1031_v58  ;;  %v408_v33 = vmax.f32 %v376_v59, 0.0  ;;  %v6526_v39 = vld [vmem:[#allocation2 + $0x58] sm:$0xf]  ;;  %v6528_v29 = vld [vmem:[#allocation2 + $0x5c] sm:$0x1]  ;;  %v1294_v25 = vshrl.u32 %v6520_v14, 16  ;;  %v854_v15 = vsel %vm6085_vm10, %v846_v60, %v853_v1 }
  0xa4   : > { %v1282_v12 = vsel %vm6029_vm3, %v1277_v35, %v1281_v40  ;;  %v1297_v45 = vshll.u32 %v6520_v14, 16  ;;  %1033 = vst [vmem:[#allocation2 + $0xa8] sm:$0xf] %v1032_v8  ;;  %v1287_v43 = vrot.slane %v1286_v11, 4  ;;  %v1303_v49 = vshll.u32 %v6526_v39, 16 }
  0xa5   : > { %v1307_v21 = vshrl.u32 %v6526_v39, 16  ;;  %v1313_v46 = vshll.u32 %v6528_v29, 16  ;;  %1034 = vst [vmem:[#allocation2 + $0xac] sm:$0xf] %v854_v15  ;;  %v1296_v54 = vrot.slane %v1294_v25, 4  ;;  %v1036_v58 = vsel %vm6037_vm5, %v855_v5, %v1035_v10 }
  0xa6   : > { %v1299_v55 = vrot.slane %v1297_v45, 5  ;;  %v481_v53 = vsel %vm6037_vm5, 0, %v480_v42  ;;  %v1292_v59 = vsel %vm6029_vm3, %v1287_v43, %v1291_v26  ;;  %v1305_v40 = vrot.slane %v1303_v49, 5  ;;  %1037 = vst [vmem:[#allocation2 + $0xb0] sm:$0x1] %v1036_v58 }
  0xa7   : > { %v1309_v0 = vrot.slane %v1307_v21, 4  ;;  %v1315_v63 = vrot.slane %v1313_v46, 5  ;;  %482 = vst [vmem:[#allocation2 + $0xb4] sm:$0x1] %v481_v53  ;;  %v6543_v35 = vcombine.low %v1282_v12, %v1292_v59  ;;  %v531_v1 = vsel %vm6048_vm8, 0, %v530_v38 }
  0xa8   : > { %v1300_v60 = vor.u32 %v1299_v55, %v1296_v54  ;;  %v4931_v11 = vpack.c.bf16 %v407_v32, %v407_v32  ;;  %532 = vst [vmem:[#allocation2 + $0xbc] sm:$0x1] %v531_v1  ;;  %v4932_v5 = vpack.c.bf16 %v408_v33, %v408_v33  ;;  %v6548_v25 = vld [vmem:[#allocation2] sm:$0xf]  ;;  %v6553_v32 = vld [vmem:[#allocation2 + $0x4] sm:$0xf] }
  0xa9   : > { %7803 = vst [vmem:[#allocation10_spill] sm:$0xff] %v6543_v35  ;;  %v1310_v8 = vor.u32 %v1309_v0, %v1305_v40  ;;  %5385 = vmatprep.mubr.bf16.mxu0 %v6543_v35  ;;  %v4659_v12 = vrot.slane %v6548_v25, 9  ;;  %v2125_v33 = vrot.slane %v6553_v32, 5  ;;  %v4664_v35 = vrot.slane %v6388_v57, 9 }
  0xaa   : > { %v1301_v26 = vrot.slane %v1300_v60, 4  ;;  %v857_v42 = vshrl.u32 %v4931_v11, 16  ;;  %v860_v10 = vshll.u32 %v4931_v11, 16  ;;  %v865_v43 = vshrl.u32 %v4932_v5, 16 }
  0xab   : > { %v1311_v45 = vrot.slane %v1310_v8, 4  ;;  %v6551_v15 = vld [vmem:[#allocation2 + $0xa8] sm:$0xf]  ;;  %v868_v38 = vshll.u32 %v4932_v5, 16  ;;  %v2126_v3 = vsel %vm6572_vm14, %v4659_v12, %v2125_v33  ;;  %v2163_v28 = vrot.slane %v6398_v62, 5 }
  0xac   : > { %v1306_v49 = vsel %vm6029_vm3, %v1301_v26, %v1305_v40  ;;  %v6558_v21 = vld [vmem:[#allocation2 + $0xac] sm:$0xf]  ;;  %v1462_v46 = vshrl.u32 %v6551_v15, 16  ;;  %v1465_v54 = vshll.u32 %v6551_v15, 16  ;;  %v859_v55 = vrot.slane %v857_v42, 7 }
  0xad   : > { %v1316_v58 = vsel %vm6029_vm3, %v1311_v45, %v1315_v63  ;;  %v1471_v53 = vshll.u32 %v6558_v21, 16  ;;  %v1475_v59 = vshrl.u32 %v6558_v21, 16  ;;  %v867_v0 = vrot.slane %v865_v43, 7  ;;  %v6568_v1 = vld [vmem:[#allocation2 + $0xb0] sm:$0x1] }
  0xae   : > { %v6566_v60 = vcombine.low %v1306_v49, %v1316_v58  ;;  %v1464_v40 = vrot.slane %v1462_v46, 4  ;;  %v1467_v11 = vrot.slane %v1465_v54, 5  ;;  %v862_v8 = vor.u32 %v860_v10, %v859_v55  ;;  %v1038_v5 = vld [vmem:[#allocation2 + $0xb4] sm:$0xf] }
  0xaf   : > { %v1473_v63 = vrot.slane %v1471_v53, 5  ;;  %v1477_v42 = vrot.slane %v1475_v59, 4  ;;  %v1481_v45 = vshll.u32 %v6568_v1, 16  ;;  %v863_v13 = vrot.slane %v859_v55, 4  ;;  %v1042_v46 = vld [vmem:[#allocation2 + $0xbc] sm:$0x1] }
  0xb0   : > { %7804 = vst [vmem:[#allocation11_spill] sm:$0xff] %v6566_v60  ;;  %5386 = vmatmul.mubr.bf16.gmra.mxu0 %v6566_v60  ;;  %v1468_v43 = vor.u32 %v1467_v11, %v1464_v40  ;;  %v870_v49 = vor.u32 %v868_v38, %v867_v0  ;;  %v872_v58 = vrot.slane %v867_v0, 4  ;;  %v1039_v10 = vsel %vm6094_vm11, %v862_v8, %v1038_v5  ;;  %v5908_v59 = vld [vmem:[#allocation2 + $0x14] sm:$0x1]  ;;  %v6590_v8 = vld [vmem:[#allocation2 + $0xc] sm:$0xf] }
  0xb1   : > { %v1478_v54 = vor.u32 %v1477_v42, %v1473_v63  ;;  %v1483_v56 = vrot.slane %v1481_v45, 5  ;;  %1040 = vst [vmem:[#allocation2 + $0xb4] sm:$0xf] %v1039_v10  ;;  %v2127_v53 = vrot.slane %v2125_v33, 4  ;;  %v2135_v48 = vrot.slane %v5908_v59, 5 }
  0xb2   : > { %v1469_v50 = vrot.slane %v1468_v43, 4  ;;  %v871_v55 = vsel %vm6085_vm10, %v863_v13, %v870_v49  ;;  %v1043_v38 = vsel %vm6037_vm5, %v872_v58, %v1042_v46  ;;  %v7807_v40 = vrot.slane %v6008_v7, 5  ;;  %v6593_v33 = vld [vmem:[#allocation2 + $0x10] sm:$0xf]  ;;  %v6598_v45 = vld [vmem:[#allocation2 + $0x18] sm:$0xf] }
  0xb3   : > { %v1479_v0 = vrot.slane %v1478_v54, 4  ;;  %1041 = vst [vmem:[#allocation2 + $0xb8] sm:$0xf] %v871_v55  ;;  %1044 = vst [vmem:[#allocation2 + $0xbc] sm:$0x1] %v1043_v38  ;;  %v4660_v12 = vrot.slane %v6590_v8, 9  ;;  %v4635_v62 = vcombine.low %v6548_v25, %v6553_v32 }
  0xb4   : > { %v2129_v11 = vsel %vm6572_vm14, %v2127_v53, %v7807_v40  ;;  %v2132_v5 = vrot.slane %v6593_v33, 5  ;;  %v1474_v13 = vsel %vm6029_vm3, %v1469_v50, %v1473_v63  ;;  %v4661_v43 = vrot.slane %v6598_v45, 9  ;;  %v6605_v10 = vld [vmem:[#allocation2 + $0x1c] sm:$0xf]  ;;  %v5913_v50 = vld [vmem:[#allocation2 + $0x20] sm:$0x1] }
  0xb5   : > { %v4691_v42 = vcombine.low %v2126_v3, %v2129_v11  ;;  %v1484_v7 = vsel %vm6029_vm3, %v1479_v0, %v1483_v56  ;;  %v2139_v46 = vrot.slane %v6605_v10, 5  ;;  %v2142_v3 = vrot.slane %v5913_v50, 5  ;;  %v6610_v63 = vld [vmem:[#allocation2 + $0x24] sm:$0xf]  ;;  %v6617_v38 = vld [vmem:[#allocation2 + $0x28] sm:$0xf] }
  0xb6   : > { %v2133_v49 = vsel %vm6572_vm14, %v4660_v12, %v2132_v5  ;;  %v2134_v58 = vrot.slane %v2132_v5, 4  ;;  %v6608_v54 = vcombine.low %v1474_v13, %v1484_v7  ;;  %v4662_v53 = vrot.slane %v6610_v63, 9  ;;  %v5916_v12 = vld [vmem:[#allocation2 + $0x2c] sm:$0x1]  ;;  %v5857_v32 = vld [vmem:[%s7746_s3 + $0x118] sm:$0xff]  }
  0xb7   : > { %5469 = vmatprep.mubr.bf16.mxu0 %v4691_v42  ;;  %v2140_v59 = vsel %vm6572_vm14, %v4661_v43, %v2139_v46  ;;  %v2141_v55 = vrot.slane %v2139_v46, 4  ;;  %v2146_v0 = vrot.slane %v6617_v38, 5  ;;  %v2149_v5 = vrot.slane %v5916_v12, 5 }
  0xb8   : > { %7808 = vst [vmem:[#allocation12_spill] sm:$0xff] %v6608_v54  ;;  %v2136_v56 = vsel %vm6572_vm14, %v2134_v58, %v2135_v48  ;;  %5401 = vmatprep.mubr.bf16.mxu1 %v6608_v54  ;;  %v6621_v40 = vld [vmem:[#allocation2 + $0xb4] sm:$0xf]  ;;  %v4663_v7 = vrot.slane %v6363_v47, 9  ;;  %v2153_v12 = vrot.slane %v6374_v19, 5  ;;  %v2160_v60 = vrot.slane %v6396_v61, 5 }
  0xb9   : > { %v6623_v11 = vcombine.low %v2133_v49, %v2136_v56  ;;  %v5845_v48 = vld [vmem:[%s7746_s3 + $0x130] sm:$0xff]   ;;  %v1486_v13 = vshrl.u32 %v6621_v40, 16  ;;  %v1489_v42 = vshll.u32 %v6621_v40, 16  ;;  %v2143_v43 = vsel %vm6572_vm14, %v2141_v55, %v2142_v3  ;;  %v5917_v55 = vld [vmem:[%s7746_s3 + $0x138] sm:$0xff]  }
  0xba   : > { %v6633_v58 = vld [vmem:[#allocation2 + $0xb8] sm:$0xf]  ;;  %v6635_v46 = vld [vmem:[#allocation2 + $0xbc] sm:$0x1]  ;;  %v6638_v49 = vcombine.low %v2140_v59, %v2143_v43  ;;  %v2147_v50 = vsel %vm6572_vm14, %v4662_v53, %v2146_v0  ;;  %v2148_v56 = vrot.slane %v2146_v0, 4  ;;  %v2155_v19 = vrot.slane %v2153_v12, 4 }
  0xbb   : > { %7809 = vst [vmem:[#allocation13_spill] sm:$0xff] %v6623_v11  ;;  %5470 = vmatmul.mubr.bf16.vlgmr.msra.gmra.mxu0 %v6623_v11  ;;  %v1488_v54 = vrot.slane %v1486_v13, 4  ;;  %v1491_v9 = vrot.slane %v1489_v42, 5  ;;  %v1495_v3 = vshll.u32 %v6633_v58, 16  ;;  %v1499_v47 = vshrl.u32 %v6633_v58, 16  ;;  %v5849_v0 = vld [vmem:[%s7746_s3 + $0x128] sm:$0xff]  }
  0xbc   : > { %7810 = vst [vmem:[#allocation14_spill] sm:$0xff] %v6638_v49  ;;  %5550 = vmatpush3.bf16.msra.mxu0 %v5917_v55  ;;  %v1505_v59 = vshll.u32 %v6635_v46, 16  ;;  %5473 = vmatprep.mubr.bf16.mxu0 %v6638_v49  ;;  %v2150_v53 = vsel %vm6572_vm14, %v2148_v56, %v2149_v5  ;;  %v2154_v11 = vsel %vm6572_vm14, %v4663_v7, %v2153_v12  ;;  %v2156_v49 = vrot.slane %v6376_v6, 5  ;;  %v5853_v6 = vld [vmem:[%s7746_s3 + $0x120] sm:$0xff]  }
  0xbd   : > { %5551 = vmatprep.subr.bf16.mxu0 %v5845_v48  ;;  %v1492_v13 = vor.u32 %v1491_v9, %v1488_v54  ;;  %v1497_v42 = vrot.slane %v1495_v3, 5  ;;  %v1501_v43 = vrot.slane %v1499_v47, 4  ;;  %v6657_v27 = vcombine.low %v2147_v50, %v2150_v53 }
  0xbe   : > { %v1507_v55 = vrot.slane %v1505_v59, 5  ;;  %v2157_v9 = vsel %vm6572_vm14, %v2155_v19, %v2156_v49  ;;  %v2162_v54 = vrot.slane %v2160_v60, 4  ;;  %v4665_v7 = vrot.slane %v6499_v44, 9 }
  0xbf   : > { %7811 = vst [vmem:[#allocation15_spill] sm:$0xff] %v6657_v27  ;;  %v1493_v5 = vrot.slane %v1492_v13, 4  ;;  %v1502_v56 = vor.u32 %v1501_v43, %v1497_v42  ;;  %v2167_v57 = vrot.slane %v6509_v18, 5  ;;  %v2170_v49 = vrot.slane %v6511_v37, 5  ;;  %v6705_v43 = vld [vmem:[#allocation2 + $0x60] sm:$0xf] }
  0xc0   : > { %5552 = vmatpush3.bf16.msra.mxu0 %v5845_v48  ;;  %v6671_v48 = vcombine.low %v2154_v11, %v2157_v9  ;;  %v2161_v3 = vsel %vm6572_vm14, %v4664_v35, %v2160_v60  ;;  %v2164_v11 = vsel %vm6572_vm14, %v2162_v54, %v2163_v28  ;;  %v2174_v37 = vrot.slane %v6526_v39, 5  ;;  %v6695_v60 = vld [vmem:[#allocation2 + $0x64] sm:$0xf]  ;;  %v5861_v54 = vld [vmem:[%s7746_s3 + $0x110] sm:$0xff]  }
  0xc1   : > { %5553 = vmatprep.subr.bf16.mxu0 %v5849_v0  ;;  %v1498_v61 = vsel %vm6029_vm3, %v1493_v5, %v1497_v42  ;;  %v1503_v50 = vrot.slane %v1502_v56, 4  ;;  %v2169_v47 = vrot.slane %v2167_v57, 4  ;;  %v2168_v25 = vsel %vm6572_vm14, %v4665_v7, %v2167_v57  ;;  %v5920_v56 = vld [vmem:[#allocation2 + $0x68] sm:$0x1] }
  0xc2   : > { %7812 = vst [vmem:[#allocation16_spill] sm:$0xff] %v6671_v48  ;;  %v2181_v28 = vrot.slane %v6695_v60, 5  ;;  %v6699_v53 = vcombine.low %v2161_v3, %v2164_v11  ;;  %v2176_v13 = vrot.slane %v2174_v37, 4  ;;  %v2177_v42 = vrot.slane %v6528_v29, 5  ;;  %v6744_v3 = vld [vmem:[#allocation2 + $0x6c] sm:$0xf] }
  0xc3   : > { %5474 = vmatmul.mubr.bf16.gmra.mxu0 %v6657_v27  ;;  %v1508_v12 = vsel %vm6029_vm3, %v1503_v50, %v1507_v55  ;;  %v2171_v35 = vsel %vm6572_vm14, %v2169_v47, %v2170_v49  ;;  %v4667_v55 = vrot.slane %v6705_v43, 9  ;;  %v2184_v9 = vrot.slane %v5920_v56, 5  ;;  %v6725_v50 = vld [vmem:[#allocation2 + $0x70] sm:$0xf]  ;;  %v5865_v49 = vld [vmem:[%s7746_s3 + $0x108] sm:$0xff]  }
  0xc4   : > { %5477 = vmatprep.mubr.bf16.mxu0 %v6671_v48  ;;  %5554 = vmatpush3.bf16.msra.mxu0 %v5849_v0  ;;  %v6685_v59 = vcombine.low %v1498_v61, %v1508_v12  ;;  %7814 = vst [vmem:[#allocation18_spill] sm:$0xff] %v6699_v53  ;;  %v6701_v19 = vcombine.low %v2168_v25, %v2171_v35  ;;  %v4666_v0 = vrot.slane %v6520_v14, 9  ;;  %v2183_v5 = vrot.slane %v2181_v28, 4  ;;  %v5924_v25 = vld [vmem:[%s7746_s3 + $0xf8] sm:$0xff]   ;;  %v5925_v35 = vld [vmem:[#allocation2 + $0x74] sm:$0x1] }
  0xc5   : > { %5555 = vmatprep.subr.bf16.mxu0 %v5853_v6  ;;  %v6713_v7 = vcombine.low %v6590_v8, %v6593_v33  ;;  %v6718_v29 = vcombine.low %v6598_v45, %v6605_v10  ;;  %v2178_v61 = vsel %vm6572_vm14, %v2176_v13, %v2177_v42  ;;  %v2188_v57 = vrot.slane %v6725_v50, 5  ;;  %v5843_v8 = vld [vmem:[%s7746_s3 + $0xf0] sm:$0xff]   ;;  %v6735_v10 = vld [vmem:[#allocation2 + $0x7c] sm:$0xf]  ;;  %v5847_v42 = vld [vmem:[%s7746_s3 + $0xe8] sm:$0xff]  }
  0xc6   : > { %7813 = vst [vmem:[#allocation17_spill] sm:$0xff] %v6685_v59  ;;  %5402 = vmatmul.mubr.bf16.gmra.mxu1 %v6685_v59  ;;  %7815 = vst [vmem:[#allocation19_spill] sm:$0xff] %v6701_v19  ;;  %v2182_v33 = vsel %vm6572_vm14, %v4667_v55, %v2181_v28  ;;  %v2185_v45 = vsel %vm6572_vm14, %v2183_v5, %v2184_v9  ;;  %v4668_v11 = vrot.slane %v6744_v3, 9  ;;  %v4672_v47 = vrot.slane %v6470_v31, 9  ;;  %v5927_v5 = vld [vmem:[#allocation2 + $0x80] sm:$0x1] }
  0xc7   : > { %5421 = vmatprep.mubr.bf16.mxu1 %v4635_v62  ;;  %v2195_v62 = vrot.slane %v6735_v10, 5  ;;  %v2191_v28 = vrot.slane %v5925_v35, 5  ;;  %v2198_v56 = vrot.slane %v5927_v5, 5  ;;  %v2216_v9 = vrot.slane %v6464_v22, 5  ;;  %v5869_v35 = vld [vmem:[%s7746_s3 + $0x100] sm:$0xff]  }
  0xc8   : > { %5556 = vmatpush3.bf16.msra.mxu0 %v5853_v6  ;;  %v2175_v6 = vsel %vm6572_vm14, %v4666_v0, %v2174_v37  ;;  %v6752_v37 = vcombine.low %v2182_v33, %v2185_v45  ;;  %v6754_v0 = vld [vmem:[#allocation2 + $0x78] sm:$0xf]  ;;  %v5928_v33 = vld [vmem:[#allocation2 + $0x30] sm:$0xf]  ;;  %v5929_v45 = vld [vmem:[#allocation2 + $0x34] sm:$0xf]  ;;  %v6899_v30 = vcombine.low %v6744_v3, %v6725_v50 }
  0xc9   : > { %5557 = vmatprep.subr.bf16.mxu0 %v5857_v32  ;;  %v6742_v12 = vcombine.low %v2175_v6, %v2178_v61  ;;  %v4669_v13 = vrot.slane %v6754_v0, 9  ;;  %v2197_v55 = vrot.slane %v2195_v62, 4  ;;  %v2219_v6 = vrot.slane %v6474_v34, 5  ;;  %v5937_v3 = vld [vmem:[#allocation2 + $0x90] sm:$0xf] }
  0xca   : > { %7817 = vst [vmem:[#allocation21_spill] sm:$0xff] %v6752_v37  ;;  %v6764_v61 = vcombine.low %v6610_v63, %v6617_v38  ;;  %v2217_v34 = vsel %vm6572_vm14, %v4672_v47, %v2216_v9  ;;  %v2218_v63 = vrot.slane %v2216_v9, 4  ;;  %v6779_v38 = vcombine.low %v6551_v15, %v6558_v21  ;;  %v483_v47 = vld [vmem:[#allocation2 + $0xc0] sm:$0x1] }
  0xcb   : > { %5478 = vmatmul.mubr.bf16.gmra.mxu0 %v6699_v53  ;;  %7816 = vst [vmem:[#allocation20_spill] sm:$0xff] %v6742_v12  ;;  %v2199_v9 = vsel %vm6572_vm14, %v2197_v55, %v2198_v56  ;;  %v6809_v55 = vld [vmem:[%s7746_s3 + $0x1b8] sm:$0xff]   ;;  %v4671_v27 = vrot.slane %v6416_v41, 9  ;;  %v5936_v41 = vld [vmem:[#allocation2 + $0x40] sm:$0xf]  ;;  %v2233_v24 = vrot.slane %v6635_v46, 5 }
  0xcc   : > { %5481 = vmatprep.mubr.bf16.mxu0 %v6701_v19  ;;  %5558 = vmatpush3.bf16.msra.mxu0 %v5857_v32  ;;  %v2190_v32 = vrot.slane %v2188_v57, 4  ;;  %v5125_v19 = vld [vmem:[%s6006_s6 + $0x78] sm:$0xff]  }
  0xcd   : > { %5559 = vmatprep.subr.bf16.mxu0 %v5861_v54  ;;  %v5030_v56 = vunpack.c.h.bf16 %v5125_v19 }
  0xce   : > { %5422 = vmatmul.mubr.bf16.vlgmr.msra.gmra.mxu1 %v6713_v7  ;;  %v2192_v5 = vsel %vm6572_vm14, %v2190_v32, %v2191_v28  ;;  %v2220_v32 = vsel %vm6572_vm14, %v2218_v63, %v2219_v6  ;;  %v5029_v28 = vunpack.c.l.bf16 %v5125_v19  ;;  %v5933_v6 = vld [vmem:[%s7744_s1] ss:$0 sm:$0xff] }
  0xcf   : > { %5502 = vmatpush3.bf16.msra.mxu1 %v5924_v25  ;;  %5425 = vmatprep.mubr.bf16.mxu1 %v6718_v29  ;;  %v6766_v25 = vcombine.low %v5928_v33, %v5929_v45  ;;  %v2196_v33 = vsel %vm6572_vm14, %v4669_v13, %v2195_v62  ;;  %v6786_v45 = vld [vmem:[#allocation2 + $0x88] sm:$0xf]  ;;  %v6799_v62 = vcombine.low %v6621_v40, %v6633_v58 }
  0xd0   : > { %5503 = vmatprep.subr.bf16.mxu1 %v5843_v8  ;;  %5560 = vmatpush3.bf16.msra.mxu0 %v5861_v54  ;;  %v2189_v54 = vsel %vm6572_vm14, %v4668_v11, %v2188_v57  ;;  %v2202_v57 = vrot.slane %v6786_v45, 5  ;;  %v2209_v11 = vrot.slane %v6418_v51, 5  ;;  %v533_v13 = vld [vmem:[#allocation2 + $0xc8] sm:$0x1]  ;;  %v6801_v51 = vld [vmem:[#allocation2 + $0x84] sm:$0xf]  ;;  %v6804_v48 = vcombine.low %v2217_v34, %v2220_v32 }
  0xd1   : > { %5561 = vmatprep.subr.bf16.mxu0 %v5865_v49  ;;  %v338_v63 = vmul.f32 %v5933_v6, %v5029_v28  ;;  %v6820_v34 = vcombine.low %v2196_v33, %v2199_v9  ;;  %v534_v19 = vsel %vm6048_vm8, 0, %v533_v13  ;;  %v339_v28 = vmul.f32 %v5933_v6, %v5030_v56 }
  0xd2   : > { %v2204_v32 = vrot.slane %v2202_v57, 4  ;;  %535 = vst [vmem:[#allocation2 + $0xc8] sm:$0x1] %v534_v19  ;;  %v6833_v9 = vcombine.low %v5935_v36, %v5936_v41  ;;  %v6837_v13 = vcombine.low %v6499_v44, %v6509_v18  ;;  %v5859_v44 = vld [vmem:[%s7746_s3 + $0xd0] sm:$0xff]   ;;  %v6866_v41 = vcombine.low %v6520_v14, %v6526_v39  ;;  %v5867_v39 = vld [vmem:[%s7746_s3 + $0xc0] sm:$0xff]  }
  0xd3   : > { %5482 = vmatmul.mubr.bf16.gmra.mxu0 %v6742_v12  ;;  %5504 = vmatpush3.bf16.msra.mxu1 %v5843_v8  ;;  %v5851_v8 = vld [vmem:[%s7746_s3 + $0xe0] sm:$0xff]   ;;  %v5932_v12 = vld [vmem:[#allocation2 + $0x8c] sm:$0x1] }
  0xd4   : > { %5485 = vmatprep.mubr.bf16.mxu0 %v6752_v37  ;;  %5505 = vmatprep.subr.bf16.mxu1 %v5847_v42  ;;  %v4670_v37 = vrot.slane %v6801_v51, 9  ;;  %v2205_v53 = vrot.slane %v5932_v12, 5  ;;  %v484_v12 = vsel %vm6037_vm5, 0, %v483_v47  ;;  %v2212_v47 = vrot.slane %v6420_v52, 5 }
  0xd5   : > { %5562 = vmatpush3.bf16.msra.mxu0 %v5865_v49  ;;  %v6812_v49 = vcombine.low %v2189_v54, %v2192_v5  ;;  %485 = vst [vmem:[#allocation2 + $0xc0] sm:$0x1] %v484_v12  ;;  %v5855_v54 = vld [vmem:[%s7746_s3 + $0xd8] sm:$0xff]   ;;  %v2211_v5 = vrot.slane %v2209_v11, 4 }
  0xd6   : > { %5563 = vmatprep.subr.bf16.mxu0 %v5869_v35  ;;  %5426 = vmatmul.mubr.bf16.gmra.mxu1 %v6764_v61  ;;  %v2203_v56 = vsel %vm6572_vm14, %v4670_v37, %v2202_v57  ;;  %v2206_v6 = vsel %vm6572_vm14, %v2204_v32, %v2205_v53 }
  0xd7   : > { %5429 = vmatprep.mubr.bf16.mxu1 %v6766_v25  ;;  %5506 = vmatpush3.bf16.msra.mxu1 %v5847_v42  ;;  %v5934_v42 = vld [vmem:[%s7745_s2] ss:$0 sm:$0xff]  ;;  %v2213_v18 = vsel %vm6572_vm14, %v2211_v5, %v2212_v47  ;;  %v6854_v37 = vcombine.low %v2203_v56, %v2206_v6  ;;  %v2226_v5 = vrot.slane %v6568_v1, 5  ;;  %v6871_v1 = vcombine.low %v6705_v43, %v6695_v60 }
  0xd8   : > { %5507 = vmatprep.subr.bf16.mxu1 %v5851_v8  ;;  %v377_v33 = vadd.f32 %v5934_v42, %v338_v63  ;;  %v378_v52 = vadd.f32 %v5934_v42, %v339_v28  ;;  %v2210_v63 = vsel %vm6572_vm14, %v4671_v27, %v2209_v11  ;;  %v4673_v11 = vrot.slane %v6551_v15, 9 }
  0xd9   : > { %5564 = vmatpush3.bf16.msra.mxu0 %v5869_v35  ;;  %v6857_v27 = vcombine.low %v2210_v63, %v2213_v18  ;;  %v2230_v56 = vrot.slane %v6633_v58, 5  ;;  %v1049_v6 = vld [vmem:[#allocation2 + $0xc8] sm:$0x1] }
  0xda   : > { %5645 = vmatprep.subr.bf16.mxu0 %v6809_v55  ;;  %v409_v35 = vmax.f32 %v377_v33, 0.0  ;;  %v410_v12 = vmax.f32 %v378_v52, 0.0 }
  0xdb   : > { %5486 = vmatmul.mubr.bf16.gmra.mxu0 %v6812_v49  ;;  %5508 = vmatpush3.bf16.msra.mxu1 %v5851_v8  ;;  %v2223_v8 = vrot.slane %v6558_v21, 5  ;;  %v5863_v21 = vld [vmem:[%s7746_s3 + $0xc8] sm:$0xff]  }
  0xdc   : > { %5489 = vmatprep.mubr.bf16.mxu0 %v6820_v34  ;;  %5509 = vmatprep.subr.bf16.mxu1 %v5855_v54  ;;  %v4933_v19 = vpack.c.bf16 %v409_v35, %v409_v35  ;;  %v4934_v53 = vpack.c.bf16 %v410_v12, %v410_v12  ;;  %v1045_v36 = vld [vmem:[#allocation2 + $0xc0] sm:$0xf]  ;;  %v2232_v12 = vrot.slane %v2230_v56, 4 }
  0xdd   : > { %v2225_v47 = vrot.slane %v2223_v8, 4  ;;  %v2224_v35 = vsel %vm6572_vm14, %v4673_v11, %v2223_v8  ;;  %v4674_v8 = vrot.slane %v6621_v40, 9 }
  0xde   : > { %5430 = vmatmul.mubr.bf16.gmra.mxu1 %v6833_v9  ;;  %v874_v57 = vshrl.u32 %v4933_v19, 16  ;;  %v877_v32 = vshll.u32 %v4933_v19, 16  ;;  %v882_v42 = vshrl.u32 %v4934_v53, 16  ;;  %v885_v33 = vshll.u32 %v4934_v53, 16 }
  0xdf   : > { %5433 = vmatprep.mubr.bf16.mxu1 %v6837_v13  ;;  %5510 = vmatpush3.bf16.msra.mxu1 %v5855_v54  ;;  %v2227_v14 = vsel %vm6572_vm14, %v2225_v47, %v2226_v5  ;;  %v6904_v19 = vcombine.low %v6754_v0, %v6735_v10  ;;  %v2231_v40 = vsel %vm6572_vm14, %v4674_v8, %v2230_v56  ;;  %v5938_v0 = vld [vmem:[#allocation2 + $0x94] sm:$0xf]  ;;  %v5874_v56 = vld [vmem:[%s7746_s3 + $0x168] sm:$0xff]  }
  0xe0   : > { %5511 = vmatprep.subr.bf16.mxu1 %v5859_v44  ;;  %v876_v28 = vrot.slane %v874_v57, 7  ;;  %v884_v52 = vrot.slane %v882_v42, 7  ;;  %v6890_v18 = vcombine.low %v2224_v35, %v2227_v14  ;;  %v2234_v46 = vsel %vm6572_vm14, %v2232_v12, %v2233_v24  ;;  %v5873_v57 = vld [vmem:[%s7746_s3 + $0x1b0] sm:$0xff]   ;;  %v5879_v42 = vld [vmem:[%s7746_s3 + $0x198] sm:$0xff]  }
  0xe1   : > { %v6912_v50 = vcombine.low %v2231_v40, %v2234_v46  ;;  %v6917_v10 = vcombine.low %v6801_v51, %v6786_v45  ;;  %v6920_v53 = vcombine.low %v5937_v3, %v5938_v0  ;;  %v6930_v45 = vcombine.low %v6470_v31, %v6464_v22  ;;  %v5877_v31 = vld [vmem:[%s7746_s3 + $0x1a0] sm:$0xff]   ;;  %v5872_v35 = vld [vmem:[%s7746_s3 + $0x170] sm:$0xff]   ;;  %v7821_v14 = vld [vmem:[#allocation3_spill] sm:$0xff] }
  0xe2   : > { %v879_v54 = vor.u32 %v877_v32, %v876_v28  ;;  %v880_v15 = vrot.slane %v876_v28, 4  ;;  %v887_v63 = vor.u32 %v885_v33, %v884_v52  ;;  %v889_v60 = vrot.slane %v884_v52, 4  ;;  %v7820_v52 = vld [vmem:[#allocation11_spill] sm:$0xff]  ;;  %v5880_v40 = vld [vmem:[%s7746_s3 + $0x150] sm:$0xff]  }
  0xe3   : > { %5490 = vmatmul.mubr.bf16.gmra.mxu0 %v6854_v37  ;;  %5512 = vmatpush3.bf16.msra.mxu1 %v5859_v44 }
  0xe4   : > { %5493 = vmatprep.mubr.bf16.mxu0 %v6857_v27  ;;  %5513 = vmatprep.subr.bf16.mxu1 %v5863_v21  ;;  %v1046_v43 = vsel %vm6094_vm11, %v879_v54, %v1045_v36  ;;  %v888_v58 = vsel %vm6085_vm10, %v880_v15, %v887_v63  ;;  %v1050_v44 = vsel %vm6037_vm5, %v889_v60, %v1049_v6  ;;  %v5881_v54 = vld [vmem:[%s7746_s3 + $0x190] sm:$0xff]   ;;  %v5886_v6 = vld [vmem:[%s7746_s3 + $0x180] sm:$0xff]   ;;  %v5888_v60 = vld [vmem:[%s7746_s3 + $0x238] sm:$0xff]  }
  0xe5   : > { %1047 = vst [vmem:[#allocation2 + $0xc0] sm:$0xf] %v1046_v43  ;;  %1048 = vst [vmem:[#allocation2 + $0xc4] sm:$0xf] %v888_v58  ;;  %v7819_v15 = vld [vmem:[#allocation10_spill] sm:$0xff]  ;;  %v5876_v63 = vld [vmem:[%s7746_s3 + $0x160] sm:$0xff]  }
  0xe6   : > { %5434 = vmatmul.mubr.bf16.gmra.mxu1 %v6866_v41  ;;  %1051 = vst [vmem:[#allocation2 + $0xc8] sm:$0x1] %v1050_v44  ;;  %v5878_v43 = vld [vmem:[%s7746_s3 + $0x158] sm:$0xff]   ;;  %v7823_v58 = vld [vmem:[#allocation5_spill] sm:$0xff]  ;;  %v7824_v44 = vld [vmem:[#allocation6_spill] sm:$0xff] }
  0xe7   : > { %5437 = vmatprep.mubr.bf16.mxu1 %v6871_v1  ;;  %5514 = vmatpush3.bf16.msra.mxu1 %v5863_v21  ;;  %v7818_v21 = vld [vmem:[#allocation7_spill] sm:$0xff] }
  0xe8   : > { %5515 = vmatprep.subr.bf16.mxu1 %v5867_v39 }
  0xeb   : > { %5494 = vmatmul.mubr.bf16.gmra.mxu0 %v6804_v48  ;;  %5516 = vmatpush3.bf16.msra.mxu1 %v5867_v39  ;;  %v7822_v39 = vld [vmem:[#allocation4_spill] sm:$0xff] }
  0xec   : > { %5497 = vmatprep.mubr.bf16.mxu0 %v6890_v18  ;;  %5597 = vmatprep.subr.bf16.mxu1 %v5870_v16  ;;  %v6939_v51 = vld [vmem:[#allocation2 + $0xc4] sm:$0xf] }
  0xed   : > { %v3110_v22 = vrot.slane %v6939_v51, 5  ;;  %v6950_v11 = vld [vmem:[#allocation2 + $0xc8] sm:$0x1]  ;;  %v2831_v24 = vshll.u32 %v6939_v51, 16 }
  0xee   : > { %5438 = vmatmul.mubr.bf16.gmra.mxu1 %v6899_v30  ;;  %v3113_v28 = vrot.slane %v6950_v11, 5 }
  0xef   : > { %5441 = vmatprep.mubr.bf16.mxu1 %v6904_v19  ;;  %v3112_v5 = vrot.slane %v3110_v22, 4  ;;  %v2833_v0 = vrot.slane %v2831_v24, 5 }
  0xf1   : > { %v3114_v33 = vsel %vm6572_vm14, %v3112_v5, %v3113_v28  ;;  %v5884_v28 = vld [vmem:[%s7746_s3 + $0x140] sm:$0xff]  }
  0xf3   : > { %5498 = vmatmul.mubr.bf16.gmra.mxu0 %v6912_v50 }
  0xf4   : > { %5565 = vmatprep.mubr.bf16.mxu0 %v6158_v17  ;;  %v5875_v17 = vld [vmem:[%s7746_s3 + $0x1a8] sm:$0xff]  }
  0xf6   : > { %5442 = vmatmul.mubr.bf16.gmra.mxu1 %v6917_v10 }
  0xf7   : > { %5445 = vmatprep.mubr.bf16.mxu1 %v6920_v53 }
  0xfb   : > { %5566 = vmatmul.mubr.bf16.vlgmr.msra.gmra.mxu0 %v6271_v2 }
  0xfc   : > { %5646 = vmatpush3.bf16.msra.mxu0 %v6809_v55  ;;  %5569 = vmatprep.mubr.bf16.mxu0 %v6302_v4  ;;  %v6946_v55 = vld [vmem:[#allocation2 + $0xc0] sm:$0xf] }
  0xfd   : > { %5647 = vmatprep.subr.bf16.mxu0 %v5873_v57  ;;  %v4765_v32 = vrot.slane %v6946_v55, 9  ;;  %v2822_v8 = vshrl.u32 %v6946_v55, 16  ;;  %v2825_v12 = vshll.u32 %v6946_v55, 16 }
  0xfe   : > { %5446 = vmatmul.mubr.bf16.gmra.mxu1 %v6930_v45 }
  0xff   : > { %5449 = vmatprep.mubr.bf16.mxu1 %v6779_v38  ;;  %v3111_v47 = vsel %vm6572_vm14, %v4765_v32, %v3110_v22  ;;  %v2824_v46 = vrot.slane %v2822_v8, 4  ;;  %v2827_v3 = vrot.slane %v2825_v12, 5  ;;  %v7825_v22 = vld [vmem:[#allocation8_spill] sm:$0xff] }
 0x100   : > { %5648 = vmatpush3.bf16.msra.mxu0 %v5873_v57  ;;  %v6962_v36 = vcombine.low %v3111_v47, %v3114_v33  ;;  %v2841_v47 = vshll.u32 %v6950_v11, 16  ;;  %v7827_v11 = vld [vmem:[#allocation12_spill] sm:$0xff] }
 0x101   : > { %5649 = vmatprep.subr.bf16.mxu0 %v5875_v17  ;;  %v2828_v32 = vor.u32 %v2827_v3, %v2824_v46 }
 0x103   : > { %5570 = vmatmul.mubr.bf16.gmra.mxu0 %v6410_v20 }
 0x104   : > { %5573 = vmatprep.mubr.bf16.mxu0 %v7818_v21  ;;  %5650 = vmatpush3.bf16.msra.mxu0 %v5875_v17  ;;  %v5882_v17 = vld [vmem:[%s7746_s3 + $0x148] sm:$0xff]  }
 0x105   : > { %5651 = vmatprep.subr.bf16.mxu0 %v5877_v31 }
 0x106   : > { %5450 = vmatmul.mubr.bf16.gmra.mxu1 %v6799_v62 }
 0x107   : > { %5517 = vmatprep.mubr.bf16.mxu1 %v6713_v7  ;;  %v5883_v7 = vld [vmem:[%s7746_s3 + $0x188] sm:$0xff]  }
 0x108   : > { %5652 = vmatpush3.bf16.msra.mxu0 %v5877_v31  ;;  %v7826_v31 = vld [vmem:[#allocation9_spill] sm:$0xff] }
 0x109   : > { %5653 = vmatprep.subr.bf16.mxu0 %v5879_v42 }
 0x10b   : > { %5574 = vmatmul.mubr.bf16.gmra.mxu0 %v7819_v15 }
 0x10c   : > { %5577 = vmatprep.mubr.bf16.mxu0 %v7820_v52  ;;  %5654 = vmatpush3.bf16.msra.mxu0 %v5879_v42  ;;  %v2829_v42 = vrot.slane %v2828_v32, 4  ;;  %v5894_v32 = vld [vmem:[%s7746_s3 + $0x220] sm:$0xff]  }
 0x10d   : > { %5655 = vmatprep.subr.bf16.mxu0 %v5881_v54 }
 0x10e   : > { %5518 = vmatmul.mubr.bf16.vlgmr.msra.gmra.mxu1 %v6718_v29 }
 0x10f   : > { %5598 = vmatpush3.bf16.msra.mxu1 %v5870_v16  ;;  %5521 = vmatprep.mubr.bf16.mxu1 %v6764_v61  ;;  %v2835_v16 = vshrl.u32 %v6939_v51, 16 }
 0x110   : > { %5599 = vmatprep.subr.bf16.mxu1 %v5872_v35  ;;  %5656 = vmatpush3.bf16.msra.mxu0 %v5881_v54  ;;  %v2843_v54 = vrot.slane %v2841_v47, 5 }
 0x111   : > { %5657 = vmatprep.subr.bf16.mxu0 %v5883_v7  ;;  %v2837_v57 = vrot.slane %v2835_v16, 4 }
 0x113   : > { %5578 = vmatmul.mubr.bf16.gmra.mxu0 %v7821_v14  ;;  %5600 = vmatpush3.bf16.msra.mxu1 %v5872_v35  ;;  %v2838_v5 = vor.u32 %v2837_v57, %v2833_v0  ;;  %v7022_v35 = vld [vmem:[%s7746_s3 + $0x1f8] sm:$0xff]   ;;  %v5892_v57 = vld [vmem:[%s7746_s3 + $0x228] sm:$0xff]  }
 0x114   : > { %5581 = vmatprep.mubr.bf16.mxu0 %v7822_v39  ;;  %5601 = vmatprep.subr.bf16.mxu1 %v5874_v56 }
 0x115   : > { %5658 = vmatpush3.bf16.msra.mxu0 %v5883_v7  ;;  %v2839_v33 = vrot.slane %v2838_v5, 4  ;;  %v2834_v7 = vsel %vm6029_vm3, %v2829_v42, %v2833_v0  ;;  %v7063_v5 = vpop.f32.mrf.mxu0 }
 0x116   : > { %5659 = vmatprep.subr.bf16.mxu0 %v5886_v6  ;;  %5522 = vmatmul.mubr.bf16.gmra.mxu1 %v6766_v25 }
 0x117   : > { %5525 = vmatprep.mubr.bf16.mxu1 %v6833_v9  ;;  %5602 = vmatpush3.bf16.msra.mxu1 %v5874_v56  ;;  %v2844_v56 = vsel %vm6029_vm3, %v2839_v33, %v2843_v54  ;;  %v7067_v33 = vcombine.low %v6946_v55, %v6939_v51  ;;  %v5889_v55 = vld [vmem:[%s7746_s3 + $0x1f0] sm:$0xff]  }
 0x118   : > { %5603 = vmatprep.subr.bf16.mxu1 %v5876_v63 }
 0x119   : > { %5660 = vmatpush3.bf16.msra.mxu0 %v5886_v6  ;;  %v7032_v6 = vcombine.low %v2834_v7, %v2844_v56  ;;  %v7075_v56 = vpop.f32.mrf.mxu0 }
 0x11a   : > { %5741 = vmatprep.subr.bf16.mxu0 %v5888_v60 }
 0x11b   : > { %5582 = vmatmul.mubr.bf16.gmra.mxu0 %v7823_v58  ;;  %5604 = vmatpush3.bf16.msra.mxu1 %v5876_v63  ;;  %7828 = vst [vmem:[#allocation7_spill] sm:$0xff] %v7032_v6  ;;  %v7038_v63 = vld [vmem:[#allocation2 + $0xcc] sm:$0xf] }
 0x11c   : > { %5585 = vmatprep.mubr.bf16.mxu0 %v7824_v44  ;;  %5605 = vmatprep.subr.bf16.mxu1 %v5878_v43  ;;  %v3642_v8 = vshrl.u32 %v7038_v63, 16  ;;  %v3645_v12 = vshll.u32 %v7038_v63, 16 }
 0x11e   : > { %5526 = vmatmul.mubr.bf16.gmra.mxu1 %v6837_v13  ;;  %v3647_v46 = vrot.slane %v3645_v12, 5 }
 0x11f   : > { %5529 = vmatprep.mubr.bf16.mxu1 %v6866_v41  ;;  %5606 = vmatpush3.bf16.msra.mxu1 %v5878_v43  ;;  %v7040_v43 = vld [vmem:[#allocation2 + $0xd0] sm:$0xf] }
 0x120   : > { %5607 = vmatprep.subr.bf16.mxu1 %v5880_v40  ;;  %v3651_v24 = vshll.u32 %v7040_v43, 16  ;;  %v3655_v16 = vshrl.u32 %v7040_v43, 16 }
 0x122   : > { %v3653_v3 = vrot.slane %v3651_v24, 5  ;;  %v3657_v0 = vrot.slane %v3655_v16, 4  ;;  %v5900_v24 = vld [vmem:[%s7746_s3 + $0x208] sm:$0xff]   ;;  %v7831_v16 = vld [vmem:[#allocation14_spill] sm:$0xff] }
 0x123   : > { %5586 = vmatmul.mubr.bf16.gmra.mxu0 %v7825_v22  ;;  %5608 = vmatpush3.bf16.msra.mxu1 %v5880_v40  ;;  %v3644_v40 = vrot.slane %v3642_v8, 4  ;;  %v5896_v8 = vld [vmem:[%s7746_s3 + $0x218] sm:$0xff]  }
 0x124   : > { %5589 = vmatprep.mubr.bf16.mxu0 %v7826_v31  ;;  %5609 = vmatprep.subr.bf16.mxu1 %v5882_v17 }
 0x126   : > { %5530 = vmatmul.mubr.bf16.gmra.mxu1 %v6871_v1 }
 0x127   : > { %5533 = vmatprep.mubr.bf16.mxu1 %v6899_v30  ;;  %5610 = vmatpush3.bf16.msra.mxu1 %v5882_v17  ;;  %v7056_v17 = vld [vmem:[#allocation2 + $0xd4] sm:$0x1] }
 0x128   : > { %5611 = vmatprep.subr.bf16.mxu1 %v5884_v28 }
 0x12b   : > { %5590 = vmatmul.mubr.bf16.gmra.mxu0 %v7827_v11  ;;  %5612 = vmatpush3.bf16.msra.mxu1 %v5884_v28 }
 0x12c   : > { %5593 = vmatprep.mubr.bf16.mxu0 %v6685_v59  ;;  %5693 = vmatprep.subr.bf16.mxu1 %v7022_v35 }
 0x12e   : > { %5534 = vmatmul.mubr.bf16.gmra.mxu1 %v6904_v19 }
 0x12f   : > { %5537 = vmatprep.mubr.bf16.mxu1 %v6917_v10 }
 0x133   : > { %5594 = vmatmul.mubr.bf16.gmra.mxu0 %v7032_v6 }
 0x134   : > { %5661 = vmatprep.mubr.bf16.mxu0 %v6718_v29  ;;  %v5890_v29 = vld [vmem:[%s7746_s3 + $0x230] sm:$0xff]  }
 0x136   : > { %5538 = vmatmul.mubr.bf16.gmra.mxu1 %v6920_v53 }
 0x137   : > { %5541 = vmatprep.mubr.bf16.mxu1 %v6930_v45 }
 0x13b   : > { %5662 = vmatmul.mubr.bf16.vlgmr.msra.gmra.mxu0 %v6764_v61  ;;  %v3648_v61 = vor.u32 %v3647_v46, %v3644_v40  ;;  %v5903_v40 = vld [vmem:[%s7746_s3 + $0x200] sm:$0xff]  }
 0x13c   : > { %5742 = vmatpush3.bf16.msra.mxu0 %v5888_v60  ;;  %5665 = vmatprep.mubr.bf16.mxu0 %v6766_v25  ;;  %v3658_v60 = vor.u32 %v3657_v0, %v3653_v3  ;;  %v3661_v25 = vshll.u32 %v7056_v17, 16  ;;  %v7118_v0 = vpop.f32.mrf.mxu1 }
 0x13d   : > { %5743 = vmatprep.subr.bf16.mxu0 %v5890_v29  ;;  %v3649_v47 = vrot.slane %v3648_v61, 4 }
 0x13e   : > { %5542 = vmatmul.mubr.bf16.gmra.mxu1 %v6779_v38  ;;  %v3659_v28 = vrot.slane %v3658_v60, 4  ;;  %v3663_v42 = vrot.slane %v3661_v25, 5  ;;  %v7127_v61 = vpop.f32.mrf.mxu1  ;;  %v5897_v60 = vld [vmem:[%s7746_s3 + $0x1d0] sm:$0xff]  }
 0x13f   : > { %5545 = vmatprep.mubr.bf16.mxu1 %v6799_v62  ;;  %v3654_v54 = vsel %vm6029_vm3, %v3649_v47, %v3653_v3  ;;  %v7833_v3 = vld [vmem:[#allocation16_spill] sm:$0xff] }
 0x140   : > { %5744 = vmatpush3.bf16.msra.mxu0 %v5890_v29  ;;  %v3664_v7 = vsel %vm6029_vm3, %v3659_v28, %v3663_v42  ;;  %v7832_v29 = vld [vmem:[#allocation15_spill] sm:$0xff]  ;;  %v7136_v47 = vpop.f32.mrf.mxu1  ;;  %v7836_v28 = vld [vmem:[#allocation20_spill] sm:$0xff] }
 0x141   : > { %5745 = vmatprep.subr.bf16.mxu0 %v5892_v57  ;;  %v7080_v51 = vcombine.low %v3654_v54, %v3664_v7  ;;  %v5902_v7 = vld [vmem:[%s7746_s3 + $0x1c0] sm:$0xff]  }
 0x142   : > { %v7144_v42 = vpop.f32.mrf.mxu1 }
 0x143   : > { %5666 = vmatmul.mubr.bf16.gmra.mxu0 %v6833_v9  ;;  %7829 = vst [vmem:[#allocation10_spill] sm:$0xff] %v7080_v51  ;;  %v7830_v9 = vld [vmem:[#allocation13_spill] sm:$0xff] }
 0x144   : > { %5669 = vmatprep.mubr.bf16.mxu0 %v6837_v13  ;;  %5746 = vmatpush3.bf16.msra.mxu0 %v5892_v57  ;;  %v7084_v13 = vpop.f32.mrf.mxu0  ;;  %v7834_v57 = vld [vmem:[#allocation18_spill] sm:$0xff] }
 0x145   : > { %5747 = vmatprep.subr.bf16.mxu0 %v5894_v32 }
 0x146   : > { %5546 = vmatmul.mubr.bf16.gmra.mxu1 %v7067_v33  ;;  %v7094_v12 = vpop.f32.mrf.mxu0 }
 0x147   : > { %5613 = vmatprep.mubr.bf16.mxu1 %v7830_v9  ;;  %v7154_v9 = vpop.f32.mrf.mxu1 }
 0x148   : > { %5748 = vmatpush3.bf16.msra.mxu0 %v5894_v32  ;;  %v7835_v32 = vld [vmem:[#allocation19_spill] sm:$0xff]  ;;  %7838 = vst [vmem:[#allocation11_spill] sm:$0xff] %v7154_v9 }
 0x149   : > { %5749 = vmatprep.subr.bf16.mxu0 %v5896_v8 }
 0x14b   : > { %5670 = vmatmul.mubr.bf16.gmra.mxu0 %v6866_v41  ;;  %v5891_v41 = vld [vmem:[%s7746_s3 + $0x1e8] sm:$0xff]  }
 0x14c   : > { %5673 = vmatprep.mubr.bf16.mxu0 %v6871_v1  ;;  %5750 = vmatpush3.bf16.msra.mxu0 %v5896_v8  ;;  %v7105_v1 = vpop.f32.mrf.mxu0  ;;  %v7837_v8 = vld [vmem:[#allocation21_spill] sm:$0xff] }
 0x14d   : > { %5751 = vmatprep.subr.bf16.mxu0 %v5898_v23 }
 0x14e   : > { %5614 = vmatmul.mubr.bf16.vlgmr.msra.gmra.mxu1 %v7831_v16  ;;  %v7115_v46 = vpop.f32.mrf.mxu0 }
 0x14f   : > { %5694 = vmatpush3.bf16.msra.mxu1 %v7022_v35  ;;  %5617 = vmatprep.mubr.bf16.mxu1 %v7832_v29  ;;  %v5893_v35 = vld [vmem:[%s7746_s3 + $0x1e0] sm:$0xff]  }
 0x150   : > { %5695 = vmatprep.subr.bf16.mxu1 %v5889_v55  ;;  %5752 = vmatpush3.bf16.msra.mxu0 %v5898_v23 }
 0x151   : > { %5753 = vmatprep.subr.bf16.mxu0 %v5900_v24 }
 0x153   : > { %5674 = vmatmul.mubr.bf16.gmra.mxu0 %v6899_v30  ;;  %5696 = vmatpush3.bf16.msra.mxu1 %v5889_v55  ;;  %v5895_v30 = vld [vmem:[%s7746_s3 + $0x1d8] sm:$0xff]  }
 0x154   : > { %5677 = vmatprep.mubr.bf16.mxu0 %v6904_v19  ;;  %5697 = vmatprep.subr.bf16.mxu1 %v5891_v41  ;;  %v7124_v19 = vpop.f32.mrf.mxu0 }
 0x155   : > { %5754 = vmatpush3.bf16.msra.mxu0 %v5900_v24  ;;  %v4807_v24 = vcombine.low %v7038_v63, %v7040_v43 }
 0x156   : > { %5755 = vmatprep.subr.bf16.mxu0 %v5903_v40  ;;  %5618 = vmatmul.mubr.bf16.gmra.mxu1 %v7833_v3  ;;  %v7133_v25 = vpop.f32.mrf.mxu0 }
 0x157   : > { %5621 = vmatprep.mubr.bf16.mxu1 %v7834_v57  ;;  %5698 = vmatpush3.bf16.msra.mxu1 %v5891_v41 }
 0x158   : > { %5699 = vmatprep.subr.bf16.mxu1 %v5893_v35 }
 0x159   : > { %5756 = vmatpush3.bf16.msra.mxu0 %v5903_v40 }
 0x15b   : > { %5678 = vmatmul.mubr.bf16.gmra.mxu0 %v6917_v10  ;;  %5700 = vmatpush3.bf16.msra.mxu1 %v5893_v35  ;;  %v7139_v10 = vpop.f32.mrf.mxu0 }
 0x15c   : > { %5681 = vmatprep.mubr.bf16.mxu0 %v6920_v53  ;;  %5701 = vmatprep.subr.bf16.mxu1 %v5895_v30  ;;  %v5899_v53 = vld [vmem:[%s7746_s3 + $0x1c8] sm:$0xff]  }
 0x15d   : > { %v7148_v54 = vpop.f32.mrf.mxu0 }
 0x15e   : > { %5622 = vmatmul.mubr.bf16.gmra.mxu1 %v7835_v32 }
 0x15f   : > { %5625 = vmatprep.mubr.bf16.mxu1 %v7836_v28  ;;  %5702 = vmatpush3.bf16.msra.mxu1 %v5895_v30  ;;  %v7157_v23 = vpop.f32.mrf.mxu0 }
 0x160   : > { %5703 = vmatprep.subr.bf16.mxu1 %v5897_v60 }
 0x163   : > { %5682 = vmatmul.mubr.bf16.gmra.mxu0 %v6930_v45  ;;  %5704 = vmatpush3.bf16.msra.mxu1 %v5897_v60  ;;  %v7159_v45 = vpop.f32.mrf.mxu1 }
 0x164   : > { %5685 = vmatprep.mubr.bf16.mxu0 %v6779_v38  ;;  %5705 = vmatprep.subr.bf16.mxu1 %v5899_v53  ;;  %7839 = vst [vmem:[#allocation3_spill] sm:$0xff] %v7159_v45  ;;  %v7163_v38 = vpop.f32.mrf.mxu0 }
 0x165   : > { %v7166_v55 = vpop.f32.mrf.mxu1 }
 0x166   : > { %5626 = vmatmul.mubr.bf16.gmra.mxu1 %v7837_v8  ;;  %7840 = vst [vmem:[#allocation4_spill] sm:$0xff] %v7166_v55 }
 0x167   : > { %5629 = vmatprep.mubr.bf16.mxu1 %v6812_v49  ;;  %5706 = vmatpush3.bf16.msra.mxu1 %v5899_v53  ;;  %v7173_v40 = vpop.f32.mrf.mxu1 }
 0x168   : > { %5707 = vmatprep.subr.bf16.mxu1 %v5902_v7  ;;  %7841 = vst [vmem:[#allocation5_spill] sm:$0xff] %v7173_v40 }
 0x169   : > { %v7181_v35 = vpop.f32.mrf.mxu1 }
 0x16a   : > { %7842 = vst [vmem:[#allocation6_spill] sm:$0xff] %v7181_v35 }
 0x16b   : > { %5686 = vmatmul.mubr.bf16.gmra.mxu0 %v6799_v62  ;;  %5708 = vmatpush3.bf16.msra.mxu1 %v5902_v7  ;;  %v7186_v60 = vpop.f32.mrf.mxu1 }
 0x16c   : > { %5689 = vmatprep.mubr.bf16.mxu0 %v7067_v33  ;;  %7843 = vst [vmem:[#allocation8_spill] sm:$0xff] %v7186_v60 }
 0x16e   : > { %5630 = vmatmul.mubr.bf16.gmra.mxu1 %v6820_v34 }
 0x16f   : > { %5633 = vmatprep.mubr.bf16.mxu1 %v6854_v37 }
 0x170   : > { %v7171_v41 = vpop.f32.mrf.mxu0 }
 0x172   : > { %v7175_v62 = vpop.f32.mrf.mxu0 }
 0x173   : > { %5690 = vmatmul.mubr.bf16.gmra.mxu0 %v4807_v24 }
 0x174   : > { %5757 = vmatprep.mubr.bf16.mxu0 %v7831_v16  ;;  %v7178_v33 = vpop.f32.mrf.mxu0  ;;  %v7191_v16 = vpop.f32.mrf.mxu1 }
 0x175   : > { %7844 = vst [vmem:[#allocation9_spill] sm:$0xff] %v7191_v16 }
 0x176   : > { %5634 = vmatmul.mubr.bf16.gmra.mxu1 %v6857_v27  ;;  %v7183_v30 = vpop.f32.mrf.mxu0  ;;  %v7194_v6 = vpop.f32.mrf.mxu1 }
 0x177   : > { %5637 = vmatprep.mubr.bf16.mxu1 %v6804_v48  ;;  %7845 = vst [vmem:[#allocation13_spill] sm:$0xff] %v7194_v6 }
 0x17b   : > { %v5471_v53 = vpop.f32.mrf.mxu0  ;;  %5758 = vmatmul.mubr.bf16.vlgmr.msra.gmra.mxu0 %v7832_v29 }
 0x17c   : > { %5761 = vmatprep.mubr.bf16.mxu0 %v7833_v3 }
 0x17d   : > { %v2398_v7 = vpop.f32.mrf.mxu0 }
 0x17e   : > { %5638 = vmatmul.mubr.bf16.gmra.mxu1 %v6890_v18 }
 0x17f   : > { %v5472_v24 = vpop.f32.mrf.mxu0  ;;  %5641 = vmatprep.mubr.bf16.mxu1 %v6912_v50 }
 0x181   : > { %v2401_v51 = vpop.f32.mrf.mxu0 }
 0x183   : > { %v5475_v35 = vpop.f32.mrf.mxu0  ;;  %5762 = vmatmul.mubr.bf16.gmra.mxu0 %v7834_v57 }
 0x184   : > { %5765 = vmatprep.mubr.bf16.mxu0 %v7835_v32 }
 0x185   : > { %v2414_v60 = vpop.f32.mrf.mxu0 }
 0x186   : > { %v7198_v29 = vpop.f32.mrf.mxu1  ;;  %5642 = vmatmul.mubr.bf16.gmra.mxu1 %v6962_v36 }
 0x187   : > { %7846 = vst [vmem:[#allocation14_spill] sm:$0xff] %v7198_v29  ;;  %v5476_v3 = vpop.f32.mrf.mxu0  ;;  %5709 = vmatprep.mubr.bf16.mxu1 %v6271_v2 }
 0x188   : > { %v7202_v16 = vpop.f32.mrf.mxu1 }
 0x189   : > { %7847 = vst [vmem:[#allocation15_spill] sm:$0xff] %v7202_v16  ;;  %v2417_v59 = vpop.f32.mrf.mxu0 }
 0x18a   : > { %v7204_v40 = vpop.f32.mrf.mxu1 }
 0x18b   : > { %7848 = vst [vmem:[#allocation16_spill] sm:$0xff] %v7204_v40  ;;  %v5479_v55 = vpop.f32.mrf.mxu0  ;;  %5766 = vmatmul.mubr.bf16.gmra.mxu0 %v7836_v28 }
 0x18c   : > { %5769 = vmatprep.mubr.bf16.mxu0 %v7837_v8  ;;  %v7208_v57 = vpop.f32.mrf.mxu1 }
 0x18d   : > { %7849 = vst [vmem:[#allocation18_spill] sm:$0xff] %v7208_v57  ;;  %v2430_v32 = vpop.f32.mrf.mxu0 }
 0x18e   : > { %v5423_v6 = vpop.f32.mrf.mxu1  ;;  %5710 = vmatmul.mubr.bf16.vlgmr.msra.gmra.mxu1 %v6302_v4 }
 0x18f   : > { %v5480_v29 = vpop.f32.mrf.mxu0  ;;  %v1986_v45 = vadd.f32 %v5423_v6, %v7063_v5  ;;  %5713 = vmatprep.mubr.bf16.mxu1 %v6410_v20 }
 0x190   : > { %v1977_v2 = vpop.f32.mrf.mxu1 }
 0x191   : > { %v2433_v16 = vpop.f32.mrf.mxu0  ;;  %v1978_v40 = vadd.f32 %v1977_v2, %v7075_v56  ;;  %v7214_v11 = vadd.f32 %v5471_v53, %v1986_v45 }
 0x192   : > { %v5424_v28 = vpop.f32.mrf.mxu1 }
 0x193   : > { %v5483_v9 = vpop.f32.mrf.mxu0  ;;  %5770 = vmatmul.mubr.bf16.gmra.mxu0 %v6812_v49  ;;  %v1989_v8 = vadd.f32 %v5424_v28, %v7084_v13  ;;  %v7219_v4 = vadd.f32 %v2398_v7, %v1978_v40 }
 0x194   : > { %5773 = vmatprep.mubr.bf16.mxu0 %v6820_v34  ;;  %v1980_v57 = vpop.f32.mrf.mxu1 }
 0x195   : > { %v7221_v6 = vpop.f32.mrf.mxu0  ;;  %v1981_v20 = vadd.f32 %v1980_v57, %v7094_v12  ;;  %v7224_v5 = vadd.f32 %v5472_v24, %v1989_v8 }
 0x196   : > { %v5427_v56 = vpop.f32.mrf.mxu1  ;;  %5714 = vmatmul.mubr.bf16.gmra.mxu1 %v7818_v21 }
 0x197   : > { %v7227_v45 = vpop.f32.mrf.mxu0  ;;  %v2002_v49 = vadd.f32 %v5427_v56, %v7105_v1  ;;  %5717 = vmatprep.mubr.bf16.mxu1 %v7819_v15  ;;  %v7231_v13 = vadd.f32 %v2401_v51, %v1981_v20 }
 0x198   : > { %v1993_v34 = vpop.f32.mrf.mxu1 }
 0x199   : > { %v7233_v40 = vpop.f32.mrf.mxu0  ;;  %v1994_v53 = vadd.f32 %v1993_v34, %v7115_v46  ;;  %v7236_v7 = vadd.f32 %v5475_v35, %v2002_v49 }
 0x19a   : > { %v5428_v12 = vpop.f32.mrf.mxu1 }
 0x19b   : > { %v7238_v24 = vpop.f32.mrf.mxu0  ;;  %5774 = vmatmul.mubr.bf16.gmra.mxu0 %v6854_v37  ;;  %v2005_v21 = vadd.f32 %v5428_v12, %v7124_v19  ;;  %v7243_v1 = vadd.f32 %v2414_v60, %v1994_v53 }
 0x19c   : > { %5777 = vmatprep.mubr.bf16.mxu0 %v6857_v27  ;;  %v1996_v15 = vpop.f32.mrf.mxu1 }
 0x19d   : > { %v7245_v51 = vpop.f32.mrf.mxu0  ;;  %v1997_v57 = vadd.f32 %v1996_v15, %v7133_v25  ;;  %v7248_v2 = vadd.f32 %v5476_v3, %v2005_v21 }
 0x19e   : > { %v5431_v46 = vpop.f32.mrf.mxu1  ;;  %5718 = vmatmul.mubr.bf16.gmra.mxu1 %v7820_v52  ;;  %v3930_v52 = vrot.slane %v7040_v43, 5 }
 0x19f   : > { %v7251_v35 = vpop.f32.mrf.mxu0  ;;  %v2018_v37 = vadd.f32 %v5431_v46, %v7139_v10  ;;  %5721 = vmatprep.mubr.bf16.mxu1 %v7821_v14  ;;  %v7255_v19 = vadd.f32 %v2417_v59, %v1997_v57 }
 0x1a0   : > { %v2009_v27 = vpop.f32.mrf.mxu1 }
 0x1a1   : > { %v7257_v60 = vpop.f32.mrf.mxu0  ;;  %v2010_v28 = vadd.f32 %v2009_v27, %v7148_v54  ;;  %v7260_v8 = vadd.f32 %v5479_v55, %v2018_v37  ;;  %v4841_v55 = vrot.slane %v7038_v63, 9 }
 0x1a2   : > { %v5432_v25 = vpop.f32.mrf.mxu1 }
 0x1a3   : > { %v7262_v3 = vpop.f32.mrf.mxu0  ;;  %5778 = vmatmul.mubr.bf16.gmra.mxu0 %v6804_v48  ;;  %v2021_v10 = vadd.f32 %v5432_v25, %v7157_v23  ;;  %v7268_v59 = vadd.f32 %v2430_v32, %v2010_v28  ;;  %v3932_v23 = vrot.slane %v3930_v52, 4 }
 0x1a4   : > { %5781 = vmatprep.mubr.bf16.mxu0 %v6890_v18  ;;  %v2012_v14 = vpop.f32.mrf.mxu1  ;;  %v3933_v18 = vrot.slane %v7056_v17, 5 }
 0x1a5   : > { %v2478_v20 = vpop.f32.mrf.mxu0  ;;  %v2013_v56 = vadd.f32 %v2012_v14, %v7163_v38  ;;  %v7271_v54 = vadd.f32 %v5480_v29, %v2021_v10  ;;  %v7851_v10 = vld [vmem:[#allocation12_spill] sm:$0xff] }
 0x1a6   : > { %v5435_v49 = vpop.f32.mrf.mxu1  ;;  %5722 = vmatmul.mubr.bf16.gmra.mxu1 %v7822_v39  ;;  %v3934_v17 = vsel %vm6572_vm14, %v3932_v23, %v3933_v18 }
 0x1a7   : > { %v5492_v48 = vpop.f32.mrf.mxu0  ;;  %v2034_v43 = vadd.f32 %v5435_v49, %v7171_v41  ;;  %5725 = vmatprep.mubr.bf16.mxu1 %v7823_v58  ;;  %v7278_v32 = vadd.f32 %v2433_v16, %v2013_v56  ;;  %v3931_v58 = vsel %vm6572_vm14, %v4841_v55, %v3930_v52  ;;  %v7852_v56 = vld [vmem:[#allocation3_spill] sm:$0xff] }
 0x1a8   : > { %v2025_v34 = vpop.f32.mrf.mxu1 }
 0x1a9   : > { %v2481_v53 = vpop.f32.mrf.mxu0  ;;  %v2026_v38 = vadd.f32 %v2025_v34, %v7175_v62  ;;  %v7281_v29 = vadd.f32 %v5483_v9, %v2034_v43  ;;  %v7853_v43 = vld [vmem:[#allocation4_spill] sm:$0xff] }
 0x1aa   : > { %v5436_v63 = vpop.f32.mrf.mxu1 }
 0x1ab   : > { %v5495_v12 = vpop.f32.mrf.mxu0  ;;  %5782 = vmatmul.mubr.bf16.gmra.mxu0 %v6912_v50  ;;  %v2037_v39 = vadd.f32 %v5436_v63, %v7178_v33  ;;  %v7291_v41 = vadd.f32 %v7221_v6, %v2026_v38  ;;  %v4858_v33 = vcombine.low %v3931_v58, %v3934_v17  ;;  %v7854_v38 = vld [vmem:[#allocation5_spill] sm:$0xff] }
 0x1ac   : > { %5785 = vmatprep.mubr.bf16.mxu0 %v6962_v36  ;;  %v2028_v62 = vpop.f32.mrf.mxu1  ;;  %v7855_v58 = vld [vmem:[#allocation17_spill] sm:$0xff] }
 0x1ad   : > { %v2494_v9 = vpop.f32.mrf.mxu0  ;;  %v2029_v16 = vadd.f32 %v2028_v62, %v7183_v30  ;;  %v7295_v21 = vadd.f32 %v7227_v45, %v2037_v39  ;;  %v7856_v62 = vld [vmem:[#allocation6_spill] sm:$0xff] }
 0x1ae   : > { %v5439_v50 = vpop.f32.mrf.mxu1  ;;  %5726 = vmatmul.mubr.bf16.gmra.mxu1 %v7824_v44 }
 0x1af   : > { %v5496_v36 = vpop.f32.mrf.mxu0  ;;  %v2050_v15 = vadd.f32 %v5439_v50, %v7118_v0  ;;  %5729 = vmatprep.mubr.bf16.mxu1 %v7825_v22  ;;  %v7301_v26 = vadd.f32 %v7233_v40, %v2029_v16 }
 0x1b0   : > { %v2041_v6 = vpop.f32.mrf.mxu1 }
 0x1b1   : > { %v2497_v57 = vpop.f32.mrf.mxu0  ;;  %v2042_v46 = vadd.f32 %v2041_v6, %v7127_v61  ;;  %v7305_v30 = vadd.f32 %v7238_v24, %v2050_v15  ;;  %v7850_v24 = vld [vmem:[#allocation11_spill] sm:$0xff] }
 0x1b2   : > { %v5440_v45 = vpop.f32.mrf.mxu1 }
 0x1b3   : > { %v5499_v37 = vpop.f32.mrf.mxu0  ;;  %5786 = vmatmul.mubr.bf16.gmra.mxu0 %v4858_v33  ;;  %v2053_v44 = vadd.f32 %v5440_v45, %v7136_v47  ;;  %v7309_v27 = vadd.f32 %v7245_v51, %v2042_v46 }
 0x1b4   : > { %v2044_v0 = vpop.f32.mrf.mxu1 }
 0x1b5   : > { %v2510_v22 = vpop.f32.mrf.mxu0  ;;  %v2045_v40 = vadd.f32 %v2044_v0, %v7144_v42  ;;  %v7313_v28 = vadd.f32 %v7251_v35, %v2053_v44 }
 0x1b6   : > { %v5443_v25 = vpop.f32.mrf.mxu1  ;;  %5730 = vmatmul.mubr.bf16.gmra.mxu1 %v7826_v31 }
 0x1b7   : > { %v5500_v61 = vpop.f32.mrf.mxu0  ;;  %v2066_v52 = vadd.f32 %v5443_v25, %v7850_v24  ;;  %5733 = vmatprep.mubr.bf16.mxu1 %v7851_v10  ;;  %v7319_v47 = vadd.f32 %v7257_v60, %v2045_v40 }
 0x1b8   : > { %v2057_v51 = vpop.f32.mrf.mxu1 }
 0x1b9   : > { %v2513_v14 = vpop.f32.mrf.mxu0  ;;  %v2058_v55 = vadd.f32 %v2057_v51, %v7852_v56  ;;  %v7323_v42 = vadd.f32 %v7262_v3, %v2066_v52  ;;  %v7857_v3 = vld [vmem:[#allocation7_spill] sm:$0xff]  ;;  %v7860_v52 = vld [vmem:[#allocation13_spill] sm:$0xff]  ;;  %v7861_v56 = vld [vmem:[#allocation10_spill] sm:$0xff] }
 0x1ba   : > { %v5444_v35 = vpop.f32.mrf.mxu1 }
 0x1bb   : > { %v5567_v49 = vpop.f32.mrf.mxu0  ;;  %v2069_v23 = vadd.f32 %v5444_v35, %v7853_v43  ;;  %v7326_v31 = vadd.f32 %v2478_v20, %v2058_v55  ;;  %v7858_v20 = vld [vmem:[#allocation8_spill] sm:$0xff]  ;;  %v7862_v35 = vld [vmem:[#allocation14_spill] sm:$0xff] }
 0x1bc   : > { %v2060_v18 = vpop.f32.mrf.mxu1 }
 0x1bd   : > { %v2948_v34 = vpop.f32.mrf.mxu0  ;;  %v2061_v63 = vadd.f32 %v2060_v18, %v7854_v38  ;;  %v7329_v39 = vadd.f32 %v5492_v48, %v2069_v23  ;;  %v7859_v48 = vld [vmem:[#allocation9_spill] sm:$0xff]  ;;  %v7863_v38 = vld [vmem:[#allocation15_spill] sm:$0xff] }
 0x1be   : > { %v5447_v60 = vpop.f32.mrf.mxu1  ;;  %5734 = vmatmul.mubr.bf16.gmra.mxu1 %v7855_v58 }
 0x1bf   : > { %v5568_v17 = vpop.f32.mrf.mxu0  ;;  %v2082_v16 = vadd.f32 %v5447_v60, %v7856_v62  ;;  %5737 = vmatprep.mubr.bf16.mxu1 %v7857_v3  ;;  %v7334_v50 = vadd.f32 %v2481_v53, %v2061_v63  ;;  %v7864_v62 = vld [vmem:[#allocation16_spill] sm:$0xff] }
 0x1c0   : > { %v2073_v33 = vpop.f32.mrf.mxu1 }
 0x1c1   : > { %v2951_v15 = vpop.f32.mrf.mxu0  ;;  %v2074_v6 = vadd.f32 %v2073_v33, %v7858_v20  ;;  %v7337_v46 = vadd.f32 %v5495_v12, %v2082_v16  ;;  %v7865_v20 = vld [vmem:[#allocation18_spill] sm:$0xff] }
 0x1c2   : > { %v5448_v45 = vpop.f32.mrf.mxu1 }
 0x1c3   : > { %v5571_v44 = vpop.f32.mrf.mxu0  ;;  %v2085_v0 = vadd.f32 %v5448_v45, %v7859_v48  ;;  %v7340_v40 = vadd.f32 %v2494_v9, %v2074_v6 }
 0x1c4   : > { %v2076_v25 = vpop.f32.mrf.mxu1 }
 0x1c5   : > { %v2964_v24 = vpop.f32.mrf.mxu0  ;;  %v2077_v10 = vadd.f32 %v2076_v25, %v7860_v52  ;;  %v7343_v51 = vadd.f32 %v5496_v36, %v2085_v0 }
 0x1c6   : > { %v5451_v53 = vpop.f32.mrf.mxu1  ;;  %5738 = vmatmul.mubr.bf16.gmra.mxu1 %v7861_v56 }
 0x1c7   : > { %v5572_v55 = vpop.f32.mrf.mxu0  ;;  %v2098_v43 = vadd.f32 %v5451_v53, %v7862_v35  ;;  %v7347_v12 = vadd.f32 %v2497_v57, %v2077_v10 }
 0x1c8   : > { %v2089_v23 = vpop.f32.mrf.mxu1 }
 0x1c9   : > { %v2967_v18 = vpop.f32.mrf.mxu0  ;;  %v2090_v63 = vadd.f32 %v2089_v23, %v7863_v38  ;;  %v7350_v9 = vadd.f32 %v5499_v37, %v2098_v43 }
 0x1ca   : > { %v5452_v60 = vpop.f32.mrf.mxu1 }
 0x1cb   : > { %v5575_v58 = vpop.f32.mrf.mxu0  ;;  %v2101_v16 = vadd.f32 %v5452_v60, %v7864_v62  ;;  %v7353_v36 = vadd.f32 %v2510_v22, %v2090_v63 }
 0x1cc   : > { %v2092_v3 = vpop.f32.mrf.mxu1 }
 0x1cd   : > { %v2980_v33 = vpop.f32.mrf.mxu0  ;;  %v2093_v6 = vadd.f32 %v2092_v3, %v7865_v20  ;;  %v7356_v45 = vadd.f32 %v5500_v61, %v2101_v16 }
 0x1ce   : > { %v5519_v57 = vpop.f32.mrf.mxu1 }
 0x1cf   : > { %v5576_v48 = vpop.f32.mrf.mxu0  ;;  %v2791_v0 = vadd.f32 %v5519_v57, %v7214_v11  ;;  %v7359_v25 = vadd.f32 %v2513_v14, %v2093_v6 }
 0x1d0   : > { %v2662_v37 = vpop.f32.mrf.mxu1 }
 0x1d1   : > { %v2983_v52 = vpop.f32.mrf.mxu0  ;;  %v2789_v10 = vadd.f32 %v2662_v37, %v7219_v4  ;;  %v7362_v53 = vadd.f32 %v5567_v49, %v2791_v0 }
 0x1d2   : > { %v5520_v22 = vpop.f32.mrf.mxu1 }
 0x1d3   : > { %v5579_v56 = vpop.f32.mrf.mxu0  ;;  %v2792_v35 = vadd.f32 %v5520_v22, %v7224_v5  ;;  %v7365_v43 = vadd.f32 %v2948_v34, %v2789_v10 }
 0x1d4   : > { %v2665_v61 = vpop.f32.mrf.mxu1 }
 0x1d5   : > { %v2996_v23 = vpop.f32.mrf.mxu0  ;;  %v2790_v38 = vadd.f32 %v2665_v61, %v7231_v13  ;;  %v7368_v63 = vadd.f32 %v5568_v17, %v2792_v35 }
 0x1d6   : > { %v5523_v11 = vpop.f32.mrf.mxu1 }
 0x1d7   : > { %v5580_v14 = vpop.f32.mrf.mxu0  ;;  %v2795_v60 = vadd.f32 %v5523_v11, %v7236_v7  ;;  %v7371_v62 = vadd.f32 %v2951_v15, %v2790_v38 }
 0x1d8   : > { %v2678_v4 = vpop.f32.mrf.mxu1 }
 0x1d9   : > { %v2999_v49 = vpop.f32.mrf.mxu0  ;;  %v2793_v16 = vadd.f32 %v2678_v4, %v7243_v1  ;;  %v7374_v3 = vadd.f32 %v5571_v44, %v2795_v60 }
 0x1da   : > { %v5524_v5 = vpop.f32.mrf.mxu1 }
 0x1db   : > { %v5583_v34 = vpop.f32.mrf.mxu0  ;;  %v2796_v20 = vadd.f32 %v5524_v5, %v7248_v2  ;;  %v7377_v6 = vadd.f32 %v2964_v24, %v2793_v16 }
 0x1dc   : > { %v2681_v13 = vpop.f32.mrf.mxu1 }
 0x1dd   : > { %v3012_v17 = vpop.f32.mrf.mxu0  ;;  %v2794_v57 = vadd.f32 %v2681_v13, %v7255_v19  ;;  %v7380_v0 = vadd.f32 %v5572_v55, %v2796_v20 }
 0x1de   : > { %v5527_v7 = vpop.f32.mrf.mxu1 }
 0x1df   : > { %v5584_v15 = vpop.f32.mrf.mxu0  ;;  %v2799_v37 = vadd.f32 %v5527_v7, %v7260_v8  ;;  %v7383_v10 = vadd.f32 %v2967_v18, %v2794_v57 }
 0x1e0   : > { %v2694_v1 = vpop.f32.mrf.mxu1 }
 0x1e1   : > { %v3015_v44 = vpop.f32.mrf.mxu0  ;;  %v2797_v22 = vadd.f32 %v2694_v1, %v7268_v59  ;;  %v7386_v35 = vadd.f32 %v5575_v58, %v2799_v37 }
 0x1e2   : > { %v5528_v2 = vpop.f32.mrf.mxu1 }
 0x1e3   : > { %v5587_v24 = vpop.f32.mrf.mxu0  ;;  %v2800_v61 = vadd.f32 %v5528_v2, %v7271_v54  ;;  %v7389_v38 = vadd.f32 %v2980_v33, %v2797_v22 }
 0x1e4   : > { %v2697_v19 = vpop.f32.mrf.mxu1 }
 0x1e5   : > { %v3028_v55 = vpop.f32.mrf.mxu0  ;;  %v2798_v11 = vadd.f32 %v2697_v19, %v7278_v32  ;;  %v7392_v60 = vadd.f32 %v5576_v48, %v2800_v61 }
 0x1e6   : > { %v5531_v8 = vpop.f32.mrf.mxu1 }
 0x1e7   : > { %v5588_v18 = vpop.f32.mrf.mxu0  ;;  %v2803_v4 = vadd.f32 %v5531_v8, %v7281_v29  ;;  %v7395_v16 = vadd.f32 %v2983_v52, %v2798_v11 }
 0x1e8   : > { %v2710_v59 = vpop.f32.mrf.mxu1 }
 0x1e9   : > { %v3031_v58 = vpop.f32.mrf.mxu0  ;;  %v2801_v5 = vadd.f32 %v2710_v59, %v7291_v41  ;;  %v7398_v20 = vadd.f32 %v5579_v56, %v2803_v4 }
 0x1ea   : > { %v5532_v54 = vpop.f32.mrf.mxu1 }
 0x1eb   : > { %v5591_v33 = vpop.f32.mrf.mxu0  ;;  %v2804_v13 = vadd.f32 %v5532_v54, %v7295_v21  ;;  %v7401_v57 = vadd.f32 %v2996_v23, %v2801_v5 }
 0x1ec   : > { %v2713_v32 = vpop.f32.mrf.mxu1 }
 0x1ed   : > { %v3044_v48 = vpop.f32.mrf.mxu0  ;;  %v2802_v7 = vadd.f32 %v2713_v32, %v7301_v26  ;;  %v7404_v37 = vadd.f32 %v5580_v14, %v2804_v13 }
 0x1ee   : > { %v5535_v29 = vpop.f32.mrf.mxu1 }
 0x1ef   : > { %v5592_v52 = vpop.f32.mrf.mxu0  ;;  %v2807_v1 = vadd.f32 %v5535_v29, %v7305_v30  ;;  %v7407_v22 = vadd.f32 %v2999_v49, %v2802_v7 }
 0x1f0   : > { %v2726_v41 = vpop.f32.mrf.mxu1 }
 0x1f1   : > { %v3047_v56 = vpop.f32.mrf.mxu0  ;;  %v2805_v2 = vadd.f32 %v2726_v41, %v7309_v27  ;;  %v7410_v61 = vadd.f32 %v5583_v34, %v2807_v1 }
 0x1f2   : > { %v5536_v21 = vpop.f32.mrf.mxu1 }
 0x1f3   : > { %v5595_v23 = vpop.f32.mrf.mxu0  ;;  %v2808_v19 = vadd.f32 %v5536_v21, %v7313_v28  ;;  %v7413_v11 = vadd.f32 %v3012_v17, %v2805_v2 }
 0x1f4   : > { %v2729_v26 = vpop.f32.mrf.mxu1 }
 0x1f5   : > { %v3060_v14 = vpop.f32.mrf.mxu0  ;;  %v2806_v8 = vadd.f32 %v2729_v26, %v7319_v47  ;;  %v7416_v4 = vadd.f32 %v5584_v15, %v2808_v19 }
 0x1f6   : > { %v5539_v30 = vpop.f32.mrf.mxu1 }
 0x1f7   : > { %v5596_v49 = vpop.f32.mrf.mxu0  ;;  %v2811_v59 = vadd.f32 %v5539_v30, %v7323_v42  ;;  %v7419_v5 = vadd.f32 %v3015_v44, %v2806_v8 }
 0x1f8   : > { %v2742_v27 = vpop.f32.mrf.mxu1 }
 0x1f9   : > { %7866 = vst [vmem:[#allocation19_spill] sm:$0xff] %v7419_v5  ;;  %v3063_v34 = vpop.f32.mrf.mxu0  ;;  %v2809_v54 = vadd.f32 %v2742_v27, %v7326_v31  ;;  %v7422_v13 = vadd.f32 %v5587_v24, %v2811_v59 }
 0x1fa   : > { %v5540_v28 = vpop.f32.mrf.mxu1 }
 0x1fb   : > { %v5663_v17 = vpop.f32.mrf.mxu0  ;;  %v2812_v32 = vadd.f32 %v5540_v28, %v7329_v39  ;;  %v7425_v7 = vadd.f32 %v3028_v55, %v2809_v54 }
 0x1fc   : > { %v2745_v47 = vpop.f32.mrf.mxu1 }
 0x1fd   : > { %7867 = vst [vmem:[#allocation20_spill] sm:$0xff] %v7425_v7  ;;  %v3482_v15 = vpop.f32.mrf.mxu0  ;;  %v2810_v29 = vadd.f32 %v2745_v47, %v7334_v50  ;;  %v7428_v1 = vadd.f32 %v5588_v18, %v2812_v32 }
 0x1fe   : > { %v5543_v42 = vpop.f32.mrf.mxu1 }
 0x1ff   : > { %7868 = vst [vmem:[#allocation21_spill] sm:$0xff] %v7428_v1  ;;  %v7430_v44 = vpop.f32.mrf.mxu0  ;;  %v2815_v41 = vadd.f32 %v5543_v42, %v7337_v46  ;;  %v7433_v31 = vadd.f32 %v3031_v58, %v2810_v29 }
 0x200   : > { %v2758_v24 = vpop.f32.mrf.mxu1 }
 0x201   : > { %7869 = vst [vmem:[#allocation11_spill] sm:$0xff] %v7433_v31  ;;  %v7435_v2 = vpop.f32.mrf.mxu0  ;;  %v2813_v39 = vadd.f32 %v2758_v24, %v7340_v40  ;;  %v7438_v55 = vadd.f32 %v5591_v33, %v2815_v41 }
 0x202   : > { %v5544_v21 = vpop.f32.mrf.mxu1 }
 0x203   : > { %v5667_v19 = vpop.f32.mrf.mxu0  ;;  %v2816_v50 = vadd.f32 %v5544_v21, %v7343_v51  ;;  %v7441_v18 = vadd.f32 %v3044_v48, %v2813_v39 }
 0x204   : > { %v2761_v26 = vpop.f32.mrf.mxu1 }
 0x205   : > { %7870 = vst [vmem:[#allocation12_spill] sm:$0xff] %v7441_v18  ;;  %v7443_v8 = vpop.f32.mrf.mxu0  ;;  %v2814_v46 = vadd.f32 %v2761_v26, %v7347_v12  ;;  %v7446_v58 = vadd.f32 %v5592_v52, %v2816_v50 }
 0x206   : > { %v5547_v30 = vpop.f32.mrf.mxu1 }
 0x207   : > { %7871 = vst [vmem:[#allocation3_spill] sm:$0xff] %v7446_v58  ;;  %v7448_v59 = vpop.f32.mrf.mxu0  ;;  %v2819_v40 = vadd.f32 %v5547_v30, %v7350_v9  ;;  %v7451_v33 = vadd.f32 %v3047_v56, %v2814_v46 }
 0x208   : > { %v2774_v27 = vpop.f32.mrf.mxu1 }
 0x209   : > { %7872 = vst [vmem:[#allocation4_spill] sm:$0xff] %v7451_v33  ;;  %v7453_v54 = vpop.f32.mrf.mxu0  ;;  %v2817_v51 = vadd.f32 %v2774_v27, %v7353_v36  ;;  %v7456_v48 = vadd.f32 %v5595_v23, %v2819_v40 }
 0x20a   : > { %v5548_v28 = vpop.f32.mrf.mxu1 }
 0x20b   : > { %v5671_v32 = vpop.f32.mrf.mxu0  ;;  %v2820_v12 = vadd.f32 %v5548_v28, %v7356_v45  ;;  %v7459_v52 = vadd.f32 %v3060_v14, %v2817_v51 }
 0x20c   : > { %v2777_v47 = vpop.f32.mrf.mxu1 }
 0x20d   : > { %7873 = vst [vmem:[#allocation5_spill] sm:$0xff] %v7459_v52  ;;  %v7461_v29 = vpop.f32.mrf.mxu0  ;;  %v2818_v9 = vadd.f32 %v2777_v47, %v7359_v25  ;;  %v7464_v56 = vadd.f32 %v5596_v49, %v2820_v12 }
 0x20e   : > { %v5615_v42 = vpop.f32.mrf.mxu1 }
 0x20f   : > { %7874 = vst [vmem:[#allocation17_spill] sm:$0xff] %v7464_v56  ;;  %v7466_v41 = vpop.f32.mrf.mxu0  ;;  %v3347_v36 = vadd.f32 %v5615_v42, %v7362_v53  ;;  %v7469_v23 = vadd.f32 %v3063_v34, %v2818_v9 }
 0x210   : > { %v3218_v24 = vpop.f32.mrf.mxu1 }
 0x211   : > { %7875 = vst [vmem:[#allocation6_spill] sm:$0xff] %v7469_v23  ;;  %v7471_v39 = vpop.f32.mrf.mxu0  ;;  %v3345_v45 = vadd.f32 %v3218_v24, %v7365_v43  ;;  %v7474_v14 = vadd.f32 %v5663_v17, %v3347_v36 }
 0x212   : > { %v7476_v21 = vpop.f32.mrf.mxu1 }
 0x213   : > { %v5675_v50 = vpop.f32.mrf.mxu0  ;;  %v7478_v25 = vadd.f32 %v3482_v15, %v3345_v45 }
 0x214   : > { %v7480_v49 = vpop.f32.mrf.mxu1 }
 0x215   : > { %v7482_v26 = vpop.f32.mrf.mxu0 }
 0x216   : > { %v5619_v46 = vpop.f32.mrf.mxu1 }
 0x217   : > { %v7484_v53 = vpop.f32.mrf.mxu0  ;;  %v3351_v34 = vadd.f32 %v5619_v46, %v7374_v3 }
 0x218   : > { %v7487_v30 = vpop.f32.mrf.mxu1 }
 0x219   : > { %v7489_v40 = vpop.f32.mrf.mxu0  ;;  %v7491_v43 = vadd.f32 %v5667_v19, %v3351_v34  ;;  %v3349_v5 = vadd.f32 %v7487_v30, %v7377_v6 }
 0x21a   : > { %7876 = vst [vmem:[#allocation7_spill] sm:$0xff] %v7489_v40  ;;  %v7493_v17 = vpop.f32.mrf.mxu1 }
 0x21b   : > { %v5679_v27 = vpop.f32.mrf.mxu0 }
 0x21c   : > { %v7495_v15 = vpop.f32.mrf.mxu1 }
 0x21d   : > { %v7497_v51 = vpop.f32.mrf.mxu0 }
 0x21e   : > { %7877 = vst [vmem:[#allocation8_spill] sm:$0xff] %v7497_v51  ;;  %v5623_v28 = vpop.f32.mrf.mxu1 }
 0x21f   : > { %v7499_v12 = vpop.f32.mrf.mxu0  ;;  %v3355_v47 = vadd.f32 %v5623_v28, %v7386_v35 }
 0x220   : > { %7878 = vst [vmem:[#allocation9_spill] sm:$0xff] %v7499_v12  ;;  %v7502_v9 = vpop.f32.mrf.mxu1 }
 0x221   : > { %v7504_v3 = vpop.f32.mrf.mxu0  ;;  %v7506_v42 = vadd.f32 %v5671_v32, %v3355_v47 }
 0x222   : > { %7879 = vst [vmem:[#allocation13_spill] sm:$0xff] %v7504_v3  ;;  %v7508_v19 = vpop.f32.mrf.mxu1 }
 0x223   : > { %v5683_v36 = vpop.f32.mrf.mxu0 }
 0x224   : > { %v7510_v24 = vpop.f32.mrf.mxu1 }
 0x225   : > { %v7512_v45 = vpop.f32.mrf.mxu0 }
 0x226   : > { %7880 = vst [vmem:[#allocation10_spill] sm:$0xff] %v7512_v45  ;;  %v5627_v46 = vpop.f32.mrf.mxu1 }
 0x227   : > { %v7514_v34 = vpop.f32.mrf.mxu0  ;;  %v3359_v23 = vadd.f32 %v5627_v46, %v7398_v20 }
 0x228   : > { %7881 = vst [vmem:[#allocation14_spill] sm:$0xff] %v7514_v34  ;;  %v7517_v56 = vpop.f32.mrf.mxu1 }
 0x229   : > { %v7519_v35 = vpop.f32.mrf.mxu0  ;;  %v7521_v28 = vadd.f32 %v5675_v50, %v3359_v23 }
 0x22a   : > { %7882 = vst [vmem:[#allocation15_spill] sm:$0xff] %v7519_v35  ;;  %v7523_v32 = vpop.f32.mrf.mxu1 }
 0x22b   : > { %v5687_v47 = vpop.f32.mrf.mxu0 }
 0x22c   : > { %v7525_v52 = vpop.f32.mrf.mxu1 }
 0x22d   : > { %v7527_v33 = vpop.f32.mrf.mxu0 }
 0x22e   : > { %7883 = vst [vmem:[#allocation16_spill] sm:$0xff] %v7527_v33  ;;  %v5631_v58 = vpop.f32.mrf.mxu1 }
 0x22f   : > { %v7529_v18 = vpop.f32.mrf.mxu0  ;;  %v3363_v34 = vadd.f32 %v5631_v58, %v7410_v61 }
 0x230   : > { %7884 = vst [vmem:[#allocation18_spill] sm:$0xff] %v7529_v18  ;;  %v7532_v45 = vpop.f32.mrf.mxu1 }
 0x231   : > { %v7534_v20 = vpop.f32.mrf.mxu0  ;;  %v7536_v46 = vadd.f32 %v5679_v27, %v3363_v34 }
 0x232   : > { %7885 = vst [vmem:[#allocation22_spill] sm:$0xff] %v7534_v20  ;;  %v7538_v23 = vpop.f32.mrf.mxu1 }
 0x233   : > { %7886 = vst [vmem:[#allocation23_spill] sm:$0xff] %v7536_v46  ;;  %v5691_v50 = vpop.f32.mrf.mxu0 }
 0x234   : > { %v7540_v35 = vpop.f32.mrf.mxu1 }
 0x235   : > { %7887 = vst [vmem:[#allocation24_spill] sm:$0xff] %v7540_v35  ;;  %v7542_v31 = vpop.f32.mrf.mxu0 }
 0x236   : > { %7888 = vst [vmem:[#allocation25_spill] sm:$0xff] %v7542_v31  ;;  %v5635_v3 = vpop.f32.mrf.mxu1 }
 0x237   : > { %v7544_v33 = vpop.f32.mrf.mxu0  ;;  %v3367_v18 = vadd.f32 %v5635_v3, %v7422_v13 }
 0x238   : > { %7889 = vst [vmem:[#allocation26_spill] sm:$0xff] %v7544_v33  ;;  %v7547_v1 = vpop.f32.mrf.mxu1 }
 0x239   : > { %7890 = vst [vmem:[#allocation27_spill] sm:$0xff] %v7547_v1  ;;  %v7549_v61 = vpop.f32.mrf.mxu0  ;;  %v7551_v58 = vadd.f32 %v5683_v36, %v3367_v18 }
 0x23a   : > { %7891 = vst [vmem:[#allocation28_spill] sm:$0xff] %v7549_v61  ;;  %v7553_v27 = vpop.f32.mrf.mxu1 }
 0x23b   : > { %7892 = vst [vmem:[#allocation29_spill] sm:$0xff] %v7551_v58  ;;  %7893 = vst [vmem:[#allocation30_spill] sm:$0xff] %v7553_v27  ;;  %v5759_v34 = vpop.f32.mrf.mxu0 }
 0x23c   : > { %v7555_v20 = vpop.f32.mrf.mxu1 }
 0x23d   : > { %7894 = vst [vmem:[#allocation31_spill] sm:$0xff] %v7555_v20  ;;  %v4038_v7 = vpop.f32.mrf.mxu0 }
 0x23e   : > { %v5639_v46 = vpop.f32.mrf.mxu1 }
 0x23f   : > { %v5760_v12 = vpop.f32.mrf.mxu0  ;;  %v3371_v31 = vadd.f32 %v5639_v46, %v7438_v55 }
 0x240   : > { %v7558_v51 = vpop.f32.mrf.mxu1 }
 0x241   : > { %7895 = vst [vmem:[#allocation32_spill] sm:$0xff] %v7558_v51  ;;  %v4041_v33 = vpop.f32.mrf.mxu0  ;;  %v7560_v13 = vadd.f32 %v5687_v47, %v3371_v31 }
 0x242   : > { %v7562_v3 = vpop.f32.mrf.mxu1 }
 0x243   : > { %7896 = vst [vmem:[#allocation33_spill] sm:$0xff] %v7560_v13  ;;  %7897 = vst [vmem:[#allocation34_spill] sm:$0xff] %v7562_v3  ;;  %v5763_v61 = vpop.f32.mrf.mxu0 }
 0x244   : > { %v7564_v18 = vpop.f32.mrf.mxu1 }
 0x245   : > { %7898 = vst [vmem:[#allocation35_spill] sm:$0xff] %v7564_v18  ;;  %v4054_v36 = vpop.f32.mrf.mxu0  ;;  %v3348_v18 = vadd.f32 %v7476_v21, %v7368_v63 }
 0x246   : > { %v5643_v58 = vpop.f32.mrf.mxu1 }
 0x247   : > { %v7566_v27 = vpop.f32.mrf.mxu0  ;;  %v3375_v20 = vadd.f32 %v5643_v58, %v7456_v48  ;;  %v3346_v48 = vadd.f32 %v7480_v49, %v7371_v62  ;;  %v3352_v62 = vadd.f32 %v7493_v17, %v7380_v0 }
 0x248   : > { %v7569_v1 = vpop.f32.mrf.mxu1 }
 0x249   : > { %7899 = vst [vmem:[#allocation36_spill] sm:$0xff] %v7569_v1  ;;  %v7571_v35 = vpop.f32.mrf.mxu0  ;;  %v7573_v55 = vadd.f32 %v5691_v50, %v3375_v20  ;;  %v3610_v21 = vadd.f32 %v7435_v2, %v3346_v48 }
 0x24a   : > { %v7575_v46 = vpop.f32.mrf.mxu1 }
 0x24b   : > { %7900 = vst [vmem:[#allocation37_spill] sm:$0xff] %v7573_v55  ;;  %7901 = vst [vmem:[#allocation38_spill] sm:$0xff] %v7575_v46  ;;  %v7577_v31 = vpop.f32.mrf.mxu0 }
 0x24c   : > { %v7579_v47 = vpop.f32.mrf.mxu1 }
 0x24d   : > { %7902 = vst [vmem:[#allocation39_spill] sm:$0xff] %v7579_v47  ;;  %v7581_v13 = vpop.f32.mrf.mxu0  ;;  %v3612_v47 = vadd.f32 %v7430_v44, %v3348_v18  ;;  %v3350_v44 = vadd.f32 %v7495_v15, %v7383_v10  ;;  %v3616_v10 = vadd.f32 %v7448_v59, %v3352_v62 }
 0x24e   : > { %v5711_v3 = vpop.f32.mrf.mxu1 }
 0x24f   : > { %v7585_v51 = vpop.f32.mrf.mxu0  ;;  %v3897_v50 = vadd.f32 %v5711_v3, %v7474_v14 }
 0x250   : > { %v3768_v58 = vpop.f32.mrf.mxu1 }
 0x251   : > { %v7589_v20 = vpop.f32.mrf.mxu0  ;;  %v3895_v55 = vadd.f32 %v3768_v58, %v7478_v25  ;;  %v4167_v14 = vadd.f32 %v5759_v34, %v3897_v50 }
 0x252   : > { %v5712_v46 = vpop.f32.mrf.mxu1 }
 0x253   : > { %v7594_v1 = vpop.f32.mrf.mxu0  ;;  %v3898_v63 = vadd.f32 %v5712_v46, %v3612_v47  ;;  %v4165_v3 = vadd.f32 %v4038_v7, %v3895_v55  ;;  %v3613_v7 = vadd.f32 %v7443_v8, %v3349_v5  ;;  %v3353_v47 = vadd.f32 %v7502_v9, %v7389_v38 }
 0x254   : > { %v3771_v49 = vpop.f32.mrf.mxu1  ;;  %v4397_v5 = vmul.f32 %v4167_v14, %v4167_v14 }
 0x255   : > { %v7601_v40 = vpop.f32.mrf.mxu0  ;;  %v4168_v25 = vadd.f32 %v5760_v12, %v3898_v63  ;;  %v3896_v58 = vadd.f32 %v3771_v49, %v3610_v21  ;;  %v4395_v34 = vmul.f32 %v4165_v3, %v4165_v3  ;;  %v3356_v21 = vadd.f32 %v7508_v19, %v7392_v60 }
 0x256   : > { %v5715_v6 = vpop.f32.mrf.mxu1 }
 0x257   : > { %v7612_v2 = vpop.f32.mrf.mxu0  ;;  %v5039_v0 = vpack.c.bf16 %v4168_v25, %v4167_v14  ;;  %v4166_v30 = vadd.f32 %v4041_v33, %v3896_v58  ;;  %v3901_v17 = vadd.f32 %v5715_v6, %v7491_v43  ;;  %v3614_v43 = vadd.f32 %v7453_v54, %v3350_v44 }
 0x258   : > { %v3784_v12 = vpop.f32.mrf.mxu1  ;;  %v4398_v62 = vmul.f32 %v4168_v25, %v4168_v25 }
 0x259   : > { %v7617_v15 = vpop.f32.mrf.mxu0  ;;  %5126 = vst [vmem:[%s7610_s10 + $0x8] sm:$0xff] %v5039_v0   ;;  %v5034_v18 = vpack.c.bf16 %v4166_v30, %v4165_v3  ;;  %v4357_v55 = vadd.f32 %v4166_v30, %v4165_v3  ;;  %v4396_v46 = vmul.f32 %v4166_v30, %v4166_v30  ;;  %v3899_v48 = vadd.f32 %v3784_v12, %v3613_v7 }
 0x25a   : > { %v5716_v33 = vpop.f32.mrf.mxu1  ;;  %v4171_v49 = vadd.f32 %v5763_v61, %v3901_v17  ;;  %v3617_v30 = vadd.f32 %v7461_v29, %v3353_v47  ;;  %v3360_v47 = vadd.f32 %v7523_v32, %v7404_v37 }
 0x25b   : > { %v7623_v50 = vpop.f32.mrf.mxu0  ;;  %5035 = vst [vmem:[%s7610_s10] sm:$0xff] %v5034_v18   ;;  %v4358_v8 = vadd.f32 %v4357_v55, %v4167_v14  ;;  %v4427_v59 = vadd.f32 %v4396_v46, %v4395_v34  ;;  %v3902_v63 = vadd.f32 %v5716_v33, %v3616_v10  ;;  %v4169_v3 = vadd.f32 %v4054_v36, %v3899_v48 }
 0x25c   : > { %v3787_v58 = vpop.f32.mrf.mxu1  ;;  %v3354_v14 = vadd.f32 %v7510_v24, %v7395_v16  ;;  %v3620_v24 = vadd.f32 %v7466_v41, %v3356_v21 }
 0x25d   : > { %v7628_v6 = vpop.f32.mrf.mxu0  ;;  %v4428_v38 = vadd.f32 %v4427_v59, %v4397_v5  ;;  %v4359_v9 = vadd.f32 %v4358_v8, %v4168_v25  ;;  %v4172_v54 = vadd.f32 %v7566_v27, %v3902_v63  ;;  %v3900_v44 = vadd.f32 %v3787_v58, %v3614_v43 }
 0x25e   : > { %v5719_v0 = vpop.f32.mrf.mxu1  ;;  %v4399_v19 = vmul.f32 %v4169_v3, %v4169_v3  ;;  %v3618_v33 = vadd.f32 %v7471_v39, %v3354_v14  ;;  %v4401_v43 = vmul.f32 %v4171_v49, %v4171_v49  ;;  %v3358_v39 = vadd.f32 %v7525_v52, %v7407_v22 }
 0x25f   : > { %v7634_v7 = vpop.f32.mrf.mxu0  ;;  %v4360_v60 = vadd.f32 %v4359_v9, %v4169_v3  ;;  %v4429_v61 = vadd.f32 %v4428_v38, %v4398_v62  ;;  %v5049_v36 = vpack.c.bf16 %v4172_v54, %v4171_v49  ;;  %v4170_v17 = vadd.f32 %v7571_v35, %v3900_v44 }
 0x260   : > { %v3800_v12 = vpop.f32.mrf.mxu1  ;;  %v3905_v25 = vadd.f32 %v5719_v0, %v7506_v42  ;;  %v3357_v35 = vadd.f32 %v7517_v56, %v7401_v57  ;;  %v4402_v57 = vmul.f32 %v4172_v54, %v4172_v54  ;;  %v3624_v9 = vadd.f32 %v7484_v53, %v3360_v47  ;;  %v7903_v53 = vld [vmem:[#allocation7_spill] sm:$0xff] }
 0x261   : > { %v7637_v10 = vpop.f32.mrf.mxu0  ;;  %v4430_v27 = vadd.f32 %v4429_v61, %v4399_v19  ;;  %5128 = vst [vmem:[%s7610_s10 + $0x18] sm:$0xff] %v5049_v36   ;;  %v3903_v16 = vadd.f32 %v3800_v12, %v3617_v30  ;;  %v5044_v29 = vpack.c.bf16 %v4170_v17, %v4169_v3  ;;  %v4361_v34 = vadd.f32 %v4360_v60, %v4170_v17 }
 0x262   : > { %v4400_v18 = vmul.f32 %v4170_v17, %v4170_v17  ;;  %v5720_v55 = vpop.f32.mrf.mxu1  ;;  %v4175_v59 = vadd.f32 %v7577_v31, %v3905_v25  ;;  %v3622_v61 = vadd.f32 %v7903_v53, %v3358_v39  ;;  %v7910_v39 = vld [vmem:[#allocation27_spill] sm:$0xff] }
 0x263   : > { %v7642_v46 = vpop.f32.mrf.mxu0  ;;  %v3906_v48 = vadd.f32 %v5720_v55, %v3620_v24  ;;  %5127 = vst [vmem:[%s7610_s10 + $0x10] sm:$0xff] %v5044_v29   ;;  %v4362_v42 = vadd.f32 %v4361_v34, %v4171_v49  ;;  %v4173_v41 = vadd.f32 %v7581_v13, %v3903_v16  ;;  %v3621_v13 = vadd.f32 %v7482_v26, %v3357_v35  ;;  %v7904_v34 = vld [vmem:[#allocation19_spill] sm:$0xff] }
 0x264   : > { %v4431_v5 = vadd.f32 %v4430_v27, %v4400_v18  ;;  %v3803_v8 = vpop.f32.mrf.mxu1  ;;  %v3361_v26 = vadd.f32 %v7532_v45, %v7413_v11  ;;  %v4405_v36 = vmul.f32 %v4175_v59, %v4175_v59  ;;  %v7905_v18 = vld [vmem:[#allocation24_spill] sm:$0xff] }
 0x265   : > { %v4176_v63 = vadd.f32 %v7585_v51, %v3906_v48  ;;  %v3904_v21 = vadd.f32 %v3803_v8, %v3618_v33  ;;  %v4363_v62 = vadd.f32 %v4362_v42, %v4172_v54  ;;  %v7653_v32 = vpop.f32.mrf.mxu0  ;;  %v4403_v31 = vmul.f32 %v4173_v41, %v4173_v41  ;;  %v7907_v42 = vld [vmem:[#allocation9_spill] sm:$0xff] }
 0x266   : > { %v4432_v56 = vadd.f32 %v4431_v5, %v4401_v43  ;;  %v5723_v37 = vpop.f32.mrf.mxu1  ;;  %v3362_v55 = vadd.f32 %v7905_v18, %v7904_v34  ;;  %v7918_v34 = vld [vmem:[#allocation29_spill] sm:$0xff] }
 0x267   : > { %v5059_v49 = vpack.c.bf16 %v4176_v63, %v4175_v59  ;;  %v4174_v3 = vadd.f32 %v7589_v20, %v3904_v21  ;;  %v4364_v58 = vadd.f32 %v4363_v62, %v4173_v41  ;;  %v3909_v14 = vadd.f32 %v5723_v37, %v7521_v28  ;;  %v7662_v60 = vpop.f32.mrf.mxu0 }
 0x268   : > { %v4433_v51 = vadd.f32 %v4432_v56, %v4402_v57  ;;  %v3816_v38 = vpop.f32.mrf.mxu1  ;;  %v3364_v20 = vadd.f32 %v7538_v23, %v7416_v4  ;;  %v4406_v11 = vmul.f32 %v4176_v63, %v4176_v63 }
 0x269   : > { %5130 = vst [vmem:[%s7610_s10 + $0x28] sm:$0xff] %v5059_v49   ;;  %v5054_v54 = vpack.c.bf16 %v4174_v3, %v4173_v41  ;;  %v4404_v44 = vmul.f32 %v4174_v3, %v4174_v3  ;;  %v3907_v0 = vadd.f32 %v3816_v38, %v3621_v13  ;;  %v4365_v22 = vadd.f32 %v4364_v58, %v4174_v3  ;;  %v7673_v23 = vpop.f32.mrf.mxu0  ;;  %v7911_v3 = vld [vmem:[#allocation21_spill] sm:$0xff]  ;;  %v7912_v13 = vld [vmem:[#allocation30_spill] sm:$0xff] }
 0x26a   : > { %v4434_v30 = vadd.f32 %v4433_v51, %v4403_v31  ;;  %v5724_v52 = vpop.f32.mrf.mxu1  ;;  %v4179_v25 = vadd.f32 %v7594_v1, %v3909_v14  ;;  %v3628_v5 = vadd.f32 %v7907_v42, %v3364_v20  ;;  %v3368_v58 = vadd.f32 %v7912_v13, %v7911_v3  ;;  %v7913_v51 = vld [vmem:[#allocation13_spill] sm:$0xff] }
 0x26b   : > { %5129 = vst [vmem:[%s7610_s10 + $0x20] sm:$0xff] %v5054_v54   ;;  %v3910_v19 = vadd.f32 %v5724_v52, %v3624_v9  ;;  %v4366_v17 = vadd.f32 %v4365_v22, %v4175_v59  ;;  %v4177_v28 = vadd.f32 %v7601_v40, %v3907_v0  ;;  %v7906_v40 = vld [vmem:[#allocation8_spill] sm:$0xff]  ;;  %v7908_v59 = vld [vmem:[#allocation23_spill] sm:$0xff]  ;;  %v7682_v37 = vpop.f32.mrf.mxu0  ;;  %v3626_v38 = vadd.f32 %v7913_v51, %v3362_v55 }
 0x26c   : > { %v4435_v12 = vadd.f32 %v4434_v30, %v4404_v44  ;;  %v3819_v27 = vpop.f32.mrf.mxu1  ;;  %v3625_v48 = vadd.f32 %v7906_v40, %v3361_v26  ;;  %v4409_v9 = vmul.f32 %v4179_v25, %v4179_v25  ;;  %v7924_v51 = vld [vmem:[#allocation4_spill] sm:$0xff] }
 0x26d   : > { %v4180_v16 = vadd.f32 %v7612_v2, %v3910_v19  ;;  %v3908_v24 = vadd.f32 %v3819_v27, %v3622_v61  ;;  %v4367_v29 = vadd.f32 %v4366_v17, %v4176_v63  ;;  %v4407_v1 = vmul.f32 %v4177_v28, %v4177_v28  ;;  %v7693_v61 = vpop.f32.mrf.mxu0  ;;  %v7915_v17 = vld [vmem:[#allocation31_spill] sm:$0xff] }
 0x26e   : > { %v4436_v45 = vadd.f32 %v4435_v12, %v4405_v36  ;;  %v5727_v4 = vpop.f32.mrf.mxu1  ;;  %v7914_v36 = vld [vmem:[#allocation11_spill] sm:$0xff] }
 0x26f   : > { %v5069_v35 = vpack.c.bf16 %v4180_v16, %v4179_v25  ;;  %v4178_v47 = vadd.f32 %v7617_v15, %v3908_v24  ;;  %v4368_v33 = vadd.f32 %v4367_v29, %v4177_v28  ;;  %v3913_v63 = vadd.f32 %v5727_v4, %v7908_v59  ;;  %v7909_v15 = vld [vmem:[#allocation20_spill] sm:$0xff] }
 0x270   : > { %v4437_v2 = vadd.f32 %v4436_v45, %v4406_v11  ;;  %v3832_v43 = vpop.f32.mrf.mxu1  ;;  %v3365_v49 = vadd.f32 %v7910_v39, %v7909_v15  ;;  %v4410_v26 = vmul.f32 %v4180_v16, %v4180_v16  ;;  %v3366_v12 = vadd.f32 %v7915_v17, %v7914_v36  ;;  %v7917_v45 = vld [vmem:[#allocation14_spill] sm:$0xff] }
 0x271   : > { %5132 = vst [vmem:[%s7610_s10 + $0x38] sm:$0xff] %v5069_v35   ;;  %v5064_v41 = vpack.c.bf16 %v4178_v47, %v4177_v28  ;;  %v4408_v8 = vmul.f32 %v4178_v47, %v4178_v47  ;;  %v3911_v21 = vadd.f32 %v3832_v43, %v3625_v48  ;;  %v4369_v56 = vadd.f32 %v4368_v33, %v4178_v47  ;;  %v5784_v48 = vpop.f32.mrf.mxu0  ;;  %v7920_v33 = vld [vmem:[#allocation32_spill] sm:$0xff]  ;;  %v7922_v43 = vld [vmem:[#allocation34_spill] sm:$0xff] }
 0x272   : > { %v4438_v57 = vadd.f32 %v4437_v2, %v4407_v1  ;;  %v5728_v62 = vpop.f32.mrf.mxu1  ;;  %v4183_v30 = vadd.f32 %v7623_v50, %v3913_v63  ;;  %v3632_v29 = vadd.f32 %v7917_v45, %v3368_v58  ;;  %v7921_v2 = vld [vmem:[#allocation3_spill] sm:$0xff]  ;;  %v7933_v45 = vld [vmem:[#allocation22_spill] sm:$0xff] }
 0x273   : > { %5131 = vst [vmem:[%s7610_s10 + $0x30] sm:$0xff] %v5064_v41   ;;  %v3914_v31 = vadd.f32 %v5728_v62, %v3628_v5  ;;  %v4370_v54 = vadd.f32 %v4369_v56, %v4179_v25  ;;  %v4181_v14 = vadd.f32 %v7628_v6, %v3911_v21  ;;  %v7916_v6 = vld [vmem:[#allocation10_spill] sm:$0xff]  ;;  %v3372_v42 = vadd.f32 %v7922_v43, %v7921_v2  ;;  %v7923_v41 = vld [vmem:[#allocation15_spill] sm:$0xff] }
 0x274   : > { %v4439_v44 = vadd.f32 %v4438_v57, %v4408_v8  ;;  %v3835_v0 = vpop.f32.mrf.mxu1  ;;  %v3629_v25 = vadd.f32 %v7916_v6, %v3365_v49  ;;  %v3630_v8 = vadd.f32 %v7923_v41, %v3366_v12  ;;  %v4413_v59 = vmul.f32 %v4183_v30, %v4183_v30  ;;  %v7930_v6 = vld [vmem:[#allocation36_spill] sm:$0xff] }
 0x275   : > { %v4184_v22 = vadd.f32 %v7634_v7, %v3914_v31  ;;  %v3912_v52 = vadd.f32 %v3835_v0, %v3626_v38  ;;  %v4371_v19 = vadd.f32 %v4370_v54, %v4180_v16  ;;  %v4411_v50 = vmul.f32 %v4181_v14, %v4181_v14  ;;  %v4137_v31 = vpop.f32.mrf.mxu0  ;;  %v7925_v38 = vld [vmem:[#allocation35_spill] sm:$0xff] }
 0x276   : > { %v4440_v20 = vadd.f32 %v4439_v44, %v4409_v9  ;;  %v5731_v53 = vpop.f32.mrf.mxu1  ;;  %v3370_v9 = vadd.f32 %v7925_v38, %v7924_v51 }
 0x277   : > { %v5079_v28 = vpack.c.bf16 %v4184_v22, %v4183_v30  ;;  %v4182_v27 = vadd.f32 %v7637_v10, %v3912_v52  ;;  %v4372_v24 = vadd.f32 %v4371_v19, %v4181_v14  ;;  %v3917_v18 = vadd.f32 %v5731_v53, %v7918_v34  ;;  %v7919_v10 = vld [vmem:[#allocation12_spill] sm:$0xff]  ;;  %v7927_v52 = vld [vmem:[#allocation18_spill] sm:$0xff]  ;;  %v7928_v19 = vld [vmem:[#allocation33_spill] sm:$0xff] }
 0x278   : > { %v4441_v7 = vadd.f32 %v4440_v20, %v4410_v26  ;;  %v3848_v11 = vpop.f32.mrf.mxu1  ;;  %v3369_v1 = vadd.f32 %v7920_v33, %v7919_v10  ;;  %v4414_v49 = vmul.f32 %v4184_v22, %v4184_v22  ;;  %v3636_v26 = vadd.f32 %v7927_v52, %v3372_v42  ;;  %v7934_v42 = vld [vmem:[#allocation6_spill] sm:$0xff] }
 0x279   : > { %5134 = vst [vmem:[%s7610_s10 + $0x48] sm:$0xff] %v5079_v28   ;;  %v5074_v16 = vpack.c.bf16 %v4182_v27, %v4181_v14  ;;  %v4412_v4 = vmul.f32 %v4182_v27, %v4182_v27  ;;  %v3915_v55 = vadd.f32 %v3848_v11, %v3629_v25  ;;  %v4373_v47 = vadd.f32 %v4372_v24, %v4182_v27  ;;  %v7926_v14 = vld [vmem:[#allocation16_spill] sm:$0xff]  ;;  %v5787_v27 = vpop.f32.mrf.mxu0  ;;  %v7931_v24 = vld [vmem:[#allocation17_spill] sm:$0xff] }
 0x27a   : > { %v4442_v35 = vadd.f32 %v4441_v7, %v4411_v50  ;;  %v5732_v40 = vpop.f32.mrf.mxu1  ;;  %v4187_v62 = vadd.f32 %v7642_v46, %v3917_v18  ;;  %v7932_v50 = vld [vmem:[#allocation38_spill] sm:$0xff] }
 0x27b   : > { %5133 = vst [vmem:[%s7610_s10 + $0x40] sm:$0xff] %v5074_v16   ;;  %v3918_v5 = vadd.f32 %v5732_v40, %v3632_v29  ;;  %v4374_v63 = vadd.f32 %v4373_v47, %v4183_v30  ;;  %v4185_v57 = vadd.f32 %v7653_v32, %v3915_v55  ;;  %v3633_v32 = vadd.f32 %v7926_v14, %v3369_v1  ;;  %v4150_v43 = vpop.f32.mrf.mxu0 }
 0x27c   : > { %v4443_v21 = vadd.f32 %v4442_v35, %v4412_v4  ;;  %v3851_v56 = vpop.f32.mrf.mxu1  ;;  %v3376_v7 = vadd.f32 %v7932_v50, %v7931_v24  ;;  %v3634_v29 = vadd.f32 %v7933_v45, %v3370_v9  ;;  %v4417_v16 = vmul.f32 %v4187_v62, %v4187_v62 }
 0x27d   : > { %v4188_v15 = vadd.f32 %v7662_v60, %v3918_v5  ;;  %v3916_v39 = vadd.f32 %v3851_v56, %v3630_v8  ;;  %v4375_v13 = vadd.f32 %v4374_v63, %v4184_v22  ;;  %v4415_v46 = vmul.f32 %v4185_v57, %v4185_v57  ;;  %v7935_v5 = vld [vmem:[#allocation39_spill] sm:$0xff]  ;;  %v7936_v63 = vld [vmem:[#allocation25_spill] sm:$0xff]  ;;  %v5788_v38 = vpop.f32.mrf.mxu0 }
 0x27e   : > { %v4444_v3 = vadd.f32 %v4443_v21, %v4413_v59  ;;  %v5735_v58 = vpop.f32.mrf.mxu1  ;;  %v3374_v41 = vadd.f32 %v7935_v5, %v7934_v42 }
 0x27f   : > { %v5089_v54 = vpack.c.bf16 %v4188_v15, %v4187_v62  ;;  %v4186_v44 = vadd.f32 %v7673_v23, %v3916_v39  ;;  %v4376_v0 = vadd.f32 %v4375_v13, %v4185_v57  ;;  %v3921_v53 = vadd.f32 %v5735_v58, %v7928_v19  ;;  %v7929_v23 = vld [vmem:[#allocation5_spill] sm:$0xff] }
 0x280   : > { %v4445_v30 = vadd.f32 %v4444_v3, %v4414_v49  ;;  %v3864_v60 = vpop.f32.mrf.mxu1  ;;  %v3373_v25 = vadd.f32 %v7930_v6, %v7929_v23  ;;  %v4418_v10 = vmul.f32 %v4188_v15, %v4188_v15 }
 0x281   : > { %5136 = vst [vmem:[%s7610_s10 + $0x58] sm:$0xff] %v5089_v54   ;;  %v5084_v20 = vpack.c.bf16 %v4186_v44, %v4185_v57  ;;  %v4416_v22 = vmul.f32 %v4186_v44, %v4186_v44  ;;  %v3919_v36 = vadd.f32 %v3864_v60, %v3633_v32  ;;  %v4377_v12 = vadd.f32 %v4376_v0, %v4186_v44  ;;  %v7939_v54 = vld [vmem:[#allocation28_spill] sm:$0xff] }
 0x282   : > { %v4446_v17 = vadd.f32 %v4445_v30, %v4415_v46  ;;  %v5736_v28 = vpop.f32.mrf.mxu1  ;;  %v4191_v35 = vadd.f32 %v7682_v37, %v3921_v53  ;;  %v3637_v21 = vadd.f32 %v7936_v63, %v3373_v25  ;;  %v3638_v44 = vadd.f32 %v7939_v54, %v3374_v41  ;;  %v4153_v53 = vpop.f32.mrf.mxu0 }
 0x283   : > { %5135 = vst [vmem:[%s7610_s10 + $0x50] sm:$0xff] %v5084_v20   ;;  %v3922_v11 = vadd.f32 %v5736_v28, %v3636_v26  ;;  %v4378_v4 = vadd.f32 %v4377_v12, %v4187_v62  ;;  %v4189_v18 = vadd.f32 %v7693_v61, %v3919_v36 }
 0x284   : > { %v4447_v34 = vadd.f32 %v4446_v17, %v4416_v22  ;;  %v3867_v55 = vpop.f32.mrf.mxu1  ;;  %v4421_v14 = vmul.f32 %v4191_v35, %v4191_v35 }
 0x285   : > { %v4192_v47 = vadd.f32 %v5784_v48, %v3922_v11  ;;  %v3920_v40 = vadd.f32 %v3867_v55, %v3634_v29  ;;  %v4379_v1 = vadd.f32 %v4378_v4, %v4188_v15  ;;  %v4419_v57 = vmul.f32 %v4189_v18, %v4189_v18  ;;  %v7937_v48 = vld [vmem:[#allocation26_spill] sm:$0xff]  ;;  %v7938_v15 = vld [vmem:[#allocation37_spill] sm:$0xff] }
 0x286   : > { %v4448_v33 = vadd.f32 %v4447_v34, %v4417_v16  ;;  %v5739_v2 = vpop.f32.mrf.mxu1  ;;  %v3640_v62 = vadd.f32 %v7937_v48, %v3376_v7 }
 0x287   : > { %v5099_v8 = vpack.c.bf16 %v4192_v47, %v4191_v35  ;;  %v4190_v59 = vadd.f32 %v4137_v31, %v3920_v40  ;;  %v4380_v61 = vadd.f32 %v4379_v1, %v4189_v18  ;;  %v3925_v3 = vadd.f32 %v5739_v2, %v7938_v15 }
 0x288   : > { %v4449_v56 = vadd.f32 %v4448_v33, %v4418_v10  ;;  %v3880_v37 = vpop.f32.mrf.mxu1  ;;  %v4422_v20 = vmul.f32 %v4192_v47, %v4192_v47 }
 0x289   : > { %5138 = vst [vmem:[%s7610_s10 + $0x68] sm:$0xff] %v5099_v8   ;;  %v5094_v39 = vpack.c.bf16 %v4190_v59, %v4189_v18  ;;  %v4420_v49 = vmul.f32 %v4190_v59, %v4190_v59  ;;  %v3923_v13 = vadd.f32 %v3880_v37, %v3637_v21  ;;  %v4381_v51 = vadd.f32 %v4380_v61, %v4190_v59 }
 0x28a   : > { %v4450_v58 = vadd.f32 %v4449_v56, %v4419_v57  ;;  %v5740_v9 = vpop.f32.mrf.mxu1  ;;  %v4195_v60 = vadd.f32 %v5787_v27, %v3925_v3 }
 0x28b   : > { %5137 = vst [vmem:[%s7610_s10 + $0x60] sm:$0xff] %v5094_v39   ;;  %v3926_v31 = vadd.f32 %v5740_v9, %v3640_v62  ;;  %v4382_v32 = vadd.f32 %v4381_v51, %v4191_v35  ;;  %v4193_v46 = vadd.f32 %v4150_v43, %v3923_v13 }
 0x28c   : > { %v4451_v0 = vadd.f32 %v4450_v58, %v4420_v49  ;;  %v3883_v30 = vpop.f32.mrf.mxu1  ;;  %v4425_v27 = vmul.f32 %v4195_v60, %v4195_v60 }
 0x28d   : > { %v4196_v52 = vadd.f32 %v5788_v38, %v3926_v31  ;;  %v3924_v26 = vadd.f32 %v3883_v30, %v3638_v44  ;;  %v4383_v19 = vadd.f32 %v4382_v32, %v4192_v47  ;;  %v4423_v28 = vmul.f32 %v4193_v46, %v4193_v46 }
 0x28e   : > { %v4452_v22 = vadd.f32 %v4451_v0, %v4421_v14 }
 0x28f   : > { %v5109_v36 = vpack.c.bf16 %v4196_v52, %v4195_v60  ;;  %v4194_v17 = vadd.f32 %v4153_v53, %v3924_v26  ;;  %v4384_v12 = vadd.f32 %v4383_v19, %v4193_v46  ;;  %v4426_v45 = vmul.f32 %v4196_v52, %v4196_v52 }
 0x290   : > { %v4453_v23 = vadd.f32 %v4452_v22, %v4422_v20 }
 0x291   : > { %5140 = vst [vmem:[%s7610_s10 + $0x78] sm:$0xff] %v5109_v36   ;;  %v5104_v6 = vpack.c.bf16 %v4194_v17, %v4193_v46  ;;  %v4424_v25 = vmul.f32 %v4194_v17, %v4194_v17  ;;  %v4385_v50 = vadd.f32 %v4384_v12, %v4194_v17 }
 0x292   : > { %v4454_v24 = vadd.f32 %v4453_v23, %v4423_v28 }
 0x293   : > { %5139 = vst [vmem:[%s7610_s10 + $0x70] sm:$0xff] %v5104_v6   ;;  %v4386_v7 = vadd.f32 %v4385_v50, %v4195_v60 }
 0x294   : > { %v4455_v11 = vadd.f32 %v4454_v24, %v4424_v25 }
 0x295   : > { %v4387_v29 = vadd.f32 %v4386_v7, %v4196_v52 }
 0x296   : > { %v4456_v16 = vadd.f32 %v4455_v11, %v4425_v27 }
 0x297   : > { %v4388_v4 = vrot.slane %v4387_v29, 4 }
 0x298   : > { %v4457_v34 = vadd.f32 %v4456_v16, %v4426_v45 }
 0x299   : > { %v4389_v18 = vadd.f32 %v4388_v4, %v4387_v29 }
 0x29a   : > { %v4458_v55 = vrot.slane %v4457_v34, 4 }
 0x29b   : > { %v4390_v35 = vrot.slane %v4389_v18, 2 }
 0x29c   : > { %v4459_v47 = vadd.f32 %v4458_v55, %v4457_v34 }
 0x29d   : > { %v4391_v40 = vadd.f32 %v4390_v35, %v4389_v18 }
 0x29e   : > { %v4460_v10 = vrot.slane %v4459_v47, 2 }
 0x29f   : > { %v4392_v33 = vrot.slane %v4391_v40, 1 }
 0x2a0   : > { %v4461_v1 = vadd.f32 %v4460_v10, %v4459_v47 }
 0x2a1   : > { %v4393_v2 = vadd.f32 %v4392_v33, %v4391_v40 }
 0x2a2   : > { %v4462_v43 = vrot.slane %v4461_v1, 1 }
 0x2a3   : > { %4394 = vst [vmem:[%s235_s13] sm:$0x1] %v4393_v2 }
 0x2a4   : > { %v4463_v42 = vadd.f32 %v4462_v43, %v4461_v1 }
 0x2a6   : > { %4464 = vst [vmem:[%s235_s13 + $0x1] sm:$0x1] %v4463_v42 }
 0x2a7 PF: > { %s16_s18 = sadd.s32 1, %s5945_s18  }
 0x2a8   : > { %p13_p4 = scmp.ge.s32.totalorder %s16_s18, 4  }
 0x2aa   :  { %15 = sbr.rel (!%p13_p4) target bundleno = 1 (0x1), region = 88 }

</bundles_post_ra>
